<compile_context>
chip_gen: v7x
topology: tpu7x:2x2x1
jax: 0.10.0
libtpu: 0.0.40
codegen_flags: <defaults>
</compile_context>

<pallas_src>
import jax
import jax.numpy as jnp
from jax.experimental import pallas as pl
from jax.experimental.pallas import tpu as pltpu

C_STEM = 32          # stand-in conv-stem channels
P_FRAG = 48 * 48     # 2304 patch positions per 96x96 fragment (stride 2) -> lane dim
K_PATCH = 3 * 3 * 3  # 27 patch elements (3x3 kernel * 3 channels)       -> sublane dim

HORI_SET = [(i, i + 1) for i in range(9) if i % 3 != 2]
VERT_SET = [(i, i + 3) for i in range(6)]


# ---------------------------------------------------------------------------
# Pallas kernel 1: per-image stem + global-average-pool
#   for each of the 9 fragments: relu(W_stem @ patches + b) -> mean over P
# ---------------------------------------------------------------------------
def stem_gap_kernel(patches_ref, w_stem_ref, b_stem_ref, pooled_ref):
    w = w_stem_ref[...]                                           # (C_STEM, K) bf16
    b = b_stem_ref[...]                                           # (C_STEM, 1) f32
    cols = []
    for p in range(9):                                            # 9 fragments / grid step
        pat = patches_ref[0, p]                                   # (K, P) bf16, lane-dense
        h = jnp.dot(w, pat, preferred_element_type=jnp.float32)   # (C_STEM, P) f32 on MXU
        h = jnp.maximum(h + b, 0.0)
        cols.append(jnp.mean(h, axis=1, keepdims=True))           # (C_STEM, 1) GAP
    pooled_ref[0] = jnp.concatenate(cols, axis=1)                 # (C_STEM, 9)


def stem_gap_forward(patches, w_stem, b_stem):
    bsz = patches.shape[0]
    return pl.pallas_call(
        stem_gap_kernel,
        out_shape=jax.ShapeDtypeStruct((bsz, C_STEM, 9), jnp.float32),
        grid=(bsz,),
        in_specs=[
            pl.BlockSpec((1, 9, K_PATCH, P_FRAG), lambda i: (i, 0, 0, 0)),
            pl.BlockSpec((C_STEM, K_PATCH), lambda i: (0, 0)),
            pl.BlockSpec((C_STEM, 1), lambda i: (0, 0)),
        ],
        out_specs=pl.BlockSpec((1, C_STEM, 9), lambda i: (i, 0, 0)),
        compiler_params=pltpu.CompilerParams(dimension_semantics=("parallel",)),
    )(patches, w_stem, b_stem)


# ---------------------------------------------------------------------------
# Pallas kernel 2: fused post-stem path (feature proj + classifier + MLP head)
#   per fragment p: relu(g_p @ W_feat + b) @ W_cls + b  -> accumulate @ W1_eff[p]
#   then ReLU(acc + b1')  (BN folded)  -> @ W2 + b2
# ---------------------------------------------------------------------------
def post_head_kernel(pooled_ref, w_feat_ref, b_feat_ref, w_cls_ref, b_cls_ref,
                     w1_ref, b1_ref, w2_ref, b2_ref, out_ref):
    bsz = pooled_ref.shape[1]
    h1 = w1_ref.shape[2]
    w_feat = w_feat_ref[...]                                      # (C_STEM, 1280)
    b_feat = b_feat_ref[...]                                      # (1, 1280)
    w_cls = w_cls_ref[...]                                        # (1280, 64)
    b_cls = b_cls_ref[...]                                        # (1, 64)
    acc = jnp.zeros((bsz, h1), jnp.float32)
    for p in range(9):
        g = pooled_ref[p]                                         # (B, C_STEM)
        f = jnp.dot(g, w_feat, preferred_element_type=jnp.float32) + b_feat
        f = jnp.maximum(f, 0.0)                                   # (B, 1280)
        c = jnp.dot(f, w_cls, preferred_element_type=jnp.float32) + b_cls   # (B, 64)
        acc = acc + jnp.dot(c, w1_ref[p], preferred_element_type=jnp.float32)
    h = jnp.maximum(acc + b1_ref[...], 0.0)                       # fc1 + BN(eval) + ReLU
    out_ref[...] = jnp.dot(h, w2_ref[...], preferred_element_type=jnp.float32) + b2_ref[...]


def post_head_forward(pooled, params, w1_eff, b1_eff):
    bsz = pooled.shape[1]
    h2 = params["w2"].shape[1]
    vmem = pl.BlockSpec(memory_space=pltpu.MemorySpace.VMEM)
    return pl.pallas_call(
        post_head_kernel,
        out_shape=jax.ShapeDtypeStruct((bsz, h2), jnp.float32),
        in_specs=[vmem] * 9,
        out_specs=vmem,
    )(pooled, params["w_feat"], params["b_feat"], params["w_cls"], params["b_cls"],
      w1_eff, b1_eff, params["w2"], params["b2"])


# ---------------------------------------------------------------------------
# Plain-JAX glue: fragment slicing, lane-dense im2col, weight folding
# ---------------------------------------------------------------------------
def split_fragments(image):
    # matches the hard-coded slice order of the reference forward (row-major 3x3)
    frags = []
    for r in range(3):
        for c in range(3):
            frags.append(image[:, :, 96 * r:96 * (r + 1), 96 * c:96 * (c + 1)])
    return jnp.stack(frags, axis=1)                               # (B, 9, 3, 96, 96)


def extract_patches(frags):
    # im2col for 3x3 conv, stride 2, pad 1, lane-dense: (B,9,3,96,96) -> (B,9,27,2304)
    b, n, c, h, w = frags.shape
    xp = jnp.pad(frags, ((0, 0), (0, 0), (0, 0), (1, 1), (1, 1)))
    cols = []
    for dy in range(3):
        for dx in range(3):
            cols.append(xp[:, :, :, dy:dy + h:2, dx:dx + w:2])    # (B, 9, C, 48, 48)
    pat = jnp.stack(cols, axis=3)                                 # (B, 9, C, 9, 48, 48)
    return pat.reshape(b, n, K_PATCH, P_FRAG)                     # K = c*9 + dydx, P = y*48+x


def fold_head_params(params, eps=1e-5):
    # Fold BatchNorm1d(eval) into fc1, and fold the feature-duplication pattern
    # (both halves of every pair use pair[0]) into a per-fragment weight stack.
    scale = params["gamma"] * jax.lax.rsqrt(params["var"] + eps)          # (1, h1)
    b1_eff = (params["b1"] - params["mean"]) * scale + params["beta"]     # (1, h1)
    w1s = params["w1"] * scale                                            # (1536, h1)
    h1 = w1s.shape[1]
    src = []
    for p0, _ in HORI_SET:
        src += [p0, p0]
    for p0, _ in VERT_SET:
        src += [p0, p0]                                                   # 24 blocks of 64
    blocks = w1s.reshape(len(src), 64, h1)
    per_frag = []
    for p in range(9):                                                    # fragment 8 -> zeros
        acc = jnp.zeros((64, h1), jnp.float32)
        for j, s in enumerate(src):
            if s == p:
                acc = acc + blocks[j]
        per_frag.append(acc)
    return jnp.stack(per_frag, axis=0), b1_eff                            # (9, 64, h1)


def fen_forward(image, params):
    frags = split_fragments(image)                                        # (B, 9, 3, 96, 96)
    patches = extract_patches(frags).astype(jnp.bfloat16)                 # (B, 9, 27, 2304)
    pooled_raw = stem_gap_forward(
        patches, params["w_stem"].astype(jnp.bfloat16), params["b_stem"])  # (B, C_STEM, 9)
    pooled = jnp.transpose(pooled_raw, (2, 0, 1))                         # (9, B, C_STEM)
    w1_eff, b1_eff = fold_head_params(params)
    # Dropout1d(p=0.1): eval mode -> identity (both occurrences).
    return post_head_forward(pooled, params, w1_eff, b1_eff)              # (B, hidden_size2)


# ---------------------------------------------------------------------------
# Deterministic parameter init
# ---------------------------------------------------------------------------
def init_params(key, hidden1, hidden2):
    ks = jax.random.split(key, 5)

    def w(k, shape, fan_in):
        return jax.random.normal(k, shape, jnp.float32) / jnp.sqrt(float(fan_in))

    return dict(
        w_stem=w(ks[0], (C_STEM, K_PATCH), K_PATCH),   # transposed (lane-dense) stem weight
        b_stem=jnp.zeros((C_STEM, 1), jnp.float32),
        w_feat=w(ks[1], (C_STEM, 1280), C_STEM),
        b_feat=jnp.zeros((1, 1280), jnp.float32),
        w_cls=w(ks[2], (1280, 64), 1280),              # ef.classifier = Linear(1280, 64)
        b_cls=jnp.zeros((1, 64), jnp.float32),
        w1=w(ks[3], (128 * 12, hidden1), 128 * 12),    # fc1
        b1=jnp.zeros((1, hidden1), jnp.float32),
        gamma=jnp.ones((1, hidden1), jnp.float32),     # BatchNorm1d params / running stats
        beta=jnp.zeros((1, hidden1), jnp.float32),
        mean=jnp.zeros((1, hidden1), jnp.float32),
        var=jnp.ones((1, hidden1), jnp.float32),
        w2=w(ks[4], (hidden1, hidden2), hidden1),      # fc2
        b2=jnp.zeros((1, hidden2), jnp.float32),
    )


if __name__ == "__main__":
    key = jax.random.PRNGKey(0)
    pkey, xkey = jax.random.split(key)

    hidden_size1, hidden_size2 = 32, 16
    params = init_params(pkey, hidden_size1, hidden_size2)

    # image must be (B, 3, 288, 288): the forward hard-codes the 3x3 grid of 96px slices
    image = jax.random.normal(xkey, (2, 3, 288, 288), jnp.float32)

    out = jax.jit(fen_forward)(image, params)
    out = jax.block_until_ready(out)
    assert out.shape == (2, hidden_size2) and bool(jnp.all(jnp.isfinite(out)))
    print("KERNEL_OK")
</pallas_src>

<mosaic_0001>
module attributes {stable_mosaic.version = 11 : i64} {
  func.func @stem_gap_kernel(%arg0: i32, %arg1: memref<1x9x27x2304xbf16, #tpu.memory_space<vmem>>, %arg2: memref<32x27xbf16, #tpu.memory_space<vmem>>, %arg3: memref<32x1xf32, #tpu.memory_space<vmem>>, %arg4: memref<1x32x9xf32, #tpu.memory_space<vmem>>) attributes {dimension_semantics = [#tpu.dimension_semantics<parallel>], iteration_bounds = array<i64: 2>, scalar_prefetch = 0 : i64, scratch_operands = 0 : i64, tpu.core_type = #tpu.core_type<tc>, window_params = [{transform_indices = @transform_0, window_bounds = array<i64: 1, 9, 27, 2304>}, {pipeline_mode = #tpu.pipeline_mode<synchronous>, transform_indices = @transform_1, window_bounds = array<i64: 32, 27>}, {pipeline_mode = #tpu.pipeline_mode<synchronous>, transform_indices = @transform_2, window_bounds = array<i64: 32, 1>}, {transform_indices = @transform_3, window_bounds = array<i64: 1, 32, 9>}]} {
    %c0 = arith.constant 0 : index
    %c0_0 = arith.constant 0 : index
    %0 = vector.load %arg2[%c0, %c0_0] : memref<32x27xbf16, #tpu.memory_space<vmem>>, vector<32x27xbf16>
    %c0_1 = arith.constant 0 : index
    %c0_2 = arith.constant 0 : index
    %1 = vector.load %arg3[%c0_1, %c0_2] : memref<32x1xf32, #tpu.memory_space<vmem>>, vector<32x1xf32>
    %c0_3 = arith.constant 0 : index
    %c0_4 = arith.constant 0 : index
    %c0_5 = arith.constant 0 : index
    %c0_6 = arith.constant 0 : index
    %2 = vector.load %arg1[%c0_3, %c0_4, %c0_5, %c0_6] : memref<1x9x27x2304xbf16, #tpu.memory_space<vmem>>, vector<1x1x27x2304xbf16>
    %3 = vector.shape_cast %2 : vector<1x1x27x2304xbf16> to vector<27x2304xbf16>
    %cst = arith.constant dense<0.000000e+00> : vector<32x2304xf32>
    %4 = tpu.matmul %0, %3, %cst {dimension_numbers = #tpu.dot_dimension_numbers<[1], [0], [0], [1], [0, 0, 1, 1], [], []>} : vector<32x27xbf16>, vector<27x2304xbf16>, vector<32x2304xf32> -> vector<32x2304xf32>
    %5 = vector.broadcast %1 : vector<32x1xf32> to vector<32x2304xf32>
    %6 = arith.addf %4, %5 : vector<32x2304xf32>
    %cst_7 = arith.constant 0.000000e+00 : f32
    %7 = vector.broadcast %cst_7 : f32 to vector<32x2304xf32>
    %8 = arith.maximumf %6, %7 : vector<32x2304xf32>
    %cst_8 = arith.constant dense<0.000000e+00> : vector<32xf32>
    %9 = vector.multi_reduction <add>, %8, %cst_8 [1] : vector<32x2304xf32> to vector<32xf32>
    %10 = vector.shape_cast %9 : vector<32xf32> to vector<32x1xf32>
    %cst_9 = arith.constant 2.304000e+03 : f32
    %11 = vector.broadcast %cst_9 : f32 to vector<32x1xf32>
    %12 = arith.divf %10, %11 : vector<32x1xf32>
    %c0_10 = arith.constant 0 : index
    %c1 = arith.constant 1 : index
    %c0_11 = arith.constant 0 : index
    %c0_12 = arith.constant 0 : index
    %13 = vector.load %arg1[%c0_10, %c1, %c0_11, %c0_12] : memref<1x9x27x2304xbf16, #tpu.memory_space<vmem>>, vector<1x1x27x2304xbf16>
    %14 = vector.shape_cast %13 : vector<1x1x27x2304xbf16> to vector<27x2304xbf16>
    %cst_13 = arith.constant dense<0.000000e+00> : vector<32x2304xf32>
    %15 = tpu.matmul %0, %14, %cst_13 {dimension_numbers = #tpu.dot_dimension_numbers<[1], [0], [0], [1], [0, 0, 1, 1], [], []>} : vector<32x27xbf16>, vector<27x2304xbf16>, vector<32x2304xf32> -> vector<32x2304xf32>
    %16 = vector.broadcast %1 : vector<32x1xf32> to vector<32x2304xf32>
    %17 = arith.addf %15, %16 : vector<32x2304xf32>
    %cst_14 = arith.constant 0.000000e+00 : f32
    %18 = vector.broadcast %cst_14 : f32 to vector<32x2304xf32>
    %19 = arith.maximumf %17, %18 : vector<32x2304xf32>
    %cst_15 = arith.constant dense<0.000000e+00> : vector<32xf32>
    %20 = vector.multi_reduction <add>, %19, %cst_15 [1] : vector<32x2304xf32> to vector<32xf32>
    %21 = vector.shape_cast %20 : vector<32xf32> to vector<32x1xf32>
    %cst_16 = arith.constant 2.304000e+03 : f32
    %22 = vector.broadcast %cst_16 : f32 to vector<32x1xf32>
    %23 = arith.divf %21, %22 : vector<32x1xf32>
    %c0_17 = arith.constant 0 : index
    %c2 = arith.constant 2 : index
    %c0_18 = arith.constant 0 : index
    %c0_19 = arith.constant 0 : index
    %24 = vector.load %arg1[%c0_17, %c2, %c0_18, %c0_19] : memref<1x9x27x2304xbf16, #tpu.memory_space<vmem>>, vector<1x1x27x2304xbf16>
    %25 = vector.shape_cast %24 : vector<1x1x27x2304xbf16> to vector<27x2304xbf16>
    %cst_20 = arith.constant dense<0.000000e+00> : vector<32x2304xf32>
    %26 = tpu.matmul %0, %25, %cst_20 {dimension_numbers = #tpu.dot_dimension_numbers<[1], [0], [0], [1], [0, 0, 1, 1], [], []>} : vector<32x27xbf16>, vector<27x2304xbf16>, vector<32x2304xf32> -> vector<32x2304xf32>
    %27 = vector.broadcast %1 : vector<32x1xf32> to vector<32x2304xf32>
    %28 = arith.addf %26, %27 : vector<32x2304xf32>
    %cst_21 = arith.constant 0.000000e+00 : f32
    %29 = vector.broadcast %cst_21 : f32 to vector<32x2304xf32>
    %30 = arith.maximumf %28, %29 : vector<32x2304xf32>
    %cst_22 = arith.constant dense<0.000000e+00> : vector<32xf32>
    %31 = vector.multi_reduction <add>, %30, %cst_22 [1] : vector<32x2304xf32> to vector<32xf32>
    %32 = vector.shape_cast %31 : vector<32xf32> to vector<32x1xf32>
    %cst_23 = arith.constant 2.304000e+03 : f32
    %33 = vector.broadcast %cst_23 : f32 to vector<32x1xf32>
    %34 = arith.divf %32, %33 : vector<32x1xf32>
    %c0_24 = arith.constant 0 : index
    %c3 = arith.constant 3 : index
    %c0_25 = arith.constant 0 : index
    %c0_26 = arith.constant 0 : index
    %35 = vector.load %arg1[%c0_24, %c3, %c0_25, %c0_26] : memref<1x9x27x2304xbf16, #tpu.memory_space<vmem>>, vector<1x1x27x2304xbf16>
    %36 = vector.shape_cast %35 : vector<1x1x27x2304xbf16> to vector<27x2304xbf16>
    %cst_27 = arith.constant dense<0.000000e+00> : vector<32x2304xf32>
    %37 = tpu.matmul %0, %36, %cst_27 {dimension_numbers = #tpu.dot_dimension_numbers<[1], [0], [0], [1], [0, 0, 1, 1], [], []>} : vector<32x27xbf16>, vector<27x2304xbf16>, vector<32x2304xf32> -> vector<32x2304xf32>
    %38 = vector.broadcast %1 : vector<32x1xf32> to vector<32x2304xf32>
    %39 = arith.addf %37, %38 : vector<32x2304xf32>
    %cst_28 = arith.constant 0.000000e+00 : f32
    %40 = vector.broadcast %cst_28 : f32 to vector<32x2304xf32>
    %41 = arith.maximumf %39, %40 : vector<32x2304xf32>
    %cst_29 = arith.constant dense<0.000000e+00> : vector<32xf32>
    %42 = vector.multi_reduction <add>, %41, %cst_29 [1] : vector<32x2304xf32> to vector<32xf32>
    %43 = vector.shape_cast %42 : vector<32xf32> to vector<32x1xf32>
    %cst_30 = arith.constant 2.304000e+03 : f32
    %44 = vector.broadcast %cst_30 : f32 to vector<32x1xf32>
    %45 = arith.divf %43, %44 : vector<32x1xf32>
    %c0_31 = arith.constant 0 : index
    %c4 = arith.constant 4 : index
    %c0_32 = arith.constant 0 : index
    %c0_33 = arith.constant 0 : index
    %46 = vector.load %arg1[%c0_31, %c4, %c0_32, %c0_33] : memref<1x9x27x2304xbf16, #tpu.memory_space<vmem>>, vector<1x1x27x2304xbf16>
    %47 = vector.shape_cast %46 : vector<1x1x27x2304xbf16> to vector<27x2304xbf16>
    %cst_34 = arith.constant dense<0.000000e+00> : vector<32x2304xf32>
    %48 = tpu.matmul %0, %47, %cst_34 {dimension_numbers = #tpu.dot_dimension_numbers<[1], [0], [0], [1], [0, 0, 1, 1], [], []>} : vector<32x27xbf16>, vector<27x2304xbf16>, vector<32x2304xf32> -> vector<32x2304xf32>
    %49 = vector.broadcast %1 : vector<32x1xf32> to vector<32x2304xf32>
    %50 = arith.addf %48, %49 : vector<32x2304xf32>
    %cst_35 = arith.constant 0.000000e+00 : f32
    %51 = vector.broadcast %cst_35 : f32 to vector<32x2304xf32>
    %52 = arith.maximumf %50, %51 : vector<32x2304xf32>
    %cst_36 = arith.constant dense<0.000000e+00> : vector<32xf32>
    %53 = vector.multi_reduction <add>, %52, %cst_36 [1] : vector<32x2304xf32> to vector<32xf32>
    %54 = vector.shape_cast %53 : vector<32xf32> to vector<32x1xf32>
    %cst_37 = arith.constant 2.304000e+03 : f32
    %55 = vector.broadcast %cst_37 : f32 to vector<32x1xf32>
    %56 = arith.divf %54, %55 : vector<32x1xf32>
    %c0_38 = arith.constant 0 : index
    %c5 = arith.constant 5 : index
    %c0_39 = arith.constant 0 : index
    %c0_40 = arith.constant 0 : index
    %57 = vector.load %arg1[%c0_38, %c5, %c0_39, %c0_40] : memref<1x9x27x2304xbf16, #tpu.memory_space<vmem>>, vector<1x1x27x2304xbf16>
    %58 = vector.shape_cast %57 : vector<1x1x27x2304xbf16> to vector<27x2304xbf16>
    %cst_41 = arith.constant dense<0.000000e+00> : vector<32x2304xf32>
    %59 = tpu.matmul %0, %58, %cst_41 {dimension_numbers = #tpu.dot_dimension_numbers<[1], [0], [0], [1], [0, 0, 1, 1], [], []>} : vector<32x27xbf16>, vector<27x2304xbf16>, vector<32x2304xf32> -> vector<32x2304xf32>
    %60 = vector.broadcast %1 : vector<32x1xf32> to vector<32x2304xf32>
    %61 = arith.addf %59, %60 : vector<32x2304xf32>
    %cst_42 = arith.constant 0.000000e+00 : f32
    %62 = vector.broadcast %cst_42 : f32 to vector<32x2304xf32>
    %63 = arith.maximumf %61, %62 : vector<32x2304xf32>
    %cst_43 = arith.constant dense<0.000000e+00> : vector<32xf32>
    %64 = vector.multi_reduction <add>, %63, %cst_43 [1] : vector<32x2304xf32> to vector<32xf32>
    %65 = vector.shape_cast %64 : vector<32xf32> to vector<32x1xf32>
    %cst_44 = arith.constant 2.304000e+03 : f32
    %66 = vector.broadcast %cst_44 : f32 to vector<32x1xf32>
    %67 = arith.divf %65, %66 : vector<32x1xf32>
    %c0_45 = arith.constant 0 : index
    %c6 = arith.constant 6 : index
    %c0_46 = arith.constant 0 : index
    %c0_47 = arith.constant 0 : index
    %68 = vector.load %arg1[%c0_45, %c6, %c0_46, %c0_47] : memref<1x9x27x2304xbf16, #tpu.memory_space<vmem>>, vector<1x1x27x2304xbf16>
    %69 = vector.shape_cast %68 : vector<1x1x27x2304xbf16> to vector<27x2304xbf16>
    %cst_48 = arith.constant dense<0.000000e+00> : vector<32x2304xf32>
    %70 = tpu.matmul %0, %69, %cst_48 {dimension_numbers = #tpu.dot_dimension_numbers<[1], [0], [0], [1], [0, 0, 1, 1], [], []>} : vector<32x27xbf16>, vector<27x2304xbf16>, vector<32x2304xf32> -> vector<32x2304xf32>
    %71 = vector.broadcast %1 : vector<32x1xf32> to vector<32x2304xf32>
    %72 = arith.addf %70, %71 : vector<32x2304xf32>
    %cst_49 = arith.constant 0.000000e+00 : f32
    %73 = vector.broadcast %cst_49 : f32 to vector<32x2304xf32>
    %74 = arith.maximumf %72, %73 : vector<32x2304xf32>
    %cst_50 = arith.constant dense<0.000000e+00> : vector<32xf32>
    %75 = vector.multi_reduction <add>, %74, %cst_50 [1] : vector<32x2304xf32> to vector<32xf32>
    %76 = vector.shape_cast %75 : vector<32xf32> to vector<32x1xf32>
    %cst_51 = arith.constant 2.304000e+03 : f32
    %77 = vector.broadcast %cst_51 : f32 to vector<32x1xf32>
    %78 = arith.divf %76, %77 : vector<32x1xf32>
    %c0_52 = arith.constant 0 : index
    %c7 = arith.constant 7 : index
    %c0_53 = arith.constant 0 : index
    %c0_54 = arith.constant 0 : index
    %79 = vector.load %arg1[%c0_52, %c7, %c0_53, %c0_54] : memref<1x9x27x2304xbf16, #tpu.memory_space<vmem>>, vector<1x1x27x2304xbf16>
    %80 = vector.shape_cast %79 : vector<1x1x27x2304xbf16> to vector<27x2304xbf16>
    %cst_55 = arith.constant dense<0.000000e+00> : vector<32x2304xf32>
    %81 = tpu.matmul %0, %80, %cst_55 {dimension_numbers = #tpu.dot_dimension_numbers<[1], [0], [0], [1], [0, 0, 1, 1], [], []>} : vector<32x27xbf16>, vector<27x2304xbf16>, vector<32x2304xf32> -> vector<32x2304xf32>
    %82 = vector.broadcast %1 : vector<32x1xf32> to vector<32x2304xf32>
    %83 = arith.addf %81, %82 : vector<32x2304xf32>
    %cst_56 = arith.constant 0.000000e+00 : f32
    %84 = vector.broadcast %cst_56 : f32 to vector<32x2304xf32>
    %85 = arith.maximumf %83, %84 : vector<32x2304xf32>
    %cst_57 = arith.constant dense<0.000000e+00> : vector<32xf32>
    %86 = vector.multi_reduction <add>, %85, %cst_57 [1] : vector<32x2304xf32> to vector<32xf32>
    %87 = vector.shape_cast %86 : vector<32xf32> to vector<32x1xf32>
    %cst_58 = arith.constant 2.304000e+03 : f32
    %88 = vector.broadcast %cst_58 : f32 to vector<32x1xf32>
    %89 = arith.divf %87, %88 : vector<32x1xf32>
    %c0_59 = arith.constant 0 : index
    %c8 = arith.constant 8 : index
    %c0_60 = arith.constant 0 : index
    %c0_61 = arith.constant 0 : index
    %90 = vector.load %arg1[%c0_59, %c8, %c0_60, %c0_61] : memref<1x9x27x2304xbf16, #tpu.memory_space<vmem>>, vector<1x1x27x2304xbf16>
    %91 = vector.shape_cast %90 : vector<1x1x27x2304xbf16> to vector<27x2304xbf16>
    %cst_62 = arith.constant dense<0.000000e+00> : vector<32x2304xf32>
    %92 = tpu.matmul %0, %91, %cst_62 {dimension_numbers = #tpu.dot_dimension_numbers<[1], [0], [0], [1], [0, 0, 1, 1], [], []>} : vector<32x27xbf16>, vector<27x2304xbf16>, vector<32x2304xf32> -> vector<32x2304xf32>
    %93 = vector.broadcast %1 : vector<32x1xf32> to vector<32x2304xf32>
    %94 = arith.addf %92, %93 : vector<32x2304xf32>
    %cst_63 = arith.constant 0.000000e+00 : f32
    %95 = vector.broadcast %cst_63 : f32 to vector<32x2304xf32>
    %96 = arith.maximumf %94, %95 : vector<32x2304xf32>
    %cst_64 = arith.constant dense<0.000000e+00> : vector<32xf32>
    %97 = vector.multi_reduction <add>, %96, %cst_64 [1] : vector<32x2304xf32> to vector<32xf32>
    %98 = vector.shape_cast %97 : vector<32xf32> to vector<32x1xf32>
    %cst_65 = arith.constant 2.304000e+03 : f32
    %99 = vector.broadcast %cst_65 : f32 to vector<32x1xf32>
    %100 = arith.divf %98, %99 : vector<32x1xf32>
    %101 = tpu.concatenate %12, %23, %34, %45, %56, %67, %78, %89, %100 in 1 : vector<32x1xf32>, vector<32x1xf32>, vector<32x1xf32>, vector<32x1xf32>, vector<32x1xf32>, vector<32x1xf32>, vector<32x1xf32>, vector<32x1xf32>, vector<32x1xf32> -> vector<32x9xf32>
    %c0_66 = arith.constant 0 : index
    %c0_67 = arith.constant 0 : index
    %c0_68 = arith.constant 0 : index
    %102 = vector.load %arg4[%c0_66, %c0_67, %c0_68] : memref<1x32x9xf32, #tpu.memory_space<vmem>>, vector<1x32x9xf32>
    %103 = vector.shape_cast %102 : vector<1x32x9xf32> to vector<32x9xf32>
    %104 = vector.shape_cast %101 : vector<32x9xf32> to vector<1x32x9xf32>
    tpu.vector_store %arg4[%c0_66, %c0_67, %c0_68], %104 {strides = array<i32>} : memref<1x32x9xf32, #tpu.memory_space<vmem>>, vector<1x32x9xf32>,
    return
  }
  func.func @transform_0(%arg0: i32) -> (i32, i32, i32, i32) {
    %c0_i32 = arith.constant 0 : i32
    %c0_i32_0 = arith.constant 0 : i32
    %c0_i32_1 = arith.constant 0 : i32
    %c0_i32_2 = arith.constant 0 : i32
    return %arg0, %c0_i32, %c0_i32_0, %c0_i32_1 : i32, i32, i32, i32
  }
  func.func @transform_1(%arg0: i32) -> (i32, i32) {
    %c0_i32 = arith.constant 0 : i32
    %c0_i32_0 = arith.constant 0 : i32
    %c0_i32_1 = arith.constant 0 : i32
    return %c0_i32, %c0_i32_0 : i32, i32
  }
  func.func @transform_2(%arg0: i32) -> (i32, i32) {
    %c0_i32 = arith.constant 0 : i32
    %c0_i32_0 = arith.constant 0 : i32
    %c0_i32_1 = arith.constant 0 : i32
    return %c0_i32, %c0_i32_0 : i32, i32
  }
  func.func @transform_3(%arg0: i32) -> (i32, i32, i32) {
    %c0_i32 = arith.constant 0 : i32
    %c0_i32_0 = arith.constant 0 : i32
    %c0_i32_1 = arith.constant 0 : i32
    return %arg0, %c0_i32, %c0_i32_0 : i32, i32, i32
  }
}

module attributes {stable_mosaic.version = 11 : i64} {
  func.func @post_head_kernel(%arg0: memref<9x2x32xf32, #tpu.memory_space<vmem>>, %arg1: memref<32x1280xf32, #tpu.memory_space<vmem>>, %arg2: memref<1x1280xf32, #tpu.memory_space<vmem>>, %arg3: memref<1280x64xf32, #tpu.memory_space<vmem>>, %arg4: memref<1x64xf32, #tpu.memory_space<vmem>>, %arg5: memref<9x64x32xf32, #tpu.memory_space<vmem>>, %arg6: memref<1x32xf32, #tpu.memory_space<vmem>>, %arg7: memref<32x16xf32, #tpu.memory_space<vmem>>, %arg8: memref<1x16xf32, #tpu.memory_space<vmem>>, %arg9: memref<2x16xf32, #tpu.memory_space<vmem>>) attributes {dimension_semantics = [], scalar_prefetch = 0 : i64, scratch_operands = 0 : i64, tpu.core_type = #tpu.core_type<tc>} {
    %c0 = arith.constant 0 : index
    %c0_0 = arith.constant 0 : index
    %0 = vector.load %arg1[%c0, %c0_0] : memref<32x1280xf32, #tpu.memory_space<vmem>>, vector<32x1280xf32>
    %c0_1 = arith.constant 0 : index
    %c0_2 = arith.constant 0 : index
    %1 = vector.load %arg2[%c0_1, %c0_2] : memref<1x1280xf32, #tpu.memory_space<vmem>>, vector<1x1280xf32>
    %c0_3 = arith.constant 0 : index
    %c0_4 = arith.constant 0 : index
    %2 = vector.load %arg3[%c0_3, %c0_4] : memref<1280x64xf32, #tpu.memory_space<vmem>>, vector<1280x64xf32>
    %c0_5 = arith.constant 0 : index
    %c0_6 = arith.constant 0 : index
    %3 = vector.load %arg4[%c0_5, %c0_6] : memref<1x64xf32, #tpu.memory_space<vmem>>, vector<1x64xf32>
    %cst = arith.constant 0.000000e+00 : f32
    %4 = vector.broadcast %cst : f32 to vector<2x32xf32>
    %c0_7 = arith.constant 0 : index
    %c0_8 = arith.constant 0 : index
    %c0_9 = arith.constant 0 : index
    %5 = vector.load %arg0[%c0_7, %c0_8, %c0_9] : memref<9x2x32xf32, #tpu.memory_space<vmem>>, vector<1x2x32xf32>
    %6 = vector.shape_cast %5 : vector<1x2x32xf32> to vector<2x32xf32>
    %cst_10 = arith.constant dense<0.000000e+00> : vector<2x1280xf32>
    %7 = tpu.matmul %6, %0, %cst_10 {dimension_numbers = #tpu.dot_dimension_numbers<[1], [0], [0], [1], [0, 0, 1, 1], [], []>} : vector<2x32xf32>, vector<32x1280xf32>, vector<2x1280xf32> -> vector<2x1280xf32>
    %8 = vector.broadcast %1 : vector<1x1280xf32> to vector<2x1280xf32>
    %9 = arith.addf %7, %8 : vector<2x1280xf32>
    %cst_11 = arith.constant 0.000000e+00 : f32
    %10 = vector.broadcast %cst_11 : f32 to vector<2x1280xf32>
    %11 = arith.maximumf %9, %10 : vector<2x1280xf32>
    %cst_12 = arith.constant dense<0.000000e+00> : vector<2x64xf32>
    %12 = tpu.matmul %11, %2, %cst_12 {dimension_numbers = #tpu.dot_dimension_numbers<[1], [0], [0], [1], [0, 0, 1, 1], [], []>} : vector<2x1280xf32>, vector<1280x64xf32>, vector<2x64xf32> -> vector<2x64xf32>
    %13 = vector.broadcast %3 : vector<1x64xf32> to vector<2x64xf32>
    %14 = arith.addf %12, %13 : vector<2x64xf32>
    %c0_13 = arith.constant 0 : index
    %c0_14 = arith.constant 0 : index
    %c0_15 = arith.constant 0 : index
    %15 = vector.load %arg5[%c0_13, %c0_14, %c0_15] : memref<9x64x32xf32, #tpu.memory_space<vmem>>, vector<1x64x32xf32>
    %16 = vector.shape_cast %15 : vector<1x64x32xf32> to vector<64x32xf32>
    %cst_16 = arith.constant dense<0.000000e+00> : vector<2x32xf32>
    %17 = tpu.matmul %14, %16, %cst_16 {dimension_numbers = #tpu.dot_dimension_numbers<[1], [0], [0], [1], [0, 0, 1, 1], [], []>} : vector<2x64xf32>, vector<64x32xf32>, vector<2x32xf32> -> vector<2x32xf32>
    %18 = arith.addf %4, %17 : vector<2x32xf32>
    %c1 = arith.constant 1 : index
    %c0_17 = arith.constant 0 : index
    %c0_18 = arith.constant 0 : index
    %19 = vector.load %arg0[%c1, %c0_17, %c0_18] : memref<9x2x32xf32, #tpu.memory_space<vmem>>, vector<1x2x32xf32>
    %20 = vector.shape_cast %19 : vector<1x2x32xf32> to vector<2x32xf32>
    %cst_19 = arith.constant dense<0.000000e+00> : vector<2x1280xf32>
    %21 = tpu.matmul %20, %0, %cst_19 {dimension_numbers = #tpu.dot_dimension_numbers<[1], [0], [0], [1], [0, 0, 1, 1], [], []>} : vector<2x32xf32>, vector<32x1280xf32>, vector<2x1280xf32> -> vector<2x1280xf32>
    %22 = vector.broadcast %1 : vector<1x1280xf32> to vector<2x1280xf32>
    %23 = arith.addf %21, %22 : vector<2x1280xf32>
    %cst_20 = arith.constant 0.000000e+00 : f32
    %24 = vector.broadcast %cst_20 : f32 to vector<2x1280xf32>
    %25 = arith.maximumf %23, %24 : vector<2x1280xf32>
    %cst_21 = arith.constant dense<0.000000e+00> : vector<2x64xf32>
    %26 = tpu.matmul %25, %2, %cst_21 {dimension_numbers = #tpu.dot_dimension_numbers<[1], [0], [0], [1], [0, 0, 1, 1], [], []>} : vector<2x1280xf32>, vector<1280x64xf32>, vector<2x64xf32> -> vector<2x64xf32>
    %27 = vector.broadcast %3 : vector<1x64xf32> to vector<2x64xf32>
    %28 = arith.addf %26, %27 : vector<2x64xf32>
    %c1_22 = arith.constant 1 : index
    %c0_23 = arith.constant 0 : index
    %c0_24 = arith.constant 0 : index
    %29 = vector.load %arg5[%c1_22, %c0_23, %c0_24] : memref<9x64x32xf32, #tpu.memory_space<vmem>>, vector<1x64x32xf32>
    %30 = vector.shape_cast %29 : vector<1x64x32xf32> to vector<64x32xf32>
    %cst_25 = arith.constant dense<0.000000e+00> : vector<2x32xf32>
    %31 = tpu.matmul %28, %30, %cst_25 {dimension_numbers = #tpu.dot_dimension_numbers<[1], [0], [0], [1], [0, 0, 1, 1], [], []>} : vector<2x64xf32>, vector<64x32xf32>, vector<2x32xf32> -> vector<2x32xf32>
    %32 = arith.addf %18, %31 : vector<2x32xf32>
    %c2 = arith.constant 2 : index
    %c0_26 = arith.constant 0 : index
    %c0_27 = arith.constant 0 : index
    %33 = vector.load %arg0[%c2, %c0_26, %c0_27] : memref<9x2x32xf32, #tpu.memory_space<vmem>>, vector<1x2x32xf32>
    %34 = vector.shape_cast %33 : vector<1x2x32xf32> to vector<2x32xf32>
    %cst_28 = arith.constant dense<0.000000e+00> : vector<2x1280xf32>
    %35 = tpu.matmul %34, %0, %cst_28 {dimension_numbers = #tpu.dot_dimension_numbers<[1], [0], [0], [1], [0, 0, 1, 1], [], []>} : vector<2x32xf32>, vector<32x1280xf32>, vector<2x1280xf32> -> vector<2x1280xf32>
    %36 = vector.broadcast %1 : vector<1x1280xf32> to vector<2x1280xf32>
    %37 = arith.addf %35, %36 : vector<2x1280xf32>
    %cst_29 = arith.constant 0.000000e+00 : f32
    %38 = vector.broadcast %cst_29 : f32 to vector<2x1280xf32>
    %39 = arith.maximumf %37, %38 : vector<2x1280xf32>
    %cst_30 = arith.constant dense<0.000000e+00> : vector<2x64xf32>
    %40 = tpu.matmul %39, %2, %cst_30 {dimension_numbers = #tpu.dot_dimension_numbers<[1], [0], [0], [1], [0, 0, 1, 1], [], []>} : vector<2x1280xf32>, vector<1280x64xf32>, vector<2x64xf32> -> vector<2x64xf32>
    %41 = vector.broadcast %3 : vector<1x64xf32> to vector<2x64xf32>
    %42 = arith.addf %40, %41 : vector<2x64xf32>
    %c2_31 = arith.constant 2 : index
    %c0_32 = arith.constant 0 : index
    %c0_33 = arith.constant 0 : index
    %43 = vector.load %arg5[%c2_31, %c0_32, %c0_33] : memref<9x64x32xf32, #tpu.memory_space<vmem>>, vector<1x64x32xf32>
    %44 = vector.shape_cast %43 : vector<1x64x32xf32> to vector<64x32xf32>
    %cst_34 = arith.constant dense<0.000000e+00> : vector<2x32xf32>
    %45 = tpu.matmul %42, %44, %cst_34 {dimension_numbers = #tpu.dot_dimension_numbers<[1], [0], [0], [1], [0, 0, 1, 1], [], []>} : vector<2x64xf32>, vector<64x32xf32>, vector<2x32xf32> -> vector<2x32xf32>
    %46 = arith.addf %32, %45 : vector<2x32xf32>
    %c3 = arith.constant 3 : index
    %c0_35 = arith.constant 0 : index
    %c0_36 = arith.constant 0 : index
    %47 = vector.load %arg0[%c3, %c0_35, %c0_36] : memref<9x2x32xf32, #tpu.memory_space<vmem>>, vector<1x2x32xf32>
    %48 = vector.shape_cast %47 : vector<1x2x32xf32> to vector<2x32xf32>
    %cst_37 = arith.constant dense<0.000000e+00> : vector<2x1280xf32>
    %49 = tpu.matmul %48, %0, %cst_37 {dimension_numbers = #tpu.dot_dimension_numbers<[1], [0], [0], [1], [0, 0, 1, 1], [], []>} : vector<2x32xf32>, vector<32x1280xf32>, vector<2x1280xf32> -> vector<2x1280xf32>
    %50 = vector.broadcast %1 : vector<1x1280xf32> to vector<2x1280xf32>
    %51 = arith.addf %49, %50 : vector<2x1280xf32>
    %cst_38 = arith.constant 0.000000e+00 : f32
    %52 = vector.broadcast %cst_38 : f32 to vector<2x1280xf32>
    %53 = arith.maximumf %51, %52 : vector<2x1280xf32>
    %cst_39 = arith.constant dense<0.000000e+00> : vector<2x64xf32>
    %54 = tpu.matmul %53, %2, %cst_39 {dimension_numbers = #tpu.dot_dimension_numbers<[1], [0], [0], [1], [0, 0, 1, 1], [], []>} : vector<2x1280xf32>, vector<1280x64xf32>, vector<2x64xf32> -> vector<2x64xf32>
    %55 = vector.broadcast %3 : vector<1x64xf32> to vector<2x64xf32>
    %56 = arith.addf %54, %55 : vector<2x64xf32>
    %c3_40 = arith.constant 3 : index
    %c0_41 = arith.constant 0 : index
    %c0_42 = arith.constant 0 : index
    %57 = vector.load %arg5[%c3_40, %c0_41, %c0_42] : memref<9x64x32xf32, #tpu.memory_space<vmem>>, vector<1x64x32xf32>
    %58 = vector.shape_cast %57 : vector<1x64x32xf32> to vector<64x32xf32>
    %cst_43 = arith.constant dense<0.000000e+00> : vector<2x32xf32>
    %59 = tpu.matmul %56, %58, %cst_43 {dimension_numbers = #tpu.dot_dimension_numbers<[1], [0], [0], [1], [0, 0, 1, 1], [], []>} : vector<2x64xf32>, vector<64x32xf32>, vector<2x32xf32> -> vector<2x32xf32>
    %60 = arith.addf %46, %59 : vector<2x32xf32>
    %c4 = arith.constant 4 : index
    %c0_44 = arith.constant 0 : index
    %c0_45 = arith.constant 0 : index
    %61 = vector.load %arg0[%c4, %c0_44, %c0_45] : memref<9x2x32xf32, #tpu.memory_space<vmem>>, vector<1x2x32xf32>
    %62 = vector.shape_cast %61 : vector<1x2x32xf32> to vector<2x32xf32>
    %cst_46 = arith.constant dense<0.000000e+00> : vector<2x1280xf32>
    %63 = tpu.matmul %62, %0, %cst_46 {dimension_numbers = #tpu.dot_dimension_numbers<[1], [0], [0], [1], [0, 0, 1, 1], [], []>} : vector<2x32xf32>, vector<32x1280xf32>, vector<2x1280xf32> -> vector<2x1280xf32>
    %64 = vector.broadcast %1 : vector<1x1280xf32> to vector<2x1280xf32>
    %65 = arith.addf %63, %64 : vector<2x1280xf32>
    %cst_47 = arith.constant 0.000000e+00 : f32
    %66 = vector.broadcast %cst_47 : f32 to vector<2x1280xf32>
    %67 = arith.maximumf %65, %66 : vector<2x1280xf32>
    %cst_48 = arith.constant dense<0.000000e+00> : vector<2x64xf32>
    %68 = tpu.matmul %67, %2, %cst_48 {dimension_numbers = #tpu.dot_dimension_numbers<[1], [0], [0], [1], [0, 0, 1, 1], [], []>} : vector<2x1280xf32>, vector<1280x64xf32>, vector<2x64xf32> -> vector<2x64xf32>
    %69 = vector.broadcast %3 : vector<1x64xf32> to vector<2x64xf32>
    %70 = arith.addf %68, %69 : vector<2x64xf32>
    %c4_49 = arith.constant 4 : index
    %c0_50 = arith.constant 0 : index
    %c0_51 = arith.constant 0 : index
    %71 = vector.load %arg5[%c4_49, %c0_50, %c0_51] : memref<9x64x32xf32, #tpu.memory_space<vmem>>, vector<1x64x32xf32>
    %72 = vector.shape_cast %71 : vector<1x64x32xf32> to vector<64x32xf32>
    %cst_52 = arith.constant dense<0.000000e+00> : vector<2x32xf32>
    %73 = tpu.matmul %70, %72, %cst_52 {dimension_numbers = #tpu.dot_dimension_numbers<[1], [0], [0], [1], [0, 0, 1, 1], [], []>} : vector<2x64xf32>, vector<64x32xf32>, vector<2x32xf32> -> vector<2x32xf32>
    %74 = arith.addf %60, %73 : vector<2x32xf32>
    %c5 = arith.constant 5 : index
    %c0_53 = arith.constant 0 : index
    %c0_54 = arith.constant 0 : index
    %75 = vector.load %arg0[%c5, %c0_53, %c0_54] : memref<9x2x32xf32, #tpu.memory_space<vmem>>, vector<1x2x32xf32>
    %76 = vector.shape_cast %75 : vector<1x2x32xf32> to vector<2x32xf32>
    %cst_55 = arith.constant dense<0.000000e+00> : vector<2x1280xf32>
    %77 = tpu.matmul %76, %0, %cst_55 {dimension_numbers = #tpu.dot_dimension_numbers<[1], [0], [0], [1], [0, 0, 1, 1], [], []>} : vector<2x32xf32>, vector<32x1280xf32>, vector<2x1280xf32> -> vector<2x1280xf32>
    %78 = vector.broadcast %1 : vector<1x1280xf32> to vector<2x1280xf32>
    %79 = arith.addf %77, %78 : vector<2x1280xf32>
    %cst_56 = arith.constant 0.000000e+00 : f32
    %80 = vector.broadcast %cst_56 : f32 to vector<2x1280xf32>
    %81 = arith.maximumf %79, %80 : vector<2x1280xf32>
    %cst_57 = arith.constant dense<0.000000e+00> : vector<2x64xf32>
    %82 = tpu.matmul %81, %2, %cst_57 {dimension_numbers = #tpu.dot_dimension_numbers<[1], [0], [0], [1], [0, 0, 1, 1], [], []>} : vector<2x1280xf32>, vector<1280x64xf32>, vector<2x64xf32> -> vector<2x64xf32>
    %83 = vector.broadcast %3 : vector<1x64xf32> to vector<2x64xf32>
    %84 = arith.addf %82, %83 : vector<2x64xf32>
    %c5_58 = arith.constant 5 : index
    %c0_59 = arith.constant 0 : index
    %c0_60 = arith.constant 0 : index
    %85 = vector.load %arg5[%c5_58, %c0_59, %c0_60] : memref<9x64x32xf32, #tpu.memory_space<vmem>>, vector<1x64x32xf32>
    %86 = vector.shape_cast %85 : vector<1x64x32xf32> to vector<64x32xf32>
    %cst_61 = arith.constant dense<0.000000e+00> : vector<2x32xf32>
    %87 = tpu.matmul %84, %86, %cst_61 {dimension_numbers = #tpu.dot_dimension_numbers<[1], [0], [0], [1], [0, 0, 1, 1], [], []>} : vector<2x64xf32>, vector<64x32xf32>, vector<2x32xf32> -> vector<2x32xf32>
    %88 = arith.addf %74, %87 : vector<2x32xf32>
    %c6 = arith.constant 6 : index
    %c0_62 = arith.constant 0 : index
    %c0_63 = arith.constant 0 : index
    %89 = vector.load %arg0[%c6, %c0_62, %c0_63] : memref<9x2x32xf32, #tpu.memory_space<vmem>>, vector<1x2x32xf32>
    %90 = vector.shape_cast %89 : vector<1x2x32xf32> to vector<2x32xf32>
    %cst_64 = arith.constant dense<0.000000e+00> : vector<2x1280xf32>
    %91 = tpu.matmul %90, %0, %cst_64 {dimension_numbers = #tpu.dot_dimension_numbers<[1], [0], [0], [1], [0, 0, 1, 1], [], []>} : vector<2x32xf32>, vector<32x1280xf32>, vector<2x1280xf32> -> vector<2x1280xf32>
    %92 = vector.broadcast %1 : vector<1x1280xf32> to vector<2x1280xf32>
    %93 = arith.addf %91, %92 : vector<2x1280xf32>
    %cst_65 = arith.constant 0.000000e+00 : f32
    %94 = vector.broadcast %cst_65 : f32 to vector<2x1280xf32>
    %95 = arith.maximumf %93, %94 : vector<2x1280xf32>
    %cst_66 = arith.constant dense<0.000000e+00> : vector<2x64xf32>
    %96 = tpu.matmul %95, %2, %cst_66 {dimension_numbers = #tpu.dot_dimension_numbers<[1], [0], [0], [1], [0, 0, 1, 1], [], []>} : vector<2x1280xf32>, vector<1280x64xf32>, vector<2x64xf32> -> vector<2x64xf32>
    %97 = vector.broadcast %3 : vector<1x64xf32> to vector<2x64xf32>
    %98 = arith.addf %96, %97 : vector<2x64xf32>
    %c6_67 = arith.constant 6 : index
    %c0_68 = arith.constant 0 : index
    %c0_69 = arith.constant 0 : index
    %99 = vector.load %arg5[%c6_67, %c0_68, %c0_69] : memref<9x64x32xf32, #tpu.memory_space<vmem>>, vector<1x64x32xf32>
    %100 = vector.shape_cast %99 : vector<1x64x32xf32> to vector<64x32xf32>
    %cst_70 = arith.constant dense<0.000000e+00> : vector<2x32xf32>
    %101 = tpu.matmul %98, %100, %cst_70 {dimension_numbers = #tpu.dot_dimension_numbers<[1], [0], [0], [1], [0, 0, 1, 1], [], []>} : vector<2x64xf32>, vector<64x32xf32>, vector<2x32xf32> -> vector<2x32xf32>
    %102 = arith.addf %88, %101 : vector<2x32xf32>
    %c7 = arith.constant 7 : index
    %c0_71 = arith.constant 0 : index
    %c0_72 = arith.constant 0 : index
    %103 = vector.load %arg0[%c7, %c0_71, %c0_72] : memref<9x2x32xf32, #tpu.memory_space<vmem>>, vector<1x2x32xf32>
    %104 = vector.shape_cast %103 : vector<1x2x32xf32> to vector<2x32xf32>
    %cst_73 = arith.constant dense<0.000000e+00> : vector<2x1280xf32>
    %105 = tpu.matmul %104, %0, %cst_73 {dimension_numbers = #tpu.dot_dimension_numbers<[1], [0], [0], [1], [0, 0, 1, 1], [], []>} : vector<2x32xf32>, vector<32x1280xf32>, vector<2x1280xf32> -> vector<2x1280xf32>
    %106 = vector.broadcast %1 : vector<1x1280xf32> to vector<2x1280xf32>
    %107 = arith.addf %105, %106 : vector<2x1280xf32>
    %cst_74 = arith.constant 0.000000e+00 : f32
    %108 = vector.broadcast %cst_74 : f32 to vector<2x1280xf32>
    %109 = arith.maximumf %107, %108 : vector<2x1280xf32>
    %cst_75 = arith.constant dense<0.000000e+00> : vector<2x64xf32>
    %110 = tpu.matmul %109, %2, %cst_75 {dimension_numbers = #tpu.dot_dimension_numbers<[1], [0], [0], [1], [0, 0, 1, 1], [], []>} : vector<2x1280xf32>, vector<1280x64xf32>, vector<2x64xf32> -> vector<2x64xf32>
    %111 = vector.broadcast %3 : vector<1x64xf32> to vector<2x64xf32>
    %112 = arith.addf %110, %111 : vector<2x64xf32>
    %c7_76 = arith.constant 7 : index
    %c0_77 = arith.constant 0 : index
    %c0_78 = arith.constant 0 : index
    %113 = vector.load %arg5[%c7_76, %c0_77, %c0_78] : memref<9x64x32xf32, #tpu.memory_space<vmem>>, vector<1x64x32xf32>
    %114 = vector.shape_cast %113 : vector<1x64x32xf32> to vector<64x32xf32>
    %cst_79 = arith.constant dense<0.000000e+00> : vector<2x32xf32>
    %115 = tpu.matmul %112, %114, %cst_79 {dimension_numbers = #tpu.dot_dimension_numbers<[1], [0], [0], [1], [0, 0, 1, 1], [], []>} : vector<2x64xf32>, vector<64x32xf32>, vector<2x32xf32> -> vector<2x32xf32>
    %116 = arith.addf %102, %115 : vector<2x32xf32>
    %c8 = arith.constant 8 : index
    %c0_80 = arith.constant 0 : index
    %c0_81 = arith.constant 0 : index
    %117 = vector.load %arg0[%c8, %c0_80, %c0_81] : memref<9x2x32xf32, #tpu.memory_space<vmem>>, vector<1x2x32xf32>
    %118 = vector.shape_cast %117 : vector<1x2x32xf32> to vector<2x32xf32>
    %cst_82 = arith.constant dense<0.000000e+00> : vector<2x1280xf32>
    %119 = tpu.matmul %118, %0, %cst_82 {dimension_numbers = #tpu.dot_dimension_numbers<[1], [0], [0], [1], [0, 0, 1, 1], [], []>} : vector<2x32xf32>, vector<32x1280xf32>, vector<2x1280xf32> -> vector<2x1280xf32>
    %120 = vector.broadcast %1 : vector<1x1280xf32> to vector<2x1280xf32>
    %121 = arith.addf %119, %120 : vector<2x1280xf32>
    %cst_83 = arith.constant 0.000000e+00 : f32
    %122 = vector.broadcast %cst_83 : f32 to vector<2x1280xf32>
    %123 = arith.maximumf %121, %122 : vector<2x1280xf32>
    %cst_84 = arith.constant dense<0.000000e+00> : vector<2x64xf32>
    %124 = tpu.matmul %123, %2, %cst_84 {dimension_numbers = #tpu.dot_dimension_numbers<[1], [0], [0], [1], [0, 0, 1, 1], [], []>} : vector<2x1280xf32>, vector<1280x64xf32>, vector<2x64xf32> -> vector<2x64xf32>
    %125 = vector.broadcast %3 : vector<1x64xf32> to vector<2x64xf32>
    %126 = arith.addf %124, %125 : vector<2x64xf32>
    %c8_85 = arith.constant 8 : index
    %c0_86 = arith.constant 0 : index
    %c0_87 = arith.constant 0 : index
    %127 = vector.load %arg5[%c8_85, %c0_86, %c0_87] : memref<9x64x32xf32, #tpu.memory_space<vmem>>, vector<1x64x32xf32>
    %128 = vector.shape_cast %127 : vector<1x64x32xf32> to vector<64x32xf32>
    %cst_88 = arith.constant dense<0.000000e+00> : vector<2x32xf32>
    %129 = tpu.matmul %126, %128, %cst_88 {dimension_numbers = #tpu.dot_dimension_numbers<[1], [0], [0], [1], [0, 0, 1, 1], [], []>} : vector<2x64xf32>, vector<64x32xf32>, vector<2x32xf32> -> vector<2x32xf32>
    %130 = arith.addf %116, %129 : vector<2x32xf32>
    %c0_89 = arith.constant 0 : index
    %c0_90 = arith.constant 0 : index
    %131 = vector.load %arg6[%c0_89, %c0_90] : memref<1x32xf32, #tpu.memory_space<vmem>>, vector<1x32xf32>
    %132 = vector.broadcast %131 : vector<1x32xf32> to vector<2x32xf32>
    %133 = arith.addf %130, %132 : vector<2x32xf32>
    %cst_91 = arith.constant 0.000000e+00 : f32
    %134 = vector.broadcast %cst_91 : f32 to vector<2x32xf32>
    %135 = arith.maximumf %133, %134 : vector<2x32xf32>
    %c0_92 = arith.constant 0 : index
    %c0_93 = arith.constant 0 : index
    %136 = vector.load %arg7[%c0_92, %c0_93] : memref<32x16xf32, #tpu.memory_space<vmem>>, vector<32x16xf32>
    %cst_94 = arith.constant dense<0.000000e+00> : vector<2x16xf32>
    %137 = tpu.matmul %135, %136, %cst_94 {dimension_numbers = #tpu.dot_dimension_numbers<[1], [0], [0], [1], [0, 0, 1, 1], [], []>} : vector<2x32xf32>, vector<32x16xf32>, vector<2x16xf32> -> vector<2x16xf32>
    %c0_95 = arith.constant 0 : index
    %c0_96 = arith.constant 0 : index
    %138 = vector.load %arg8[%c0_95, %c0_96] : memref<1x16xf32, #tpu.memory_space<vmem>>, vector<1x16xf32>
    %139 = vector.broadcast %138 : vector<1x16xf32> to vector<2x16xf32>
    %140 = arith.addf %137, %139 : vector<2x16xf32>
    %c0_97 = arith.constant 0 : index
    %c0_98 = arith.constant 0 : index
    %141 = vector.load %arg9[%c0_97, %c0_98] : memref<2x16xf32, #tpu.memory_space<vmem>>, vector<2x16xf32>
    tpu.vector_store %arg9[%c0_97, %c0_98], %140 {strides = array<i32>} : memref<2x16xf32, #tpu.memory_space<vmem>>, vector<2x16xf32>,
    return
  }
}

</mosaic_0001>

<bundles_post_ra>
// kernel: fen_forward.2
= control target key start
LH: loop header
LB: loop body
LE: loop exit
PB: predicated region body
PF: predicated region fallthrough
CT: control target
= control target key end

     0   :  { %s9591_s12 = smov 0   ;;  %s11459_s0 = inlined_call_operand.vmem [shape: bf16[2,9,27,2304], index: 0, kind: input, shape index: {}]   ;;  %s11460_s1 = inlined_call_operand.vmem [shape: bf16[32,27], index: 1, kind: input, shape index: {}]   ;;  %s11461_s2 = inlined_call_operand.vmem [shape: f32[32,1], index: 2, kind: input, shape index: {}]   ;;  %s11462_s3 = inlined_call_operand.vmem [shape: f32[2,32,9], index: 3, kind: output, shape index: {}]  }
   0x1 LB: > { %s8259_s13 = sadd.s32 4294967295, %s9567_s12   ;;  %p8263_p0 = scmp.ge.s32.totalorder %s9567_s12, 1  ;;  %s9567_s12 = sphi %s9591_s12, %s13_s12  }
   0x2   : > { %p137_p1 = scmp.lt.s32.totalorder %s9567_s12, 3 }
   0x4   : > { %p138_p2 = pnand %p8263_p0, %p137_p1 }
   0x5   : > { %p161_p3 = scmp.lt.s32.totalorder (!%p138_p2), %s8259_s13, 1  ;;  %vm415_vm0 = vcmask (!%p138_p2), 1044480   ;;  %v9569_v0 = vmov (!%p138_p2), 0   ;;  %v178_v1 = vld [vmem:[%s11461_s2 + $0x10] sm:$0xff] (!%p138_p2)  ;;  %v176_v2 = vld [vmem:[%s11461_s2] sm:$0xff] (!%p138_p2)  ;;  %vm416_vm1 = vcmask (!%p138_p2), 1045504  }
   0x6   : > { %141 = sbr.rel (%p138_p2) target bundleno = 1038 (0x40e), region = 32  ;;  %505 = vmatprep.mubr.bf16.mxu0 (!%p138_p2), %v9569_v0  ;;  %515 = vmatprep.mubr.bf16.mxu1 (!%p138_p2), %v9569_v0  ;;  %v9570_v3 = vmov (!%p138_p2), 65535   ;;  %v179_v5 = vld [vmem:[%s11461_s2 + $0x18] sm:$0xff] (!%p138_p2)  ;;  %v177_v6 = vld [vmem:[%s11461_s2 + $0x8] sm:$0xff] (!%p138_p2)  ;;  %v9634_v14 = vld [vmem:[%s11460_s1] sm:$0xff] (!%p138_p2)   ;;  %vm408_vm2 = vcmask (!%p138_p2), 220160  }
   0x7   : > { %9062 = vset.pattern.permute.xlu1 (!%p138_p2), %v9569_v0  ;;  %9061 = vset.pattern.permute.xlu0 (!%p138_p2), %v9569_v0  ;;  %v417_v4 = vsel (!%p138_p2), %vm415_vm0, 4294967295, %v9570_v3  ;;  %v9639_v15 = vld [vmem:[%s11460_s1 + $0x8] sm:$0xff] (!%p138_p2)   ;;  %vm8159_vm3 = vcmask (!%p138_p2), 7168   ;;  %vm8164_vm4 = vcmask (!%p138_p2), 15360   ;;  %vm8169_vm5 = vcmask (!%p138_p2), 23552  }
   0x8   : > { %228 = vperm.xlu1 (!%p138_p2), %9062, %v178_v1   ;;  %218 = vperm.xlu0 (!%p138_p2), %9061, %v176_v2   ;;  %v9625_v9 = vsel (!%p138_p2), %vm416_vm1, %v417_v4, 0  ;;  %vm8174_vm6 = vcmask (!%p138_p2), 31744   ;;  %vm8179_vm7 = vcmask (!%p138_p2), 39936   ;;  %vm8184_vm8 = vcmask (!%p138_p2), 48128  }
   0x9   : > { %vm8189_vm9 = vcmask (!%p138_p2), 56320   ;;  %vm8194_vm10 = vcmask (!%p138_p2), 64512   ;;  %vm8199_vm11 = vcmask (!%p138_p2), 72704  }
   0xc   : > { %233 = vperm.xlu1 (!%p138_p2), %9062, %v179_v5   ;;  %223 = vperm.xlu0 (!%p138_p2), %9061, %v177_v6  }
   0xd   : > { %s11464_s13 = smov (!%p161_p3, %s8259_s13), 1 }
   0xe   : > { %s9050_s18 = smul.u32 2592, %s11464_s13 }
  0x10   : > { %s9621_s25 = scalar_lea.vmem %s11459_s0, %s9050_s18 }
  0x11   : > { %v9063_v7 = vld [vmem:[%s9621_s25 + $0x4] ss:$72 sps:$4 sm:$0xff]   ;;  %v9065_v8 = vld [vmem:[%s9621_s25] ss:$72 sps:$4 sm:$0xff]   ;;  %v9074_v18 = vld [vmem:[%s9621_s25 + $0x10] ss:$72 sps:$4 sm:$0xff]  }
  0x12   : > { %473 = vmatprep.subr.bf16.mxu0 %v9063_v7  ;;  %9046 = vmatprep.subr.bf16.mxu1 %v9063_v7  ;;  %v9066_v10 = vld [vmem:[%s9621_s25 + $0x94] ss:$72 sps:$4 sm:$0x3f]   ;;  %v9068_v11 = vld [vmem:[%s9621_s25 + $0x90] ss:$72 sps:$4 sm:$0x3f]  }
  0x13   : > { %474 = vmatpush1.bf16.msra.mxu0 %v9065_v8  ;;  %9048 = vmatpush1.bf16.msra.mxu1 %v9065_v8  ;;  %v423_v12 = vand.u32 %v9066_v10, %v9625_v9  ;;  %v420_v13 = vand.u32 %v9068_v11, %v9625_v9  ;;  %v9073_v16 = vld [vmem:[%s9621_s25 + $0xc] ss:$72 sps:$4 sm:$0xff]   ;;  %v9071_v17 = vld [vmem:[%s9621_s25 + $0x8] ss:$72 sps:$4 sm:$0xff]   ;;  %v9085_v28 = vld [vmem:[%s9621_s25 + $0x1c] ss:$72 sps:$4 sm:$0xff]  }
  0x14   : > { %v9076_v19 = vld [vmem:[%s9621_s25 + $0x14] ss:$72 sps:$4 sm:$0xff]   ;;  %v9077_v20 = vld [vmem:[%s9621_s25 + $0x98] ss:$72 sps:$4 sm:$0x3f]  }
  0x15   : > { %475 = vmatprep.subr.bf16.mxu0 %v423_v12  ;;  %9047 = vmatprep.subr.bf16.mxu1 %v423_v12  ;;  %v9079_v21 = vld [vmem:[%s9621_s25 + $0x9c] ss:$72 sps:$4 sm:$0x3f]   ;;  %v9080_v22 = vld [vmem:[%s9621_s25 + $0xa0] ss:$72 sps:$4 sm:$0x3f]   ;;  %v426_v26 = vand.u32 %v9077_v20, %v9625_v9 }
  0x16   : > { %v9082_v23 = vld [vmem:[%s9621_s25 + $0xa4] ss:$72 sps:$4 sm:$0x3f]   ;;  %v429_v24 = vand.u32 %v9079_v21, %v9625_v9  ;;  %v432_v27 = vand.u32 %v9080_v22, %v9625_v9  ;;  %v9083_v30 = vld [vmem:[%s9621_s25 + $0x18] ss:$72 sps:$4 sm:$0xff]  }
  0x17   : > { %476 = vmatpush1.bf16.msra.mxu0 %v420_v13  ;;  %9049 = vmatpush1.bf16.msra.mxu1 %v420_v13  ;;  %v435_v25 = vand.u32 %v9082_v23, %v9625_v9  ;;  %v9088_v29 = vld [vmem:[%s9621_s25 + $0x24] ss:$72 sps:$4 sm:$0xff]   ;;  %v9089_v31 = vld [vmem:[%s9621_s25 + $0xa8] ss:$72 sps:$4 sm:$0x3f]  }
  0x18   : > { %526 = vmatprep.subr.bf16.mxu1 %v9073_v16  ;;  %579 = vmatprep.subr.bf16.mxu0 %v9076_v19  ;;  %v9091_v32 = vld [vmem:[%s9621_s25 + $0xac] ss:$72 sps:$4 sm:$0x3f]   ;;  %v9086_v34 = vld [vmem:[%s9621_s25 + $0x20] ss:$72 sps:$4 sm:$0xff]   ;;  %v438_v38 = vand.u32 %v9089_v31, %v9625_v9 }
  0x19   : > { %v9094_v33 = vld [vmem:[%s9621_s25 + $0xb4] ss:$72 sps:$4 sm:$0x3f]   ;;  %v9092_v35 = vld [vmem:[%s9621_s25 + $0xb0] ss:$72 sps:$4 sm:$0x3f]   ;;  %v441_v36 = vand.u32 %v9091_v32, %v9625_v9 }
  0x1a   : > { %8305 = vmatmul.mubr.msk.bf16.vlgmr.msra.gmra.mrb[0].mxu0 %vm408_vm2, %v9634_v14  ;;  %8306 = vmatmul.mubr.msk.bf16.vlgmr.msra.gmra.mrb[0].mxu1 %vm408_vm2, %v9639_v15  ;;  %v447_v37 = vand.u32 %v9094_v33, %v9625_v9  ;;  %v444_v39 = vand.u32 %v9092_v35, %v9625_v9  ;;  %v9097_v40 = vld [vmem:[%s9621_s25 + $0x2c] ss:$72 sps:$4 sm:$0xff]   ;;  %v9095_v42 = vld [vmem:[%s9621_s25 + $0x28] ss:$72 sps:$4 sm:$0xff]   ;;  %v9109_v52 = vld [vmem:[%s9621_s25 + $0x3c] ss:$72 sps:$4 sm:$0xff]  }
  0x1b   : > { %527 = vmatpush1.bf16.msra.mxu1 %v9071_v17  ;;  %580 = vmatpush1.bf16.msra.mxu0 %v9074_v18  ;;  %v9100_v41 = vld [vmem:[%s9621_s25 + $0x34] ss:$72 sps:$4 sm:$0xff]   ;;  %v9098_v43 = vld [vmem:[%s9621_s25 + $0x30] ss:$72 sps:$4 sm:$0xff]   ;;  %v9112_v53 = vld [vmem:[%s9621_s25 + $0x44] ss:$72 sps:$4 sm:$0xff]  }
  0x1c   : > { %528 = vmatprep.subr.bf16.mxu1 %v429_v24  ;;  %581 = vmatprep.subr.bf16.mxu0 %v435_v25  ;;  %v9103_v44 = vld [vmem:[%s9621_s25 + $0xbc] ss:$72 sps:$4 sm:$0x3f]   ;;  %v9101_v46 = vld [vmem:[%s9621_s25 + $0xb8] ss:$72 sps:$4 sm:$0x3f]  }
  0x1d   : > { %558 = vmatprep.mubr.bf16.mxu1 %v9569_v0  ;;  %611 = vmatprep.mubr.bf16.mxu0 %v9569_v0  ;;  %v9106_v45 = vld [vmem:[%s9621_s25 + $0xc4] ss:$72 sps:$4 sm:$0x3f]   ;;  %v9104_v47 = vld [vmem:[%s9621_s25 + $0xc0] ss:$72 sps:$4 sm:$0x3f]   ;;  %v453_v48 = vand.u32 %v9103_v44, %v9625_v9  ;;  %v450_v50 = vand.u32 %v9101_v46, %v9625_v9 }
  0x1e   : > { %v459_v49 = vand.u32 %v9106_v45, %v9625_v9  ;;  %v456_v51 = vand.u32 %v9104_v47, %v9625_v9  ;;  %v9115_v54 = vld [vmem:[%s9621_s25 + $0xcc] ss:$72 sps:$4 sm:$0x3f]   ;;  %v9107_v55 = vld [vmem:[%s9621_s25 + $0x38] ss:$72 sps:$4 sm:$0xff]  }
  0x1f   : > { %529 = vmatpush1.bf16.msra.mxu1 %v426_v26  ;;  %582 = vmatpush1.bf16.msra.mxu0 %v432_v27  ;;  %v9118_v56 = vld [vmem:[%s9621_s25 + $0xd4] ss:$72 sps:$4 sm:$0x3f]   ;;  %v9110_v57 = vld [vmem:[%s9621_s25 + $0x40] ss:$72 sps:$4 sm:$0xff]   ;;  %v465_v60 = vand.u32 %v9115_v54, %v9625_v9 }
  0x20   : > { %632 = vmatprep.subr.bf16.mxu1 %v9085_v28  ;;  %685 = vmatprep.subr.bf16.mxu0 %v9088_v29  ;;  %v9113_v58 = vld [vmem:[%s9621_s25 + $0xc8] ss:$72 sps:$4 sm:$0x3f]   ;;  %v471_v61 = vand.u32 %v9118_v56, %v9625_v9  ;;  %v9121_v1 = vld [vmem:[%s9621_s25 + $0x124] ss:$72 sps:$4 sm:$0xff]  }
  0x21   : > { %v9116_v59 = vld [vmem:[%s9621_s25 + $0xd0] ss:$72 sps:$4 sm:$0x3f]   ;;  %v462_v62 = vand.u32 %v9113_v58, %v9625_v9  ;;  %v9124_v2 = vld [vmem:[%s9621_s25 + $0x12c] ss:$72 sps:$4 sm:$0xff]  }
  0x22   : > { %8307 = vmatmul.mubr.msk.bf16.vlgmr.msra.gmra.mrb[4].mxu1 %vm408_vm2, %v9634_v14  ;;  %8309 = vmatmul.mubr.msk.bf16.vlgmr.msra.gmra.mrb[4].mxu0 %vm408_vm2, %v9634_v14  ;;  %v468_v63 = vand.u32 %v9116_v59, %v9625_v9  ;;  %v9127_v3 = vld [vmem:[%s9621_s25 + $0x1b4] ss:$72 sps:$4 sm:$0x3f]   ;;  %v9119_v4 = vld [vmem:[%s9621_s25 + $0x120] ss:$72 sps:$4 sm:$0xff]  }
  0x23   : > { %633 = vmatpush1.bf16.msra.mxu1 %v9083_v30  ;;  %686 = vmatpush1.bf16.msra.mxu0 %v9086_v34  ;;  %v9130_v5 = vld [vmem:[%s9621_s25 + $0x1bc] ss:$72 sps:$4 sm:$0x3f]   ;;  %v9122_v6 = vld [vmem:[%s9621_s25 + $0x128] ss:$72 sps:$4 sm:$0xff]   ;;  %v1306_v10 = vand.u32 %v9127_v3, %v9625_v9 }
  0x24   : > { %568 = vmatprep.mubr.bf16.mxu1 %v9569_v0  ;;  %621 = vmatprep.mubr.bf16.mxu0 %v9569_v0  ;;  %v9125_v7 = vld [vmem:[%s9621_s25 + $0x1b0] ss:$72 sps:$4 sm:$0x3f]   ;;  %v1312_v11 = vand.u32 %v9130_v5, %v9625_v9  ;;  %v9133_v16 = vld [vmem:[%s9621_s25 + $0x134] ss:$72 sps:$4 sm:$0xff]  }
  0x25   : > { %634 = vmatprep.subr.bf16.mxu1 %v441_v36  ;;  %687 = vmatprep.subr.bf16.mxu0 %v447_v37  ;;  %v9128_v8 = vld [vmem:[%s9621_s25 + $0x1b8] ss:$72 sps:$4 sm:$0x3f]   ;;  %v1303_v12 = vand.u32 %v9125_v7, %v9625_v9  ;;  %v9136_v17 = vld [vmem:[%s9621_s25 + $0x13c] ss:$72 sps:$4 sm:$0xff]  }
  0x26   : > { %v1309_v13 = vand.u32 %v9128_v8, %v9625_v9  ;;  %v9139_v18 = vld [vmem:[%s9621_s25 + $0x1c4] ss:$72 sps:$4 sm:$0x3f]   ;;  %v9131_v20 = vld [vmem:[%s9621_s25 + $0x130] ss:$72 sps:$4 sm:$0xff]  }
  0x27   : > { %635 = vmatpush1.bf16.msra.mxu1 %v438_v38  ;;  %688 = vmatpush1.bf16.msra.mxu0 %v444_v39  ;;  %v9142_v19 = vld [vmem:[%s9621_s25 + $0x1cc] ss:$72 sps:$4 sm:$0x3f]   ;;  %v9134_v21 = vld [vmem:[%s9621_s25 + $0x138] ss:$72 sps:$4 sm:$0xff]   ;;  %v1318_v24 = vand.u32 %v9139_v18, %v9625_v9 }
  0x28   : > { %738 = vmatprep.subr.bf16.mxu1 %v9097_v40  ;;  %791 = vmatprep.subr.bf16.mxu0 %v9100_v41  ;;  %v9137_v22 = vld [vmem:[%s9621_s25 + $0x1c0] ss:$72 sps:$4 sm:$0x3f]   ;;  %v1324_v25 = vand.u32 %v9142_v19, %v9625_v9  ;;  %v9145_v28 = vld [vmem:[%s9621_s25 + $0x144] ss:$72 sps:$4 sm:$0xff]  }
  0x29   : > { %v9140_v23 = vld [vmem:[%s9621_s25 + $0x1c8] ss:$72 sps:$4 sm:$0x3f]   ;;  %v1315_v26 = vand.u32 %v9137_v22, %v9625_v9  ;;  %v9148_v29 = vld [vmem:[%s9621_s25 + $0x14c] ss:$72 sps:$4 sm:$0xff]  }
  0x2a   : > { %8308 = vmatmul.mubr.msk.bf16.gmra.mrb[8].mxu1 %vm408_vm2, %v9639_v15  ;;  %8310 = vmatmul.mubr.msk.bf16.gmra.mrb[8].mxu0 %vm408_vm2, %v9639_v15  ;;  %v1321_v27 = vand.u32 %v9140_v23, %v9625_v9  ;;  %v9151_v30 = vld [vmem:[%s9621_s25 + $0x1d4] ss:$72 sps:$4 sm:$0x3f]   ;;  %v9143_v32 = vld [vmem:[%s9621_s25 + $0x140] ss:$72 sps:$4 sm:$0xff]  }
  0x2b   : > { %664 = vmatprep.mubr.bf16.mxu1 %v9569_v0  ;;  %717 = vmatprep.mubr.bf16.mxu0 %v9569_v0  ;;  %v9154_v31 = vld [vmem:[%s9621_s25 + $0x1dc] ss:$72 sps:$4 sm:$0x3f]   ;;  %v9146_v33 = vld [vmem:[%s9621_s25 + $0x148] ss:$72 sps:$4 sm:$0xff]   ;;  %v1330_v36 = vand.u32 %v9151_v30, %v9625_v9 }
  0x2c   : > { %v9149_v34 = vld [vmem:[%s9621_s25 + $0x1d0] ss:$72 sps:$4 sm:$0x3f]   ;;  %v1336_v37 = vand.u32 %v9154_v31, %v9625_v9  ;;  %v9157_v38 = vld [vmem:[%s9621_s25 + $0x154] ss:$72 sps:$4 sm:$0xff]  }
  0x2d   : > { %v9152_v35 = vld [vmem:[%s9621_s25 + $0x1d8] ss:$72 sps:$4 sm:$0x3f]   ;;  %v9160_v39 = vld [vmem:[%s9621_s25 + $0x15c] ss:$72 sps:$4 sm:$0xff]   ;;  %v1327_v40 = vand.u32 %v9149_v34, %v9625_v9 }
  0x2e   : > { %v1333_v41 = vand.u32 %v9152_v35, %v9625_v9  ;;  %v9155_v44 = vld [vmem:[%s9621_s25 + $0x150] ss:$72 sps:$4 sm:$0xff]   ;;  %v9161_v46 = vld [vmem:[%s9621_s25 + $0x1e0] ss:$72 sps:$4 sm:$0x3f]  }
  0x2f   : > { %v9158_v45 = vld [vmem:[%s9621_s25 + $0x158] ss:$72 sps:$4 sm:$0xff]   ;;  %v9164_v47 = vld [vmem:[%s9621_s25 + $0x1e8] ss:$72 sps:$4 sm:$0x3f]  }
  0x30   : > { %v9175_v54 = vld [vmem:[%s9621_s25 + $0x1f4] ss:$72 sps:$4 sm:$0x3f]   ;;  %v9167_v56 = vld [vmem:[%s9621_s25 + $0x160] ss:$72 sps:$4 sm:$0xff]  }
  0x31   : > { %v9173_v58 = vld [vmem:[%s9621_s25 + $0x1f0] ss:$72 sps:$4 sm:$0x3f]   ;;  %v9190_v3 = vld [vmem:[%s9621_s25 + $0x2e4] ss:$72 sps:$4 sm:$0x3f]  }
  0x32   : > { %8311 = vmatmul.mubr.msk.bf16.vlgmr.msra.gmra.mrb[12].mxu1 %vm408_vm2, %v9634_v14  ;;  %8313 = vmatmul.mubr.msk.bf16.vlgmr.msra.gmra.mrb[12].mxu0 %vm408_vm2, %v9634_v14  ;;  %v9176_v59 = vld [vmem:[%s9621_s25 + $0x2d0] ss:$72 sps:$4 sm:$0x3f]   ;;  %v9188_v7 = vld [vmem:[%s9621_s25 + $0x2e0] ss:$72 sps:$4 sm:$0x3f]  }
  0x33   : > { %739 = vmatpush1.bf16.msra.mxu1 %v9095_v42  ;;  %792 = vmatpush1.bf16.msra.mxu0 %v9098_v43  ;;  %v9163_v42 = vld [vmem:[%s9621_s25 + $0x1e4] ss:$72 sps:$4 sm:$0x3f]   ;;  %v9182_v5 = vld [vmem:[%s9621_s25 + $0x250] ss:$72 sps:$4 sm:$0xff]  }
  0x34   : > { %674 = vmatprep.mubr.bf16.mxu1 %v9569_v0  ;;  %727 = vmatprep.mubr.bf16.mxu0 %v9569_v0  ;;  %v9166_v43 = vld [vmem:[%s9621_s25 + $0x1ec] ss:$72 sps:$4 sm:$0x3f]   ;;  %v9197_v22 = vld [vmem:[%s9621_s25 + $0x2e8] ss:$72 sps:$4 sm:$0x3f]  }
  0x35   : > { %740 = vmatprep.subr.bf16.mxu1 %v453_v48  ;;  %793 = vmatprep.subr.bf16.mxu0 %v459_v49  ;;  %v1342_v48 = vand.u32 %v9163_v42, %v9625_v9  ;;  %v1348_v49 = vand.u32 %v9166_v43, %v9625_v9  ;;  %v9199_v18 = vld [vmem:[%s9621_s25 + $0x2ec] ss:$72 sps:$4 sm:$0x3f]   ;;  %v9200_v23 = vld [vmem:[%s9621_s25 + $0x2f0] ss:$72 sps:$4 sm:$0x3f]  }
  0x36   : > { %v9202_v19 = vld [vmem:[%s9621_s25 + $0x2f4] ss:$72 sps:$4 sm:$0x3f]   ;;  %v9214_v31 = vld [vmem:[%s9621_s25 + $0x304] ss:$72 sps:$4 sm:$0x3f]  }
  0x37   : > { %741 = vmatpush1.bf16.msra.mxu1 %v450_v50  ;;  %794 = vmatpush1.bf16.msra.mxu0 %v456_v51  ;;  %v9169_v50 = vld [vmem:[%s9621_s25 + $0x164] ss:$72 sps:$4 sm:$0xff]   ;;  %v9209_v34 = vld [vmem:[%s9621_s25 + $0x2f8] ss:$72 sps:$4 sm:$0x3f]  }
  0x38   : > { %844 = vmatprep.subr.bf16.mxu1 %v9109_v52  ;;  %897 = vmatprep.subr.bf16.mxu0 %v9112_v53  ;;  %v9172_v51 = vld [vmem:[%s9621_s25 + $0x244] ss:$72 sps:$4 sm:$0xff]   ;;  %v1339_v52 = vand.u32 %v9161_v46, %v9625_v9  ;;  %v1345_v53 = vand.u32 %v9164_v47, %v9625_v9  ;;  %v9212_v35 = vld [vmem:[%s9621_s25 + $0x300] ss:$72 sps:$4 sm:$0x3f]  }
  0x39   : > { %v9211_v30 = vld [vmem:[%s9621_s25 + $0x2fc] ss:$72 sps:$4 sm:$0x3f]   ;;  %v9223_v42 = vld [vmem:[%s9621_s25 + $0x30c] ss:$72 sps:$4 sm:$0x3f]  }
  0x3a   : > { %8312 = vmatmul.mubr.msk.bf16.gmra.mrb[16].mxu1 %vm408_vm2, %v9639_v15  ;;  %8314 = vmatmul.mubr.msk.bf16.gmra.mrb[16].mxu0 %vm408_vm2, %v9639_v15  ;;  %v9226_v43 = vld [vmem:[%s9621_s25 + $0x314] ss:$72 sps:$4 sm:$0x3f]   ;;  %v9221_v46 = vld [vmem:[%s9621_s25 + $0x308] ss:$72 sps:$4 sm:$0x3f]  }
  0x3b   : > { %770 = vmatprep.mubr.bf16.mxu1 %v9569_v0  ;;  %823 = vmatprep.mubr.bf16.mxu0 %v9569_v0  ;;  %v9224_v47 = vld [vmem:[%s9621_s25 + $0x310] ss:$72 sps:$4 sm:$0x3f]  }
  0x42   : > { %8315 = vmatmul.mubr.msk.bf16.vlgmr.msra.gmra.mrb[20].mxu1 %vm408_vm2, %v9634_v14  ;;  %8317 = vmatmul.mubr.msk.bf16.vlgmr.msra.gmra.mrb[20].mxu0 %vm408_vm2, %v9634_v14 }
  0x43   : > { %845 = vmatpush1.bf16.msra.mxu1 %v9107_v55  ;;  %898 = vmatpush1.bf16.msra.mxu0 %v9110_v57  ;;  %v9178_v55 = vld [vmem:[%s9621_s25 + $0x2d4] ss:$72 sps:$4 sm:$0x3f]   ;;  %v9170_v57 = vld [vmem:[%s9621_s25 + $0x240] ss:$72 sps:$4 sm:$0xff]  }
  0x44   : > { %780 = vmatprep.mubr.bf16.mxu1 %v9569_v0  ;;  %833 = vmatprep.mubr.bf16.mxu0 %v9569_v0 }
  0x45   : > { %846 = vmatprep.subr.bf16.mxu1 %v465_v60  ;;  %899 = vmatprep.subr.bf16.mxu0 %v471_v61  ;;  %v1354_v60 = vand.u32 %v9175_v54, %v9625_v9  ;;  %v2188_v61 = vand.u32 %v9178_v55, %v9625_v9  ;;  %v9235_v54 = vld [vmem:[%s9621_s25 + $0x3f4] ss:$72 sps:$4 sm:$0x3f]  }
  0x46   : > { %v9238_v55 = vld [vmem:[%s9621_s25 + $0x3fc] ss:$72 sps:$4 sm:$0x3f]  }
  0x47   : > { %847 = vmatpush1.bf16.msra.mxu1 %v462_v62  ;;  %900 = vmatpush1.bf16.msra.mxu0 %v468_v63  ;;  %v9181_v62 = vld [vmem:[%s9621_s25 + $0x24c] ss:$72 sps:$4 sm:$0xff]  }
  0x48   : > { %1356 = vmatprep.subr.bf16.mxu1 %v9121_v1  ;;  %1409 = vmatprep.subr.bf16.mxu0 %v9124_v2  ;;  %v9184_v63 = vld [vmem:[%s9621_s25 + $0x254] ss:$72 sps:$4 sm:$0xff]   ;;  %v1351_v1 = vand.u32 %v9173_v58, %v9625_v9  ;;  %v2185_v2 = vand.u32 %v9176_v59, %v9625_v9  ;;  %v9233_v58 = vld [vmem:[%s9621_s25 + $0x3f0] ss:$72 sps:$4 sm:$0x3f]  }
  0x49   : > { %v9236_v59 = vld [vmem:[%s9621_s25 + $0x3f8] ss:$72 sps:$4 sm:$0x3f]  }
  0x4a   : > { %8316 = vmatmul.mubr.msk.bf16.gmra.mrb[24].mxu1 %vm408_vm2, %v9639_v15  ;;  %8318 = vmatmul.mubr.msk.bf16.gmra.mrb[24].mxu0 %vm408_vm2, %v9639_v15 }
  0x4b   : > { %876 = vmatprep.mubr.bf16.mxu1 %v9569_v0  ;;  %929 = vmatprep.mubr.bf16.mxu0 %v9569_v0 }
  0x52   : > { %8319 = vmatmul.mubr.msk.bf16.vlgmr.msra.gmra.mrb[28].mxu1 %vm408_vm2, %v9634_v14  ;;  %8321 = vmatmul.mubr.msk.bf16.vlgmr.msra.gmra.mrb[28].mxu0 %vm408_vm2, %v9634_v14 }
  0x53   : > { %1357 = vmatpush1.bf16.msra.mxu1 %v9119_v4  ;;  %1410 = vmatpush1.bf16.msra.mxu0 %v9122_v6  ;;  %v9179_v4 = vld [vmem:[%s9621_s25 + $0x248] ss:$72 sps:$4 sm:$0xff]   ;;  %v9185_v6 = vld [vmem:[%s9621_s25 + $0x2d8] ss:$72 sps:$4 sm:$0x3f]  }
  0x54   : > { %886 = vmatprep.mubr.bf16.mxu1 %v9569_v0  ;;  %939 = vmatprep.mubr.bf16.mxu0 %v9569_v0 }
  0x55   : > { %1358 = vmatprep.subr.bf16.mxu1 %v1306_v10  ;;  %1411 = vmatprep.subr.bf16.mxu0 %v1312_v11  ;;  %v2200_v10 = vand.u32 %v9190_v3, %v9625_v9  ;;  %v9864_v11 = vld [vmem:[%s11460_s1] sm:$0xff]  }
  0x57   : > { %1359 = vmatpush1.bf16.msra.mxu1 %v1303_v12  ;;  %1412 = vmatpush1.bf16.msra.mxu0 %v1309_v13  ;;  %v9196_v12 = vld [vmem:[%s9621_s25 + $0x264] ss:$72 sps:$4 sm:$0xff]   ;;  %v2191_v13 = vand.u32 %v9185_v6, %v9625_v9 }
  0x58   : > { %1462 = vmatprep.subr.bf16.mxu1 %v9133_v16  ;;  %1515 = vmatprep.subr.bf16.mxu0 %v9136_v17  ;;  %v2197_v16 = vand.u32 %v9188_v7, %v9625_v9  ;;  %v9879_v17 = vld [vmem:[%s11460_s1 + $0x8] sm:$0xff]  }
  0x5a   : > { %8320 = vmatmul.mubr.msk.bf16.gmra.mrb[32].mxu1 %vm408_vm2, %v9639_v15  ;;  %8322 = vmatmul.mubr.msk.bf16.gmra.mrb[32].mxu0 %vm408_vm2, %v9639_v15 }
  0x5b   : > { %1388 = vmatprep.mubr.bf16.mxu1 %v9569_v0  ;;  %1441 = vmatprep.mubr.bf16.mxu0 %v9569_v0 }
  0x62   : > { %8395 = vmatmul.mubr.msk.bf16.vlgmr.msra.gmra.mrb[36].mxu1 %vm408_vm2, %v9634_v14  ;;  %8397 = vmatmul.mubr.msk.bf16.vlgmr.msra.gmra.mrb[36].mxu0 %vm408_vm2, %v9634_v14 }
  0x63   : > { %1463 = vmatpush1.bf16.msra.mxu1 %v9131_v20  ;;  %1516 = vmatpush1.bf16.msra.mxu0 %v9134_v21  ;;  %v9191_v20 = vld [vmem:[%s9621_s25 + $0x258] ss:$72 sps:$4 sm:$0xff]  }
  0x64   : > { %1398 = vmatprep.mubr.bf16.mxu1 %v9569_v0  ;;  %1451 = vmatprep.mubr.bf16.mxu0 %v9569_v0  ;;  %v9194_v21 = vld [vmem:[%s9621_s25 + $0x260] ss:$72 sps:$4 sm:$0xff]  }
  0x65   : > { %1464 = vmatprep.subr.bf16.mxu1 %v1318_v24  ;;  %1517 = vmatprep.subr.bf16.mxu0 %v1324_v25  ;;  %v2206_v24 = vand.u32 %v9199_v18, %v9625_v9  ;;  %v2212_v25 = vand.u32 %v9202_v19, %v9625_v9  ;;  %v9248_v19 = vld [vmem:[%s9621_s25 + $0x408] ss:$72 sps:$4 sm:$0x3f]  }
  0x67   : > { %1465 = vmatpush1.bf16.msra.mxu1 %v1315_v26  ;;  %1518 = vmatpush1.bf16.msra.mxu0 %v1321_v27  ;;  %v2203_v26 = vand.u32 %v9197_v22, %v9625_v9  ;;  %v2209_v27 = vand.u32 %v9200_v23, %v9625_v9 }
  0x68   : > { %1568 = vmatprep.subr.bf16.mxu1 %v9145_v28  ;;  %1621 = vmatprep.subr.bf16.mxu0 %v9148_v29  ;;  %v9205_v28 = vld [vmem:[%s9621_s25 + $0x26c] ss:$72 sps:$4 sm:$0xff]  }
  0x69   : > { %v9208_v29 = vld [vmem:[%s9621_s25 + $0x274] ss:$72 sps:$4 sm:$0xff]  }
  0x6a   : > { %8396 = vmatmul.mubr.msk.bf16.gmra.mrb[40].mxu1 %vm408_vm2, %v9639_v15  ;;  %8398 = vmatmul.mubr.msk.bf16.gmra.mrb[40].mxu0 %vm408_vm2, %v9639_v15 }
  0x6b   : > { %1494 = vmatprep.mubr.bf16.mxu1 %v9569_v0  ;;  %1547 = vmatprep.mubr.bf16.mxu0 %v9569_v0 }
  0x72   : > { %8399 = vmatmul.mubr.msk.bf16.vlgmr.msra.gmra.mrb[44].mxu1 %vm408_vm2, %v9634_v14  ;;  %8401 = vmatmul.mubr.msk.bf16.vlgmr.msra.gmra.mrb[44].mxu0 %vm408_vm2, %v9634_v14 }
  0x73   : > { %1569 = vmatpush1.bf16.msra.mxu1 %v9143_v32  ;;  %1622 = vmatpush1.bf16.msra.mxu0 %v9146_v33  ;;  %v9203_v32 = vld [vmem:[%s9621_s25 + $0x268] ss:$72 sps:$4 sm:$0xff]  }
  0x74   : > { %1504 = vmatprep.mubr.bf16.mxu1 %v9569_v0  ;;  %1557 = vmatprep.mubr.bf16.mxu0 %v9569_v0  ;;  %v9206_v33 = vld [vmem:[%s9621_s25 + $0x270] ss:$72 sps:$4 sm:$0xff]  }
  0x75   : > { %1570 = vmatprep.subr.bf16.mxu1 %v1330_v36  ;;  %1623 = vmatprep.subr.bf16.mxu0 %v1336_v37  ;;  %v2218_v36 = vand.u32 %v9211_v30, %v9625_v9  ;;  %v2224_v37 = vand.u32 %v9214_v31, %v9625_v9 }
  0x77   : > { %1571 = vmatpush1.bf16.msra.mxu1 %v1327_v40  ;;  %1624 = vmatpush1.bf16.msra.mxu0 %v1333_v41  ;;  %v9217_v40 = vld [vmem:[%s9621_s25 + $0x27c] ss:$72 sps:$4 sm:$0xff]  }
  0x78   : > { %1674 = vmatprep.subr.bf16.mxu1 %v9157_v38  ;;  %1727 = vmatprep.subr.bf16.mxu0 %v9160_v39  ;;  %v2215_v38 = vand.u32 %v9209_v34, %v9625_v9  ;;  %v2221_v39 = vand.u32 %v9212_v35, %v9625_v9  ;;  %v9220_v41 = vld [vmem:[%s9621_s25 + $0x284] ss:$72 sps:$4 sm:$0xff]  }
  0x7a   : > { %8400 = vmatmul.mubr.msk.bf16.gmra.mrb[48].mxu1 %vm408_vm2, %v9639_v15  ;;  %8402 = vmatmul.mubr.msk.bf16.gmra.mrb[48].mxu0 %vm408_vm2, %v9639_v15 }
  0x7b   : > { %1600 = vmatprep.mubr.bf16.mxu1 %v9569_v0  ;;  %1653 = vmatprep.mubr.bf16.mxu0 %v9569_v0 }
  0x82   : > { %8403 = vmatmul.mubr.msk.bf16.vlgmr.msra.gmra.mrb[52].mxu1 %vm408_vm2, %v9634_v14  ;;  %8405 = vmatmul.mubr.msk.bf16.vlgmr.msra.gmra.mrb[52].mxu0 %vm408_vm2, %v9634_v14 }
  0x83   : > { %1675 = vmatpush1.bf16.msra.mxu1 %v9155_v44  ;;  %1728 = vmatpush1.bf16.msra.mxu0 %v9158_v45  ;;  %v9215_v44 = vld [vmem:[%s9621_s25 + $0x278] ss:$72 sps:$4 sm:$0xff]  }
  0x84   : > { %1610 = vmatprep.mubr.bf16.mxu1 %v9569_v0  ;;  %1663 = vmatprep.mubr.bf16.mxu0 %v9569_v0  ;;  %v9218_v45 = vld [vmem:[%s9621_s25 + $0x280] ss:$72 sps:$4 sm:$0xff]  }
  0x85   : > { %1676 = vmatprep.subr.bf16.mxu1 %v1342_v48  ;;  %1729 = vmatprep.subr.bf16.mxu0 %v1348_v49  ;;  %v2230_v48 = vand.u32 %v9223_v42, %v9625_v9  ;;  %v2236_v49 = vand.u32 %v9226_v43, %v9625_v9 }
  0x87   : > { %1677 = vmatpush1.bf16.msra.mxu1 %v1339_v52  ;;  %1730 = vmatpush1.bf16.msra.mxu0 %v1345_v53  ;;  %v9229_v52 = vld [vmem:[%s9621_s25 + $0x364] ss:$72 sps:$4 sm:$0xff]   ;;  %v9979_v3 = vpop.permute.xlu0 %218 }
  0x88   : > { %1780 = vmatprep.subr.bf16.mxu1 %v9169_v50  ;;  %2238 = vmatprep.subr.bf16.mxu0 %v9172_v51  ;;  %v2227_v50 = vand.u32 %v9221_v46, %v9625_v9  ;;  %v2233_v51 = vand.u32 %v9224_v47, %v9625_v9  ;;  %v9232_v53 = vld [vmem:[%s9621_s25 + $0x36c] ss:$72 sps:$4 sm:$0xff]  }
  0x89   : > { %v9253_v46 = vld [vmem:[%s9621_s25 + $0x384] ss:$72 sps:$4 sm:$0xff]  }
  0x8a   : > { %8404 = vmatmul.mubr.msk.bf16.gmra.mrb[56].mxu1 %vm408_vm2, %v9639_v15  ;;  %8406 = vmatmul.mubr.msk.bf16.gmra.mrb[56].mxu0 %vm408_vm2, %v9639_v15  ;;  %v9256_v47 = vld [vmem:[%s9621_s25 + $0x38c] ss:$72 sps:$4 sm:$0xff]  }
  0x8b   : > { %1706 = vmatprep.mubr.bf16.mxu1 %v9569_v0  ;;  %1759 = vmatprep.mubr.bf16.mxu0 %v9569_v0  ;;  %v9991_v7 = vpop.permute.xlu0 %223 }
  0x92   : > { %8407 = vmatmul.mubr.msk.bf16.vlgmr.msra.gmra.mrb[60].mxu1 %vm408_vm2, %v9634_v14  ;;  %8409 = vmatmul.mubr.msk.bf16.vlgmr.msra.gmra.mrb[60].mxu0 %vm408_vm2, %v9634_v14  ;;  %v9187_v14 = vld [vmem:[%s9621_s25 + $0x2dc] ss:$72 sps:$4 sm:$0x3f]  }
  0x93   : > { %1781 = vmatpush1.bf16.msra.mxu1 %v9167_v56  ;;  %2239 = vmatpush1.bf16.msra.mxu0 %v9170_v57  ;;  %v2194_v8 = vand.u32 %v9187_v14, %v9625_v9  ;;  %v9227_v56 = vld [vmem:[%s9621_s25 + $0x360] ss:$72 sps:$4 sm:$0xff]   ;;  %v9977_v14 = vpop.permute.xlu1 %228 }
  0x94   : > { %1716 = vmatprep.mubr.bf16.mxu1 %v9569_v0  ;;  %1769 = vmatprep.mubr.bf16.mxu0 %v9569_v0  ;;  %v9230_v57 = vld [vmem:[%s9621_s25 + $0x368] ss:$72 sps:$4 sm:$0xff]  }
  0x95   : > { %1782 = vmatprep.subr.bf16.mxu1 %v1354_v60  ;;  %2240 = vmatprep.subr.bf16.mxu0 %v2188_v61  ;;  %v3070_v60 = vand.u32 %v9235_v54, %v9625_v9  ;;  %v3076_v61 = vand.u32 %v9238_v55, %v9625_v9 }
  0x97   : > { %1783 = vmatpush1.bf16.msra.mxu1 %v1351_v1  ;;  %2241 = vmatpush1.bf16.msra.mxu0 %v2185_v2  ;;  %v9241_v1 = vld [vmem:[%s9621_s25 + $0x374] ss:$72 sps:$4 sm:$0xff]   ;;  %v9989_v6 = vpop.permute.xlu1 %233 }
  0x98   : > { %2291 = vmatprep.subr.bf16.mxu1 %v9181_v62  ;;  %2344 = vmatprep.subr.bf16.mxu0 %v9184_v63  ;;  %v3067_v62 = vand.u32 %v9233_v58, %v9625_v9  ;;  %v3073_v63 = vand.u32 %v9236_v59, %v9625_v9  ;;  %v9244_v2 = vld [vmem:[%s9621_s25 + $0x37c] ss:$72 sps:$4 sm:$0xff]  }
  0x9a   : > { %8408 = vmatmul.mubr.msk.bf16.gmra.mrb[64].mxu1 %vm408_vm2, %v9639_v15  ;;  %8410 = vmatmul.mubr.msk.bf16.gmra.mrb[64].mxu0 %vm408_vm2, %v9639_v15  ;;  %v9193_v15 = vld [vmem:[%s9621_s25 + $0x25c] ss:$72 sps:$4 sm:$0xff]  }
  0x9b   : > { %1812 = vmatprep.mubr.bf16.mxu1 %v9569_v0  ;;  %2270 = vmatprep.mubr.bf16.mxu0 %v9569_v0 }
  0xa2   : > { %8411 = vmatmul.mubr.msk.bf16.vlgmr.msra.gmra.mrb[68].mxu1 %vm408_vm2, %v9864_v11  ;;  %8485 = vmatmul.mubr.msk.bf16.vlgmr.msra.gmra.mrb[68].mxu0 %vm408_vm2, %v9864_v11 }
  0xa3   : > { %2292 = vmatpush1.bf16.msra.mxu1 %v9179_v4  ;;  %2345 = vmatpush1.bf16.msra.mxu0 %v9182_v5  ;;  %v9247_v4 = vld [vmem:[%s9621_s25 + $0x404] ss:$72 sps:$4 sm:$0x3f]  }
  0xa4   : > { %1822 = vmatprep.mubr.bf16.mxu1 %v9569_v0  ;;  %2280 = vmatprep.mubr.bf16.mxu0 %v9569_v0  ;;  %v9250_v5 = vld [vmem:[%s9621_s25 + $0x40c] ss:$72 sps:$4 sm:$0x3f]  }
  0xa5   : > { %2293 = vmatprep.subr.bf16.mxu1 %v2194_v8  ;;  %2346 = vmatprep.subr.bf16.mxu0 %v2200_v10 }
  0xa7   : > { %2294 = vmatpush1.bf16.msra.mxu1 %v2191_v13  ;;  %2347 = vmatpush1.bf16.msra.mxu0 %v2197_v16 }
  0xa8   : > { %2397 = vmatprep.subr.bf16.mxu1 %v9193_v15  ;;  %2450 = vmatprep.subr.bf16.mxu0 %v9196_v12  ;;  %v9245_v15 = vld [vmem:[%s9621_s25 + $0x400] ss:$72 sps:$4 sm:$0x3f]  }
  0xaa   : > { %8412 = vmatmul.mubr.msk.bf16.gmra.mrb[72].mxu1 %vm408_vm2, %v9879_v17  ;;  %8486 = vmatmul.mubr.msk.bf16.gmra.mrb[72].mxu0 %vm408_vm2, %v9879_v17 }
  0xab   : > { %2323 = vmatprep.mubr.bf16.mxu1 %v9569_v0  ;;  %2376 = vmatprep.mubr.bf16.mxu0 %v9569_v0 }
  0xb2   : > { %8487 = vmatmul.mubr.msk.bf16.vlgmr.msra.gmra.mrb[76].mxu1 %vm408_vm2, %v9864_v11  ;;  %8489 = vmatmul.mubr.msk.bf16.vlgmr.msra.gmra.mrb[76].mxu0 %vm408_vm2, %v9864_v11 }
  0xb3   : > { %2398 = vmatpush1.bf16.msra.mxu1 %v9191_v20  ;;  %2451 = vmatpush1.bf16.msra.mxu0 %v9194_v21 }
  0xb4   : > { %2333 = vmatprep.mubr.bf16.mxu1 %v9569_v0  ;;  %2386 = vmatprep.mubr.bf16.mxu0 %v9569_v0 }
  0xb5   : > { %2399 = vmatprep.subr.bf16.mxu1 %v2206_v24  ;;  %2452 = vmatprep.subr.bf16.mxu0 %v2212_v25  ;;  %v9239_v24 = vld [vmem:[%s9621_s25 + $0x370] ss:$72 sps:$4 sm:$0xff]  }
  0xb6   : > { %v9242_v25 = vld [vmem:[%s9621_s25 + $0x378] ss:$72 sps:$4 sm:$0xff]  }
  0xb7   : > { %2400 = vmatpush1.bf16.msra.mxu1 %v2203_v26  ;;  %2453 = vmatpush1.bf16.msra.mxu0 %v2209_v27  ;;  %v3082_v26 = vand.u32 %v9247_v4, %v9625_v9  ;;  %v3088_v27 = vand.u32 %v9250_v5, %v9625_v9 }
  0xb8   : > { %2503 = vmatprep.subr.bf16.mxu1 %v9205_v28  ;;  %2556 = vmatprep.subr.bf16.mxu0 %v9208_v29 }
  0xba   : > { %8488 = vmatmul.mubr.msk.bf16.gmra.mrb[80].mxu1 %vm408_vm2, %v9879_v17  ;;  %8490 = vmatmul.mubr.msk.bf16.gmra.mrb[80].mxu0 %vm408_vm2, %v9879_v17 }
  0xbb   : > { %2429 = vmatprep.mubr.bf16.mxu1 %v9569_v0  ;;  %2482 = vmatprep.mubr.bf16.mxu0 %v9569_v0 }
  0xc2   : > { %8491 = vmatmul.mubr.msk.bf16.vlgmr.msra.gmra.mrb[84].mxu1 %vm408_vm2, %v9864_v11  ;;  %8493 = vmatmul.mubr.msk.bf16.vlgmr.msra.gmra.mrb[84].mxu0 %vm408_vm2, %v9864_v11 }
  0xc3   : > { %2504 = vmatpush1.bf16.msra.mxu1 %v9203_v32  ;;  %2557 = vmatpush1.bf16.msra.mxu0 %v9206_v33 }
  0xc4   : > { %2439 = vmatprep.mubr.bf16.mxu1 %v9569_v0  ;;  %2492 = vmatprep.mubr.bf16.mxu0 %v9569_v0 }
  0xc5   : > { %2505 = vmatprep.subr.bf16.mxu1 %v2218_v36  ;;  %2558 = vmatprep.subr.bf16.mxu0 %v2224_v37 }
  0xc7   : > { %2506 = vmatpush1.bf16.msra.mxu1 %v2215_v38  ;;  %2559 = vmatpush1.bf16.msra.mxu0 %v2221_v39 }
  0xc8   : > { %2609 = vmatprep.subr.bf16.mxu1 %v9217_v40  ;;  %2662 = vmatprep.subr.bf16.mxu0 %v9220_v41  ;;  %v3079_v40 = vand.u32 %v9245_v15, %v9625_v9  ;;  %v3085_v41 = vand.u32 %v9248_v19, %v9625_v9  ;;  %v9259_v15 = vld [vmem:[%s9621_s25 + $0x414] ss:$72 sps:$4 sm:$0x3f]  }
  0xca   : > { %8492 = vmatmul.mubr.msk.bf16.gmra.mrb[88].mxu1 %vm408_vm2, %v9879_v17  ;;  %8494 = vmatmul.mubr.msk.bf16.gmra.mrb[88].mxu0 %vm408_vm2, %v9879_v17 }
  0xcb   : > { %2535 = vmatprep.mubr.bf16.mxu1 %v9569_v0  ;;  %2588 = vmatprep.mubr.bf16.mxu0 %v9569_v0 }
  0xd2   : > { %8495 = vmatmul.mubr.msk.bf16.vlgmr.msra.gmra.mrb[92].mxu1 %vm408_vm2, %v9864_v11  ;;  %8497 = vmatmul.mubr.msk.bf16.vlgmr.msra.gmra.mrb[92].mxu0 %vm408_vm2, %v9864_v11 }
  0xd3   : > { %2610 = vmatpush1.bf16.msra.mxu1 %v9215_v44  ;;  %2663 = vmatpush1.bf16.msra.mxu0 %v9218_v45 }
  0xd4   : > { %2545 = vmatprep.mubr.bf16.mxu1 %v9569_v0  ;;  %2598 = vmatprep.mubr.bf16.mxu0 %v9569_v0 }
  0xd5   : > { %2611 = vmatprep.subr.bf16.mxu1 %v2230_v48  ;;  %2664 = vmatprep.subr.bf16.mxu0 %v2236_v49 }
  0xd7   : > { %2612 = vmatpush1.bf16.msra.mxu1 %v2227_v50  ;;  %2665 = vmatpush1.bf16.msra.mxu0 %v2233_v51 }
  0xd8   : > { %3120 = vmatprep.subr.bf16.mxu1 %v9229_v52  ;;  %3173 = vmatprep.subr.bf16.mxu0 %v9232_v53 }
  0xda   : > { %8496 = vmatmul.mubr.msk.bf16.gmra.mrb[96].mxu1 %vm408_vm2, %v9879_v17  ;;  %8498 = vmatmul.mubr.msk.bf16.gmra.mrb[96].mxu0 %vm408_vm2, %v9879_v17 }
  0xdb   : > { %2641 = vmatprep.mubr.bf16.mxu1 %v9569_v0  ;;  %2694 = vmatprep.mubr.bf16.mxu0 %v9569_v0 }
  0xe2   : > { %8499 = vmatmul.mubr.msk.bf16.vlgmr.msra.gmra.mrb[100].mxu1 %vm408_vm2, %v9864_v11  ;;  %8501 = vmatmul.mubr.msk.bf16.vlgmr.msra.gmra.mrb[100].mxu0 %vm408_vm2, %v9864_v11 }
  0xe3   : > { %3121 = vmatpush1.bf16.msra.mxu1 %v9227_v56  ;;  %3174 = vmatpush1.bf16.msra.mxu0 %v9230_v57 }
  0xe4   : > { %2651 = vmatprep.mubr.bf16.mxu1 %v9569_v0  ;;  %2704 = vmatprep.mubr.bf16.mxu0 %v9569_v0 }
  0xe5   : > { %3122 = vmatprep.subr.bf16.mxu1 %v3070_v60  ;;  %3175 = vmatprep.subr.bf16.mxu0 %v3076_v61 }
  0xe7   : > { %3123 = vmatpush1.bf16.msra.mxu1 %v3067_v62  ;;  %3176 = vmatpush1.bf16.msra.mxu0 %v3073_v63 }
  0xe8   : > { %3226 = vmatprep.subr.bf16.mxu1 %v9241_v1  ;;  %3279 = vmatprep.subr.bf16.mxu0 %v9244_v2 }
  0xea   : > { %8500 = vmatmul.mubr.msk.bf16.gmra.mrb[104].mxu1 %vm408_vm2, %v9879_v17  ;;  %8502 = vmatmul.mubr.msk.bf16.gmra.mrb[104].mxu0 %vm408_vm2, %v9879_v17 }
  0xeb   : > { %3152 = vmatprep.mubr.bf16.mxu1 %v9569_v0  ;;  %3205 = vmatprep.mubr.bf16.mxu0 %v9569_v0 }
  0xed   : > { %v517_v8 = vpop.f32.mrb[0].mxu1  ;;  %v507_v10 = vpop.f32.mrb[0].mxu0 }
  0xee   : > { %v518_v12 = vadd.f32 %v517_v8, %v9977_v14  ;;  %v519_v13 = vpop.f32.mrb[1].mxu1  ;;  %v508_v16 = vadd.f32 %v507_v10, %v9979_v3  ;;  %v509_v18 = vpop.f32.mrb[1].mxu0 }
  0xef   : > { %v520_v20 = vadd.f32 %v519_v13, %v9977_v14  ;;  %v521_v21 = vpop.f32.mrb[2].mxu1  ;;  %v510_v22 = vadd.f32 %v509_v18, %v9979_v3  ;;  %v511_v23 = vpop.f32.mrb[2].mxu0 }
  0xf0   : > { %v986_v28 = vmax.f32 %v518_v12, 0.0  ;;  %v950_v29 = vmax.f32 %v508_v16, 0.0  ;;  %v522_v30 = vadd.f32 %v521_v21, %v9989_v6  ;;  %v523_v31 = vpop.f32.mrb[3].mxu1  ;;  %v512_v32 = vadd.f32 %v511_v23, %v9991_v7  ;;  %v513_v33 = vpop.f32.mrb[3].mxu0 }
  0xf1   : > { %v987_v34 = vmax.f32 %v520_v20, 0.0  ;;  %v951_v35 = vmax.f32 %v510_v22, 0.0  ;;  %v524_v36 = vadd.f32 %v523_v31, %v9989_v6  ;;  %v514_v37 = vadd.f32 %v513_v33, %v9991_v7  ;;  %v9262_v16 = vld [vmem:[%s9621_s25 + $0x41c] ss:$72 sps:$4 sm:$0x3f]  }
  0xf2   : > { %v1004_v38 = vmax.f32 %v522_v30, 0.0  ;;  %v968_v39 = vmax.f32 %v512_v32, 0.0  ;;  %8575 = vmatmul.mubr.msk.bf16.vlgmr.msra.gmra.mrb[108].mxu1 %vm408_vm2, %v9864_v11  ;;  %8577 = vmatmul.mubr.msk.bf16.vlgmr.msra.gmra.mrb[108].mxu0 %vm408_vm2, %v9864_v11  ;;  %v9257_v32 = vld [vmem:[%s9621_s25 + $0x410] ss:$72 sps:$4 sm:$0x3f]  }
  0xf3   : > { %v10013_v42 = vadd.f32 %v987_v34, %v986_v28  ;;  %v1022_v43 = vadd.f32 %v951_v35, %v950_v29  ;;  %v1005_v44 = vmax.f32 %v524_v36, 0.0  ;;  %v969_v45 = vmax.f32 %v514_v37, 0.0  ;;  %3227 = vmatpush1.bf16.msra.mxu1 %v9239_v24  ;;  %3280 = vmatpush1.bf16.msra.mxu0 %v9242_v25  ;;  %v9251_v24 = vld [vmem:[%s9621_s25 + $0x380] ss:$72 sps:$4 sm:$0xff]  }
  0xf4   : > { %3162 = vmatprep.mubr.bf16.mxu1 %v9569_v0  ;;  %3215 = vmatprep.mubr.bf16.mxu0 %v9569_v0  ;;  %v9254_v25 = vld [vmem:[%s9621_s25 + $0x388] ss:$72 sps:$4 sm:$0xff]   ;;  %v3094_v37 = vand.u32 %v9259_v15, %v9625_v9 }
  0xf5   : > { %v10019_v48 = vadd.f32 %v1005_v44, %v1004_v38  ;;  %v1041_v49 = vadd.f32 %v969_v45, %v968_v39  ;;  %v560_v50 = vpop.f32.mrb[4].mxu1  ;;  %v613_v51 = vpop.f32.mrb[4].mxu0  ;;  %3228 = vmatprep.subr.bf16.mxu1 %v3082_v26  ;;  %3281 = vmatprep.subr.bf16.mxu0 %v3088_v27  ;;  %v9260_v38 = vld [vmem:[%s9621_s25 + $0x418] ss:$72 sps:$4 sm:$0x3f]   ;;  %v3100_v39 = vand.u32 %v9262_v16, %v9625_v9 }
  0xf6   : > { %v561_v52 = vadd.f32 %v560_v50, %v9979_v3  ;;  %v562_v53 = vpop.f32.mrb[5].mxu1  ;;  %v614_v54 = vadd.f32 %v613_v51, %v9979_v3  ;;  %v615_v55 = vpop.f32.mrb[5].mxu0 }
  0xf7   : > { %v563_v56 = vadd.f32 %v562_v53, %v9979_v3  ;;  %v564_v57 = vpop.f32.mrb[6].mxu1  ;;  %v617_v58 = vpop.f32.mrb[6].mxu0  ;;  %3229 = vmatpush1.bf16.msra.mxu1 %v3079_v40  ;;  %3282 = vmatpush1.bf16.msra.mxu0 %v3085_v41  ;;  %v616_v2 = vadd.f32 %v615_v55, %v9979_v3 }
  0xf8   : > { %v952_v59 = vmax.f32 %v561_v52, 0.0  ;;  %v565_v60 = vadd.f32 %v564_v57, %v9991_v7  ;;  %v566_v61 = vpop.f32.mrb[7].mxu1  ;;  %v619_v62 = vpop.f32.mrb[7].mxu0  ;;  %3332 = vmatprep.subr.bf16.mxu1 %v9253_v46  ;;  %3385 = vmatprep.subr.bf16.mxu0 %v9256_v47  ;;  %v618_v4 = vadd.f32 %v617_v58, %v9991_v7  ;;  %v954_v10 = vmax.f32 %v614_v54, 0.0 }
  0xf9   : > { %v953_v63 = vmax.f32 %v563_v56, 0.0  ;;  %v567_v1 = vadd.f32 %v566_v61, %v9991_v7  ;;  %v620_v13 = vadd.f32 %v619_v62, %v9991_v7  ;;  %v955_v20 = vmax.f32 %v616_v2, 0.0  ;;  %v9265_v61 = vld [vmem:[%s9621_s25 + $0x394] ss:$72 sps:$4 sm:$0xff]  }
  0xfa   : > { %v1023_v5 = vadd.f32 %v1022_v43, %v952_v59  ;;  %v970_v8 = vmax.f32 %v565_v60, 0.0  ;;  %8576 = vmatmul.mubr.msk.bf16.gmra.mrb[112].mxu1 %vm408_vm2, %v9879_v17  ;;  %8578 = vmatmul.mubr.msk.bf16.gmra.mrb[112].mxu0 %vm408_vm2, %v9879_v17  ;;  %v972_v21 = vmax.f32 %v618_v4, 0.0  ;;  %v3091_v58 = vand.u32 %v9257_v32, %v9625_v9  ;;  %v9268_v62 = vld [vmem:[%s9621_s25 + $0x39c] ss:$72 sps:$4 sm:$0xff]  }
  0xfb   : > { %v971_v12 = vmax.f32 %v567_v1, 0.0  ;;  %3258 = vmatprep.mubr.bf16.mxu1 %v9569_v0  ;;  %3311 = vmatprep.mubr.bf16.mxu0 %v9569_v0  ;;  %v973_v33 = vmax.f32 %v620_v13, 0.0  ;;  %v3097_v59 = vand.u32 %v9260_v38, %v9625_v9 }
  0xfc   : > { %v1024_v18 = vadd.f32 %v1023_v5, %v953_v63  ;;  %v1042_v19 = vadd.f32 %v1041_v49, %v970_v8 }
  0xfd   : > { %v570_v22 = vpop.f32.mrb[8].mxu1  ;;  %v623_v23 = vpop.f32.mrb[8].mxu0 }
  0xfe   : > { %v1025_v26 = vadd.f32 %v1024_v18, %v954_v10  ;;  %v1043_v27 = vadd.f32 %v1042_v19, %v971_v12  ;;  %v571_v28 = vadd.f32 %v570_v22, %v9977_v14  ;;  %v572_v29 = vpop.f32.mrb[9].mxu1  ;;  %v624_v30 = vadd.f32 %v623_v23, %v9977_v14  ;;  %v625_v31 = vpop.f32.mrb[9].mxu0 }
  0xff   : > { %v573_v34 = vadd.f32 %v572_v29, %v9977_v14  ;;  %v574_v35 = vpop.f32.mrb[10].mxu1  ;;  %v627_v36 = vpop.f32.mrb[10].mxu0  ;;  %v626_v51 = vadd.f32 %v625_v31, %v9977_v14 }
 0x100   : > { %v1026_v40 = vadd.f32 %v1025_v26, %v955_v20  ;;  %v1044_v41 = vadd.f32 %v1043_v27, %v972_v21  ;;  %v988_v43 = vmax.f32 %v571_v28, 0.0  ;;  %v575_v44 = vadd.f32 %v574_v35, %v9989_v6  ;;  %v576_v45 = vpop.f32.mrb[11].mxu1  ;;  %v629_v46 = vpop.f32.mrb[11].mxu0 }
 0x101   : > { %v989_v47 = vmax.f32 %v573_v34, 0.0  ;;  %v990_v49 = vmax.f32 %v624_v30, 0.0  ;;  %v577_v50 = vadd.f32 %v576_v45, %v9989_v6  ;;  %v628_v55 = vadd.f32 %v627_v36, %v9989_v6  ;;  %v9271_v34 = vld [vmem:[%s9621_s25 + $0x424] ss:$72 sps:$4 sm:$0x3f]  }
 0x102   : > { %v1045_v52 = vadd.f32 %v1044_v41, %v973_v33  ;;  %v1061_v53 = vadd.f32 %v10013_v42, %v988_v43  ;;  %v1006_v54 = vmax.f32 %v575_v44, 0.0  ;;  %8579 = vmatmul.mubr.msk.bf16.vlgmr.msra.gmra.mrb[116].mxu1 %vm408_vm2, %v9864_v11  ;;  %8581 = vmatmul.mubr.msk.bf16.vlgmr.msra.gmra.mrb[116].mxu0 %vm408_vm2, %v9864_v11  ;;  %v630_v57 = vadd.f32 %v629_v46, %v9989_v6  ;;  %v9263_v45 = vld [vmem:[%s9621_s25 + $0x390] ss:$72 sps:$4 sm:$0xff]  }
 0x103   : > { %v1007_v56 = vmax.f32 %v577_v50, 0.0  ;;  %3333 = vmatpush1.bf16.msra.mxu1 %v9251_v24  ;;  %3386 = vmatpush1.bf16.msra.mxu0 %v9254_v25  ;;  %v991_v63 = vmax.f32 %v626_v51, 0.0  ;;  %v1008_v1 = vmax.f32 %v628_v55, 0.0  ;;  %v9266_v46 = vld [vmem:[%s9621_s25 + $0x398] ss:$72 sps:$4 sm:$0xff]  }
 0x104   : > { %v1062_v42 = vadd.f32 %v1061_v53, %v989_v47  ;;  %v1080_v60 = vadd.f32 %v10019_v48, %v1006_v54  ;;  %3268 = vmatprep.mubr.bf16.mxu1 %v9569_v0  ;;  %3321 = vmatprep.mubr.bf16.mxu0 %v9569_v0  ;;  %v1009_v13 = vmax.f32 %v630_v57, 0.0  ;;  %v9269_v55 = vld [vmem:[%s9621_s25 + $0x420] ss:$72 sps:$4 sm:$0x3f]  }
 0x105   : > { %v666_v2 = vpop.f32.mrb[12].mxu1  ;;  %v719_v4 = vpop.f32.mrb[12].mxu0  ;;  %3334 = vmatprep.subr.bf16.mxu1 %v3094_v37  ;;  %3387 = vmatprep.subr.bf16.mxu0 %v3100_v39  ;;  %v9274_v37 = vld [vmem:[%s9621_s25 + $0x42c] ss:$72 sps:$4 sm:$0x3f]  }
 0x106   : > { %v1063_v5 = vadd.f32 %v1062_v42, %v990_v49  ;;  %v1081_v8 = vadd.f32 %v1080_v60, %v1007_v56  ;;  %v667_v10 = vadd.f32 %v666_v2, %v9979_v3  ;;  %v668_v15 = vpop.f32.mrb[13].mxu1  ;;  %v720_v12 = vadd.f32 %v719_v4, %v9979_v3  ;;  %v721_v48 = vpop.f32.mrb[13].mxu0  ;;  %v9272_v42 = vld [vmem:[%s9621_s25 + $0x428] ss:$72 sps:$4 sm:$0x3f]  }
 0x107   : > { %v669_v16 = vadd.f32 %v668_v15, %v9979_v3  ;;  %v670_v18 = vpop.f32.mrb[14].mxu1  ;;  %v723_v19 = vpop.f32.mrb[14].mxu0  ;;  %3335 = vmatpush1.bf16.msra.mxu1 %v3091_v58  ;;  %3388 = vmatpush1.bf16.msra.mxu0 %v3097_v59  ;;  %v722_v29 = vadd.f32 %v721_v48, %v9979_v3  ;;  %v3106_v59 = vand.u32 %v9271_v34, %v9625_v9 }
 0x108   : > { %v1064_v20 = vadd.f32 %v1063_v5, %v991_v63  ;;  %v1082_v21 = vadd.f32 %v1081_v8, %v1008_v1  ;;  %v956_v22 = vmax.f32 %v667_v10, 0.0  ;;  %v671_v23 = vadd.f32 %v670_v18, %v9991_v7  ;;  %v672_v24 = vpop.f32.mrb[15].mxu1  ;;  %v725_v25 = vpop.f32.mrb[15].mxu0  ;;  %3438 = vmatprep.subr.bf16.mxu1 %v9265_v61  ;;  %3491 = vmatprep.subr.bf16.mxu0 %v9268_v62 }
 0x109   : > { %v957_v26 = vmax.f32 %v669_v16, 0.0  ;;  %v958_v27 = vmax.f32 %v720_v12, 0.0  ;;  %v673_v28 = vadd.f32 %v672_v24, %v9991_v7  ;;  %v724_v33 = vadd.f32 %v723_v19, %v9991_v7  ;;  %v9277_v24 = vld [vmem:[%s9621_s25 + $0x3a4] ss:$72 sps:$4 sm:$0xff]  }
 0x10a   : > { %v1083_v30 = vadd.f32 %v1082_v21, %v1009_v13  ;;  %v1027_v31 = vadd.f32 %v1026_v40, %v956_v22  ;;  %v974_v32 = vmax.f32 %v671_v23, 0.0  ;;  %8580 = vmatmul.mubr.msk.bf16.gmra.mrb[120].mxu1 %vm408_vm2, %v9879_v17  ;;  %8582 = vmatmul.mubr.msk.bf16.gmra.mrb[120].mxu0 %vm408_vm2, %v9879_v17  ;;  %v726_v36 = vadd.f32 %v725_v25, %v9991_v7  ;;  %v9280_v25 = vld [vmem:[%s9621_s25 + $0x484] ss:$72 sps:$4 sm:$0xff]  }
 0x10b   : > { %v975_v35 = vmax.f32 %v673_v28, 0.0  ;;  %3364 = vmatprep.mubr.bf16.mxu1 %v9569_v0  ;;  %3417 = vmatprep.mubr.bf16.mxu0 %v9569_v0  ;;  %v959_v40 = vmax.f32 %v722_v29, 0.0  ;;  %v976_v41 = vmax.f32 %v724_v33, 0.0  ;;  %v3112_v60 = vand.u32 %v9274_v37, %v9625_v9 }
 0x10c   : > { %v1028_v38 = vadd.f32 %v1027_v31, %v957_v26  ;;  %v1046_v39 = vadd.f32 %v1045_v52, %v974_v32  ;;  %v977_v56 = vmax.f32 %v726_v36, 0.0  ;;  %v3103_v21 = vand.u32 %v9269_v55, %v9625_v9 }
 0x10d   : > { %v676_v43 = vpop.f32.mrb[16].mxu1  ;;  %v729_v44 = vpop.f32.mrb[16].mxu0  ;;  %v3109_v22 = vand.u32 %v9272_v42, %v9625_v9 }
 0x10e   : > { %v1029_v47 = vadd.f32 %v1028_v38, %v958_v27  ;;  %v1047_v49 = vadd.f32 %v1046_v39, %v975_v35  ;;  %v677_v50 = vadd.f32 %v676_v43, %v9977_v14  ;;  %v678_v51 = vpop.f32.mrb[17].mxu1  ;;  %v730_v53 = vadd.f32 %v729_v44, %v9977_v14  ;;  %v731_v54 = vpop.f32.mrb[17].mxu0 }
 0x10f   : > { %v679_v57 = vadd.f32 %v678_v51, %v9977_v14  ;;  %v680_v52 = vpop.f32.mrb[18].mxu1  ;;  %v733_v58 = vpop.f32.mrb[18].mxu0  ;;  %v732_v15 = vadd.f32 %v731_v54, %v9977_v14 }
 0x110   : > { %v1030_v61 = vadd.f32 %v1029_v47, %v959_v40  ;;  %v1048_v62 = vadd.f32 %v1047_v49, %v976_v41  ;;  %v992_v63 = vmax.f32 %v677_v50, 0.0  ;;  %v681_v1 = vadd.f32 %v680_v52, %v9989_v6  ;;  %v682_v2 = vpop.f32.mrb[19].mxu1  ;;  %v735_v4 = vpop.f32.mrb[19].mxu0 }
 0x111   : > { %v993_v5 = vmax.f32 %v679_v57, 0.0  ;;  %v994_v8 = vmax.f32 %v730_v53, 0.0  ;;  %v683_v10 = vadd.f32 %v682_v2, %v9989_v6  ;;  %v734_v16 = vadd.f32 %v733_v58, %v9989_v6  ;;  %v9283_v57 = vld [vmem:[%s9621_s25 + $0x434] ss:$72 sps:$4 sm:$0x3f]  }
 0x112   : > { %v1049_v12 = vadd.f32 %v1048_v62, %v977_v56  ;;  %v1065_v48 = vadd.f32 %v1064_v20, %v992_v63  ;;  %v1010_v13 = vmax.f32 %v681_v1, 0.0  ;;  %8583 = vmatmul.mubr.msk.bf16.vlgmr.msra.gmra.mrb[124].mxu1 %vm408_vm2, %v9864_v11  ;;  %8585 = vmatmul.mubr.msk.bf16.vlgmr.msra.gmra.mrb[124].mxu0 %vm408_vm2, %v9864_v11  ;;  %v736_v19 = vadd.f32 %v735_v4, %v9989_v6  ;;  %v9275_v2 = vld [vmem:[%s9621_s25 + $0x3a0] ss:$72 sps:$4 sm:$0xff]  }
 0x113   : > { %v1011_v18 = vmax.f32 %v683_v10, 0.0  ;;  %3439 = vmatpush1.bf16.msra.mxu1 %v9263_v45  ;;  %3492 = vmatpush1.bf16.msra.mxu0 %v9266_v46  ;;  %v995_v26 = vmax.f32 %v732_v15, 0.0  ;;  %v1012_v27 = vmax.f32 %v734_v16, 0.0  ;;  %v9278_v4 = vld [vmem:[%s9621_s25 + $0x480] ss:$72 sps:$4 sm:$0xff]  }
 0x114   : > { %v1066_v20 = vadd.f32 %v1065_v48, %v993_v5  ;;  %v1084_v23 = vadd.f32 %v1083_v30, %v1010_v13  ;;  %3374 = vmatprep.mubr.bf16.mxu1 %v9569_v0  ;;  %3427 = vmatprep.mubr.bf16.mxu0 %v9569_v0  ;;  %v1013_v36 = vmax.f32 %v736_v19, 0.0  ;;  %v9281_v16 = vld [vmem:[%s9621_s25 + $0x430] ss:$72 sps:$4 sm:$0x3f]  }
 0x115   : > { %v772_v28 = vpop.f32.mrb[20].mxu1  ;;  %v825_v29 = vpop.f32.mrb[20].mxu0  ;;  %3440 = vmatprep.subr.bf16.mxu1 %v3106_v59  ;;  %3493 = vmatprep.subr.bf16.mxu0 %v3112_v60  ;;  %v9286_v59 = vld [vmem:[%s9621_s25 + $0x514] ss:$72 sps:$4 sm:$0x3f]  }
 0x116   : > { %v1067_v31 = vadd.f32 %v1066_v20, %v994_v8  ;;  %v1085_v32 = vadd.f32 %v1084_v23, %v1011_v18  ;;  %v773_v33 = vadd.f32 %v772_v28, %v9979_v3  ;;  %v774_v34 = vpop.f32.mrb[21].mxu1  ;;  %v826_v35 = vadd.f32 %v825_v29, %v9979_v3  ;;  %v827_v30 = vpop.f32.mrb[21].mxu0  ;;  %v9284_v20 = vld [vmem:[%s9621_s25 + $0x510] ss:$72 sps:$4 sm:$0x3f]  }
 0x117   : > { %v775_v37 = vadd.f32 %v774_v34, %v9979_v3  ;;  %v776_v38 = vpop.f32.mrb[22].mxu1  ;;  %v829_v39 = vpop.f32.mrb[22].mxu0  ;;  %3441 = vmatpush1.bf16.msra.mxu1 %v3103_v21  ;;  %3494 = vmatpush1.bf16.msra.mxu0 %v3109_v22  ;;  %v828_v51 = vadd.f32 %v827_v30, %v9979_v3  ;;  %v3118_v22 = vand.u32 %v9283_v57, %v9625_v9 }
 0x118   : > { %v1068_v40 = vadd.f32 %v1067_v31, %v995_v26  ;;  %v1086_v41 = vadd.f32 %v1085_v32, %v1012_v27  ;;  %v960_v43 = vmax.f32 %v773_v33, 0.0  ;;  %v777_v44 = vadd.f32 %v776_v38, %v9991_v7  ;;  %v778_v45 = vpop.f32.mrb[23].mxu1  ;;  %v831_v46 = vpop.f32.mrb[23].mxu0  ;;  %3544 = vmatprep.subr.bf16.mxu1 %v9277_v24  ;;  %4002 = vmatprep.subr.bf16.mxu0 %v9280_v25 }
 0x119   : > { %v961_v47 = vmax.f32 %v775_v37, 0.0  ;;  %v962_v49 = vmax.f32 %v826_v35, 0.0  ;;  %v779_v50 = vadd.f32 %v778_v45, %v9991_v7  ;;  %v830_v56 = vadd.f32 %v829_v39, %v9991_v7  ;;  %v9289_v45 = vld [vmem:[%s9621_s25 + $0x48c] ss:$72 sps:$4 sm:$0xff]  }
 0x11a   : > { %v1087_v53 = vadd.f32 %v1086_v41, %v1013_v36  ;;  %v1031_v54 = vadd.f32 %v1030_v61, %v960_v43  ;;  %v978_v55 = vmax.f32 %v777_v44, 0.0  ;;  %8584 = vmatmul.mubr.msk.bf16.gmra.mrb[128].mxu1 %vm408_vm2, %v9879_v17  ;;  %8586 = vmatmul.mubr.msk.bf16.gmra.mrb[128].mxu0 %vm408_vm2, %v9879_v17  ;;  %v832_v58 = vadd.f32 %v831_v46, %v9991_v7  ;;  %v9292_v46 = vld [vmem:[%s9621_s25 + $0x494] ss:$72 sps:$4 sm:$0xff]  }
 0x11b   : > { %v979_v52 = vmax.f32 %v779_v50, 0.0  ;;  %3470 = vmatprep.mubr.bf16.mxu1 %v9569_v0  ;;  %3523 = vmatprep.mubr.bf16.mxu0 %v9569_v0  ;;  %v963_v61 = vmax.f32 %v828_v51, 0.0  ;;  %v980_v62 = vmax.f32 %v830_v56, 0.0  ;;  %v3952_v23 = vand.u32 %v9286_v59, %v9625_v9 }
 0x11c   : > { %v1032_v42 = vadd.f32 %v1031_v54, %v961_v47  ;;  %v1050_v60 = vadd.f32 %v1049_v12, %v978_v55  ;;  %v981_v18 = vmax.f32 %v832_v58, 0.0  ;;  %v3115_v41 = vand.u32 %v9281_v16, %v9625_v9 }
 0x11d   : > { %v782_v63 = vpop.f32.mrb[24].mxu1  ;;  %v835_v1 = vpop.f32.mrb[24].mxu0  ;;  %v3949_v43 = vand.u32 %v9284_v20, %v9625_v9  ;;  %v10161_v20 = vld [vmem:[%s9621_s25 + $0x518] ss:$72 sps:$4 sm:$0x3f]  }
 0x11e   : > { %v1033_v5 = vadd.f32 %v1032_v42, %v962_v49  ;;  %v1051_v8 = vadd.f32 %v1050_v60, %v979_v52  ;;  %v783_v10 = vadd.f32 %v782_v63, %v9977_v14  ;;  %v784_v15 = vpop.f32.mrb[25].mxu1  ;;  %v836_v48 = vadd.f32 %v835_v1, %v9977_v14  ;;  %v837_v13 = vpop.f32.mrb[25].mxu0 }
 0x11f   : > { %v785_v19 = vadd.f32 %v784_v15, %v9977_v14  ;;  %v786_v12 = vpop.f32.mrb[26].mxu1  ;;  %v839_v21 = vpop.f32.mrb[26].mxu0  ;;  %v838_v34 = vadd.f32 %v837_v13, %v9977_v14  ;;  %v9295_v13 = vld [vmem:[%s9621_s25 + $0x51c] ss:$72 sps:$4 sm:$0x3f]  }
 0x120   : > { %v1034_v24 = vadd.f32 %v1033_v5, %v963_v61  ;;  %v1052_v25 = vadd.f32 %v1051_v8, %v980_v62  ;;  %v996_v26 = vmax.f32 %v783_v10, 0.0  ;;  %v787_v27 = vadd.f32 %v786_v12, %v9989_v6  ;;  %v788_v28 = vpop.f32.mrb[27].mxu1  ;;  %v841_v29 = vpop.f32.mrb[27].mxu0 }
 0x121   : > { %v997_v31 = vmax.f32 %v785_v19, 0.0  ;;  %v998_v32 = vmax.f32 %v836_v48, 0.0  ;;  %v789_v33 = vadd.f32 %v788_v28, %v9989_v6  ;;  %v840_v37 = vadd.f32 %v839_v21, %v9989_v6  ;;  %v10157_v19 = vld [vmem:[%s9621_s25 + $0x524] ss:$72 sps:$4 sm:$0x3f]  }
 0x122   : > { %v1053_v35 = vadd.f32 %v1052_v25, %v981_v18  ;;  %v1069_v30 = vadd.f32 %v1068_v40, %v996_v26  ;;  %v1014_v36 = vmax.f32 %v787_v27, 0.0  ;;  %8587 = vmatmul.mubr.msk.bf16.vlgmr.msra.gmra.mrb[132].mxu1 %vm408_vm2, %v9864_v11  ;;  %8589 = vmatmul.mubr.msk.bf16.vlgmr.msra.gmra.mrb[132].mxu0 %vm408_vm2, %v9864_v11  ;;  %v842_v39 = vadd.f32 %v841_v29, %v9989_v6  ;;  %v9287_v29 = vld [vmem:[%s9621_s25 + $0x488] ss:$72 sps:$4 sm:$0xff]  }
 0x123   : > { %v1015_v38 = vmax.f32 %v789_v33, 0.0  ;;  %3545 = vmatpush1.bf16.msra.mxu1 %v9275_v2  ;;  %4003 = vmatpush1.bf16.msra.mxu0 %v9278_v4  ;;  %v999_v47 = vmax.f32 %v838_v34, 0.0  ;;  %v1016_v49 = vmax.f32 %v840_v37, 0.0  ;;  %v9296_v37 = vld [vmem:[%s9621_s25 + $0x520] ss:$72 sps:$4 sm:$0x3f]  }
 0x124   : > { %v1070_v40 = vadd.f32 %v1069_v30, %v997_v31  ;;  %v1088_v44 = vadd.f32 %v1087_v53, %v1014_v36  ;;  %3480 = vmatprep.mubr.bf16.mxu1 %v9569_v0  ;;  %3533 = vmatprep.mubr.bf16.mxu0 %v9569_v0  ;;  %v1017_v52 = vmax.f32 %v842_v39, 0.0  ;;  %v3958_v36 = vand.u32 %v9295_v13, %v9625_v9 }
 0x125   : > { %v878_v11 = vpop.f32.mrb[28].mxu1  ;;  %v931_v50 = vpop.f32.mrb[28].mxu0  ;;  %3546 = vmatprep.subr.bf16.mxu1 %v3118_v22  ;;  %4004 = vmatprep.subr.bf16.mxu0 %v3952_v23 }
 0x126   : > { %v1071_v51 = vadd.f32 %v1070_v40, %v998_v32  ;;  %v1089_v54 = vadd.f32 %v1088_v44, %v1015_v38  ;;  %v879_v55 = vadd.f32 %v878_v11, %v9979_v3  ;;  %v880_v56 = vpop.f32.mrb[29].mxu1  ;;  %v932_v57 = vadd.f32 %v931_v50, %v9979_v3  ;;  %v933_v53 = vpop.f32.mrb[29].mxu0 }
 0x127   : > { %v881_v58 = vadd.f32 %v880_v56, %v9979_v3  ;;  %v882_v59 = vpop.f32.mrb[30].mxu1  ;;  %v935_v42 = vpop.f32.mrb[30].mxu0  ;;  %3547 = vmatpush1.bf16.msra.mxu1 %v3115_v41  ;;  %4005 = vmatpush1.bf16.msra.mxu0 %v3949_v43  ;;  %v934_v18 = vadd.f32 %v933_v53, %v9979_v3  ;;  %v3964_v38 = vand.u32 %v10157_v19, %v9625_v9  ;;  %v10180_v56 = vld [vmem:[%s11460_s1] sm:$0xff]  }
 0x128   : > { %v1072_v60 = vadd.f32 %v1071_v51, %v999_v47  ;;  %v1090_v61 = vadd.f32 %v1089_v54, %v1016_v49  ;;  %v964_v62 = vmax.f32 %v879_v55, 0.0  ;;  %v883_v63 = vadd.f32 %v882_v59, %v9991_v7  ;;  %v884_v1 = vpop.f32.mrb[31].mxu1  ;;  %v937_v2 = vpop.f32.mrb[31].mxu0  ;;  %4055 = vmatprep.subr.bf16.mxu1 %v9289_v45  ;;  %4108 = vmatprep.subr.bf16.mxu0 %v9292_v46  ;;  %v9290_v45 = vld [vmem:[%s9621_s25 + $0x490] ss:$72 sps:$4 sm:$0xff]  }
 0x129   : > { %v965_v4 = vmax.f32 %v881_v58, 0.0  ;;  %v885_v5 = vadd.f32 %v884_v1, %v9991_v7  ;;  %v966_v48 = vmax.f32 %v932_v57, 0.0  ;;  %v936_v21 = vadd.f32 %v935_v42, %v9991_v7 }
 0x12a   : > { %v1091_v8 = vadd.f32 %v1090_v61, %v1017_v52  ;;  %v1035_v10 = vadd.f32 %v1034_v24, %v964_v62  ;;  %v982_v15 = vmax.f32 %v883_v63, 0.0  ;;  %8588 = vmatmul.mubr.msk.bf16.gmra.mrb[136].mxu1 %vm408_vm2, %v9879_v17  ;;  %8590 = vmatmul.mubr.msk.bf16.gmra.mrb[136].mxu0 %vm408_vm2, %v9879_v17  ;;  %v938_v17 = vadd.f32 %v937_v2, %v9991_v7  ;;  %v9301_v62 = vld [vmem:[%s9621_s25 + $0x49c] ss:$72 sps:$4 sm:$0xff]  }
 0x12b   : > { %v983_v16 = vmax.f32 %v885_v5, 0.0  ;;  %3576 = vmatprep.mubr.bf16.mxu1 %v9569_v0  ;;  %4034 = vmatprep.mubr.bf16.mxu0 %v9569_v0  ;;  %v967_v30 = vmax.f32 %v934_v18, 0.0  ;;  %v984_v39 = vmax.f32 %v936_v21, 0.0  ;;  %v3955_v46 = vand.u32 %v10161_v20, %v9625_v9 }
 0x12c   : > { %v1054_v12 = vadd.f32 %v1053_v35, %v982_v15  ;;  %v1036_v22 = vadd.f32 %v1035_v10, %v965_v4  ;;  %v985_v50 = vmax.f32 %v938_v17, 0.0  ;;  %v3961_v59 = vand.u32 %v9296_v37, %v9625_v9  ;;  %v9304_v4 = vld [vmem:[%s9621_s25 + $0x4a4] ss:$72 sps:$4 sm:$0xff]  }
 0x12d   : > { %v888_v23 = vpop.f32.mrb[32].mxu1  ;;  %v941_v24 = vpop.f32.mrb[32].mxu0 }
 0x12e   : > { %v889_v25 = vadd.f32 %v888_v23, %v9977_v14  ;;  %v890_v26 = vpop.f32.mrb[33].mxu1  ;;  %v942_v27 = vadd.f32 %v941_v24, %v9977_v14  ;;  %v943_v28 = vpop.f32.mrb[33].mxu0  ;;  %v1037_v31 = vadd.f32 %v1036_v22, %v966_v48  ;;  %v1055_v32 = vadd.f32 %v1054_v12, %v983_v16 }
 0x12f   : > { %v891_v33 = vadd.f32 %v890_v26, %v9977_v14  ;;  %v892_v34 = vpop.f32.mrb[34].mxu1  ;;  %v945_v35 = vpop.f32.mrb[34].mxu0  ;;  %v944_v52 = vadd.f32 %v943_v28, %v9977_v14 }
 0x130   : > { %v1000_v41 = vmax.f32 %v889_v25, 0.0  ;;  %v893_v43 = vadd.f32 %v892_v34, %v9989_v6  ;;  %v894_v40 = vpop.f32.mrb[35].mxu1  ;;  %v947_v44 = vpop.f32.mrb[35].mxu0  ;;  %v1038_v11 = vadd.f32 %v1037_v31, %v967_v30  ;;  %v1002_v55 = vmax.f32 %v942_v27, 0.0 }
 0x131   : > { %v1001_v47 = vmax.f32 %v891_v33, 0.0  ;;  %v895_v49 = vadd.f32 %v894_v40, %v9989_v6  ;;  %v1056_v57 = vadd.f32 %v1055_v32, %v984_v39  ;;  %v946_v58 = vadd.f32 %v945_v35, %v9989_v6  ;;  %v10205_v33 = vld [vmem:[%s11460_s1 + $0x8] sm:$0xff]  }
 0x132   : > { %v1073_v51 = vadd.f32 %v1072_v60, %v1000_v41  ;;  %v1018_v54 = vmax.f32 %v893_v43, 0.0  ;;  %8591 = vmatmul.mubr.msk.bf16.vlgmr.msra.gmra.mrb[140].mxu1 %vm408_vm2, %v10180_v56  ;;  %8665 = vmatmul.mubr.msk.bf16.vlgmr.msra.gmra.mrb[140].mxu0 %vm408_vm2, %v10180_v56  ;;  %v948_v63 = vadd.f32 %v947_v44, %v9989_v6  ;;  %v1003_v25 = vmax.f32 %v944_v52, 0.0  ;;  %v9307_v30 = vld [vmem:[%s9621_s25 + $0x52c] ss:$72 sps:$4 sm:$0x3f]  }
 0x133   : > { %v1019_v53 = vmax.f32 %v895_v49, 0.0  ;;  %1039 = vadd.xlane.f32.xlu0 %v1038_v11  ;;  %4056 = vmatpush1.bf16.msra.mxu1 %v9287_v29  ;;  %v1057_v60 = vadd.f32 %v1056_v57, %v985_v50  ;;  %v1020_v13 = vmax.f32 %v946_v58, 0.0  ;;  %v9310_v43 = vld [vmem:[%s9621_s25 + $0x534] ss:$72 sps:$4 sm:$0x3f]  }
 0x134   : > { %v1092_v42 = vadd.f32 %v1091_v8, %v1018_v54  ;;  %4109 = vmatpush1.bf16.msra.mxu0 %v9290_v45  ;;  %3586 = vmatprep.mubr.bf16.mxu1 %v9569_v0  ;;  %v1074_v61 = vadd.f32 %v1073_v51, %v1001_v47  ;;  %v1021_v29 = vmax.f32 %v948_v63, 0.0  ;;  %v9305_v54 = vld [vmem:[%s9621_s25 + $0x528] ss:$72 sps:$4 sm:$0x3f]  }
 0x135   : > { %v1390_v1 = vpop.f32.mrb[36].mxu1  ;;  %v1443_v2 = vpop.f32.mrb[36].mxu0  ;;  %4044 = vmatprep.mubr.bf16.mxu0 %v9569_v0  ;;  %4057 = vmatprep.subr.bf16.mxu1 %v3958_v36 }
 0x136   : > { %1058 = vadd.xlane.f32.xlu1 %v1057_v60  ;;  %v1391_v5 = vadd.f32 %v1390_v1, %v9979_v3  ;;  %v1392_v10 = vpop.f32.mrb[37].mxu1  ;;  %v1444_v8 = vadd.f32 %v1443_v2, %v9979_v3  ;;  %v1445_v15 = vpop.f32.mrb[37].mxu0  ;;  %v1075_v48 = vadd.f32 %v1074_v61, %v1002_v55  ;;  %4110 = vmatprep.subr.bf16.mxu0 %v3964_v38  ;;  %v9299_v60 = vld [vmem:[%s9621_s25 + $0x498] ss:$72 sps:$4 sm:$0xff]  }
 0x137   : > { %v1393_v16 = vadd.f32 %v1392_v10, %v9979_v3  ;;  %v1394_v18 = vpop.f32.mrb[38].mxu1  ;;  %v1446_v19 = vadd.f32 %v1445_v15, %v9979_v3  ;;  %v1447_v12 = vpop.f32.mrb[38].mxu0  ;;  %4058 = vmatpush1.bf16.msra.mxu1 %v3955_v46  ;;  %v1093_v21 = vadd.f32 %v1092_v42, %v1019_v53  ;;  %v3970_v55 = vand.u32 %v9307_v30, %v9625_v9  ;;  %v9302_v61 = vld [vmem:[%s9621_s25 + $0x4a0] ss:$72 sps:$4 sm:$0xff]  }
 0x138   : > { %v1833_v22 = vmax.f32 %v1391_v5, 0.0  ;;  %v1395_v20 = vadd.f32 %v1394_v18, %v9991_v7  ;;  %v1396_v17 = vpop.f32.mrb[39].mxu1  ;;  %v1448_v23 = vadd.f32 %v1447_v12, %v9991_v7  ;;  %v1449_v24 = vpop.f32.mrb[39].mxu0  ;;  %4111 = vmatpush1.bf16.msra.mxu0 %v3961_v59  ;;  %4161 = vmatprep.subr.bf16.mxu1 %v9301_v62  ;;  %v1835_v27 = vmax.f32 %v1444_v8, 0.0 }
 0x139   : > { %v1834_v26 = vmax.f32 %v1393_v16, 0.0  ;;  %v1397_v28 = vadd.f32 %v1396_v17, %v9991_v7  ;;  %4214 = vmatprep.subr.bf16.mxu0 %v9304_v4  ;;  %v1450_v32 = vadd.f32 %v1449_v24, %v9991_v7  ;;  %v1076_v34 = vadd.f32 %v1075_v48, %v1003_v25  ;;  %v9308_v5 = vld [vmem:[%s9621_s25 + $0x530] ss:$72 sps:$4 sm:$0x3f]  }
 0x13a   : > { %v1851_v31 = vmax.f32 %v1395_v20, 0.0  ;;  %8592 = vmatmul.mubr.msk.bf16.gmra.mrb[144].mxu1 %vm408_vm2, %v10205_v33  ;;  %8666 = vmatmul.mubr.msk.bf16.gmra.mrb[144].mxu0 %vm408_vm2, %v10205_v33  ;;  %v1094_v35 = vadd.f32 %v1093_v21, %v1020_v13  ;;  %v1836_v38 = vmax.f32 %v1446_v19, 0.0  ;;  %v1853_v39 = vmax.f32 %v1448_v23, 0.0  ;;  %v9313_v23 = vld [vmem:[%s9621_s25 + $0x4ac] ss:$72 sps:$4 sm:$0xff]  }
 0x13b   : > { %v1905_v36 = vadd.f32 %v1834_v26, %v1833_v22  ;;  %v1852_v37 = vmax.f32 %v1397_v28, 0.0  ;;  %4087 = vmatprep.mubr.bf16.mxu1 %v9569_v0  ;;  %4140 = vmatprep.mubr.bf16.mxu0 %v9569_v0  ;;  %v1854_v47 = vmax.f32 %v1450_v32, 0.0  ;;  %v3976_v10 = vand.u32 %v9310_v43, %v9625_v9  ;;  %v9316_v28 = vld [vmem:[%s9621_s25 + $0x4b4] ss:$72 sps:$4 sm:$0xff]  }
 0x13c   : > { %1077 = vadd.xlane.f32.xlu0 %v1076_v34  ;;  %v1095_v41 = vadd.f32 %v1094_v35, %v1021_v29  ;;  %v3967_v19 = vand.u32 %v9305_v54, %v9625_v9  ;;  %v3973_v17 = vand.u32 %v9308_v5, %v9625_v9 }
 0x13d   : > { %v1906_v40 = vadd.f32 %v1905_v36, %v1835_v27  ;;  %v1924_v44 = vadd.f32 %v1852_v37, %v1851_v31  ;;  %v1400_v45 = vpop.f32.mrb[40].mxu1  ;;  %v1453_v46 = vpop.f32.mrb[40].mxu0 }
 0x13e   : > { %v1401_v49 = vadd.f32 %v1400_v45, %v9977_v14  ;;  %v1402_v11 = vpop.f32.mrb[41].mxu1  ;;  %v1454_v50 = vadd.f32 %v1453_v46, %v9977_v14  ;;  %v1455_v51 = vpop.f32.mrb[41].mxu0 }
 0x13f   : > { %v10219_v57 = vadd.f32 %v1906_v40, %v1836_v38  ;;  %v1925_v53 = vadd.f32 %v1924_v44, %v1853_v39  ;;  %v1403_v52 = vadd.f32 %v1402_v11, %v9977_v14  ;;  %v1404_v58 = vpop.f32.mrb[42].mxu1  ;;  %v1456_v59 = vadd.f32 %v1455_v51, %v9977_v14  ;;  %v1457_v42 = vpop.f32.mrb[42].mxu0 }
 0x140   : > { %v1869_v62 = vmax.f32 %v1401_v49, 0.0  ;;  %1096 = vadd.xlane.f32.xlu0 %v1095_v41  ;;  %v1405_v63 = vadd.f32 %v1404_v58, %v9989_v6  ;;  %v1406_v1 = vpop.f32.mrb[43].mxu1  ;;  %v1458_v2 = vadd.f32 %v1457_v42, %v9989_v6  ;;  %v1459_v4 = vpop.f32.mrb[43].mxu0  ;;  %v1871_v48 = vmax.f32 %v1454_v50, 0.0 }
 0x141   : > { %v1926_v8 = vadd.f32 %v1925_v53, %v1854_v47  ;;  %v1870_v15 = vmax.f32 %v1403_v52, 0.0  ;;  %v1407_v13 = vadd.f32 %v1406_v1, %v9989_v6  ;;  %v1872_v18 = vmax.f32 %v1456_v59, 0.0  ;;  %v9314_v1 = vld [vmem:[%s9621_s25 + $0x4b0] ss:$72 sps:$4 sm:$0xff]  }
 0x142   : > { %v1887_v16 = vmax.f32 %v1405_v63, 0.0  ;;  %8667 = vmatmul.mubr.msk.bf16.vlgmr.msra.gmra.mrb[148].mxu1 %vm408_vm2, %v10180_v56  ;;  %8669 = vmatmul.mubr.msk.bf16.vlgmr.msra.gmra.mrb[148].mxu0 %vm408_vm2, %v10180_v56  ;;  %v1889_v22 = vmax.f32 %v1458_v2, 0.0  ;;  %v1460_v20 = vadd.f32 %v1459_v4, %v9989_v6  ;;  %v9311_v63 = vld [vmem:[%s9621_s25 + $0x4a8] ss:$72 sps:$4 sm:$0xff]  }
 0x143   : > { %v1943_v12 = vadd.f32 %v1870_v15, %v1869_v62  ;;  %v1888_v21 = vmax.f32 %v1407_v13, 0.0  ;;  %4162 = vmatpush1.bf16.msra.mxu1 %v9299_v60  ;;  %4215 = vmatpush1.bf16.msra.mxu0 %v9302_v61  ;;  %v9317_v13 = vld [vmem:[%s9621_s25 + $0x538] ss:$72 sps:$4 sm:$0x3f]  }
 0x144   : > { %4097 = vmatprep.mubr.bf16.mxu1 %v9569_v0  ;;  %4150 = vmatprep.mubr.bf16.mxu0 %v9569_v0  ;;  %v1890_v36 = vmax.f32 %v1460_v20, 0.0 }
 0x145   : > { %v1944_v24 = vadd.f32 %v1943_v12, %v1871_v48  ;;  %v1962_v25 = vadd.f32 %v1888_v21, %v1887_v16  ;;  %v1496_v26 = vpop.f32.mrb[44].mxu1  ;;  %v1549_v27 = vpop.f32.mrb[44].mxu0  ;;  %4163 = vmatprep.subr.bf16.mxu1 %v3970_v55  ;;  %4216 = vmatprep.subr.bf16.mxu0 %v3976_v10  ;;  %v9319_v55 = vld [vmem:[%s9621_s25 + $0x53c] ss:$72 sps:$4 sm:$0x3f]  }
 0x146   : > { %v1497_v29 = vadd.f32 %v1496_v26, %v9979_v3  ;;  %v1498_v31 = vpop.f32.mrb[45].mxu1  ;;  %v1550_v32 = vadd.f32 %v1549_v27, %v9979_v3  ;;  %v1551_v34 = vpop.f32.mrb[45].mxu0  ;;  %v3982_v12 = vand.u32 %v9319_v55, %v9625_v9  ;;  %v9320_v21 = vld [vmem:[%s9621_s25 + $0x540] ss:$72 sps:$4 sm:$0x3f]  }
 0x147   : > { %v10243_v35 = vadd.f32 %v1944_v24, %v1872_v18  ;;  %v1963_v30 = vadd.f32 %v1962_v25, %v1889_v22  ;;  %v1499_v37 = vadd.f32 %v1498_v31, %v9979_v3  ;;  %v1500_v38 = vpop.f32.mrb[46].mxu1  ;;  %v1553_v39 = vpop.f32.mrb[46].mxu0  ;;  %4164 = vmatpush1.bf16.msra.mxu1 %v3967_v19  ;;  %v1552_v44 = vadd.f32 %v1551_v34, %v9979_v3 }
 0x148   : > { %v1837_v41 = vmax.f32 %v1497_v29, 0.0  ;;  %v1501_v43 = vadd.f32 %v1500_v38, %v9991_v7  ;;  %v1502_v40 = vpop.f32.mrb[47].mxu1  ;;  %v1555_v45 = vpop.f32.mrb[47].mxu0  ;;  %4217 = vmatpush1.bf16.msra.mxu0 %v3973_v17  ;;  %4267 = vmatprep.subr.bf16.mxu1 %v9313_v23  ;;  %v1554_v11 = vadd.f32 %v1553_v39, %v9991_v7  ;;  %v1839_v54 = vmax.f32 %v1550_v32, 0.0 }
 0x149   : > { %v1964_v46 = vadd.f32 %v1963_v30, %v1890_v36  ;;  %v1838_v47 = vmax.f32 %v1499_v37, 0.0  ;;  %v1503_v49 = vadd.f32 %v1502_v40, %v9991_v7  ;;  %4320 = vmatprep.subr.bf16.mxu0 %v9316_v28  ;;  %v1556_v52 = vadd.f32 %v1555_v45, %v9991_v7  ;;  %v9325_v40 = vld [vmem:[%s9621_s25 + $0x4bc] ss:$72 sps:$4 sm:$0xff]  }
 0x14a   : > { %v1908_v50 = vadd.f32 %v10219_v57, %v1837_v41  ;;  %v1855_v51 = vmax.f32 %v1501_v43, 0.0  ;;  %8668 = vmatmul.mubr.msk.bf16.gmra.mrb[152].mxu1 %vm408_vm2, %v10205_v33  ;;  %8670 = vmatmul.mubr.msk.bf16.gmra.mrb[152].mxu0 %vm408_vm2, %v10205_v33  ;;  %v9322_v57 = vld [vmem:[%s9621_s25 + $0x544] ss:$72 sps:$4 sm:$0x3f]   ;;  %v1840_v42 = vmax.f32 %v1552_v44, 0.0  ;;  %v1857_v60 = vmax.f32 %v1554_v11, 0.0 }
 0x14b   : > { %v1856_v53 = vmax.f32 %v1503_v49, 0.0  ;;  %4193 = vmatprep.mubr.bf16.mxu1 %v9569_v0  ;;  %4246 = vmatprep.mubr.bf16.mxu0 %v9569_v0  ;;  %v1858_v16 = vmax.f32 %v1556_v52, 0.0  ;;  %v3988_v22 = vand.u32 %v9322_v57, %v9625_v9  ;;  %v3979_v39 = vand.u32 %v9317_v13, %v9625_v9  ;;  %v9328_v44 = vld [vmem:[%s9621_s25 + $0x4c4] ss:$72 sps:$4 sm:$0xff]  }
 0x14c   : > { %v1909_v58 = vadd.f32 %v1908_v50, %v1838_v47  ;;  %v1927_v59 = vadd.f32 %v1926_v8, %v1855_v51  ;;  %v3985_v41 = vand.u32 %v9320_v21, %v9625_v9 }
 0x14d   : > { %v1506_v61 = vpop.f32.mrb[48].mxu1  ;;  %v1559_v62 = vpop.f32.mrb[48].mxu0 }
 0x14e   : > { %v1910_v2 = vadd.f32 %v1909_v58, %v1839_v54  ;;  %v1928_v4 = vadd.f32 %v1927_v59, %v1856_v53  ;;  %v1507_v5 = vadd.f32 %v1506_v61, %v9977_v14  ;;  %v1508_v10 = vpop.f32.mrb[49].mxu1  ;;  %v1560_v15 = vadd.f32 %v1559_v62, %v9977_v14  ;;  %v1561_v48 = vpop.f32.mrb[49].mxu0 }
 0x14f   : > { %v1509_v18 = vadd.f32 %v1508_v10, %v9977_v14  ;;  %v1510_v8 = vpop.f32.mrb[50].mxu1  ;;  %v1563_v19 = vpop.f32.mrb[50].mxu0  ;;  %v1562_v31 = vadd.f32 %v1561_v48, %v9977_v14 }
 0x150   : > { %v1911_v20 = vadd.f32 %v1910_v2, %v1840_v42  ;;  %v1929_v17 = vadd.f32 %v1928_v4, %v1857_v60  ;;  %v1873_v23 = vmax.f32 %v1507_v5, 0.0  ;;  %v1511_v24 = vadd.f32 %v1510_v8, %v9989_v6  ;;  %v1512_v25 = vpop.f32.mrb[51].mxu1  ;;  %v1565_v26 = vpop.f32.mrb[51].mxu0 }
 0x151   : > { %v1874_v27 = vmax.f32 %v1509_v18, 0.0  ;;  %v1875_v28 = vmax.f32 %v1560_v15, 0.0  ;;  %v1513_v29 = vadd.f32 %v1512_v25, %v9989_v6  ;;  %v1564_v36 = vadd.f32 %v1563_v19, %v9989_v6  ;;  %v9331_v18 = vld [vmem:[%s9621_s25 + $0x54c] ss:$72 sps:$4 sm:$0x3f]  }
 0x152   : > { %v1930_v32 = vadd.f32 %v1929_v17, %v1858_v16  ;;  %v1946_v34 = vadd.f32 %v10243_v35, %v1873_v23  ;;  %v1891_v30 = vmax.f32 %v1511_v24, 0.0  ;;  %8671 = vmatmul.mubr.msk.bf16.vlgmr.msra.gmra.mrb[156].mxu1 %vm408_vm2, %v10180_v56  ;;  %8673 = vmatmul.mubr.msk.bf16.vlgmr.msra.gmra.mrb[156].mxu0 %vm408_vm2, %v10180_v56  ;;  %v1566_v38 = vadd.f32 %v1565_v26, %v9989_v6  ;;  %v9323_v25 = vld [vmem:[%s9621_s25 + $0x4b8] ss:$72 sps:$4 sm:$0xff]  }
 0x153   : > { %v1892_v37 = vmax.f32 %v1513_v29, 0.0  ;;  %4268 = vmatpush1.bf16.msra.mxu1 %v9311_v63  ;;  %4321 = vmatpush1.bf16.msra.mxu0 %v9314_v1  ;;  %v1876_v45 = vmax.f32 %v1562_v31, 0.0  ;;  %v1893_v47 = vmax.f32 %v1564_v36, 0.0  ;;  %v9326_v26 = vld [vmem:[%s9621_s25 + $0x4c0] ss:$72 sps:$4 sm:$0xff]  }
 0x154   : > { %v1947_v35 = vadd.f32 %v1946_v34, %v1874_v27  ;;  %v1965_v43 = vadd.f32 %v1964_v46, %v1891_v30  ;;  %4203 = vmatprep.mubr.bf16.mxu1 %v9569_v0  ;;  %4256 = vmatprep.mubr.bf16.mxu0 %v9569_v0  ;;  %v1894_v52 = vmax.f32 %v1566_v38, 0.0  ;;  %v9329_v36 = vld [vmem:[%s9621_s25 + $0x548] ss:$72 sps:$4 sm:$0x3f]  }
 0x155   : > { %v1602_v49 = vpop.f32.mrb[52].mxu1  ;;  %v1655_v11 = vpop.f32.mrb[52].mxu0  ;;  %4269 = vmatprep.subr.bf16.mxu1 %v3982_v12  ;;  %4322 = vmatprep.subr.bf16.mxu0 %v3988_v22  ;;  %v9334_v12 = vld [vmem:[%s9621_s25 + $0x554] ss:$72 sps:$4 sm:$0x3f]  }
 0x156   : > { %v1948_v50 = vadd.f32 %v1947_v35, %v1875_v28  ;;  %v1966_v51 = vadd.f32 %v1965_v43, %v1892_v37  ;;  %v1603_v54 = vadd.f32 %v1602_v49, %v9979_v3  ;;  %v1604_v55 = vpop.f32.mrb[53].mxu1  ;;  %v1656_v53 = vadd.f32 %v1655_v11, %v9979_v3  ;;  %v1657_v46 = vpop.f32.mrb[53].mxu0  ;;  %v9332_v35 = vld [vmem:[%s9621_s25 + $0x550] ss:$72 sps:$4 sm:$0x3f]  }
 0x157   : > { %v1605_v57 = vadd.f32 %v1604_v55, %v9979_v3  ;;  %v1606_v58 = vpop.f32.mrb[54].mxu1  ;;  %v1659_v59 = vpop.f32.mrb[54].mxu0  ;;  %4270 = vmatpush1.bf16.msra.mxu1 %v3979_v39  ;;  %4323 = vmatpush1.bf16.msra.mxu0 %v3985_v41  ;;  %v1658_v10 = vadd.f32 %v1657_v46, %v9979_v3  ;;  %v3994_v41 = vand.u32 %v9331_v18, %v9625_v9 }
 0x158   : > { %v1949_v42 = vadd.f32 %v1948_v50, %v1876_v45  ;;  %v1967_v60 = vadd.f32 %v1966_v51, %v1893_v47  ;;  %v1841_v61 = vmax.f32 %v1603_v54, 0.0  ;;  %v1607_v62 = vadd.f32 %v1606_v58, %v9991_v7  ;;  %v1608_v63 = vpop.f32.mrb[55].mxu1  ;;  %v1661_v1 = vpop.f32.mrb[55].mxu0  ;;  %4373 = vmatprep.subr.bf16.mxu1 %v9325_v40  ;;  %4426 = vmatprep.subr.bf16.mxu0 %v9328_v44 }
 0x159   : > { %v1842_v2 = vmax.f32 %v1605_v57, 0.0  ;;  %v1843_v4 = vmax.f32 %v1656_v53, 0.0  ;;  %v1609_v5 = vadd.f32 %v1608_v63, %v9991_v7  ;;  %v1660_v16 = vadd.f32 %v1659_v59, %v9991_v7  ;;  %v9337_v63 = vld [vmem:[%s9621_s25 + $0x5a4] ss:$72 sps:$4 sm:$0xff]  }
 0x15a   : > { %v1968_v15 = vadd.f32 %v1967_v60, %v1894_v52  ;;  %v1912_v48 = vadd.f32 %v1911_v20, %v1841_v61  ;;  %v1859_v13 = vmax.f32 %v1607_v62, 0.0  ;;  %8672 = vmatmul.mubr.msk.bf16.gmra.mrb[160].mxu1 %vm408_vm2, %v10205_v33  ;;  %8674 = vmatmul.mubr.msk.bf16.gmra.mrb[160].mxu0 %vm408_vm2, %v10205_v33  ;;  %v1662_v19 = vadd.f32 %v1661_v1, %v9991_v7  ;;  %v9340_v1 = vld [vmem:[%s9621_s25 + $0x5ac] ss:$72 sps:$4 sm:$0xff]  }
 0x15b   : > { %v1860_v8 = vmax.f32 %v1609_v5, 0.0  ;;  %4299 = vmatprep.mubr.bf16.mxu1 %v9569_v0  ;;  %4352 = vmatprep.mubr.bf16.mxu0 %v9569_v0  ;;  %v1844_v20 = vmax.f32 %v1658_v10, 0.0  ;;  %v1861_v17 = vmax.f32 %v1660_v16, 0.0  ;;  %v4000_v43 = vand.u32 %v9334_v12, %v9625_v9 }
 0x15c   : > { %v1913_v21 = vadd.f32 %v1912_v48, %v1842_v2  ;;  %v1931_v22 = vadd.f32 %v1930_v32, %v1859_v13  ;;  %v1862_v37 = vmax.f32 %v1662_v19, 0.0  ;;  %v3991_v60 = vand.u32 %v9329_v36, %v9625_v9 }
 0x15d   : > { %v1612_v23 = vpop.f32.mrb[56].mxu1  ;;  %v1665_v24 = vpop.f32.mrb[56].mxu0  ;;  %v3997_v61 = vand.u32 %v9332_v35, %v9625_v9 }
 0x15e   : > { %v1914_v27 = vadd.f32 %v1913_v21, %v1843_v4  ;;  %v1932_v28 = vadd.f32 %v1931_v22, %v1860_v8  ;;  %v1613_v29 = vadd.f32 %v1612_v23, %v9977_v14  ;;  %v1614_v31 = vpop.f32.mrb[57].mxu1  ;;  %v1666_v34 = vadd.f32 %v1665_v24, %v9977_v14  ;;  %v1667_v30 = vpop.f32.mrb[57].mxu0 }
 0x15f   : > { %v1615_v38 = vadd.f32 %v1614_v31, %v9977_v14  ;;  %v1616_v32 = vpop.f32.mrb[58].mxu1  ;;  %v1669_v39 = vpop.f32.mrb[58].mxu0  ;;  %v1668_v55 = vadd.f32 %v1667_v30, %v9977_v14 }
 0x160   : > { %v1915_v40 = vadd.f32 %v1914_v27, %v1844_v20  ;;  %v1933_v44 = vadd.f32 %v1932_v28, %v1861_v17  ;;  %v1877_v45 = vmax.f32 %v1613_v29, 0.0  ;;  %v1617_v47 = vadd.f32 %v1616_v32, %v9989_v6  ;;  %v1618_v49 = vpop.f32.mrb[59].mxu1  ;;  %v1671_v11 = vpop.f32.mrb[59].mxu0  ;;  %v10330_v27 = vld [vmem:[%s9621_s25 + $0x634] ss:$72 sps:$4 sm:$0x3f]  }
 0x161   : > { %v1878_v50 = vmax.f32 %v1615_v38, 0.0  ;;  %v1879_v51 = vmax.f32 %v1666_v34, 0.0  ;;  %v1619_v54 = vadd.f32 %v1618_v49, %v9989_v6  ;;  %v1670_v57 = vadd.f32 %v1669_v39, %v9989_v6  ;;  %v10334_v34 = vld [vmem:[%s9621_s25 + $0x63c] ss:$72 sps:$4 sm:$0x3f]  }
 0x162   : > { %v1934_v53 = vadd.f32 %v1933_v44, %v1862_v37  ;;  %v1950_v46 = vadd.f32 %v1949_v42, %v1877_v45  ;;  %v1895_v52 = vmax.f32 %v1617_v47, 0.0  ;;  %8675 = vmatmul.mubr.msk.bf16.vlgmr.msra.gmra.mrb[164].mxu1 %vm408_vm2, %v10180_v56  ;;  %8677 = vmatmul.mubr.msk.bf16.vlgmr.msra.gmra.mrb[164].mxu0 %vm408_vm2, %v10180_v56  ;;  %v1672_v59 = vadd.f32 %v1671_v11, %v9989_v6  ;;  %v10342_v32 = vld [vmem:[%s9621_s25 + $0x630] ss:$72 sps:$4 sm:$0x3f]  }
 0x163   : > { %v1896_v58 = vmax.f32 %v1619_v54, 0.0  ;;  %4374 = vmatpush1.bf16.msra.mxu1 %v9323_v25  ;;  %4427 = vmatpush1.bf16.msra.mxu0 %v9326_v26  ;;  %v1880_v2 = vmax.f32 %v1668_v55, 0.0  ;;  %v1897_v4 = vmax.f32 %v1670_v57, 0.0  ;;  %v4834_v11 = vand.u32 %v10330_v27, %v9625_v9 }
 0x164   : > { %v1951_v42 = vadd.f32 %v1950_v46, %v1878_v50  ;;  %v1969_v62 = vadd.f32 %v1968_v15, %v1895_v52  ;;  %4309 = vmatprep.mubr.bf16.mxu1 %v9569_v0  ;;  %4362 = vmatprep.mubr.bf16.mxu0 %v9569_v0  ;;  %v1898_v19 = vmax.f32 %v1672_v59, 0.0  ;;  %v9335_v59 = vld [vmem:[%s9621_s25 + $0x5a0] ss:$72 sps:$4 sm:$0xff]  }
 0x165   : > { %v1708_v5 = vpop.f32.mrb[60].mxu1  ;;  %v1761_v10 = vpop.f32.mrb[60].mxu0  ;;  %4375 = vmatprep.subr.bf16.mxu1 %v3994_v41  ;;  %4428 = vmatprep.subr.bf16.mxu0 %v4000_v43  ;;  %v10347_v41 = vld [vmem:[%s9621_s25 + $0x638] ss:$72 sps:$4 sm:$0x3f]  }
 0x166   : > { %v1952_v48 = vadd.f32 %v1951_v42, %v1879_v51  ;;  %v1970_v13 = vadd.f32 %v1969_v62, %v1896_v58  ;;  %v1709_v16 = vadd.f32 %v1708_v5, %v9979_v3  ;;  %v1710_v18 = vpop.f32.mrb[61].mxu1  ;;  %v1762_v8 = vadd.f32 %v1761_v10, %v9979_v3  ;;  %v1763_v15 = vpop.f32.mrb[61].mxu0 }
 0x167   : > { %v1711_v12 = vadd.f32 %v1710_v18, %v9979_v3  ;;  %v1712_v21 = vpop.f32.mrb[62].mxu1  ;;  %v1765_v22 = vpop.f32.mrb[62].mxu0  ;;  %4376 = vmatpush1.bf16.msra.mxu1 %v3991_v60  ;;  %4429 = vmatpush1.bf16.msra.mxu0 %v3997_v61  ;;  %v9338_v60 = vld [vmem:[%s9621_s25 + $0x5a8] ss:$72 sps:$4 sm:$0xff]   ;;  %v4831_v61 = vand.u32 %v10342_v32, %v9625_v9  ;;  %v4840_v42 = vand.u32 %v10334_v34, %v9625_v9 }
 0x168   : > { %v1953_v20 = vadd.f32 %v1952_v48, %v1880_v2  ;;  %v1971_v17 = vadd.f32 %v1970_v13, %v1897_v4  ;;  %v1845_v23 = vmax.f32 %v1709_v16, 0.0  ;;  %v1713_v24 = vadd.f32 %v1712_v21, %v9991_v7  ;;  %v1714_v25 = vpop.f32.mrb[63].mxu1  ;;  %v1767_v26 = vpop.f32.mrb[63].mxu0  ;;  %4884 = vmatprep.subr.bf16.mxu1 %v9337_v63  ;;  %4937 = vmatprep.subr.bf16.mxu0 %v9340_v1 }
 0x169   : > { %v1846_v28 = vmax.f32 %v1711_v12, 0.0  ;;  %v1847_v29 = vmax.f32 %v1762_v8, 0.0  ;;  %v1715_v31 = vadd.f32 %v1714_v25, %v9991_v7  ;;  %v1766_v38 = vadd.f32 %v1765_v22, %v9991_v7  ;;  %v9349_v25 = vld [vmem:[%s9621_s25 + $0x5b4] ss:$72 sps:$4 sm:$0xff]  }
 0x16a   : > { %v1972_v30 = vadd.f32 %v1971_v17, %v1898_v19  ;;  %v1916_v36 = vadd.f32 %v1915_v40, %v1845_v23  ;;  %v1863_v37 = vmax.f32 %v1713_v24, 0.0  ;;  %8676 = vmatmul.mubr.msk.bf16.gmra.mrb[168].mxu1 %vm408_vm2, %v10205_v33  ;;  %8678 = vmatmul.mubr.msk.bf16.gmra.mrb[168].mxu0 %vm408_vm2, %v10205_v33  ;;  %v1764_v40 = vadd.f32 %v1763_v15, %v9979_v3 }
 0x16b   : > { %v1864_v39 = vmax.f32 %v1715_v31, 0.0  ;;  %4405 = vmatprep.mubr.bf16.mxu1 %v9569_v0  ;;  %4458 = vmatprep.mubr.bf16.mxu0 %v9569_v0  ;;  %v1865_v44 = vmax.f32 %v1766_v38, 0.0  ;;  %v1768_v45 = vadd.f32 %v1767_v26, %v9991_v7  ;;  %v4837_v62 = vand.u32 %v10347_v41, %v9625_v9  ;;  %v9352_v26 = vld [vmem:[%s9621_s25 + $0x5bc] ss:$72 sps:$4 sm:$0xff]  }
 0x16c   : > { %v1917_v35 = vadd.f32 %v1916_v36, %v1846_v28  ;;  %v1935_v43 = vadd.f32 %v1934_v53, %v1863_v37  ;;  %v1848_v63 = vmax.f32 %v1764_v40, 0.0 }
 0x16d   : > { %v1718_v47 = vpop.f32.mrb[64].mxu1  ;;  %v1771_v49 = vpop.f32.mrb[64].mxu0  ;;  %v1866_v48 = vmax.f32 %v1768_v45, 0.0 }
 0x16e   : > { %v1918_v50 = vadd.f32 %v1917_v35, %v1847_v29  ;;  %v1936_v51 = vadd.f32 %v1935_v43, %v1864_v39  ;;  %v1719_v54 = vadd.f32 %v1718_v47, %v9977_v14  ;;  %v1720_v55 = vpop.f32.mrb[65].mxu1  ;;  %v1772_v46 = vadd.f32 %v1771_v49, %v9977_v14  ;;  %v1773_v53 = vpop.f32.mrb[65].mxu0 }
 0x16f   : > { %v1721_v52 = vadd.f32 %v1720_v55, %v9977_v14  ;;  %v1722_v57 = vpop.f32.mrb[66].mxu1  ;;  %v1775_v58 = vpop.f32.mrb[66].mxu0  ;;  %v1774_v22 = vadd.f32 %v1773_v53, %v9977_v14 }
 0x170   : > { %v1937_v1 = vadd.f32 %v1936_v51, %v1865_v44  ;;  %v1881_v2 = vmax.f32 %v1719_v54, 0.0  ;;  %v1723_v4 = vadd.f32 %v1722_v57, %v9989_v6  ;;  %v1724_v5 = vpop.f32.mrb[67].mxu1  ;;  %v1777_v10 = vpop.f32.mrb[67].mxu0  ;;  %v1776_v18 = vadd.f32 %v1775_v58, %v9989_v6 }
 0x171   : > { %v1882_v13 = vmax.f32 %v1721_v52, 0.0  ;;  %v1725_v16 = vadd.f32 %v1724_v5, %v9989_v6  ;;  %v1883_v19 = vmax.f32 %v1772_v46, 0.0  ;;  %v1919_v12 = vadd.f32 %v1918_v50, %v1848_v63  ;;  %v9358_v63 = vld [vmem:[%s9621_s25 + $0x64c] ss:$72 sps:$4 sm:$0x3f]  }
 0x172   : > { %v1954_v8 = vadd.f32 %v1953_v20, %v1881_v2  ;;  %v1899_v15 = vmax.f32 %v1723_v4, 0.0  ;;  %8679 = vmatmul.mubr.msk.bf16.vlgmr.msra.gmra.mrb[172].mxu1 %vm408_vm2, %v10180_v56  ;;  %8681 = vmatmul.mubr.msk.bf16.vlgmr.msra.gmra.mrb[172].mxu0 %vm408_vm2, %v10180_v56  ;;  %v1778_v17 = vadd.f32 %v1777_v10, %v9989_v6  ;;  %v1938_v23 = vadd.f32 %v1937_v1, %v1866_v48  ;;  %v9347_v48 = vld [vmem:[%s9621_s25 + $0x5b0] ss:$72 sps:$4 sm:$0xff]  }
 0x173   : > { %v1900_v21 = vmax.f32 %v1725_v16, 0.0  ;;  %4885 = vmatpush1.bf16.msra.mxu1 %v9335_v59  ;;  %4938 = vmatpush1.bf16.msra.mxu0 %v9338_v60  ;;  %v1901_v27 = vmax.f32 %v1776_v18, 0.0  ;;  %v9355_v59 = vld [vmem:[%s9621_s25 + $0x644] ss:$72 sps:$4 sm:$0x3f]  }
 0x174   : > { %v1955_v20 = vadd.f32 %v1954_v8, %v1882_v13  ;;  %v1973_v24 = vadd.f32 %v1972_v30, %v1899_v15  ;;  %4415 = vmatprep.mubr.bf16.mxu1 %v9569_v0  ;;  %4468 = vmatprep.mubr.bf16.mxu0 %v9569_v0  ;;  %v1884_v30 = vmax.f32 %v1774_v22, 0.0  ;;  %v1902_v39 = vmax.f32 %v1778_v17, 0.0  ;;  %v9350_v13 = vld [vmem:[%s9621_s25 + $0x5b8] ss:$72 sps:$4 sm:$0xff]  }
 0x175   : > { %v1814_v28 = vpop.f32.mrb[68].mxu1  ;;  %v2272_v29 = vpop.f32.mrb[68].mxu0  ;;  %4886 = vmatprep.subr.bf16.mxu1 %v4834_v11  ;;  %4939 = vmatprep.subr.bf16.mxu0 %v4840_v42 }
 0x176   : > { %v1956_v31 = vadd.f32 %v1955_v20, %v1883_v19  ;;  %v1974_v34 = vadd.f32 %v1973_v24, %v1900_v21  ;;  %v1815_v36 = vadd.f32 %v1814_v28, %v9979_v3  ;;  %v1816_v37 = vpop.f32.mrb[69].mxu1  ;;  %v2273_v38 = vadd.f32 %v2272_v29, %v9979_v3  ;;  %v2274_v32 = vpop.f32.mrb[69].mxu0  ;;  %v9353_v21 = vld [vmem:[%s9621_s25 + $0x640] ss:$72 sps:$4 sm:$0x3f]  }
 0x177   : > { %v1817_v41 = vadd.f32 %v1816_v37, %v9979_v3  ;;  %v1818_v35 = vpop.f32.mrb[70].mxu1  ;;  %v2275_v43 = vadd.f32 %v2274_v32, %v9979_v3  ;;  %v2276_v40 = vpop.f32.mrb[70].mxu0  ;;  %4887 = vmatpush1.bf16.msra.mxu1 %v4831_v61  ;;  %4940 = vmatpush1.bf16.msra.mxu0 %v4837_v62  ;;  %v4846_v24 = vand.u32 %v9355_v59, %v9625_v9 }
 0x178   : > { %v1975_v44 = vadd.f32 %v1974_v34, %v1901_v27  ;;  %v1849_v45 = vmax.f32 %v1815_v36, 0.0  ;;  %v1819_v47 = vadd.f32 %v1818_v35, %v9991_v7  ;;  %v2715_v49 = vmax.f32 %v2273_v38, 0.0  ;;  %v1820_v11 = vpop.f32.mrb[71].mxu1  ;;  %v2278_v50 = vpop.f32.mrb[71].mxu0  ;;  %4990 = vmatprep.subr.bf16.mxu1 %v9349_v25  ;;  %5043 = vmatprep.subr.bf16.mxu0 %v9352_v26 }
 0x179   : > { %v1850_v51 = vmax.f32 %v1817_v41, 0.0  ;;  %v1821_v54 = vadd.f32 %v1820_v11, %v9991_v7  ;;  %v2716_v55 = vmax.f32 %v2275_v43, 0.0  ;;  %v2277_v46 = vadd.f32 %v2276_v40, %v9991_v7  ;;  %v9356_v25 = vld [vmem:[%s9621_s25 + $0x648] ss:$72 sps:$4 sm:$0x3f]  }
 0x17a   : > { %v1920_v53 = vadd.f32 %v1919_v12, %v1849_v45  ;;  %v1867_v52 = vmax.f32 %v1819_v47, 0.0  ;;  %v2279_v57 = vadd.f32 %v2278_v50, %v9991_v7  ;;  %8680 = vmatmul.mubr.msk.bf16.gmra.mrb[176].mxu1 %vm408_vm2, %v10205_v33  ;;  %8682 = vmatmul.mubr.msk.bf16.gmra.mrb[176].mxu0 %vm408_vm2, %v10205_v33  ;;  %v1957_v58 = vadd.f32 %v1956_v31, %v1884_v30  ;;  %v9361_v50 = vld [vmem:[%s9621_s25 + $0x5c4] ss:$72 sps:$4 sm:$0xff]  }
 0x17b   : > { %v1868_v60 = vmax.f32 %v1821_v54, 0.0  ;;  %v10390_v61 = vadd.f32 %v2716_v55, %v2715_v49  ;;  %v2733_v42 = vmax.f32 %v2277_v46, 0.0  ;;  %v1976_v62 = vadd.f32 %v1975_v44, %v1902_v39  ;;  %4916 = vmatprep.mubr.bf16.mxu1 %v9569_v0  ;;  %4969 = vmatprep.mubr.bf16.mxu0 %v9569_v0  ;;  %v9364_v55 = vld [vmem:[%s9621_s25 + $0x5cc] ss:$72 sps:$4 sm:$0xff]  }
 0x17c   : > { %v1939_v1 = vadd.f32 %v1938_v23, %v1867_v52  ;;  %v2734_v2 = vmax.f32 %v2279_v57, 0.0  ;;  %v1921_v4 = vadd.f32 %v1920_v53, %v1850_v51  ;;  %v4852_v26 = vand.u32 %v9358_v63, %v9625_v9 }
 0x17d   : > { %v1824_v5 = vpop.f32.mrb[72].mxu1  ;;  %v2282_v10 = vpop.f32.mrb[72].mxu0  ;;  %v4843_v43 = vand.u32 %v9353_v21, %v9625_v9  ;;  %v4849_v47 = vand.u32 %v9356_v25, %v9625_v9  ;;  %v9359_v25 = vld [vmem:[%s9621_s25 + $0x5c0] ss:$72 sps:$4 sm:$0xff]  }
 0x17e   : > { %v10397_v16 = vadd.f32 %v2734_v2, %v2733_v42  ;;  %v1825_v18 = vadd.f32 %v1824_v5, %v9977_v14  ;;  %v1826_v8 = vpop.f32.mrb[73].mxu1  ;;  %1922 = vadd.xlane.f32.xlu1 %v1921_v4  ;;  %v2283_v15 = vadd.f32 %v2282_v10, %v9977_v14  ;;  %v2284_v19 = vpop.f32.mrb[73].mxu0  ;;  %v1940_v12 = vadd.f32 %v1939_v1, %v1868_v60 }
 0x17f   : > { %v1827_v22 = vadd.f32 %v1826_v8, %v9977_v14  ;;  %v1828_v17 = vpop.f32.mrb[74].mxu1  ;;  %v2285_v23 = vadd.f32 %v2284_v19, %v9977_v14  ;;  %v2286_v20 = vpop.f32.mrb[74].mxu0 }
 0x180   : > { %v1885_v27 = vmax.f32 %v1825_v18, 0.0  ;;  %v1829_v28 = vadd.f32 %v1828_v17, %v9989_v6  ;;  %v2751_v29 = vmax.f32 %v2283_v15, 0.0  ;;  %v1830_v31 = vpop.f32.mrb[75].mxu1  ;;  %1941 = vadd.xlane.f32.xlu0 %v1940_v12  ;;  %v2287_v34 = vadd.f32 %v2286_v20, %v9989_v6  ;;  %v2288_v36 = vpop.f32.mrb[75].mxu0 }
 0x181   : > { %v1886_v37 = vmax.f32 %v1827_v22, 0.0  ;;  %v1831_v38 = vadd.f32 %v1830_v31, %v9989_v6  ;;  %v2752_v32 = vmax.f32 %v2285_v23, 0.0  ;;  %v2289_v30 = vadd.f32 %v2288_v36, %v9989_v6  ;;  %v9367_v15 = vld [vmem:[%s9621_s25 + $0x654] ss:$72 sps:$4 sm:$0x3f]  }
 0x182   : > { %v1958_v39 = vadd.f32 %v1957_v58, %v1885_v27  ;;  %v1903_v41 = vmax.f32 %v1829_v28, 0.0  ;;  %v2769_v35 = vmax.f32 %v2287_v34, 0.0  ;;  %8755 = vmatmul.mubr.msk.bf16.vlgmr.msra.gmra.mrb[180].mxu1 %vm408_vm2, %v10180_v56  ;;  %8757 = vmatmul.mubr.msk.bf16.vlgmr.msra.gmra.mrb[180].mxu0 %vm408_vm2, %v10180_v56  ;;  %v9365_v36 = vld [vmem:[%s9621_s25 + $0x650] ss:$72 sps:$4 sm:$0x3f]  }
 0x183   : > { %v1904_v40 = vmax.f32 %v1831_v38, 0.0  ;;  %v10416_v44 = vadd.f32 %v2752_v32, %v2751_v29  ;;  %v2770_v45 = vmax.f32 %v2289_v30, 0.0  ;;  %4991 = vmatpush1.bf16.msra.mxu1 %v9347_v48  ;;  %5044 = vmatpush1.bf16.msra.mxu0 %v9350_v13  ;;  %v4858_v30 = vand.u32 %v9367_v15, %v9625_v9 }
 0x184   : > { %v1977_v49 = vadd.f32 %v1976_v62, %v1903_v41  ;;  %v1959_v11 = vadd.f32 %v1958_v39, %v1886_v37  ;;  %4926 = vmatprep.mubr.bf16.mxu1 %v9569_v0  ;;  %4979 = vmatprep.mubr.bf16.mxu0 %v9569_v0  ;;  %v9368_v39 = vld [vmem:[%s9621_s25 + $0x658] ss:$72 sps:$4 sm:$0x3f]  }
 0x185   : > { %v10422_v51 = vadd.f32 %v2770_v45, %v2769_v35  ;;  %v2325_v56 = vpop.f32.mrb[76].mxu1  ;;  %v2378_v54 = vpop.f32.mrb[76].mxu0  ;;  %4992 = vmatprep.subr.bf16.mxu1 %v4846_v24  ;;  %5045 = vmatprep.subr.bf16.mxu0 %v4852_v26 }
 0x186   : > { %v2326_v46 = vadd.f32 %v2325_v56, %v9979_v3  ;;  %v2327_v53 = vpop.f32.mrb[77].mxu1  ;;  %1960 = vadd.xlane.f32.xlu1 %v1959_v11  ;;  %v2379_v52 = vadd.f32 %v2378_v54, %v9979_v3  ;;  %v2380_v57 = vpop.f32.mrb[77].mxu0  ;;  %v1978_v58 = vadd.f32 %v1977_v49, %v1904_v40 }
 0x187   : > { %v2328_v59 = vadd.f32 %v2327_v53, %v9979_v3  ;;  %v2329_v60 = vpop.f32.mrb[78].mxu1  ;;  %v2382_v42 = vpop.f32.mrb[78].mxu0  ;;  %4993 = vmatpush1.bf16.msra.mxu1 %v4843_v43  ;;  %5046 = vmatpush1.bf16.msra.mxu0 %v4849_v47  ;;  %v2381_v10 = vadd.f32 %v2380_v57, %v9979_v3  ;;  %v10462_v57 = vld [vmem:[%s11460_s1] sm:$0xff]  }
 0x188   : > { %v2717_v62 = vmax.f32 %v2326_v46, 0.0  ;;  %v2330_v63 = vadd.f32 %v2329_v60, %v9991_v7  ;;  %v2331_v1 = vpop.f32.mrb[79].mxu1  ;;  %1979 = vadd.xlane.f32.xlu0 %v1978_v58  ;;  %v2384_v2 = vpop.f32.mrb[79].mxu0  ;;  %5096 = vmatprep.subr.bf16.mxu1 %v9361_v50  ;;  %v2383_v48 = vadd.f32 %v2382_v42, %v9991_v7  ;;  %v2719_v8 = vmax.f32 %v2379_v52, 0.0 }
 0x189   : > { %v2718_v4 = vmax.f32 %v2328_v59, 0.0  ;;  %v2332_v5 = vadd.f32 %v2331_v1, %v9991_v7  ;;  %5149 = vmatprep.subr.bf16.mxu0 %v9364_v55  ;;  %v2385_v12 = vadd.f32 %v2384_v2, %v9991_v7  ;;  %v2720_v17 = vmax.f32 %v2381_v10, 0.0  ;;  %v9376_v1 = vld [vmem:[%s9621_s25 + $0x5dc] ss:$72 sps:$4 sm:$0xff]  }
 0x18a   : > { %v2788_v13 = vadd.f32 %v10390_v61, %v2717_v62  ;;  %v2735_v18 = vmax.f32 %v2330_v63, 0.0  ;;  %8756 = vmatmul.mubr.msk.bf16.gmra.mrb[184].mxu1 %vm408_vm2, %v10205_v33  ;;  %8758 = vmatmul.mubr.msk.bf16.gmra.mrb[184].mxu0 %vm408_vm2, %v10205_v33  ;;  %v9370_v61 = vld [vmem:[%s9621_s25 + $0x65c] ss:$72 sps:$4 sm:$0x3f]   ;;  %v2737_v23 = vmax.f32 %v2383_v48, 0.0  ;;  %v4861_v60 = vand.u32 %v9368_v39, %v9625_v9 }
 0x18b   : > { %v2736_v19 = vmax.f32 %v2332_v5, 0.0  ;;  %5022 = vmatprep.mubr.bf16.mxu1 %v9569_v0  ;;  %5075 = vmatprep.mubr.bf16.mxu0 %v9569_v0  ;;  %v9362_v33 = vld [vmem:[%s9621_s25 + $0x5c8] ss:$72 sps:$4 sm:$0xff]   ;;  %v2738_v37 = vmax.f32 %v2385_v12, 0.0  ;;  %v4864_v41 = vand.u32 %v9370_v61, %v9625_v9  ;;  %v9373_v63 = vld [vmem:[%s9621_s25 + $0x5d4] ss:$72 sps:$4 sm:$0xff]  }
 0x18c   : > { %v2789_v21 = vadd.f32 %v2788_v13, %v2718_v4  ;;  %v2807_v22 = vadd.f32 %v10397_v16, %v2735_v18 }
 0x18d   : > { %v2335_v20 = vpop.f32.mrb[80].mxu1  ;;  %v2388_v24 = vpop.f32.mrb[80].mxu0 }
 0x18e   : > { %v2790_v26 = vadd.f32 %v2789_v21, %v2719_v8  ;;  %v2808_v27 = vadd.f32 %v2807_v22, %v2736_v19  ;;  %v2336_v28 = vadd.f32 %v2335_v20, %v9977_v14  ;;  %v2337_v29 = vpop.f32.mrb[81].mxu1  ;;  %v2389_v31 = vadd.f32 %v2388_v24, %v9977_v14  ;;  %v2390_v34 = vpop.f32.mrb[81].mxu0 }
 0x18f   : > { %v2338_v38 = vadd.f32 %v2337_v29, %v9977_v14  ;;  %v2339_v16 = vpop.f32.mrb[82].mxu1  ;;  %v2392_v32 = vpop.f32.mrb[82].mxu0  ;;  %v2391_v54 = vadd.f32 %v2390_v34, %v9977_v14 }
 0x190   : > { %v2791_v35 = vadd.f32 %v2790_v26, %v2720_v17  ;;  %v2809_v43 = vadd.f32 %v2808_v27, %v2737_v23  ;;  %v2753_v40 = vmax.f32 %v2336_v28, 0.0  ;;  %v2340_v45 = vadd.f32 %v2339_v16, %v9989_v6  ;;  %v2341_v47 = vpop.f32.mrb[83].mxu1  ;;  %v2394_v49 = vpop.f32.mrb[83].mxu0 }
 0x191   : > { %v2754_v11 = vmax.f32 %v2338_v38, 0.0  ;;  %v2755_v50 = vmax.f32 %v2389_v31, 0.0  ;;  %v2342_v56 = vadd.f32 %v2341_v47, %v9989_v6  ;;  %v2393_v52 = vadd.f32 %v2392_v32, %v9989_v6  ;;  %v9379_v38 = vld [vmem:[%s9621_s25 + $0x664] ss:$72 sps:$4 sm:$0x3f]  }
 0x192   : > { %v10455_v55 = vadd.f32 %v2809_v43, %v2738_v37  ;;  %v2826_v46 = vadd.f32 %v10416_v44, %v2753_v40  ;;  %v2771_v53 = vmax.f32 %v2340_v45, 0.0  ;;  %8759 = vmatmul.mubr.msk.bf16.vlgmr.msra.gmra.mrb[188].mxu1 %vm408_vm2, %v10462_v57  ;;  %8761 = vmatmul.mubr.msk.bf16.vlgmr.msra.gmra.mrb[188].mxu0 %vm408_vm2, %v10462_v57  ;;  %v2395_v59 = vadd.f32 %v2394_v49, %v9989_v6  ;;  %v10486_v37 = vld [vmem:[%s11460_s1 + $0x8] sm:$0xff]   ;;  %v9371_v47 = vld [vmem:[%s9621_s25 + $0x5d0] ss:$72 sps:$4 sm:$0xff]  }
 0x193   : > { %v2772_v58 = vmax.f32 %v2342_v56, 0.0  ;;  %5097 = vmatpush1.bf16.msra.mxu1 %v9359_v25  ;;  %5150 = vmatpush1.bf16.msra.mxu0 %v9362_v33  ;;  %v4855_v44 = vand.u32 %v9365_v36, %v9625_v9  ;;  %v2756_v2 = vmax.f32 %v2391_v54, 0.0  ;;  %v2773_v4 = vmax.f32 %v2393_v52, 0.0  ;;  %v9374_v49 = vld [vmem:[%s9621_s25 + $0x5d8] ss:$72 sps:$4 sm:$0xff]  }
 0x194   : > { %v2827_v42 = vadd.f32 %v2826_v46, %v2754_v11  ;;  %v2845_v62 = vadd.f32 %v10422_v51, %v2771_v53  ;;  %5032 = vmatprep.mubr.bf16.mxu1 %v9569_v0  ;;  %5085 = vmatprep.mubr.bf16.mxu0 %v9569_v0  ;;  %v2774_v19 = vmax.f32 %v2395_v59, 0.0  ;;  %v9377_v52 = vld [vmem:[%s9621_s25 + $0x660] ss:$72 sps:$4 sm:$0x3f]  }
 0x195   : > { %v2431_v5 = vpop.f32.mrb[84].mxu1  ;;  %v2484_v10 = vpop.f32.mrb[84].mxu0  ;;  %5098 = vmatprep.subr.bf16.mxu1 %v4858_v30  ;;  %5151 = vmatprep.subr.bf16.mxu0 %v4864_v41  ;;  %v9382_v30 = vld [vmem:[%s9621_s25 + $0x66c] ss:$72 sps:$4 sm:$0x3f]  }
 0x196   : > { %v2828_v48 = vadd.f32 %v2827_v42, %v2755_v50  ;;  %v2846_v13 = vadd.f32 %v2845_v62, %v2772_v58  ;;  %v2432_v18 = vadd.f32 %v2431_v5, %v9979_v3  ;;  %v2433_v8 = vpop.f32.mrb[85].mxu1  ;;  %v2485_v15 = vadd.f32 %v2484_v10, %v9979_v3  ;;  %v2486_v51 = vpop.f32.mrb[85].mxu0  ;;  %v9380_v42 = vld [vmem:[%s9621_s25 + $0x668] ss:$72 sps:$4 sm:$0x3f]  }
 0x197   : > { %v2434_v12 = vadd.f32 %v2433_v8, %v9979_v3  ;;  %v2435_v61 = vpop.f32.mrb[86].mxu1  ;;  %v2488_v21 = vpop.f32.mrb[86].mxu0  ;;  %5099 = vmatpush1.bf16.msra.mxu1 %v4855_v44  ;;  %5152 = vmatpush1.bf16.msra.mxu0 %v4861_v60  ;;  %v2487_v28 = vadd.f32 %v2486_v51, %v9979_v3  ;;  %v4870_v60 = vand.u32 %v9379_v38, %v9625_v9 }
 0x198   : > { %v2829_v22 = vadd.f32 %v2828_v48, %v2756_v2  ;;  %v2847_v17 = vadd.f32 %v2846_v13, %v2773_v4  ;;  %v2721_v23 = vmax.f32 %v2432_v18, 0.0  ;;  %v2436_v20 = vadd.f32 %v2435_v61, %v9991_v7  ;;  %v2437_v24 = vpop.f32.mrb[87].mxu1  ;;  %v2490_v25 = vpop.f32.mrb[87].mxu0  ;;  %5202 = vmatprep.subr.bf16.mxu1 %v9373_v63  ;;  %5255 = vmatprep.subr.bf16.mxu0 %v9376_v1 }
 0x199   : > { %v2722_v33 = vmax.f32 %v2434_v12, 0.0  ;;  %v2723_v26 = vmax.f32 %v2485_v15, 0.0  ;;  %v2438_v27 = vadd.f32 %v2437_v24, %v9991_v7  ;;  %v2489_v36 = vadd.f32 %v2488_v21, %v9991_v7  ;;  %v9385_v24 = vld [vmem:[%s9621_s25 + $0x5e4] ss:$72 sps:$4 sm:$0xff]  }
 0x19a   : > { %v2848_v29 = vadd.f32 %v2847_v17, %v2774_v19  ;;  %v2792_v31 = vadd.f32 %v2791_v35, %v2721_v23  ;;  %v2739_v34 = vmax.f32 %v2436_v20, 0.0  ;;  %8760 = vmatmul.mubr.msk.bf16.gmra.mrb[192].mxu1 %vm408_vm2, %v10486_v37  ;;  %8762 = vmatmul.mubr.msk.bf16.gmra.mrb[192].mxu0 %vm408_vm2, %v10486_v37  ;;  %v2491_v32 = vadd.f32 %v2490_v25, %v9991_v7  ;;  %v9388_v25 = vld [vmem:[%s9621_s25 + $0x6c4] ss:$72 sps:$4 sm:$0xff]  }
 0x19b   : > { %v2740_v16 = vmax.f32 %v2438_v27, 0.0  ;;  %5128 = vmatprep.mubr.bf16.mxu1 %v9569_v0  ;;  %5181 = vmatprep.mubr.bf16.mxu0 %v9569_v0  ;;  %v2724_v35 = vmax.f32 %v2487_v28, 0.0  ;;  %v2741_v43 = vmax.f32 %v2489_v36, 0.0  ;;  %v4876_v62 = vand.u32 %v9382_v30, %v9625_v9 }
 0x19c   : > { %v2793_v39 = vadd.f32 %v2792_v31, %v2722_v33  ;;  %v2811_v41 = vadd.f32 %v10455_v55, %v2739_v34  ;;  %v2742_v58 = vmax.f32 %v2491_v32, 0.0  ;;  %v4867_v17 = vand.u32 %v9377_v52, %v9625_v9 }
 0x19d   : > { %v2441_v40 = vpop.f32.mrb[88].mxu1  ;;  %v2494_v45 = vpop.f32.mrb[88].mxu0  ;;  %v4873_v23 = vand.u32 %v9380_v42, %v9625_v9 }
 0x19e   : > { %v2794_v11 = vadd.f32 %v2793_v39, %v2723_v26  ;;  %v2812_v50 = vadd.f32 %v2811_v41, %v2740_v16  ;;  %v2442_v56 = vadd.f32 %v2441_v40, %v9977_v14  ;;  %v2443_v54 = vpop.f32.mrb[89].mxu1  ;;  %v2495_v46 = vadd.f32 %v2494_v45, %v9977_v14  ;;  %v2496_v53 = vpop.f32.mrb[89].mxu0 }
 0x19f   : > { %v2444_v59 = vadd.f32 %v2443_v54, %v9977_v14  ;;  %v2445_v55 = vpop.f32.mrb[90].mxu1  ;;  %v2498_v44 = vpop.f32.mrb[90].mxu0  ;;  %v2497_v8 = vadd.f32 %v2496_v53, %v9977_v14 }
 0x1a0   : > { %v2795_v63 = vadd.f32 %v2794_v11, %v2724_v35  ;;  %v2813_v1 = vadd.f32 %v2812_v50, %v2741_v43  ;;  %v2757_v2 = vmax.f32 %v2442_v56, 0.0  ;;  %v2446_v4 = vadd.f32 %v2445_v55, %v9989_v6  ;;  %v2447_v5 = vpop.f32.mrb[91].mxu1  ;;  %v2500_v10 = vpop.f32.mrb[91].mxu0 }
 0x1a1   : > { %v2758_v48 = vmax.f32 %v2444_v59, 0.0  ;;  %v2759_v13 = vmax.f32 %v2495_v46, 0.0  ;;  %v2448_v18 = vadd.f32 %v2447_v5, %v9989_v6  ;;  %v2499_v12 = vadd.f32 %v2498_v44, %v9989_v6  ;;  %v9391_v59 = vld [vmem:[%s9621_s25 + $0x674] ss:$72 sps:$4 sm:$0x3f]  }
 0x1a2   : > { %v2814_v15 = vadd.f32 %v2813_v1, %v2742_v58  ;;  %v2830_v51 = vadd.f32 %v2829_v22, %v2757_v2  ;;  %v2775_v19 = vmax.f32 %v2446_v4, 0.0  ;;  %8763 = vmatmul.mubr.msk.bf16.vlgmr.msra.gmra.mrb[196].mxu1 %vm408_vm2, %v10462_v57  ;;  %8765 = vmatmul.mubr.msk.bf16.vlgmr.msra.gmra.mrb[196].mxu0 %vm408_vm2, %v10462_v57  ;;  %v2501_v21 = vadd.f32 %v2500_v10, %v9989_v6  ;;  %v9383_v5 = vld [vmem:[%s9621_s25 + $0x5e0] ss:$72 sps:$4 sm:$0xff]  }
 0x1a3   : > { %v2776_v61 = vmax.f32 %v2448_v18, 0.0  ;;  %5203 = vmatpush1.bf16.msra.mxu1 %v9371_v47  ;;  %5256 = vmatpush1.bf16.msra.mxu0 %v9374_v49  ;;  %v2760_v33 = vmax.f32 %v2497_v8, 0.0  ;;  %v2777_v26 = vmax.f32 %v2499_v12, 0.0  ;;  %v9386_v10 = vld [vmem:[%s9621_s25 + $0x6c0] ss:$72 sps:$4 sm:$0xff]  }
 0x1a4   : > { %v2831_v22 = vadd.f32 %v2830_v51, %v2758_v48  ;;  %v2849_v20 = vadd.f32 %v2848_v29, %v2775_v19  ;;  %5138 = vmatprep.mubr.bf16.mxu1 %v9569_v0  ;;  %5191 = vmatprep.mubr.bf16.mxu0 %v9569_v0  ;;  %v2778_v32 = vmax.f32 %v2501_v21, 0.0  ;;  %v9389_v12 = vld [vmem:[%s9621_s25 + $0x670] ss:$72 sps:$4 sm:$0x3f]  }
 0x1a5   : > { %v2537_v27 = vpop.f32.mrb[92].mxu1  ;;  %v2590_v28 = vpop.f32.mrb[92].mxu0  ;;  %5204 = vmatprep.subr.bf16.mxu1 %v4870_v60  ;;  %5257 = vmatprep.subr.bf16.mxu0 %v4876_v62  ;;  %v9394_v60 = vld [vmem:[%s9621_s25 + $0x754] ss:$72 sps:$4 sm:$0x3f]  }
 0x1a6   : > { %v2832_v31 = vadd.f32 %v2831_v22, %v2759_v13  ;;  %v2850_v34 = vadd.f32 %v2849_v20, %v2776_v61  ;;  %v2538_v36 = vadd.f32 %v2537_v27, %v9979_v3  ;;  %v2539_v38 = vpop.f32.mrb[93].mxu1  ;;  %v2591_v16 = vadd.f32 %v2590_v28, %v9979_v3  ;;  %v2592_v29 = vpop.f32.mrb[93].mxu0  ;;  %v9392_v22 = vld [vmem:[%s9621_s25 + $0x750] ss:$72 sps:$4 sm:$0x3f]  }
 0x1a7   : > { %v2540_v30 = vadd.f32 %v2539_v38, %v9979_v3  ;;  %v2541_v39 = vpop.f32.mrb[94].mxu1  ;;  %v2594_v41 = vpop.f32.mrb[94].mxu0  ;;  %5205 = vmatpush1.bf16.msra.mxu1 %v4867_v17  ;;  %5258 = vmatpush1.bf16.msra.mxu0 %v4873_v23  ;;  %v2593_v54 = vadd.f32 %v2592_v29, %v9979_v3  ;;  %v4882_v23 = vand.u32 %v9391_v59, %v9625_v9 }
 0x1a8   : > { %v2833_v35 = vadd.f32 %v2832_v31, %v2760_v33  ;;  %v2851_v43 = vadd.f32 %v2850_v34, %v2777_v26  ;;  %v2725_v40 = vmax.f32 %v2538_v36, 0.0  ;;  %v2542_v45 = vadd.f32 %v2541_v39, %v9991_v7  ;;  %v2543_v47 = vpop.f32.mrb[95].mxu1  ;;  %v2596_v49 = vpop.f32.mrb[95].mxu0  ;;  %5308 = vmatprep.subr.bf16.mxu1 %v9385_v24  ;;  %5766 = vmatprep.subr.bf16.mxu0 %v9388_v25 }
 0x1a9   : > { %v2726_v11 = vmax.f32 %v2540_v30, 0.0  ;;  %v2727_v50 = vmax.f32 %v2591_v16, 0.0  ;;  %v2544_v56 = vadd.f32 %v2543_v47, %v9991_v7  ;;  %v2595_v58 = vadd.f32 %v2594_v41, %v9991_v7  ;;  %v9397_v47 = vld [vmem:[%s9621_s25 + $0x6cc] ss:$72 sps:$4 sm:$0xff]  }
 0x1aa   : > { %v2852_v46 = vadd.f32 %v2851_v43, %v2778_v32  ;;  %v2796_v53 = vadd.f32 %v2795_v63, %v2725_v40  ;;  %v2743_v52 = vmax.f32 %v2542_v45, 0.0  ;;  %8764 = vmatmul.mubr.msk.bf16.gmra.mrb[200].mxu1 %vm408_vm2, %v10486_v37  ;;  %8766 = vmatmul.mubr.msk.bf16.gmra.mrb[200].mxu0 %vm408_vm2, %v10486_v37  ;;  %v2597_v44 = vadd.f32 %v2596_v49, %v9991_v7  ;;  %v9400_v49 = vld [vmem:[%s9621_s25 + $0x6d4] ss:$72 sps:$4 sm:$0xff]  }
 0x1ab   : > { %v2744_v55 = vmax.f32 %v2544_v56, 0.0  ;;  %5234 = vmatprep.mubr.bf16.mxu1 %v9569_v0  ;;  %5287 = vmatprep.mubr.bf16.mxu0 %v9569_v0  ;;  %v2728_v63 = vmax.f32 %v2593_v54, 0.0  ;;  %v2745_v1 = vmax.f32 %v2595_v58, 0.0  ;;  %v5716_v20 = vand.u32 %v9394_v60, %v9625_v9 }
 0x1ac   : > { %v2797_v42 = vadd.f32 %v2796_v53, %v2726_v11  ;;  %v2815_v62 = vadd.f32 %v2814_v15, %v2743_v52  ;;  %v2746_v61 = vmax.f32 %v2597_v44, 0.0  ;;  %v4879_v43 = vand.u32 %v9389_v12, %v9625_v9 }
 0x1ad   : > { %v2547_v2 = vpop.f32.mrb[96].mxu1  ;;  %v2600_v4 = vpop.f32.mrb[96].mxu0  ;;  %v5713_v40 = vand.u32 %v9392_v22, %v9625_v9 }
 0x1ae   : > { %v2798_v48 = vadd.f32 %v2797_v42, %v2727_v50  ;;  %v2816_v13 = vadd.f32 %v2815_v62, %v2744_v55  ;;  %v2548_v18 = vadd.f32 %v2547_v2, %v9977_v14  ;;  %v2549_v8 = vpop.f32.mrb[97].mxu1  ;;  %v2601_v51 = vadd.f32 %v2600_v4, %v9977_v14  ;;  %v2602_v19 = vpop.f32.mrb[97].mxu0 }
 0x1af   : > { %v2550_v21 = vadd.f32 %v2549_v8, %v9977_v14  ;;  %v2551_v15 = vpop.f32.mrb[98].mxu1  ;;  %v2604_v17 = vpop.f32.mrb[98].mxu0  ;;  %v2603_v38 = vadd.f32 %v2602_v19, %v9977_v14  ;;  %v10568_v8 = vld [vmem:[%s9621_s25 + $0x75c] ss:$72 sps:$4 sm:$0x3f]  }
 0x1b0   : > { %v2799_v24 = vadd.f32 %v2798_v48, %v2728_v63  ;;  %v2817_v25 = vadd.f32 %v2816_v13, %v2745_v1  ;;  %v2761_v33 = vmax.f32 %v2548_v18, 0.0  ;;  %v2552_v26 = vadd.f32 %v2551_v15, %v9989_v6  ;;  %v2553_v27 = vpop.f32.mrb[99].mxu1  ;;  %v2606_v28 = vpop.f32.mrb[99].mxu0 }
 0x1b1   : > { %v2762_v31 = vmax.f32 %v2550_v21, 0.0  ;;  %v2763_v34 = vmax.f32 %v2601_v51, 0.0  ;;  %v2554_v36 = vadd.f32 %v2553_v27, %v9989_v6  ;;  %v2605_v30 = vadd.f32 %v2604_v17, %v9989_v6  ;;  %v10576_v21 = vld [vmem:[%s9621_s25 + $0x758] ss:$72 sps:$4 sm:$0x3f]  }
 0x1b2   : > { %v2818_v16 = vadd.f32 %v2817_v25, %v2746_v61  ;;  %v2834_v29 = vadd.f32 %v2833_v35, %v2761_v33  ;;  %v2779_v32 = vmax.f32 %v2552_v26, 0.0  ;;  %8767 = vmatmul.mubr.msk.bf16.vlgmr.msra.gmra.mrb[204].mxu1 %vm408_vm2, %v10462_v57  ;;  %8769 = vmatmul.mubr.msk.bf16.vlgmr.msra.gmra.mrb[204].mxu0 %vm408_vm2, %v10462_v57  ;;  %v2607_v41 = vadd.f32 %v2606_v28, %v9989_v6  ;;  %v10581_v17 = vld [vmem:[%s9621_s25 + $0x764] ss:$72 sps:$4 sm:$0x3f]  }
 0x1b3   : > { %v2780_v39 = vmax.f32 %v2554_v36, 0.0  ;;  %5309 = vmatpush1.bf16.msra.mxu1 %v9383_v5  ;;  %5767 = vmatpush1.bf16.msra.mxu0 %v9386_v10  ;;  %v2764_v11 = vmax.f32 %v2603_v38, 0.0  ;;  %v2781_v50 = vmax.f32 %v2605_v30, 0.0 }
 0x1b4   : > { %v2835_v35 = vadd.f32 %v2834_v29, %v2762_v31  ;;  %v2853_v45 = vadd.f32 %v2852_v46, %v2779_v32  ;;  %5244 = vmatprep.mubr.bf16.mxu1 %v9569_v0  ;;  %5297 = vmatprep.mubr.bf16.mxu0 %v9569_v0  ;;  %v2782_v44 = vmax.f32 %v2607_v41, 0.0  ;;  %v9398_v41 = vld [vmem:[%s9621_s25 + $0x6d0] ss:$72 sps:$4 sm:$0xff]  }
 0x1b5   : > { %v2643_v56 = vpop.f32.mrb[100].mxu1  ;;  %v2696_v54 = vpop.f32.mrb[100].mxu0  ;;  %5310 = vmatprep.subr.bf16.mxu1 %v4882_v23  ;;  %5768 = vmatprep.subr.bf16.mxu0 %v5716_v20  ;;  %v10584_v20 = vld [vmem:[%s9621_s25 + $0x760] ss:$72 sps:$4 sm:$0x3f]  }
 0x1b6   : > { %v2836_v53 = vadd.f32 %v2835_v35, %v2763_v34  ;;  %v2854_v52 = vadd.f32 %v2853_v45, %v2780_v39  ;;  %v2644_v58 = vadd.f32 %v2643_v56, %v9979_v3  ;;  %v2645_v59 = vpop.f32.mrb[101].mxu1  ;;  %v2697_v55 = vadd.f32 %v2696_v54, %v9979_v3  ;;  %v2698_v46 = vpop.f32.mrb[101].mxu0  ;;  %v9395_v39 = vld [vmem:[%s9621_s25 + $0x6c8] ss:$72 sps:$4 sm:$0xff]  }
 0x1b7   : > { %v2646_v60 = vadd.f32 %v2645_v59, %v9979_v3  ;;  %v2647_v42 = vpop.f32.mrb[102].mxu1  ;;  %v2700_v62 = vpop.f32.mrb[102].mxu0  ;;  %5311 = vmatpush1.bf16.msra.mxu1 %v4879_v43  ;;  %5769 = vmatpush1.bf16.msra.mxu0 %v5713_v40  ;;  %v5722_v43 = vand.u32 %v10568_v8, %v9625_v9  ;;  %v5719_v40 = vand.u32 %v10576_v21, %v9625_v9 }
 0x1b8   : > { %v2837_v63 = vadd.f32 %v2836_v53, %v2764_v11  ;;  %v2855_v1 = vadd.f32 %v2854_v52, %v2781_v50  ;;  %v2729_v2 = vmax.f32 %v2644_v58, 0.0  ;;  %v2648_v4 = vadd.f32 %v2647_v42, %v9991_v7  ;;  %v2649_v5 = vpop.f32.mrb[103].mxu1  ;;  %v2702_v10 = vpop.f32.mrb[103].mxu0  ;;  %5819 = vmatprep.subr.bf16.mxu1 %v9397_v47  ;;  %5872 = vmatprep.subr.bf16.mxu0 %v9400_v49 }
 0x1b9   : > { %v2730_v48 = vmax.f32 %v2646_v60, 0.0  ;;  %v2731_v13 = vmax.f32 %v2697_v55, 0.0  ;;  %v2650_v18 = vadd.f32 %v2649_v5, %v9991_v7  ;;  %v2701_v61 = vadd.f32 %v2700_v62, %v9991_v7  ;;  %v9409_v5 = vld [vmem:[%s9621_s25 + $0x6dc] ss:$72 sps:$4 sm:$0xff]  }
 0x1ba   : > { %v2856_v51 = vadd.f32 %v2855_v1, %v2782_v44  ;;  %v2800_v19 = vadd.f32 %v2799_v24, %v2729_v2  ;;  %v2747_v12 = vmax.f32 %v2648_v4, 0.0  ;;  %8768 = vmatmul.mubr.msk.bf16.gmra.mrb[208].mxu1 %vm408_vm2, %v10486_v37  ;;  %8770 = vmatmul.mubr.msk.bf16.gmra.mrb[208].mxu0 %vm408_vm2, %v10486_v37  ;;  %v2699_v24 = vadd.f32 %v2698_v46, %v9979_v3 }
 0x1bb   : > { %v2748_v15 = vmax.f32 %v2650_v18, 0.0  ;;  %5340 = vmatprep.mubr.bf16.mxu1 %v9569_v0  ;;  %5798 = vmatprep.mubr.bf16.mxu0 %v9569_v0  ;;  %v2749_v25 = vmax.f32 %v2701_v61, 0.0  ;;  %v2703_v33 = vadd.f32 %v2702_v10, %v9991_v7  ;;  %v5728_v35 = vand.u32 %v10581_v17, %v9625_v9  ;;  %v9412_v18 = vld [vmem:[%s9621_s25 + $0x6e4] ss:$72 sps:$4 sm:$0xff]  }
 0x1bc   : > { %v2801_v23 = vadd.f32 %v2800_v19, %v2730_v48  ;;  %v2819_v22 = vadd.f32 %v2818_v16, %v2747_v12  ;;  %v5725_v50 = vand.u32 %v10584_v20, %v9625_v9  ;;  %v2732_v56 = vmax.f32 %v2699_v24, 0.0 }
 0x1bd   : > { %v2653_v26 = vpop.f32.mrb[104].mxu1  ;;  %v2706_v27 = vpop.f32.mrb[104].mxu0  ;;  %v2750_v54 = vmax.f32 %v2703_v33, 0.0 }
 0x1be   : > { %v2802_v28 = vadd.f32 %v2801_v23, %v2731_v13  ;;  %v2820_v31 = vadd.f32 %v2819_v22, %v2748_v15  ;;  %v2654_v34 = vadd.f32 %v2653_v26, %v9977_v14  ;;  %v2655_v36 = vpop.f32.mrb[105].mxu1  ;;  %v2707_v38 = vadd.f32 %v2706_v27, %v9977_v14  ;;  %v2708_v29 = vpop.f32.mrb[105].mxu0 }
 0x1bf   : > { %v2656_v16 = vadd.f32 %v2655_v36, %v9977_v14  ;;  %v2657_v32 = vpop.f32.mrb[106].mxu1  ;;  %v2710_v30 = vpop.f32.mrb[106].mxu0  ;;  %v2709_v42 = vadd.f32 %v2708_v29, %v9977_v14 }
 0x1c0   : > { %v2821_v45 = vadd.f32 %v2820_v31, %v2749_v25  ;;  %v2765_v47 = vmax.f32 %v2654_v34, 0.0  ;;  %v2658_v49 = vadd.f32 %v2657_v32, %v9989_v6  ;;  %v2659_v11 = vpop.f32.mrb[107].mxu1  ;;  %v2712_v58 = vpop.f32.mrb[107].mxu0  ;;  %v2767_v46 = vmax.f32 %v2707_v38, 0.0 }
 0x1c1   : > { %v2766_v53 = vmax.f32 %v2656_v16, 0.0  ;;  %v2660_v52 = vadd.f32 %v2659_v11, %v9989_v6  ;;  %v2711_v44 = vadd.f32 %v2710_v30, %v9989_v6  ;;  %v2803_v62 = vadd.f32 %v2802_v28, %v2732_v56 }
 0x1c2   : > { %v2838_v59 = vadd.f32 %v2837_v63, %v2765_v47  ;;  %v2783_v55 = vmax.f32 %v2658_v49, 0.0  ;;  %8771 = vmatmul.mubr.msk.bf16.vlgmr.msra.gmra.mrb[212].mxu1 %vm408_vm2, %v10462_v57  ;;  %8845 = vmatmul.mubr.msk.bf16.vlgmr.msra.gmra.mrb[212].mxu0 %vm408_vm2, %v10462_v57  ;;  %v2822_v1 = vadd.f32 %v2821_v45, %v2750_v54  ;;  %v2713_v4 = vadd.f32 %v2712_v58, %v9989_v6  ;;  %v9418_v45 = vld [vmem:[%s9621_s25 + $0x774] ss:$72 sps:$4 sm:$0x3f]  }
 0x1c3   : > { %v2784_v60 = vmax.f32 %v2660_v52, 0.0  ;;  %5820 = vmatpush1.bf16.msra.mxu1 %v9395_v39  ;;  %5873 = vmatpush1.bf16.msra.mxu0 %v9398_v41  ;;  %v2785_v10 = vmax.f32 %v2711_v44, 0.0  ;;  %v2768_v15 = vmax.f32 %v2709_v42, 0.0  ;;  %v9415_v39 = vld [vmem:[%s9621_s25 + $0x76c] ss:$72 sps:$4 sm:$0x3f]  }
 0x1c4   : > { %v2839_v63 = vadd.f32 %v2838_v59, %v2766_v53  ;;  %v2857_v2 = vadd.f32 %v2856_v51, %v2783_v55  ;;  %5350 = vmatprep.mubr.bf16.mxu1 %v9569_v0  ;;  %5808 = vmatprep.mubr.bf16.mxu0 %v9569_v0  ;;  %v2786_v25 = vmax.f32 %v2713_v4, 0.0  ;;  %v9413_v52 = vld [vmem:[%s9621_s25 + $0x768] ss:$72 sps:$4 sm:$0x3f]   ;;  %v5734_v58 = vand.u32 %v9415_v39, %v9625_v9 }
 0x1c5   : > { %2804 = vadd.xlane.f32.xlu1 %v2803_v62  ;;  %2823 = vadd.xlane.f32.xlu0 %v2822_v1  ;;  %v3154_v48 = vpop.f32.mrb[108].mxu1  ;;  %v3207_v13 = vpop.f32.mrb[108].mxu0  ;;  %v9407_v62 = vld [vmem:[%s9621_s25 + $0x6d8] ss:$72 sps:$4 sm:$0xff]  }
 0x1c6   : > { %v2840_v8 = vadd.f32 %v2839_v63, %v2767_v46  ;;  %v2858_v19 = vadd.f32 %v2857_v2, %v2784_v60  ;;  %v3155_v12 = vadd.f32 %v3154_v48, %v9979_v3  ;;  %v3156_v61 = vpop.f32.mrb[109].mxu1  ;;  %v3208_v51 = vadd.f32 %v3207_v13, %v9979_v3  ;;  %v3209_v21 = vpop.f32.mrb[109].mxu0  ;;  %5821 = vmatprep.subr.bf16.mxu1 %v5722_v43  ;;  %v9410_v1 = vld [vmem:[%s9621_s25 + $0x6e0] ss:$72 sps:$4 sm:$0xff]  }
 0x1c7   : > { %v3157_v17 = vadd.f32 %v3156_v61, %v9979_v3  ;;  %v3158_v23 = vpop.f32.mrb[110].mxu1  ;;  %v3210_v22 = vadd.f32 %v3209_v21, %v9979_v3  ;;  %v3211_v20 = vpop.f32.mrb[110].mxu0  ;;  %5822 = vmatpush1.bf16.msra.mxu1 %v5719_v40  ;;  %5874 = vmatprep.subr.bf16.mxu0 %v5728_v35  ;;  %v9416_v48 = vld [vmem:[%s9621_s25 + $0x770] ss:$72 sps:$4 sm:$0x3f]   ;;  %v5740_v13 = vand.u32 %v9418_v45, %v9625_v9 }
 0x1c8   : > { %v2859_v24 = vadd.f32 %v2858_v19, %v2785_v10  ;;  %v3597_v33 = vmax.f32 %v3155_v12, 0.0  ;;  %v3159_v26 = vadd.f32 %v3158_v23, %v9991_v7  ;;  %v3160_v27 = vpop.f32.mrb[111].mxu1  ;;  %v3213_v28 = vpop.f32.mrb[111].mxu0  ;;  %5875 = vmatpush1.bf16.msra.mxu0 %v5725_v50  ;;  %5925 = vmatprep.subr.bf16.mxu1 %v9409_v5  ;;  %v3599_v34 = vmax.f32 %v3208_v51, 0.0 }
 0x1c9   : > { %v3598_v31 = vmax.f32 %v3157_v17, 0.0  ;;  %v3161_v36 = vadd.f32 %v3160_v27, %v9991_v7  ;;  %v3212_v38 = vadd.f32 %v3211_v20, %v9991_v7  ;;  %5978 = vmatprep.subr.bf16.mxu0 %v9412_v18  ;;  %v3600_v16 = vmax.f32 %v3210_v22, 0.0 }
 0x1ca   : > { %v3615_v29 = vmax.f32 %v3159_v26, 0.0  ;;  %v3214_v32 = vadd.f32 %v3213_v28, %v9991_v7  ;;  %8772 = vmatmul.mubr.msk.bf16.gmra.mrb[216].mxu1 %vm408_vm2, %v10486_v37  ;;  %8846 = vmatmul.mubr.msk.bf16.gmra.mrb[216].mxu0 %vm408_vm2, %v10486_v37  ;;  %v2841_v30 = vadd.f32 %v2840_v8, %v2768_v15  ;;  %v2860_v35 = vadd.f32 %v2859_v24, %v2786_v25 }
 0x1cb   : > { %v3669_v41 = vadd.f32 %v3598_v31, %v3597_v33  ;;  %v3616_v43 = vmax.f32 %v3161_v36, 0.0  ;;  %v3617_v40 = vmax.f32 %v3212_v38, 0.0  ;;  %5851 = vmatprep.mubr.bf16.mxu1 %v9569_v0  ;;  %5904 = vmatprep.mubr.bf16.mxu0 %v9569_v0  ;;  %v5731_v15 = vand.u32 %v9413_v52, %v9625_v9  ;;  %v9421_v33 = vld [vmem:[%s9621_s25 + $0x6ec] ss:$72 sps:$4 sm:$0xff]  }
 0x1cc   : > { %2842 = vadd.xlane.f32.xlu1 %v2841_v30  ;;  %2861 = vadd.xlane.f32.xlu0 %v2860_v35  ;;  %v3618_v50 = vmax.f32 %v3214_v32, 0.0  ;;  %v5737_v25 = vand.u32 %v9416_v48, %v9625_v9 }
 0x1cd   : > { %v3670_v47 = vadd.f32 %v3669_v41, %v3599_v34  ;;  %v3688_v49 = vadd.f32 %v3616_v43, %v3615_v29  ;;  %v3164_v11 = vpop.f32.mrb[112].mxu1  ;;  %v3217_v53 = vpop.f32.mrb[112].mxu0  ;;  %v9424_v34 = vld [vmem:[%s9621_s25 + $0x6f4] ss:$72 sps:$4 sm:$0xff]  }
 0x1ce   : > { %v3165_v56 = vadd.f32 %v3164_v11, %v9977_v14  ;;  %v3166_v54 = vpop.f32.mrb[113].mxu1  ;;  %v3218_v60 = vadd.f32 %v3217_v53, %v9977_v14  ;;  %v3219_v42 = vpop.f32.mrb[113].mxu0 }
 0x1cf   : > { %v10633_v59 = vadd.f32 %v3670_v47, %v3600_v16  ;;  %v3689_v55 = vadd.f32 %v3688_v49, %v3617_v40  ;;  %v3167_v46 = vadd.f32 %v3166_v54, %v9977_v14  ;;  %v3168_v44 = vpop.f32.mrb[114].mxu1  ;;  %v3220_v5 = vadd.f32 %v3219_v42, %v9977_v14  ;;  %v3221_v10 = vpop.f32.mrb[114].mxu0 }
 0x1d0   : > { %v3633_v63 = vmax.f32 %v3165_v56, 0.0  ;;  %v3169_v2 = vadd.f32 %v3168_v44, %v9989_v6  ;;  %v3170_v4 = vpop.f32.mrb[115].mxu1  ;;  %v3635_v19 = vmax.f32 %v3218_v60, 0.0  ;;  %v3223_v61 = vpop.f32.mrb[115].mxu0  ;;  %v3222_v21 = vadd.f32 %v3221_v10, %v9989_v6  ;;  %v9422_v10 = vld [vmem:[%s9621_s25 + $0x6f0] ss:$72 sps:$4 sm:$0xff]  }
 0x1d1   : > { %v10643_v18 = vadd.f32 %v3689_v55, %v3618_v50  ;;  %v3634_v8 = vmax.f32 %v3167_v46, 0.0  ;;  %v3171_v12 = vadd.f32 %v3170_v4, %v9989_v6  ;;  %v3636_v22 = vmax.f32 %v3220_v5, 0.0  ;;  %v9427_v46 = vld [vmem:[%s9621_s25 + $0x77c] ss:$72 sps:$4 sm:$0x3f]  }
 0x1d2   : > { %v3651_v51 = vmax.f32 %v3169_v2, 0.0  ;;  %8847 = vmatmul.mubr.msk.bf16.vlgmr.msra.gmra.mrb[220].mxu1 %vm408_vm2, %v10462_v57  ;;  %8849 = vmatmul.mubr.msk.bf16.vlgmr.msra.gmra.mrb[220].mxu0 %vm408_vm2, %v10462_v57  ;;  %v3224_v20 = vadd.f32 %v3223_v61, %v9989_v6  ;;  %v3653_v24 = vmax.f32 %v3222_v21, 0.0  ;;  %v9419_v5 = vld [vmem:[%s9621_s25 + $0x6e8] ss:$72 sps:$4 sm:$0xff]  }
 0x1d3   : > { %v3707_v17 = vadd.f32 %v3634_v8, %v3633_v63  ;;  %v3652_v23 = vmax.f32 %v3171_v12, 0.0  ;;  %5926 = vmatpush1.bf16.msra.mxu1 %v9407_v62  ;;  %5979 = vmatpush1.bf16.msra.mxu0 %v9410_v1 }
 0x1d4   : > { %5861 = vmatprep.mubr.bf16.mxu1 %v9569_v0  ;;  %5914 = vmatprep.mubr.bf16.mxu0 %v9569_v0  ;;  %v3654_v39 = vmax.f32 %v3224_v20, 0.0 }
 0x1d5   : > { %v3708_v26 = vadd.f32 %v3707_v17, %v3635_v19  ;;  %v3726_v27 = vadd.f32 %v3652_v23, %v3651_v51  ;;  %v3260_v28 = vpop.f32.mrb[116].mxu1  ;;  %v3313_v31 = vpop.f32.mrb[116].mxu0  ;;  %5927 = vmatprep.subr.bf16.mxu1 %v5734_v58  ;;  %5980 = vmatprep.subr.bf16.mxu0 %v5740_v13  ;;  %v9425_v51 = vld [vmem:[%s9621_s25 + $0x778] ss:$72 sps:$4 sm:$0x3f]   ;;  %v5746_v23 = vand.u32 %v9427_v46, %v9625_v9 }
 0x1d6   : > { %v3261_v36 = vadd.f32 %v3260_v28, %v9979_v3  ;;  %v3262_v38 = vpop.f32.mrb[117].mxu1  ;;  %v3314_v29 = vadd.f32 %v3313_v31, %v9979_v3  ;;  %v3315_v16 = vpop.f32.mrb[117].mxu0 }
 0x1d7   : > { %v10660_v32 = vadd.f32 %v3708_v26, %v3636_v22  ;;  %v3727_v30 = vadd.f32 %v3726_v27, %v3653_v24  ;;  %v3263_v41 = vadd.f32 %v3262_v38, %v9979_v3  ;;  %v3264_v43 = vpop.f32.mrb[118].mxu1  ;;  %v3317_v40 = vpop.f32.mrb[118].mxu0  ;;  %5928 = vmatpush1.bf16.msra.mxu1 %v5731_v15  ;;  %v3316_v49 = vadd.f32 %v3315_v16, %v9979_v3  ;;  %v9428_v22 = vld [vmem:[%s9621_s25 + $0x780] ss:$72 sps:$4 sm:$0x3f]  }
 0x1d8   : > { %v3601_v35 = vmax.f32 %v3261_v36, 0.0  ;;  %v3265_v45 = vadd.f32 %v3264_v43, %v9991_v7  ;;  %v3266_v47 = vpop.f32.mrb[119].mxu1  ;;  %v3319_v11 = vpop.f32.mrb[119].mxu0  ;;  %5981 = vmatpush1.bf16.msra.mxu0 %v5737_v25  ;;  %6031 = vmatprep.subr.bf16.mxu1 %v9421_v33  ;;  %v3318_v53 = vadd.f32 %v3317_v40, %v9991_v7  ;;  %v3603_v55 = vmax.f32 %v3314_v29, 0.0 }
 0x1d9   : > { %v3728_v50 = vadd.f32 %v3727_v30, %v3654_v39  ;;  %v3602_v56 = vmax.f32 %v3263_v41, 0.0  ;;  %v3267_v54 = vadd.f32 %v3266_v47, %v9991_v7  ;;  %6084 = vmatprep.subr.bf16.mxu0 %v9424_v34  ;;  %v3320_v60 = vadd.f32 %v3319_v11, %v9991_v7  ;;  %v9433_v47 = vld [vmem:[%s9621_s25 + $0x6fc] ss:$72 sps:$4 sm:$0xff]  }
 0x1da   : > { %v3672_v52 = vadd.f32 %v10633_v59, %v3601_v35  ;;  %v3619_v58 = vmax.f32 %v3265_v45, 0.0  ;;  %8848 = vmatmul.mubr.msk.bf16.gmra.mrb[224].mxu1 %vm408_vm2, %v10486_v37  ;;  %8850 = vmatmul.mubr.msk.bf16.gmra.mrb[224].mxu0 %vm408_vm2, %v10486_v37  ;;  %v9430_v59 = vld [vmem:[%s9621_s25 + $0x784] ss:$72 sps:$4 sm:$0x3f]   ;;  %v3604_v1 = vmax.f32 %v3316_v49, 0.0  ;;  %v3621_v63 = vmax.f32 %v3318_v53, 0.0 }
 0x1db   : > { %v3620_v44 = vmax.f32 %v3267_v54, 0.0  ;;  %5957 = vmatprep.mubr.bf16.mxu1 %v9569_v0  ;;  %6010 = vmatprep.mubr.bf16.mxu0 %v9569_v0  ;;  %v3622_v21 = vmax.f32 %v3320_v60, 0.0  ;;  %v5752_v20 = vand.u32 %v9430_v59, %v9625_v9  ;;  %v5743_v40 = vand.u32 %v9425_v51, %v9625_v9  ;;  %v9436_v49 = vld [vmem:[%s9621_s25 + $0x704] ss:$72 sps:$4 sm:$0xff]  }
 0x1dc   : > { %v3673_v42 = vadd.f32 %v3672_v52, %v3602_v56  ;;  %v3691_v62 = vadd.f32 %v10643_v18, %v3619_v58  ;;  %v5749_v35 = vand.u32 %v9428_v22, %v9625_v9 }
 0x1dd   : > { %v3270_v2 = vpop.f32.mrb[120].mxu1  ;;  %v3323_v4 = vpop.f32.mrb[120].mxu0 }
 0x1de   : > { %v3674_v48 = vadd.f32 %v3673_v42, %v3603_v55  ;;  %v3692_v13 = vadd.f32 %v3691_v62, %v3620_v44  ;;  %v3271_v8 = vadd.f32 %v3270_v2, %v9977_v14  ;;  %v3272_v19 = vpop.f32.mrb[121].mxu1  ;;  %v3324_v12 = vadd.f32 %v3323_v4, %v9977_v14  ;;  %v3325_v61 = vpop.f32.mrb[121].mxu0 }
 0x1df   : > { %v3273_v15 = vadd.f32 %v3272_v19, %v9977_v14  ;;  %v3274_v18 = vpop.f32.mrb[122].mxu1  ;;  %v3327_v17 = vpop.f32.mrb[122].mxu0  ;;  %v3326_v38 = vadd.f32 %v3325_v61, %v9977_v14 }
 0x1e0   : > { %v3675_v24 = vadd.f32 %v3674_v48, %v3604_v1  ;;  %v3693_v25 = vadd.f32 %v3692_v13, %v3621_v63  ;;  %v3637_v33 = vmax.f32 %v3271_v8, 0.0  ;;  %v3275_v26 = vadd.f32 %v3274_v18, %v9989_v6  ;;  %v3276_v27 = vpop.f32.mrb[123].mxu1  ;;  %v3329_v28 = vpop.f32.mrb[123].mxu0 }
 0x1e1   : > { %v3638_v31 = vmax.f32 %v3273_v15, 0.0  ;;  %v3639_v34 = vmax.f32 %v3324_v12, 0.0  ;;  %v3277_v36 = vadd.f32 %v3276_v27, %v9989_v6  ;;  %v3328_v39 = vadd.f32 %v3327_v17, %v9989_v6  ;;  %v9442_v17 = vld [vmem:[%s9621_s25 + $0x794] ss:$72 sps:$4 sm:$0x3f]  }
 0x1e2   : > { %v3694_v29 = vadd.f32 %v3693_v25, %v3622_v21  ;;  %v3710_v16 = vadd.f32 %v10660_v32, %v3637_v33  ;;  %v3655_v30 = vmax.f32 %v3275_v26, 0.0  ;;  %8851 = vmatmul.mubr.msk.bf16.vlgmr.msra.gmra.mrb[228].mxu1 %vm408_vm2, %v10462_v57  ;;  %8853 = vmatmul.mubr.msk.bf16.vlgmr.msra.gmra.mrb[228].mxu0 %vm408_vm2, %v10462_v57  ;;  %v3330_v43 = vadd.f32 %v3329_v28, %v9989_v6  ;;  %v9439_v21 = vld [vmem:[%s9621_s25 + $0x78c] ss:$72 sps:$4 sm:$0x3f]   ;;  %v9431_v26 = vld [vmem:[%s9621_s25 + $0x6f8] ss:$72 sps:$4 sm:$0xff]  }
 0x1e3   : > { %v3656_v41 = vmax.f32 %v3277_v36, 0.0  ;;  %6032 = vmatpush1.bf16.msra.mxu1 %v9419_v5  ;;  %6085 = vmatpush1.bf16.msra.mxu0 %v9422_v10  ;;  %v3640_v11 = vmax.f32 %v3326_v38, 0.0  ;;  %v3657_v56 = vmax.f32 %v3328_v39, 0.0  ;;  %v9434_v27 = vld [vmem:[%s9621_s25 + $0x700] ss:$72 sps:$4 sm:$0xff]  }
 0x1e4   : > { %v3711_v32 = vadd.f32 %v3710_v16, %v3638_v31  ;;  %v3729_v45 = vadd.f32 %v3728_v50, %v3655_v30  ;;  %5967 = vmatprep.mubr.bf16.mxu1 %v9569_v0  ;;  %6020 = vmatprep.mubr.bf16.mxu0 %v9569_v0  ;;  %v3658_v44 = vmax.f32 %v3330_v43, 0.0  ;;  %v9437_v16 = vld [vmem:[%s9621_s25 + $0x788] ss:$72 sps:$4 sm:$0x3f]   ;;  %v5758_v43 = vand.u32 %v9439_v21, %v9625_v9 }
 0x1e5   : > { %v3366_v57 = vpop.f32.mrb[124].mxu1  ;;  %v3419_v54 = vpop.f32.mrb[124].mxu0  ;;  %6033 = vmatprep.subr.bf16.mxu1 %v5746_v23  ;;  %6086 = vmatprep.subr.bf16.mxu0 %v5752_v20 }
 0x1e6   : > { %v3712_v53 = vadd.f32 %v3711_v32, %v3639_v34  ;;  %v3730_v52 = vadd.f32 %v3729_v45, %v3656_v41  ;;  %v3367_v58 = vadd.f32 %v3366_v57, %v9979_v3  ;;  %v3368_v55 = vpop.f32.mrb[125].mxu1  ;;  %v3420_v46 = vadd.f32 %v3419_v54, %v9979_v3  ;;  %v3421_v50 = vpop.f32.mrb[125].mxu0 }
 0x1e7   : > { %v3369_v60 = vadd.f32 %v3368_v55, %v9979_v3  ;;  %v3370_v59 = vpop.f32.mrb[126].mxu1  ;;  %v3423_v42 = vpop.f32.mrb[126].mxu0  ;;  %6034 = vmatpush1.bf16.msra.mxu1 %v5743_v40  ;;  %6087 = vmatpush1.bf16.msra.mxu0 %v5749_v35  ;;  %v3422_v8 = vadd.f32 %v3421_v50, %v9979_v3  ;;  %v9440_v40 = vld [vmem:[%s9621_s25 + $0x790] ss:$72 sps:$4 sm:$0x3f]   ;;  %v5764_v35 = vand.u32 %v9442_v17, %v9625_v9 }
 0x1e8   : > { %v3713_v62 = vadd.f32 %v3712_v53, %v3640_v11  ;;  %v3731_v1 = vadd.f32 %v3730_v52, %v3657_v56  ;;  %v3605_v63 = vmax.f32 %v3367_v58, 0.0  ;;  %v3371_v2 = vadd.f32 %v3370_v59, %v9991_v7  ;;  %v3372_v4 = vpop.f32.mrb[127].mxu1  ;;  %v3425_v5 = vpop.f32.mrb[127].mxu0  ;;  %6137 = vmatprep.subr.bf16.mxu1 %v9433_v47  ;;  %6190 = vmatprep.subr.bf16.mxu0 %v9436_v49 }
 0x1e9   : > { %v3606_v10 = vmax.f32 %v3369_v60, 0.0  ;;  %v3607_v48 = vmax.f32 %v3420_v46, 0.0  ;;  %v3373_v13 = vadd.f32 %v3372_v4, %v9991_v7  ;;  %v3424_v51 = vadd.f32 %v3423_v42, %v9991_v7  ;;  %v9448_v4 = vld [vmem:[%s9621_s25 + $0x7ec] ss:$72 sps:$4 sm:$0xff]  }
 0x1ea   : > { %v3732_v19 = vadd.f32 %v3731_v1, %v3658_v44  ;;  %v3676_v12 = vadd.f32 %v3675_v24, %v3605_v63  ;;  %v3623_v61 = vmax.f32 %v3371_v2, 0.0  ;;  %8852 = vmatmul.mubr.msk.bf16.gmra.mrb[232].mxu1 %vm408_vm2, %v10486_v37  ;;  %8854 = vmatmul.mubr.msk.bf16.gmra.mrb[232].mxu0 %vm408_vm2, %v10486_v37  ;;  %v3426_v18 = vadd.f32 %v3425_v5, %v9991_v7  ;;  %v10737_v44 = vld [vmem:[%s11460_s1] sm:$0xff]  }
 0x1eb   : > { %v3624_v15 = vmax.f32 %v3373_v13, 0.0  ;;  %6063 = vmatprep.mubr.bf16.mxu1 %v9569_v0  ;;  %6116 = vmatprep.mubr.bf16.mxu0 %v9569_v0  ;;  %v3608_v20 = vmax.f32 %v3422_v8, 0.0  ;;  %v3625_v24 = vmax.f32 %v3424_v51, 0.0  ;;  %v5755_v42 = vand.u32 %v9437_v16, %v9625_v9  ;;  %v9445_v2 = vld [vmem:[%s9621_s25 + $0x7e4] ss:$72 sps:$4 sm:$0xff]  }
 0x1ec   : > { %v3677_v23 = vadd.f32 %v3676_v12, %v3606_v10  ;;  %v3695_v22 = vadd.f32 %v3694_v29, %v3623_v61  ;;  %v3626_v30 = vmax.f32 %v3426_v18, 0.0 }
 0x1ed   : > { %v3376_v25 = vpop.f32.mrb[128].mxu1  ;;  %v3429_v33 = vpop.f32.mrb[128].mxu0 }
 0x1ee   : > { %v3678_v37 = vadd.f32 %v3677_v23, %v3607_v48  ;;  %v3696_v28 = vadd.f32 %v3695_v22, %v3624_v15  ;;  %v3377_v31 = vadd.f32 %v3376_v25, %v9977_v14  ;;  %v3378_v34 = vpop.f32.mrb[129].mxu1  ;;  %v3430_v36 = vadd.f32 %v3429_v33, %v9977_v14  ;;  %v3431_v38 = vpop.f32.mrb[129].mxu0 }
 0x1ef   : > { %v3379_v39 = vadd.f32 %v3378_v34, %v9977_v14  ;;  %v3380_v29 = vpop.f32.mrb[130].mxu1  ;;  %v3433_v41 = vpop.f32.mrb[130].mxu0  ;;  %v3432_v52 = vadd.f32 %v3431_v38, %v9977_v14 }
 0x1f0   : > { %v3679_v32 = vadd.f32 %v3678_v37, %v3608_v20  ;;  %v3697_v45 = vadd.f32 %v3696_v28, %v3625_v24  ;;  %v3641_v47 = vmax.f32 %v3377_v31, 0.0  ;;  %v3381_v49 = vadd.f32 %v3380_v29, %v9989_v6  ;;  %v3382_v11 = vpop.f32.mrb[131].mxu1  ;;  %v3435_v56 = vpop.f32.mrb[131].mxu0 }
 0x1f1   : > { %v3642_v57 = vmax.f32 %v3379_v39, 0.0  ;;  %v3643_v54 = vmax.f32 %v3430_v36, 0.0  ;;  %v3383_v53 = vadd.f32 %v3382_v11, %v9989_v6  ;;  %v3434_v50 = vadd.f32 %v3433_v41, %v9989_v6  ;;  %v9451_v39 = vld [vmem:[%s9621_s25 + $0x874] ss:$72 sps:$4 sm:$0x3f]  }
 0x1f2   : > { %v10731_v58 = vadd.f32 %v3697_v45, %v3626_v30  ;;  %v3714_v55 = vadd.f32 %v3713_v62, %v3641_v47  ;;  %v3659_v46 = vmax.f32 %v3381_v49, 0.0  ;;  %8855 = vmatmul.mubr.msk.bf16.vlgmr.msra.gmra.mrb[236].mxu1 %vm408_vm2, %v10737_v44  ;;  %8857 = vmatmul.mubr.msk.bf16.vlgmr.msra.gmra.mrb[236].mxu0 %vm408_vm2, %v10737_v44  ;;  %v3436_v59 = vadd.f32 %v3435_v56, %v9989_v6  ;;  %v10760_v30 = vld [vmem:[%s11460_s1 + $0x8] sm:$0xff]  }
 0x1f3   : > { %v3660_v60 = vmax.f32 %v3383_v53, 0.0  ;;  %6138 = vmatpush1.bf16.msra.mxu1 %v9431_v26  ;;  %6191 = vmatpush1.bf16.msra.mxu0 %v9434_v27  ;;  %v5761_v62 = vand.u32 %v9440_v40, %v9625_v9  ;;  %v3644_v5 = vmax.f32 %v3432_v52, 0.0  ;;  %v3661_v10 = vmax.f32 %v3434_v50, 0.0  ;;  %v9443_v11 = vld [vmem:[%s9621_s25 + $0x7e0] ss:$72 sps:$4 sm:$0xff]  }
 0x1f4   : > { %v3715_v1 = vadd.f32 %v3714_v55, %v3642_v57  ;;  %v3733_v63 = vadd.f32 %v3732_v19, %v3659_v46  ;;  %6073 = vmatprep.mubr.bf16.mxu1 %v9569_v0  ;;  %6126 = vmatprep.mubr.bf16.mxu0 %v9569_v0  ;;  %v3662_v15 = vmax.f32 %v3436_v59, 0.0  ;;  %v9446_v56 = vld [vmem:[%s9621_s25 + $0x7e8] ss:$72 sps:$4 sm:$0xff]  }
 0x1f5   : > { %v3472_v48 = vpop.f32.mrb[132].mxu1  ;;  %v3525_v13 = vpop.f32.mrb[132].mxu0  ;;  %6139 = vmatprep.subr.bf16.mxu1 %v5758_v43  ;;  %6192 = vmatprep.subr.bf16.mxu0 %v5764_v35  ;;  %v9454_v43 = vld [vmem:[%s9621_s25 + $0x87c] ss:$72 sps:$4 sm:$0x3f]  }
 0x1f6   : > { %v3716_v8 = vadd.f32 %v3715_v1, %v3643_v54  ;;  %v3734_v12 = vadd.f32 %v3733_v63, %v3660_v60  ;;  %v3473_v61 = vadd.f32 %v3472_v48, %v9979_v3  ;;  %v3474_v51 = vpop.f32.mrb[133].mxu1  ;;  %v3526_v21 = vadd.f32 %v3525_v13, %v9979_v3  ;;  %v3527_v19 = vpop.f32.mrb[133].mxu0  ;;  %v9449_v50 = vld [vmem:[%s9621_s25 + $0x870] ss:$72 sps:$4 sm:$0x3f]  }
 0x1f7   : > { %v3475_v18 = vadd.f32 %v3474_v51, %v9979_v3  ;;  %v3476_v17 = vpop.f32.mrb[134].mxu1  ;;  %v3529_v23 = vpop.f32.mrb[134].mxu0  ;;  %6140 = vmatpush1.bf16.msra.mxu1 %v5755_v42  ;;  %6193 = vmatpush1.bf16.msra.mxu0 %v5761_v62  ;;  %v3528_v31 = vadd.f32 %v3527_v19, %v9979_v3  ;;  %v6598_v62 = vand.u32 %v9451_v39, %v9625_v9  ;;  %v9452_v1 = vld [vmem:[%s9621_s25 + $0x878] ss:$72 sps:$4 sm:$0x3f]  }
 0x1f8   : > { %v3717_v22 = vadd.f32 %v3716_v8, %v3644_v5  ;;  %v3735_v20 = vadd.f32 %v3734_v12, %v3661_v10  ;;  %v3609_v24 = vmax.f32 %v3473_v61, 0.0  ;;  %v3477_v25 = vadd.f32 %v3476_v17, %v9991_v7  ;;  %v3478_v33 = vpop.f32.mrb[135].mxu1  ;;  %v3531_v26 = vpop.f32.mrb[135].mxu0  ;;  %6648 = vmatprep.subr.bf16.mxu1 %v9445_v2  ;;  %6701 = vmatprep.subr.bf16.mxu0 %v9448_v4 }
 0x1f9   : > { %v3610_v27 = vmax.f32 %v3475_v18, 0.0  ;;  %v3611_v37 = vmax.f32 %v3526_v21, 0.0  ;;  %v3479_v28 = vadd.f32 %v3478_v33, %v9991_v7  ;;  %v3530_v16 = vadd.f32 %v3529_v23, %v9991_v7  ;;  %v9457_v33 = vld [vmem:[%s9621_s25 + $0x7f4] ss:$72 sps:$4 sm:$0xff]  }
 0x1fa   : > { %v3736_v34 = vadd.f32 %v3735_v20, %v3662_v15  ;;  %v3680_v36 = vadd.f32 %v3679_v32, %v3609_v24  ;;  %v3627_v38 = vmax.f32 %v3477_v25, 0.0  ;;  %8856 = vmatmul.mubr.msk.bf16.gmra.mrb[240].mxu1 %vm408_vm2, %v10760_v30  ;;  %8858 = vmatmul.mubr.msk.bf16.gmra.mrb[240].mxu0 %vm408_vm2, %v10760_v30  ;;  %v3532_v41 = vadd.f32 %v3531_v26, %v9991_v7  ;;  %v9460_v26 = vld [vmem:[%s9621_s25 + $0x7fc] ss:$72 sps:$4 sm:$0xff]  }
 0x1fb   : > { %v3628_v29 = vmax.f32 %v3479_v28, 0.0  ;;  %6169 = vmatprep.mubr.bf16.mxu1 %v9569_v0  ;;  %6222 = vmatprep.mubr.bf16.mxu0 %v9569_v0  ;;  %v3612_v32 = vmax.f32 %v3528_v31, 0.0  ;;  %v3629_v45 = vmax.f32 %v3530_v16, 0.0  ;;  %v6604_v63 = vand.u32 %v9454_v43, %v9625_v9 }
 0x1fc   : > { %v3681_v40 = vadd.f32 %v3680_v36, %v3610_v27  ;;  %v3699_v35 = vadd.f32 %v10731_v58, %v3627_v38  ;;  %v3630_v60 = vmax.f32 %v3532_v41, 0.0  ;;  %v6595_v20 = vand.u32 %v9449_v50, %v9625_v9 }
 0x1fd   : > { %v3482_v47 = vpop.f32.mrb[136].mxu1  ;;  %v3535_v49 = vpop.f32.mrb[136].mxu0  ;;  %v6601_v24 = vand.u32 %v9452_v1, %v9625_v9  ;;  %v9463_v1 = vld [vmem:[%s9621_s25 + $0x884] ss:$72 sps:$4 sm:$0x3f]  }
 0x1fe   : > { %v3682_v57 = vadd.f32 %v3681_v40, %v3611_v37  ;;  %v3700_v54 = vadd.f32 %v3699_v35, %v3628_v29  ;;  %v3483_v53 = vadd.f32 %v3482_v47, %v9977_v14  ;;  %v3484_v52 = vpop.f32.mrb[137].mxu1  ;;  %v3536_v55 = vadd.f32 %v3535_v49, %v9977_v14  ;;  %v3537_v46 = vpop.f32.mrb[137].mxu0 }
 0x1ff   : > { %v3485_v59 = vadd.f32 %v3484_v52, %v9977_v14  ;;  %v3486_v58 = vpop.f32.mrb[138].mxu1  ;;  %v3539_v42 = vpop.f32.mrb[138].mxu0  ;;  %v3538_v51 = vadd.f32 %v3537_v46, %v9977_v14 }
 0x200   : > { %v3683_v2 = vadd.f32 %v3682_v57, %v3612_v32  ;;  %v3701_v4 = vadd.f32 %v3700_v54, %v3629_v45  ;;  %v3645_v5 = vmax.f32 %v3483_v53, 0.0  ;;  %v3487_v10 = vadd.f32 %v3486_v58, %v9989_v6  ;;  %v3488_v48 = vpop.f32.mrb[139].mxu1  ;;  %v3541_v13 = vpop.f32.mrb[139].mxu0 }
 0x201   : > { %v3646_v8 = vmax.f32 %v3485_v59, 0.0  ;;  %v3647_v12 = vmax.f32 %v3536_v55, 0.0  ;;  %v3489_v61 = vadd.f32 %v3488_v48, %v9989_v6  ;;  %v3540_v18 = vadd.f32 %v3539_v42, %v9989_v6 }
 0x202   : > { %v3702_v21 = vadd.f32 %v3701_v4, %v3630_v60  ;;  %v3718_v19 = vadd.f32 %v3717_v22, %v3645_v5  ;;  %v3663_v15 = vmax.f32 %v3487_v10, 0.0  ;;  %8859 = vmatmul.mubr.msk.bf16.vlgmr.msra.gmra.mrb[244].mxu1 %vm408_vm2, %v10737_v44  ;;  %8861 = vmatmul.mubr.msk.bf16.vlgmr.msra.gmra.mrb[244].mxu0 %vm408_vm2, %v10737_v44  ;;  %v3542_v23 = vadd.f32 %v3541_v13, %v9989_v6  ;;  %v9466_v5 = vld [vmem:[%s9621_s25 + $0x88c] ss:$72 sps:$4 sm:$0x3f]  }
 0x203   : > { %v3664_v17 = vmax.f32 %v3489_v61, 0.0  ;;  %6649 = vmatpush1.bf16.msra.mxu1 %v9443_v11  ;;  %6702 = vmatpush1.bf16.msra.mxu0 %v9446_v56  ;;  %v3648_v27 = vmax.f32 %v3538_v51, 0.0  ;;  %v3665_v37 = vmax.f32 %v3540_v18, 0.0  ;;  %v9455_v51 = vld [vmem:[%s9621_s25 + $0x7f0] ss:$72 sps:$4 sm:$0xff]  }
 0x204   : > { %v3719_v22 = vadd.f32 %v3718_v19, %v3646_v8  ;;  %v3737_v25 = vadd.f32 %v3736_v34, %v3663_v15  ;;  %6179 = vmatprep.mubr.bf16.mxu1 %v9569_v0  ;;  %6232 = vmatprep.mubr.bf16.mxu0 %v9569_v0  ;;  %v3666_v41 = vmax.f32 %v3542_v23, 0.0  ;;  %v9458_v19 = vld [vmem:[%s9621_s25 + $0x7f8] ss:$72 sps:$4 sm:$0xff]  }
 0x205   : > { %v3578_v28 = vpop.f32.mrb[140].mxu1  ;;  %v4036_v31 = vpop.f32.mrb[140].mxu0  ;;  %6650 = vmatprep.subr.bf16.mxu1 %v6598_v62  ;;  %6703 = vmatprep.subr.bf16.mxu0 %v6604_v63 }
 0x206   : > { %v3720_v36 = vadd.f32 %v3719_v22, %v3647_v12  ;;  %v3738_v38 = vadd.f32 %v3737_v25, %v3664_v17  ;;  %v3579_v16 = vadd.f32 %v3578_v28, %v9979_v3  ;;  %v3580_v39 = vpop.f32.mrb[141].mxu1  ;;  %v4037_v29 = vadd.f32 %v4036_v31, %v9979_v3  ;;  %v4038_v34 = vpop.f32.mrb[141].mxu0 }
 0x207   : > { %v3581_v43 = vadd.f32 %v3580_v39, %v9979_v3  ;;  %v3582_v40 = vpop.f32.mrb[142].mxu1  ;;  %v4039_v35 = vadd.f32 %v4038_v34, %v9979_v3  ;;  %v4040_v32 = vpop.f32.mrb[142].mxu0  ;;  %6651 = vmatpush1.bf16.msra.mxu1 %v6595_v20  ;;  %6704 = vmatpush1.bf16.msra.mxu0 %v6601_v24  ;;  %v9461_v20 = vld [vmem:[%s9621_s25 + $0x880] ss:$72 sps:$4 sm:$0x3f]   ;;  %v6610_v24 = vand.u32 %v9463_v1, %v9625_v9 }
 0x208   : > { %v3721_v45 = vadd.f32 %v3720_v36, %v3648_v27  ;;  %v3739_v47 = vadd.f32 %v3738_v38, %v3665_v37  ;;  %v3613_v49 = vmax.f32 %v3579_v16, 0.0  ;;  %v3583_v11 = vadd.f32 %v3582_v40, %v9991_v7  ;;  %v3584_v56 = vpop.f32.mrb[143].mxu1  ;;  %v4042_v57 = vpop.f32.mrb[143].mxu0  ;;  %6754 = vmatprep.subr.bf16.mxu1 %v9457_v33  ;;  %6807 = vmatprep.subr.bf16.mxu0 %v9460_v26  ;;  %v9464_v37 = vld [vmem:[%s9621_s25 + $0x888] ss:$72 sps:$4 sm:$0x3f]  }
 0x209   : > { %v3614_v54 = vmax.f32 %v3581_v43, 0.0  ;;  %v4479_v53 = vmax.f32 %v4037_v29, 0.0  ;;  %v3585_v52 = vadd.f32 %v3584_v56, %v9991_v7  ;;  %v4480_v55 = vmax.f32 %v4039_v35, 0.0  ;;  %v9469_v56 = vld [vmem:[%s9621_s25 + $0x804] ss:$72 sps:$4 sm:$0xff]  }
 0x20a   : > { %v3740_v46 = vadd.f32 %v3739_v47, %v3666_v41  ;;  %v3684_v50 = vadd.f32 %v3683_v2, %v3613_v49  ;;  %v3631_v60 = vmax.f32 %v3583_v11, 0.0  ;;  %v4041_v59 = vadd.f32 %v4040_v32, %v9991_v7  ;;  %8860 = vmatmul.mubr.msk.bf16.gmra.mrb[248].mxu1 %vm408_vm2, %v10760_v30  ;;  %8862 = vmatmul.mubr.msk.bf16.gmra.mrb[248].mxu0 %vm408_vm2, %v10760_v30 }
 0x20b   : > { %v3632_v58 = vmax.f32 %v3585_v52, 0.0  ;;  %v10807_v42 = vadd.f32 %v4480_v55, %v4479_v53  ;;  %v4043_v62 = vadd.f32 %v4042_v57, %v9991_v7  ;;  %6680 = vmatprep.mubr.bf16.mxu1 %v9569_v0  ;;  %6733 = vmatprep.mubr.bf16.mxu0 %v9569_v0  ;;  %v6616_v28 = vand.u32 %v9466_v5, %v9625_v9  ;;  %v9472_v53 = vld [vmem:[%s9621_s25 + $0x80c] ss:$72 sps:$4 sm:$0xff]  }
 0x20c   : > { %v3703_v63 = vadd.f32 %v3702_v21, %v3631_v60  ;;  %v4497_v2 = vmax.f32 %v4041_v59, 0.0  ;;  %v3685_v4 = vadd.f32 %v3684_v50, %v3614_v54  ;;  %v6607_v32 = vand.u32 %v9461_v20, %v9625_v9 }
 0x20d   : > { %v4498_v10 = vmax.f32 %v4043_v62, 0.0  ;;  %v3588_v48 = vpop.f32.mrb[144].mxu1  ;;  %v4046_v12 = vpop.f32.mrb[144].mxu0  ;;  %v6613_v11 = vand.u32 %v9464_v37, %v9625_v9 }
 0x20e   : > { %v3589_v13 = vadd.f32 %v3588_v48, %v9977_v14  ;;  %v3590_v8 = vpop.f32.mrb[145].mxu1  ;;  %3686 = vadd.xlane.f32.xlu1 %v3685_v4  ;;  %v3704_v61 = vadd.f32 %v3703_v63, %v3632_v58  ;;  %v4047_v17 = vadd.f32 %v4046_v12, %v9977_v14  ;;  %v4048_v23 = vpop.f32.mrb[145].mxu0 }
 0x20f   : > { %v10817_v15 = vadd.f32 %v4498_v10, %v4497_v2  ;;  %v3591_v18 = vadd.f32 %v3590_v8, %v9977_v14  ;;  %v3592_v21 = vpop.f32.mrb[146].mxu1  ;;  %v4049_v26 = vadd.f32 %v4048_v23, %v9977_v14  ;;  %v4050_v27 = vpop.f32.mrb[146].mxu0 }
 0x210   : > { %v3649_v22 = vmax.f32 %v3589_v13, 0.0  ;;  %v3593_v25 = vadd.f32 %v3592_v21, %v9989_v6  ;;  %v3594_v33 = vpop.f32.mrb[147].mxu1  ;;  %3705 = vadd.xlane.f32.xlu0 %v3704_v61  ;;  %v4515_v36 = vmax.f32 %v4047_v17, 0.0  ;;  %v4051_v16 = vadd.f32 %v4050_v27, %v9989_v6  ;;  %v4052_v39 = vpop.f32.mrb[147].mxu0  ;;  %v9470_v27 = vld [vmem:[%s9621_s25 + $0x808] ss:$72 sps:$4 sm:$0xff]  }
 0x211   : > { %v3650_v31 = vmax.f32 %v3591_v18, 0.0  ;;  %v3595_v38 = vadd.f32 %v3594_v33, %v9989_v6  ;;  %v4516_v41 = vmax.f32 %v4049_v26, 0.0  ;;  %v4053_v43 = vadd.f32 %v4052_v39, %v9989_v6  ;;  %v9475_v18 = vld [vmem:[%s9621_s25 + $0x894] ss:$72 sps:$4 sm:$0x3f]  }
 0x212   : > { %v3722_v29 = vadd.f32 %v3721_v45, %v3649_v22  ;;  %v3667_v34 = vmax.f32 %v3593_v25, 0.0  ;;  %8935 = vmatmul.mubr.msk.bf16.vlgmr.msra.gmra.mrb[252].mxu1 %vm408_vm2, %v10737_v44  ;;  %8937 = vmatmul.mubr.msk.bf16.vlgmr.msra.gmra.mrb[252].mxu0 %vm408_vm2, %v10737_v44  ;;  %v4533_v35 = vmax.f32 %v4051_v16, 0.0  ;;  %v9467_v26 = vld [vmem:[%s9621_s25 + $0x800] ss:$72 sps:$4 sm:$0xff]  }
 0x213   : > { %v3668_v40 = vmax.f32 %v3595_v38, 0.0  ;;  %6755 = vmatpush1.bf16.msra.mxu1 %v9455_v51  ;;  %6808 = vmatpush1.bf16.msra.mxu0 %v9458_v19  ;;  %v10835_v45 = vadd.f32 %v4516_v41, %v4515_v36  ;;  %v4534_v49 = vmax.f32 %v4053_v43, 0.0  ;;  %v9473_v39 = vld [vmem:[%s9621_s25 + $0x890] ss:$72 sps:$4 sm:$0x3f]   ;;  %v6622_v43 = vand.u32 %v9475_v18, %v9625_v9 }
 0x214   : > { %v3741_v47 = vadd.f32 %v3740_v46, %v3667_v34  ;;  %6690 = vmatprep.mubr.bf16.mxu1 %v9569_v0  ;;  %6743 = vmatprep.mubr.bf16.mxu0 %v9569_v0  ;;  %v3723_v54 = vadd.f32 %v3722_v29, %v3650_v31 }
 0x215   : > { %v4089_v57 = vpop.f32.mrb[148].mxu1  ;;  %6756 = vmatprep.subr.bf16.mxu1 %v6610_v24  ;;  %6809 = vmatprep.subr.bf16.mxu0 %v6616_v28  ;;  %v10842_v52 = vadd.f32 %v4534_v49, %v4533_v35  ;;  %v4142_v50 = vpop.f32.mrb[148].mxu0 }
 0x216   : > { %v4090_v55 = vadd.f32 %v4089_v57, %v9979_v3  ;;  %v4091_v46 = vpop.f32.mrb[149].mxu1  ;;  %3724 = vadd.xlane.f32.xlu1 %v3723_v54  ;;  %v4143_v58 = vadd.f32 %v4142_v50, %v9979_v3  ;;  %v4144_v62 = vpop.f32.mrb[149].mxu0  ;;  %v3742_v1 = vadd.f32 %v3741_v47, %v3668_v40  ;;  %v9476_v40 = vld [vmem:[%s9621_s25 + $0x898] ss:$72 sps:$4 sm:$0x3f]  }
 0x217   : > { %v4092_v60 = vadd.f32 %v4091_v46, %v9979_v3  ;;  %v4093_v59 = vpop.f32.mrb[150].mxu1  ;;  %6757 = vmatpush1.bf16.msra.mxu1 %v6607_v32  ;;  %v4146_v5 = vpop.f32.mrb[150].mxu0  ;;  %6810 = vmatpush1.bf16.msra.mxu0 %v6613_v11  ;;  %v4145_v13 = vadd.f32 %v4144_v62, %v9979_v3 }
 0x218   : > { %v4481_v63 = vmax.f32 %v4090_v55, 0.0  ;;  %v4094_v2 = vadd.f32 %v4093_v59, %v9991_v7  ;;  %v4095_v4 = vpop.f32.mrb[151].mxu1  ;;  %6860 = vmatprep.subr.bf16.mxu1 %v9469_v56  ;;  %3743 = vadd.xlane.f32.xlu0 %v3742_v1  ;;  %v4147_v8 = vadd.f32 %v4146_v5, %v9991_v7  ;;  %v4148_v12 = vpop.f32.mrb[151].mxu0  ;;  %v4483_v19 = vmax.f32 %v4143_v58, 0.0  ;;  %v9481_v5 = vld [vmem:[%s9621_s25 + $0x814] ss:$72 sps:$4 sm:$0xff]  }
 0x219   : > { %v4482_v10 = vmax.f32 %v4092_v60, 0.0  ;;  %v4096_v48 = vadd.f32 %v4095_v4, %v9991_v7  ;;  %6913 = vmatprep.subr.bf16.mxu0 %v9472_v53  ;;  %v4149_v17 = vadd.f32 %v4148_v12, %v9991_v7  ;;  %v4484_v24 = vmax.f32 %v4145_v13, 0.0 }
 0x21a   : > { %v4552_v61 = vadd.f32 %v10807_v42, %v4481_v63  ;;  %v4499_v51 = vmax.f32 %v4094_v2, 0.0  ;;  %8936 = vmatmul.mubr.msk.bf16.gmra.mrb[0].mxu1 %vm408_vm2, %v10760_v30  ;;  %8938 = vmatmul.mubr.msk.bf16.gmra.mrb[0].mxu0 %vm408_vm2, %v10760_v30  ;;  %v9478_v42 = vld [vmem:[%s9621_s25 + $0x89c] ss:$72 sps:$4 sm:$0x3f]   ;;  %v4501_v22 = vmax.f32 %v4147_v8, 0.0  ;;  %v6619_v63 = vand.u32 %v9473_v39, %v9625_v9 }
 0x21b   : > { %v4500_v21 = vmax.f32 %v4096_v48, 0.0  ;;  %6786 = vmatprep.mubr.bf16.mxu1 %v9569_v0  ;;  %6839 = vmatprep.mubr.bf16.mxu0 %v9569_v0  ;;  %v4502_v29 = vmax.f32 %v4149_v17, 0.0  ;;  %v6628_v35 = vand.u32 %v9478_v42, %v9625_v9  ;;  %v6625_v2 = vand.u32 %v9476_v40, %v9625_v9 }
 0x21c   : > { %v4553_v23 = vadd.f32 %v4552_v61, %v4482_v10  ;;  %v4571_v20 = vadd.f32 %v10817_v15, %v4499_v51  ;;  %v9484_v10 = vld [vmem:[%s9621_s25 + $0x81c] ss:$72 sps:$4 sm:$0xff]  }
 0x21d   : > { %v4099_v25 = vpop.f32.mrb[152].mxu1  ;;  %v4152_v33 = vpop.f32.mrb[152].mxu0 }
 0x21e   : > { %v4554_v37 = vadd.f32 %v4553_v23, %v4483_v19  ;;  %v4572_v28 = vadd.f32 %v4571_v20, %v4500_v21  ;;  %v4100_v31 = vadd.f32 %v4099_v25, %v9977_v14  ;;  %v4101_v36 = vpop.f32.mrb[153].mxu1  ;;  %v4153_v38 = vadd.f32 %v4152_v33, %v9977_v14  ;;  %v4154_v16 = vpop.f32.mrb[153].mxu0 }
 0x21f   : > { %v4102_v34 = vadd.f32 %v4101_v36, %v9977_v14  ;;  %v4103_v15 = vpop.f32.mrb[154].mxu1  ;;  %v4156_v41 = vpop.f32.mrb[154].mxu0  ;;  %v4155_v46 = vadd.f32 %v4154_v16, %v9977_v14 }
 0x220   : > { %v4555_v32 = vadd.f32 %v4554_v37, %v4484_v24  ;;  %v4573_v47 = vadd.f32 %v4572_v28, %v4501_v22  ;;  %v4517_v49 = vmax.f32 %v4100_v31, 0.0  ;;  %v4104_v11 = vadd.f32 %v4103_v15, %v9989_v6  ;;  %v4105_v56 = vpop.f32.mrb[155].mxu1  ;;  %v4158_v57 = vpop.f32.mrb[155].mxu0 }
 0x221   : > { %v4518_v54 = vmax.f32 %v4102_v34, 0.0  ;;  %v4519_v53 = vmax.f32 %v4153_v38, 0.0  ;;  %v4106_v55 = vadd.f32 %v4105_v56, %v9989_v6  ;;  %v4157_v58 = vadd.f32 %v4156_v41, %v9989_v6  ;;  %v9487_v34 = vld [vmem:[%s9621_s25 + $0x8a4] ss:$72 sps:$4 sm:$0x3f]  }
 0x222   : > { %v4574_v50 = vadd.f32 %v4573_v47, %v4502_v29  ;;  %v4590_v60 = vadd.f32 %v10835_v45, %v4517_v49  ;;  %v4535_v59 = vmax.f32 %v4104_v11, 0.0  ;;  %8939 = vmatmul.mubr.msk.bf16.vlgmr.msra.gmra.mrb[4].mxu1 %vm408_vm2, %v10737_v44  ;;  %8941 = vmatmul.mubr.msk.bf16.vlgmr.msra.gmra.mrb[4].mxu0 %vm408_vm2, %v10737_v44  ;;  %v4159_v1 = vadd.f32 %v4158_v57, %v9989_v6  ;;  %v9479_v56 = vld [vmem:[%s9621_s25 + $0x810] ss:$72 sps:$4 sm:$0xff]  }
 0x223   : > { %v4536_v62 = vmax.f32 %v4106_v55, 0.0  ;;  %6861 = vmatpush1.bf16.msra.mxu1 %v9467_v26  ;;  %6914 = vmatpush1.bf16.msra.mxu0 %v9470_v27  ;;  %v4520_v48 = vmax.f32 %v4155_v46, 0.0  ;;  %v4537_v13 = vmax.f32 %v4157_v58, 0.0  ;;  %v9482_v57 = vld [vmem:[%s9621_s25 + $0x818] ss:$72 sps:$4 sm:$0xff]  }
 0x224   : > { %v4591_v45 = vadd.f32 %v4590_v60, %v4518_v54  ;;  %v4609_v4 = vadd.f32 %v10842_v52, %v4535_v59  ;;  %6796 = vmatprep.mubr.bf16.mxu1 %v9569_v0  ;;  %6849 = vmatprep.mubr.bf16.mxu0 %v9569_v0  ;;  %v4538_v17 = vmax.f32 %v4159_v1, 0.0  ;;  %v9485_v58 = vld [vmem:[%s9621_s25 + $0x8a0] ss:$72 sps:$4 sm:$0x3f]  }
 0x225   : > { %v4195_v8 = vpop.f32.mrb[156].mxu1  ;;  %v4248_v12 = vpop.f32.mrb[156].mxu0  ;;  %6862 = vmatprep.subr.bf16.mxu1 %v6622_v43  ;;  %6915 = vmatprep.subr.bf16.mxu0 %v6628_v35  ;;  %v9490_v43 = vld [vmem:[%s9621_s25 + $0x8ac] ss:$72 sps:$4 sm:$0x3f]  }
 0x226   : > { %v4592_v61 = vadd.f32 %v4591_v45, %v4519_v53  ;;  %v4610_v51 = vadd.f32 %v4609_v4, %v4536_v62  ;;  %v4196_v19 = vadd.f32 %v4195_v8, %v9979_v3  ;;  %v4197_v18 = vpop.f32.mrb[157].mxu1  ;;  %v4249_v21 = vadd.f32 %v4248_v12, %v9979_v3  ;;  %v4250_v52 = vpop.f32.mrb[157].mxu0  ;;  %v9488_v45 = vld [vmem:[%s9621_s25 + $0x8a8] ss:$72 sps:$4 sm:$0x3f]  }
 0x227   : > { %v4198_v42 = vadd.f32 %v4197_v18, %v9979_v3  ;;  %v4199_v23 = vpop.f32.mrb[158].mxu1  ;;  %v4252_v20 = vpop.f32.mrb[158].mxu0  ;;  %6863 = vmatpush1.bf16.msra.mxu1 %v6619_v63  ;;  %6916 = vmatpush1.bf16.msra.mxu0 %v6625_v2  ;;  %v4251_v36 = vadd.f32 %v4250_v52, %v9979_v3  ;;  %v6634_v2 = vand.u32 %v9487_v34, %v9625_v9 }
 0x228   : > { %v4593_v24 = vadd.f32 %v4592_v61, %v4520_v48  ;;  %v4611_v22 = vadd.f32 %v4610_v51, %v4537_v13  ;;  %v4485_v25 = vmax.f32 %v4196_v19, 0.0  ;;  %v4200_v33 = vadd.f32 %v4199_v23, %v9991_v7  ;;  %v4201_v26 = vpop.f32.mrb[159].mxu1  ;;  %v4254_v27 = vpop.f32.mrb[159].mxu0  ;;  %6966 = vmatprep.subr.bf16.mxu1 %v9481_v5  ;;  %7019 = vmatprep.subr.bf16.mxu0 %v9484_v10 }
 0x229   : > { %v4486_v37 = vmax.f32 %v4198_v42, 0.0  ;;  %v4487_v28 = vmax.f32 %v4249_v21, 0.0  ;;  %v4202_v31 = vadd.f32 %v4201_v26, %v9991_v7  ;;  %v4253_v29 = vadd.f32 %v4252_v20, %v9991_v7  ;;  %v9493_v26 = vld [vmem:[%s9621_s25 + $0x824] ss:$72 sps:$4 sm:$0xff]  }
 0x22a   : > { %v4612_v38 = vadd.f32 %v4611_v22, %v4538_v17  ;;  %v4556_v16 = vadd.f32 %v4555_v32, %v4485_v25  ;;  %v4503_v39 = vmax.f32 %v4200_v33, 0.0  ;;  %8940 = vmatmul.mubr.msk.bf16.gmra.mrb[8].mxu1 %vm408_vm2, %v10760_v30  ;;  %8942 = vmatmul.mubr.msk.bf16.gmra.mrb[8].mxu0 %vm408_vm2, %v10760_v30  ;;  %v4255_v41 = vadd.f32 %v4254_v27, %v9991_v7  ;;  %v9496_v27 = vld [vmem:[%s9621_s25 + $0x904] ss:$72 sps:$4 sm:$0xff]  }
 0x22b   : > { %v4504_v15 = vmax.f32 %v4202_v31, 0.0  ;;  %6892 = vmatprep.mubr.bf16.mxu1 %v9569_v0  ;;  %6945 = vmatprep.mubr.bf16.mxu0 %v9569_v0  ;;  %v4488_v32 = vmax.f32 %v4251_v36, 0.0  ;;  %v4505_v47 = vmax.f32 %v4253_v29, 0.0  ;;  %v6640_v4 = vand.u32 %v9490_v43, %v9625_v9 }
 0x22c   : > { %v4557_v40 = vadd.f32 %v4556_v16, %v4486_v37  ;;  %v4575_v35 = vadd.f32 %v4574_v50, %v4503_v39  ;;  %v4506_v62 = vmax.f32 %v4255_v41, 0.0  ;;  %v6631_v22 = vand.u32 %v9485_v58, %v9625_v9 }
 0x22d   : > { %v4205_v49 = vpop.f32.mrb[160].mxu1  ;;  %v4258_v11 = vpop.f32.mrb[160].mxu0  ;;  %v6637_v25 = vand.u32 %v9488_v45, %v9625_v9 }
 0x22e   : > { %v4558_v54 = vadd.f32 %v4557_v40, %v4487_v28  ;;  %v4576_v53 = vadd.f32 %v4575_v35, %v4504_v15  ;;  %v4206_v55 = vadd.f32 %v4205_v49, %v9977_v14  ;;  %v4207_v46 = vpop.f32.mrb[161].mxu1  ;;  %v4259_v60 = vadd.f32 %v4258_v11, %v9977_v14  ;;  %v4260_v59 = vpop.f32.mrb[161].mxu0 }
 0x22f   : > { %v4208_v1 = vadd.f32 %v4207_v46, %v9977_v14  ;;  %v4209_v50 = vpop.f32.mrb[162].mxu1  ;;  %v4262_v63 = vpop.f32.mrb[162].mxu0  ;;  %v4261_v18 = vadd.f32 %v4260_v59, %v9977_v14 }
 0x230   : > { %v4559_v5 = vadd.f32 %v4558_v54, %v4488_v32  ;;  %v4577_v10 = vadd.f32 %v4576_v53, %v4505_v47  ;;  %v4521_v48 = vmax.f32 %v4206_v55, 0.0  ;;  %v4210_v13 = vadd.f32 %v4209_v50, %v9989_v6  ;;  %v4211_v8 = vpop.f32.mrb[163].mxu1  ;;  %v4264_v12 = vpop.f32.mrb[163].mxu0 }
 0x231   : > { %v4522_v61 = vmax.f32 %v4208_v1, 0.0  ;;  %v4523_v51 = vmax.f32 %v4259_v60, 0.0  ;;  %v4212_v19 = vadd.f32 %v4211_v8, %v9989_v6  ;;  %v4263_v42 = vadd.f32 %v4262_v63, %v9989_v6  ;;  %v9499_v1 = vld [vmem:[%s9621_s25 + $0x8b4] ss:$72 sps:$4 sm:$0x3f]  }
 0x232   : > { %v4578_v21 = vadd.f32 %v4577_v10, %v4506_v62  ;;  %v4594_v52 = vadd.f32 %v4593_v24, %v4521_v48  ;;  %v4539_v17 = vmax.f32 %v4210_v13, 0.0  ;;  %8943 = vmatmul.mubr.msk.bf16.vlgmr.msra.gmra.mrb[12].mxu1 %vm408_vm2, %v10737_v44  ;;  %8945 = vmatmul.mubr.msk.bf16.vlgmr.msra.gmra.mrb[12].mxu0 %vm408_vm2, %v10737_v44  ;;  %v4265_v20 = vadd.f32 %v4264_v12, %v9989_v6  ;;  %v9491_v8 = vld [vmem:[%s9621_s25 + $0x820] ss:$72 sps:$4 sm:$0xff]  }
 0x233   : > { %v4540_v23 = vmax.f32 %v4212_v19, 0.0  ;;  %6967 = vmatpush1.bf16.msra.mxu1 %v9479_v56  ;;  %7020 = vmatpush1.bf16.msra.mxu0 %v9482_v57  ;;  %v4524_v37 = vmax.f32 %v4261_v18, 0.0  ;;  %v4541_v28 = vmax.f32 %v4263_v42, 0.0  ;;  %v9494_v12 = vld [vmem:[%s9621_s25 + $0x900] ss:$72 sps:$4 sm:$0xff]  }
 0x234   : > { %v4595_v24 = vadd.f32 %v4594_v52, %v4522_v61  ;;  %v4613_v33 = vadd.f32 %v4612_v38, %v4539_v17  ;;  %6902 = vmatprep.mubr.bf16.mxu1 %v9569_v0  ;;  %6955 = vmatprep.mubr.bf16.mxu0 %v9569_v0  ;;  %v4542_v41 = vmax.f32 %v4265_v20, 0.0  ;;  %v9497_v42 = vld [vmem:[%s9621_s25 + $0x8b0] ss:$72 sps:$4 sm:$0x3f]  }
 0x235   : > { %v4301_v31 = vpop.f32.mrb[164].mxu1  ;;  %v4354_v36 = vpop.f32.mrb[164].mxu0  ;;  %6968 = vmatprep.subr.bf16.mxu1 %v6634_v2  ;;  %7021 = vmatprep.subr.bf16.mxu0 %v6640_v4  ;;  %v9502_v2 = vld [vmem:[%s9621_s25 + $0x994] ss:$72 sps:$4 sm:$0x3f]  }
 0x236   : > { %v4596_v16 = vadd.f32 %v4595_v24, %v4523_v51  ;;  %v4614_v39 = vadd.f32 %v4613_v33, %v4540_v23  ;;  %v4302_v29 = vadd.f32 %v4301_v31, %v9979_v3  ;;  %v4303_v34 = vpop.f32.mrb[165].mxu1  ;;  %v4355_v15 = vadd.f32 %v4354_v36, %v9979_v3  ;;  %v4356_v38 = vpop.f32.mrb[165].mxu0  ;;  %v9500_v24 = vld [vmem:[%s9621_s25 + $0x990] ss:$72 sps:$4 sm:$0x3f]  }
 0x237   : > { %v4304_v43 = vadd.f32 %v4303_v34, %v9979_v3  ;;  %v4305_v40 = vpop.f32.mrb[166].mxu1  ;;  %v4358_v35 = vpop.f32.mrb[166].mxu0  ;;  %6969 = vmatpush1.bf16.msra.mxu1 %v6631_v22  ;;  %7022 = vmatpush1.bf16.msra.mxu0 %v6637_v25  ;;  %v4357_v46 = vadd.f32 %v4356_v38, %v9979_v3  ;;  %v6646_v25 = vand.u32 %v9499_v1, %v9625_v9 }
 0x238   : > { %v4597_v32 = vadd.f32 %v4596_v16, %v4524_v37  ;;  %v4615_v47 = vadd.f32 %v4614_v39, %v4541_v28  ;;  %v4489_v49 = vmax.f32 %v4302_v29, 0.0  ;;  %v4306_v11 = vadd.f32 %v4305_v40, %v9991_v7  ;;  %v4307_v56 = vpop.f32.mrb[167].mxu1  ;;  %v4360_v57 = vpop.f32.mrb[167].mxu0  ;;  %7072 = vmatprep.subr.bf16.mxu1 %v9493_v26  ;;  %7530 = vmatprep.subr.bf16.mxu0 %v9496_v27 }
 0x239   : > { %v4490_v54 = vmax.f32 %v4304_v43, 0.0  ;;  %v4491_v53 = vmax.f32 %v4355_v15, 0.0  ;;  %v4308_v55 = vadd.f32 %v4307_v56, %v9991_v7  ;;  %v4359_v62 = vadd.f32 %v4358_v35, %v9991_v7  ;;  %v9505_v56 = vld [vmem:[%s9621_s25 + $0x90c] ss:$72 sps:$4 sm:$0xff]  }
 0x23a   : > { %v4616_v60 = vadd.f32 %v4615_v47, %v4542_v41  ;;  %v4560_v59 = vadd.f32 %v4559_v5, %v4489_v49  ;;  %v4507_v58 = vmax.f32 %v4306_v11, 0.0  ;;  %8944 = vmatmul.mubr.msk.bf16.gmra.mrb[16].mxu1 %vm408_vm2, %v10760_v30  ;;  %8946 = vmatmul.mubr.msk.bf16.gmra.mrb[16].mxu0 %vm408_vm2, %v10760_v30  ;;  %v4361_v63 = vadd.f32 %v4360_v57, %v9991_v7  ;;  %v9508_v57 = vld [vmem:[%s9621_s25 + $0x914] ss:$72 sps:$4 sm:$0xff]  }
 0x23b   : > { %v4508_v50 = vmax.f32 %v4308_v55, 0.0  ;;  %6998 = vmatprep.mubr.bf16.mxu1 %v9569_v0  ;;  %7051 = vmatprep.mubr.bf16.mxu0 %v9569_v0  ;;  %v4492_v5 = vmax.f32 %v4357_v46, 0.0  ;;  %v4509_v10 = vmax.f32 %v4359_v62, 0.0  ;;  %v7480_v33 = vand.u32 %v9502_v2, %v9625_v9 }
 0x23c   : > { %v4561_v45 = vadd.f32 %v4560_v59, %v4490_v54  ;;  %v4579_v4 = vadd.f32 %v4578_v21, %v4507_v58  ;;  %v4510_v23 = vmax.f32 %v4361_v63, 0.0  ;;  %v6643_v47 = vand.u32 %v9497_v42, %v9625_v9  ;;  %v9511_v42 = vld [vmem:[%s9621_s25 + $0x99c] ss:$72 sps:$4 sm:$0x3f]  }
 0x23d   : > { %v4311_v48 = vpop.f32.mrb[168].mxu1  ;;  %v4364_v13 = vpop.f32.mrb[168].mxu0  ;;  %v7477_v49 = vand.u32 %v9500_v24, %v9625_v9 }
 0x23e   : > { %v4562_v61 = vadd.f32 %v4561_v45, %v4491_v53  ;;  %v4580_v51 = vadd.f32 %v4579_v4, %v4508_v50  ;;  %v4312_v19 = vadd.f32 %v4311_v48, %v9977_v14  ;;  %v4313_v18 = vpop.f32.mrb[169].mxu1  ;;  %v4365_v52 = vadd.f32 %v4364_v13, %v9977_v14  ;;  %v4366_v17 = vpop.f32.mrb[169].mxu0 }
 0x23f   : > { %v4314_v20 = vadd.f32 %v4313_v18, %v9977_v14  ;;  %v4315_v21 = vpop.f32.mrb[170].mxu1  ;;  %v4368_v22 = vpop.f32.mrb[170].mxu0  ;;  %v4367_v34 = vadd.f32 %v4366_v17, %v9977_v14 }
 0x240   : > { %v4563_v26 = vadd.f32 %v4562_v61, %v4492_v5  ;;  %v4581_v27 = vadd.f32 %v4580_v51, %v4509_v10  ;;  %v4525_v37 = vmax.f32 %v4312_v19, 0.0  ;;  %v4316_v28 = vadd.f32 %v4315_v21, %v9989_v6  ;;  %v4317_v31 = vpop.f32.mrb[171].mxu1  ;;  %v4370_v36 = vpop.f32.mrb[171].mxu0 }
 0x241   : > { %v4526_v16 = vmax.f32 %v4314_v20, 0.0  ;;  %v4527_v39 = vmax.f32 %v4365_v52, 0.0  ;;  %v4318_v29 = vadd.f32 %v4317_v31, %v9989_v6  ;;  %v4369_v43 = vadd.f32 %v4368_v22, %v9989_v6  ;;  %v10982_v20 = vld [vmem:[%s9621_s25 + $0x998] ss:$72 sps:$4 sm:$0x3f]  }
 0x242   : > { %v4582_v15 = vadd.f32 %v4581_v27, %v4510_v23  ;;  %v4598_v38 = vadd.f32 %v4597_v32, %v4525_v37  ;;  %v4543_v41 = vmax.f32 %v4316_v28, 0.0  ;;  %8947 = vmatmul.mubr.msk.bf16.vlgmr.msra.gmra.mrb[20].mxu1 %vm408_vm2, %v10737_v44  ;;  %8949 = vmatmul.mubr.msk.bf16.vlgmr.msra.gmra.mrb[20].mxu0 %vm408_vm2, %v10737_v44  ;;  %v4371_v35 = vadd.f32 %v4370_v36, %v9989_v6  ;;  %v9506_v37 = vld [vmem:[%s9621_s25 + $0x910] ss:$72 sps:$4 sm:$0xff]  }
 0x243   : > { %v4544_v40 = vmax.f32 %v4318_v29, 0.0  ;;  %7073 = vmatpush1.bf16.msra.mxu1 %v9491_v8  ;;  %7531 = vmatpush1.bf16.msra.mxu0 %v9494_v12  ;;  %v4528_v54 = vmax.f32 %v4367_v34, 0.0  ;;  %v4545_v53 = vmax.f32 %v4369_v43, 0.0  ;;  %v9512_v34 = vld [vmem:[%s9621_s25 + $0x9a0] ss:$72 sps:$4 sm:$0x3f]   ;;  %v7486_v43 = vand.u32 %v9511_v42, %v9625_v9 }
 0x244   : > { %v4599_v32 = vadd.f32 %v4598_v38, %v4526_v16  ;;  %v4617_v11 = vadd.f32 %v4616_v60, %v4543_v41  ;;  %7008 = vmatprep.mubr.bf16.mxu1 %v9569_v0  ;;  %7061 = vmatprep.mubr.bf16.mxu0 %v9569_v0  ;;  %v4546_v50 = vmax.f32 %v4371_v35, 0.0  ;;  %v9514_v35 = vld [vmem:[%s9621_s25 + $0x9a4] ss:$72 sps:$4 sm:$0x3f]  }
 0x245   : > { %v4407_v44 = vpop.f32.mrb[172].mxu1  ;;  %v4460_v55 = vpop.f32.mrb[172].mxu0  ;;  %7074 = vmatprep.subr.bf16.mxu1 %v6646_v25  ;;  %7532 = vmatprep.subr.bf16.mxu0 %v7480_v33 }
 0x246   : > { %v4600_v46 = vadd.f32 %v4599_v32, %v4527_v39  ;;  %v4618_v59 = vadd.f32 %v4617_v11, %v4544_v40  ;;  %v4408_v58 = vadd.f32 %v4407_v44, %v9979_v3  ;;  %v4409_v62 = vpop.f32.mrb[173].mxu1  ;;  %v4461_v1 = vadd.f32 %v4460_v55, %v9979_v3  ;;  %v4462_v60 = vpop.f32.mrb[173].mxu0 }
 0x247   : > { %v4410_v63 = vadd.f32 %v4409_v62, %v9979_v3  ;;  %v4411_v2 = vpop.f32.mrb[174].mxu1  ;;  %v4464_v45 = vpop.f32.mrb[174].mxu0  ;;  %7075 = vmatpush1.bf16.msra.mxu1 %v6643_v47  ;;  %7533 = vmatpush1.bf16.msra.mxu0 %v7477_v49  ;;  %v4463_v25 = vadd.f32 %v4462_v60, %v9979_v3  ;;  %v7483_v40 = vand.u32 %v10982_v20, %v9625_v9  ;;  %v11002_v62 = vld [vmem:[%s11460_s1] sm:$0xff]  }
 0x248   : > { %v4601_v4 = vadd.f32 %v4600_v46, %v4528_v54  ;;  %v4619_v5 = vadd.f32 %v4618_v59, %v4545_v53  ;;  %v4493_v10 = vmax.f32 %v4408_v58, 0.0  ;;  %v4412_v48 = vadd.f32 %v4411_v2, %v9991_v7  ;;  %v4413_v13 = vpop.f32.mrb[175].mxu1  ;;  %v4466_v8 = vpop.f32.mrb[175].mxu0  ;;  %7583 = vmatprep.subr.bf16.mxu1 %v9505_v56  ;;  %7636 = vmatprep.subr.bf16.mxu0 %v9508_v57 }
 0x249   : > { %v4494_v12 = vmax.f32 %v4410_v63, 0.0  ;;  %v4495_v61 = vmax.f32 %v4461_v1, 0.0  ;;  %v4414_v51 = vadd.f32 %v4413_v13, %v9991_v7  ;;  %v4465_v17 = vadd.f32 %v4464_v45, %v9991_v7 }
 0x24a   : > { %v4620_v19 = vadd.f32 %v4619_v5, %v4546_v50  ;;  %v4564_v18 = vadd.f32 %v4563_v26, %v4493_v10  ;;  %v4511_v52 = vmax.f32 %v4412_v48, 0.0  ;;  %8948 = vmatmul.mubr.msk.bf16.gmra.mrb[24].mxu1 %vm408_vm2, %v10760_v30  ;;  %8950 = vmatmul.mubr.msk.bf16.gmra.mrb[24].mxu0 %vm408_vm2, %v10760_v30  ;;  %v4467_v33 = vadd.f32 %v4466_v8, %v9991_v7  ;;  %v9503_v30 = vld [vmem:[%s9621_s25 + $0x908] ss:$72 sps:$4 sm:$0xff]   ;;  %v9517_v10 = vld [vmem:[%s9621_s25 + $0x91c] ss:$72 sps:$4 sm:$0xff]  }
 0x24b   : > { %v4512_v23 = vmax.f32 %v4414_v51, 0.0  ;;  %7104 = vmatprep.mubr.bf16.mxu1 %v9569_v0  ;;  %7562 = vmatprep.mubr.bf16.mxu0 %v9569_v0  ;;  %v4513_v24 = vmax.f32 %v4465_v17, 0.0  ;;  %v4496_v47 = vmax.f32 %v4463_v25, 0.0  ;;  %v7492_v63 = vand.u32 %v9514_v35, %v9625_v9 }
 0x24c   : > { %v4565_v21 = vadd.f32 %v4564_v18, %v4494_v12  ;;  %v4583_v22 = vadd.f32 %v4582_v15, %v4511_v52  ;;  %v4514_v54 = vmax.f32 %v4467_v33, 0.0  ;;  %v7489_v2 = vand.u32 %v9512_v34, %v9625_v9  ;;  %v11027_v34 = vld [vmem:[%s11460_s1 + $0x8] sm:$0xff]  }
 0x24d   : > { %v4417_v26 = vpop.f32.mrb[176].mxu1  ;;  %v4470_v27 = vpop.f32.mrb[176].mxu0 }
 0x24e   : > { %v4566_v28 = vadd.f32 %v4565_v21, %v4495_v61  ;;  %v4584_v31 = vadd.f32 %v4583_v22, %v4512_v23  ;;  %v4418_v36 = vadd.f32 %v4417_v26, %v9977_v14  ;;  %v4419_v16 = vpop.f32.mrb[177].mxu1  ;;  %v4471_v39 = vadd.f32 %v4470_v27, %v9977_v14  ;;  %v4472_v29 = vpop.f32.mrb[177].mxu0  ;;  %v9520_v61 = vld [vmem:[%s9621_s25 + $0x924] ss:$72 sps:$4 sm:$0xff]  }
 0x24f   : > { %v4420_v15 = vadd.f32 %v4419_v16, %v9977_v14  ;;  %v4421_v38 = vpop.f32.mrb[178].mxu1  ;;  %v4474_v41 = vpop.f32.mrb[178].mxu0  ;;  %v4473_v50 = vadd.f32 %v4472_v29, %v9977_v14 }
 0x250   : > { %v4585_v49 = vadd.f32 %v4584_v31, %v4513_v24  ;;  %v4529_v32 = vmax.f32 %v4418_v36, 0.0  ;;  %v4422_v11 = vadd.f32 %v4421_v38, %v9989_v6  ;;  %v4423_v56 = vpop.f32.mrb[179].mxu1  ;;  %v4476_v57 = vpop.f32.mrb[179].mxu0  ;;  %v4475_v55 = vadd.f32 %v4474_v41, %v9989_v6  ;;  %v9523_v38 = vld [vmem:[%s9621_s25 + $0x9ac] ss:$72 sps:$4 sm:$0x3f]  }
 0x251   : > { %v4530_v53 = vmax.f32 %v4420_v15, 0.0  ;;  %v4424_v44 = vadd.f32 %v4423_v56, %v9989_v6  ;;  %v4531_v58 = vmax.f32 %v4471_v39, 0.0  ;;  %v4567_v1 = vadd.f32 %v4566_v28, %v4496_v47 }
 0x252   : > { %v4602_v46 = vadd.f32 %v4601_v4, %v4529_v32  ;;  %v4547_v59 = vmax.f32 %v4422_v11, 0.0  ;;  %8951 = vmatmul.mubr.msk.bf16.vlgmr.msra.gmra.mrb[28].mxu1 %vm408_vm2, %v11002_v62  ;;  %9025 = vmatmul.mubr.msk.bf16.vlgmr.msra.gmra.mrb[28].mxu0 %vm408_vm2, %v11002_v62  ;;  %v4586_v5 = vadd.f32 %v4585_v49, %v4514_v54  ;;  %v4549_v48 = vmax.f32 %v4475_v55, 0.0  ;;  %v9526_v49 = vld [vmem:[%s9621_s25 + $0x9b4] ss:$72 sps:$4 sm:$0x3f]  }
 0x253   : > { %v4548_v60 = vmax.f32 %v4424_v44, 0.0  ;;  %7584 = vmatpush1.bf16.msra.mxu1 %v9503_v30  ;;  %7637 = vmatpush1.bf16.msra.mxu0 %v9506_v37  ;;  %v4477_v13 = vadd.f32 %v4476_v57, %v9989_v6  ;;  %v4532_v25 = vmax.f32 %v4473_v50, 0.0 }
 0x254   : > { %v4603_v45 = vadd.f32 %v4602_v46, %v4530_v53  ;;  %v4621_v4 = vadd.f32 %v4620_v19, %v4547_v59  ;;  %4568 = vadd.xlane.f32.xlu1 %v4567_v1  ;;  %7114 = vmatprep.mubr.bf16.mxu1 %v9569_v0  ;;  %v9521_v59 = vld [vmem:[%s9621_s25 + $0x9a8] ss:$72 sps:$4 sm:$0x3f]  }
 0x255   : > { %v4918_v8 = vpop.f32.mrb[180].mxu1  ;;  %v4971_v12 = vpop.f32.mrb[180].mxu0  ;;  %7572 = vmatprep.mubr.bf16.mxu0 %v9569_v0  ;;  %7585 = vmatprep.subr.bf16.mxu1 %v7486_v43  ;;  %v4550_v16 = vmax.f32 %v4477_v13, 0.0 }
 0x256   : > { %v4604_v51 = vadd.f32 %v4603_v45, %v4531_v58  ;;  %v4622_v18 = vadd.f32 %v4621_v4, %v4548_v60  ;;  %4587 = vadd.xlane.f32.xlu0 %v4586_v5  ;;  %v4919_v52 = vadd.f32 %v4918_v8, %v9979_v3  ;;  %v4920_v19 = vpop.f32.mrb[181].mxu1  ;;  %v4972_v17 = vadd.f32 %v4971_v12, %v9979_v3  ;;  %v4973_v42 = vpop.f32.mrb[181].mxu0  ;;  %v9515_v4 = vld [vmem:[%s9621_s25 + $0x918] ss:$72 sps:$4 sm:$0xff]  }
 0x257   : > { %v4921_v23 = vadd.f32 %v4920_v19, %v9979_v3  ;;  %v4922_v20 = vpop.f32.mrb[182].mxu1  ;;  %v4974_v21 = vadd.f32 %v4973_v42, %v9979_v3  ;;  %v4975_v22 = vpop.f32.mrb[182].mxu0  ;;  %7586 = vmatpush1.bf16.msra.mxu1 %v7483_v40  ;;  %7638 = vmatprep.subr.bf16.mxu0 %v7492_v63  ;;  %v7498_v58 = vand.u32 %v9523_v38, %v9625_v9  ;;  %v9518_v5 = vld [vmem:[%s9621_s25 + $0x920] ss:$72 sps:$4 sm:$0xff]  }
 0x258   : > { %v4623_v24 = vadd.f32 %v4622_v18, %v4549_v48  ;;  %v5361_v33 = vmax.f32 %v4919_v52, 0.0  ;;  %v4923_v26 = vadd.f32 %v4922_v20, %v9991_v7  ;;  %v4924_v27 = vpop.f32.mrb[183].mxu1  ;;  %v4977_v30 = vpop.f32.mrb[183].mxu0  ;;  %7639 = vmatpush1.bf16.msra.mxu0 %v7489_v2  ;;  %7689 = vmatprep.subr.bf16.mxu1 %v9517_v10  ;;  %v5363_v28 = vmax.f32 %v4972_v17, 0.0 }
 0x259   : > { %v5362_v37 = vmax.f32 %v4921_v23, 0.0  ;;  %v4925_v31 = vadd.f32 %v4924_v27, %v9991_v7  ;;  %v4976_v36 = vadd.f32 %v4975_v22, %v9991_v7  ;;  %7742 = vmatprep.subr.bf16.mxu0 %v9520_v61  ;;  %v4978_v29 = vadd.f32 %v4977_v30, %v9991_v7  ;;  %v9524_v61 = vld [vmem:[%s9621_s25 + $0x9b0] ss:$72 sps:$4 sm:$0x3f]  }
 0x25a   : > { %v5379_v39 = vmax.f32 %v4923_v26, 0.0  ;;  %8952 = vmatmul.mubr.msk.bf16.gmra.mrb[32].mxu1 %vm408_vm2, %v11027_v34  ;;  %9026 = vmatmul.mubr.msk.bf16.gmra.mrb[32].mxu0 %vm408_vm2, %v11027_v34  ;;  %v4605_v15 = vadd.f32 %v4604_v51, %v4532_v25  ;;  %v5364_v40 = vmax.f32 %v4974_v21, 0.0  ;;  %v4624_v47 = vadd.f32 %v4623_v24, %v4550_v16  ;;  %v9529_v26 = vld [vmem:[%s9621_s25 + $0x92c] ss:$72 sps:$4 sm:$0xff]  }
 0x25b   : > { %v5433_v41 = vadd.f32 %v5362_v37, %v5361_v33  ;;  %v5380_v43 = vmax.f32 %v4925_v31, 0.0  ;;  %v5381_v35 = vmax.f32 %v4976_v36, 0.0  ;;  %7615 = vmatprep.mubr.bf16.mxu1 %v9569_v0  ;;  %7668 = vmatprep.mubr.bf16.mxu0 %v9569_v0  ;;  %v5382_v54 = vmax.f32 %v4978_v29, 0.0  ;;  %v9532_v31 = vld [vmem:[%s9621_s25 + $0x934] ss:$72 sps:$4 sm:$0xff]  }
 0x25c   : > { %4606 = vadd.xlane.f32.xlu1 %v4605_v15  ;;  %4625 = vadd.xlane.f32.xlu0 %v4624_v47  ;;  %v7504_v51 = vand.u32 %v9526_v49, %v9625_v9  ;;  %v7495_v20 = vand.u32 %v9521_v59, %v9625_v9  ;;  %v7501_v33 = vand.u32 %v9524_v61, %v9625_v9 }
 0x25d   : > { %v5434_v32 = vadd.f32 %v5433_v41, %v5363_v28  ;;  %v5452_v11 = vadd.f32 %v5380_v43, %v5379_v39  ;;  %v4928_v56 = vpop.f32.mrb[184].mxu1  ;;  %v4981_v57 = vpop.f32.mrb[184].mxu0 }
 0x25e   : > { %v4929_v53 = vadd.f32 %v4928_v56, %v9977_v14  ;;  %v4930_v44 = vpop.f32.mrb[185].mxu1  ;;  %v4982_v55 = vadd.f32 %v4981_v57, %v9977_v14  ;;  %v4983_v46 = vpop.f32.mrb[185].mxu0 }
 0x25f   : > { %v11041_v1 = vadd.f32 %v5434_v32, %v5364_v40  ;;  %v5453_v60 = vadd.f32 %v5452_v11, %v5381_v35  ;;  %v4931_v50 = vadd.f32 %v4930_v44, %v9977_v14  ;;  %v4932_v63 = vpop.f32.mrb[186].mxu1  ;;  %v4984_v2 = vadd.f32 %v4983_v46, %v9977_v14  ;;  %v4985_v45 = vpop.f32.mrb[186].mxu0 }
 0x260   : > { %v5397_v10 = vmax.f32 %v4929_v53, 0.0  ;;  %v4933_v48 = vadd.f32 %v4932_v63, %v9989_v6  ;;  %v4934_v13 = vpop.f32.mrb[187].mxu1  ;;  %v4986_v8 = vadd.f32 %v4985_v45, %v9989_v6  ;;  %v4987_v12 = vpop.f32.mrb[187].mxu0  ;;  %v5399_v19 = vmax.f32 %v4982_v55, 0.0 }
 0x261   : > { %v5454_v18 = vadd.f32 %v5453_v60, %v5382_v54  ;;  %v5398_v52 = vmax.f32 %v4931_v50, 0.0  ;;  %v4935_v17 = vadd.f32 %v4934_v13, %v9989_v6  ;;  %v5400_v23 = vmax.f32 %v4984_v2, 0.0  ;;  %v9530_v13 = vld [vmem:[%s9621_s25 + $0x930] ss:$72 sps:$4 sm:$0xff]  }
 0x262   : > { %v5415_v42 = vmax.f32 %v4933_v48, 0.0  ;;  %9027 = vmatmul.mubr.msk.bf16.vlgmr.msra.gmra.mrb[36].mxu1 %vm408_vm2, %v11002_v62  ;;  %9029 = vmatmul.mubr.msk.bf16.vlgmr.msra.gmra.mrb[36].mxu0 %vm408_vm2, %v11002_v62  ;;  %v5417_v25 = vmax.f32 %v4986_v8, 0.0  ;;  %v4988_v24 = vadd.f32 %v4987_v12, %v9989_v6  ;;  %v9527_v48 = vld [vmem:[%s9621_s25 + $0x928] ss:$72 sps:$4 sm:$0xff]  }
 0x263   : > { %v5471_v21 = vadd.f32 %v5398_v52, %v5397_v10  ;;  %v5416_v22 = vmax.f32 %v4935_v17, 0.0  ;;  %7690 = vmatpush1.bf16.msra.mxu1 %v9515_v4  ;;  %7743 = vmatpush1.bf16.msra.mxu0 %v9518_v5  ;;  %v9533_v17 = vld [vmem:[%s9621_s25 + $0x9b8] ss:$72 sps:$4 sm:$0x3f]  }
 0x264   : > { %7625 = vmatprep.mubr.bf16.mxu1 %v9569_v0  ;;  %7678 = vmatprep.mubr.bf16.mxu0 %v9569_v0  ;;  %v5418_v41 = vmax.f32 %v4988_v24, 0.0 }
 0x265   : > { %v5472_v27 = vadd.f32 %v5471_v21, %v5399_v19  ;;  %v5490_v30 = vadd.f32 %v5416_v22, %v5415_v42  ;;  %v5024_v37 = vpop.f32.mrb[188].mxu1  ;;  %v5077_v28 = vpop.f32.mrb[188].mxu0  ;;  %7691 = vmatprep.subr.bf16.mxu1 %v7498_v58  ;;  %7744 = vmatprep.subr.bf16.mxu0 %v7504_v51  ;;  %v9535_v58 = vld [vmem:[%s9621_s25 + $0x9bc] ss:$72 sps:$4 sm:$0x3f]  }
 0x266   : > { %v5025_v36 = vadd.f32 %v5024_v37, %v9979_v3  ;;  %v5026_v16 = vpop.f32.mrb[189].mxu1  ;;  %v5078_v39 = vadd.f32 %v5077_v28, %v9979_v3  ;;  %v5079_v29 = vpop.f32.mrb[189].mxu0  ;;  %v7510_v21 = vand.u32 %v9535_v58, %v9625_v9  ;;  %v9536_v22 = vld [vmem:[%s9621_s25 + $0x9c0] ss:$72 sps:$4 sm:$0x3f]  }
 0x267   : > { %v11065_v15 = vadd.f32 %v5472_v27, %v5400_v23  ;;  %v5491_v38 = vadd.f32 %v5490_v30, %v5417_v25  ;;  %v5027_v43 = vadd.f32 %v5026_v16, %v9979_v3  ;;  %v5028_v40 = vpop.f32.mrb[190].mxu1  ;;  %v5081_v35 = vpop.f32.mrb[190].mxu0  ;;  %7692 = vmatpush1.bf16.msra.mxu1 %v7495_v20  ;;  %v5080_v11 = vadd.f32 %v5079_v29, %v9979_v3 }
 0x268   : > { %v5365_v47 = vmax.f32 %v5025_v36, 0.0  ;;  %v5029_v49 = vadd.f32 %v5028_v40, %v9991_v7  ;;  %v5030_v32 = vpop.f32.mrb[191].mxu1  ;;  %v5083_v56 = vpop.f32.mrb[191].mxu0  ;;  %7745 = vmatpush1.bf16.msra.mxu0 %v7501_v33  ;;  %7795 = vmatprep.subr.bf16.mxu1 %v9529_v26  ;;  %v5082_v44 = vadd.f32 %v5081_v35, %v9991_v7  ;;  %v5367_v59 = vmax.f32 %v5078_v39, 0.0 }
 0x269   : > { %v5492_v57 = vadd.f32 %v5491_v38, %v5418_v41  ;;  %v5366_v54 = vmax.f32 %v5027_v43, 0.0  ;;  %v5031_v53 = vadd.f32 %v5030_v32, %v9991_v7  ;;  %7848 = vmatprep.subr.bf16.mxu0 %v9532_v31  ;;  %v5084_v50 = vadd.f32 %v5083_v56, %v9991_v7  ;;  %v9541_v32 = vld [vmem:[%s9621_s25 + $0x93c] ss:$72 sps:$4 sm:$0xff]  }
 0x26a   : > { %v5436_v55 = vadd.f32 %v11041_v1, %v5365_v47  ;;  %v5383_v46 = vmax.f32 %v5029_v49, 0.0  ;;  %9028 = vmatmul.mubr.msk.bf16.gmra.mrb[40].mxu1 %vm408_vm2, %v11027_v34  ;;  %9030 = vmatmul.mubr.msk.bf16.gmra.mrb[40].mxu0 %vm408_vm2, %v11027_v34  ;;  %v9538_v1 = vld [vmem:[%s9621_s25 + $0x9c4] ss:$72 sps:$4 sm:$0x3f]   ;;  %v5368_v45 = vmax.f32 %v5080_v11, 0.0  ;;  %v5385_v4 = vmax.f32 %v5082_v44, 0.0 }
 0x26b   : > { %v5384_v60 = vmax.f32 %v5031_v53, 0.0  ;;  %7721 = vmatprep.mubr.bf16.mxu1 %v9569_v0  ;;  %7774 = vmatprep.mubr.bf16.mxu0 %v9569_v0  ;;  %v5386_v42 = vmax.f32 %v5084_v50, 0.0  ;;  %v7516_v25 = vand.u32 %v9538_v1, %v9625_v9  ;;  %v7507_v35 = vand.u32 %v9533_v17, %v9625_v9  ;;  %v9544_v11 = vld [vmem:[%s9621_s25 + $0x944] ss:$72 sps:$4 sm:$0xff]  }
 0x26c   : > { %v5437_v63 = vadd.f32 %v5436_v55, %v5366_v54  ;;  %v5455_v2 = vadd.f32 %v5454_v18, %v5383_v46  ;;  %v7513_v47 = vand.u32 %v9536_v22, %v9625_v9 }
 0x26d   : > { %v5034_v5 = vpop.f32.mrb[192].mxu1  ;;  %v5087_v10 = vpop.f32.mrb[192].mxu0 }
 0x26e   : > { %v5438_v8 = vadd.f32 %v5437_v63, %v5367_v59  ;;  %v5456_v12 = vadd.f32 %v5455_v2, %v5384_v60  ;;  %v5035_v61 = vadd.f32 %v5034_v5, %v9977_v14  ;;  %v5036_v51 = vpop.f32.mrb[193].mxu1  ;;  %v5088_v52 = vadd.f32 %v5087_v10, %v9977_v14  ;;  %v5089_v19 = vpop.f32.mrb[193].mxu0 }
 0x26f   : > { %v5037_v23 = vadd.f32 %v5036_v51, %v9977_v14  ;;  %v5038_v18 = vpop.f32.mrb[194].mxu1  ;;  %v5091_v20 = vpop.f32.mrb[194].mxu0  ;;  %v5090_v16 = vadd.f32 %v5089_v19, %v9977_v14 }
 0x270   : > { %v5439_v24 = vadd.f32 %v5438_v8, %v5368_v45  ;;  %v5457_v33 = vadd.f32 %v5456_v12, %v5385_v4  ;;  %v5401_v26 = vmax.f32 %v5035_v61, 0.0  ;;  %v5039_v27 = vadd.f32 %v5038_v18, %v9989_v6  ;;  %v5040_v30 = vpop.f32.mrb[195].mxu1  ;;  %v5093_v37 = vpop.f32.mrb[195].mxu0 }
 0x271   : > { %v5402_v28 = vmax.f32 %v5037_v23, 0.0  ;;  %v5403_v31 = vmax.f32 %v5088_v52, 0.0  ;;  %v5041_v36 = vadd.f32 %v5040_v30, %v9989_v6  ;;  %v5092_v41 = vadd.f32 %v5091_v20, %v9989_v6  ;;  %v9547_v23 = vld [vmem:[%s9621_s25 + $0x9cc] ss:$72 sps:$4 sm:$0x3f]  }
 0x272   : > { %v5458_v39 = vadd.f32 %v5457_v33, %v5386_v42  ;;  %v5474_v29 = vadd.f32 %v11065_v15, %v5401_v26  ;;  %v5419_v38 = vmax.f32 %v5039_v27, 0.0  ;;  %9031 = vmatmul.mubr.msk.bf16.vlgmr.msra.gmra.mrb[44].mxu1 %vm408_vm2, %v11002_v62  ;;  %9033 = vmatmul.mubr.msk.bf16.vlgmr.msra.gmra.mrb[44].mxu0 %vm408_vm2, %v11002_v62  ;;  %v5094_v40 = vadd.f32 %v5093_v37, %v9989_v6  ;;  %v9539_v30 = vld [vmem:[%s9621_s25 + $0x938] ss:$72 sps:$4 sm:$0xff]  }
 0x273   : > { %v5420_v43 = vmax.f32 %v5041_v36, 0.0  ;;  %7796 = vmatpush1.bf16.msra.mxu1 %v9527_v48  ;;  %7849 = vmatpush1.bf16.msra.mxu0 %v9530_v13  ;;  %v5404_v56 = vmax.f32 %v5090_v16, 0.0  ;;  %v5421_v54 = vmax.f32 %v5092_v41, 0.0  ;;  %v9542_v37 = vld [vmem:[%s9621_s25 + $0x940] ss:$72 sps:$4 sm:$0xff]  }
 0x274   : > { %v5475_v15 = vadd.f32 %v5474_v29, %v5402_v28  ;;  %v5493_v49 = vadd.f32 %v5492_v57, %v5419_v38  ;;  %7731 = vmatprep.mubr.bf16.mxu1 %v9569_v0  ;;  %7784 = vmatprep.mubr.bf16.mxu0 %v9569_v0  ;;  %v5422_v50 = vmax.f32 %v5094_v40, 0.0  ;;  %v9545_v41 = vld [vmem:[%s9621_s25 + $0x9c8] ss:$72 sps:$4 sm:$0x3f]  }
 0x275   : > { %v5130_v53 = vpop.f32.mrb[196].mxu1  ;;  %v5183_v44 = vpop.f32.mrb[196].mxu0  ;;  %7797 = vmatprep.subr.bf16.mxu1 %v7510_v21  ;;  %7850 = vmatprep.subr.bf16.mxu0 %v7516_v25  ;;  %v9550_v21 = vld [vmem:[%s9621_s25 + $0x9d4] ss:$72 sps:$4 sm:$0x3f]  }
 0x276   : > { %v5476_v55 = vadd.f32 %v5475_v15, %v5403_v31  ;;  %v5494_v46 = vadd.f32 %v5493_v49, %v5420_v43  ;;  %v5131_v59 = vadd.f32 %v5130_v53, %v9979_v3  ;;  %v5132_v58 = vpop.f32.mrb[197].mxu1  ;;  %v5184_v60 = vadd.f32 %v5183_v44, %v9979_v3  ;;  %v5185_v57 = vpop.f32.mrb[197].mxu0  ;;  %v9548_v15 = vld [vmem:[%s9621_s25 + $0x9d0] ss:$72 sps:$4 sm:$0x3f]   ;;  %s9045_s25 = sshll.u32 %s11464_s13, 5 }
 0x277   : > { %v5133_v1 = vadd.f32 %v5132_v58, %v9979_v3  ;;  %v5134_v63 = vpop.f32.mrb[198].mxu1  ;;  %v5187_v2 = vpop.f32.mrb[198].mxu0  ;;  %7798 = vmatpush1.bf16.msra.mxu1 %v7507_v35  ;;  %7851 = vmatpush1.bf16.msra.mxu0 %v7513_v47  ;;  %v5186_v51 = vadd.f32 %v5185_v57, %v9979_v3  ;;  %v7522_v47 = vand.u32 %v9547_v23, %v9625_v9  ;;  %s11424_s28 = scalar_lea.vmem %s11462_s3, %s9045_s25 }
 0x278   : > { %v5477_v45 = vadd.f32 %v5476_v55, %v5404_v56  ;;  %v5495_v4 = vadd.f32 %v5494_v46, %v5421_v54  ;;  %v5369_v5 = vmax.f32 %v5131_v59, 0.0  ;;  %v5135_v10 = vadd.f32 %v5134_v63, %v9991_v7  ;;  %v5136_v48 = vpop.f32.mrb[199].mxu1  ;;  %v5189_v13 = vpop.f32.mrb[199].mxu0  ;;  %7901 = vmatprep.subr.bf16.mxu1 %v9541_v32  ;;  %7954 = vmatprep.subr.bf16.mxu0 %v9544_v11 }
 0x279   : > { %v5370_v8 = vmax.f32 %v5133_v1, 0.0  ;;  %v5371_v12 = vmax.f32 %v5184_v60, 0.0  ;;  %v5137_v61 = vadd.f32 %v5136_v48, %v9991_v7  ;;  %v5188_v42 = vadd.f32 %v5187_v2, %v9991_v7 }
 0x27a   : > { %v5496_v52 = vadd.f32 %v5495_v4, %v5422_v50  ;;  %v5440_v19 = vadd.f32 %v5439_v24, %v5369_v5  ;;  %v5387_v17 = vmax.f32 %v5135_v10, 0.0  ;;  %9032 = vmatmul.mubr.msk.bf16.gmra.mrb[48].mxu1 %vm408_vm2, %v11027_v34  ;;  %9034 = vmatmul.mubr.msk.bf16.gmra.mrb[48].mxu0 %vm408_vm2, %v11027_v34  ;;  %v5190_v20 = vadd.f32 %v5189_v13, %v9991_v7 }
 0x27b   : > { %v5388_v18 = vmax.f32 %v5137_v61, 0.0  ;;  %7827 = vmatprep.mubr.bf16.mxu1 %v9569_v0  ;;  %7880 = vmatprep.mubr.bf16.mxu0 %v9569_v0  ;;  %v5372_v24 = vmax.f32 %v5186_v51, 0.0  ;;  %v5389_v33 = vmax.f32 %v5188_v42, 0.0  ;;  %v7528_v49 = vand.u32 %v9550_v21, %v9625_v9 }
 0x27c   : > { %v5441_v22 = vadd.f32 %v5440_v19, %v5370_v8  ;;  %v5459_v25 = vadd.f32 %v5458_v39, %v5387_v17  ;;  %v5390_v43 = vmax.f32 %v5190_v20, 0.0  ;;  %v7519_v4 = vand.u32 %v9545_v41, %v9625_v9 }
 0x27d   : > { %v5140_v26 = vpop.f32.mrb[200].mxu1  ;;  %v5193_v27 = vpop.f32.mrb[200].mxu0  ;;  %v7525_v5 = vand.u32 %v9548_v15, %v9625_v9 }
 0x27e   : > { %v5442_v28 = vadd.f32 %v5441_v22, %v5371_v12  ;;  %v5460_v31 = vadd.f32 %v5459_v25, %v5388_v18  ;;  %v5141_v36 = vadd.f32 %v5140_v26, %v9977_v14  ;;  %v5142_v16 = vpop.f32.mrb[201].mxu1  ;;  %v5194_v29 = vadd.f32 %v5193_v27, %v9977_v14  ;;  %v5195_v38 = vpop.f32.mrb[201].mxu0 }
 0x27f   : > { %v5143_v40 = vadd.f32 %v5142_v16, %v9977_v14  ;;  %v5144_v39 = vpop.f32.mrb[202].mxu1  ;;  %v5197_v35 = vpop.f32.mrb[202].mxu0  ;;  %v5196_v58 = vadd.f32 %v5195_v38, %v9977_v14 }
 0x280   : > { %v5443_v32 = vadd.f32 %v5442_v28, %v5372_v24  ;;  %v5461_v11 = vadd.f32 %v5460_v31, %v5389_v33  ;;  %v5405_v56 = vmax.f32 %v5141_v36, 0.0  ;;  %v5145_v54 = vadd.f32 %v5144_v39, %v9989_v6  ;;  %v5146_v53 = vpop.f32.mrb[203].mxu1  ;;  %v5199_v44 = vpop.f32.mrb[203].mxu0 }
 0x281   : > { %v5406_v55 = vmax.f32 %v5143_v40, 0.0  ;;  %v5407_v46 = vmax.f32 %v5194_v29, 0.0  ;;  %v5147_v59 = vadd.f32 %v5146_v53, %v9989_v6  ;;  %v5198_v1 = vadd.f32 %v5197_v35, %v9989_v6 }
 0x282   : > { %v5462_v60 = vadd.f32 %v5461_v11, %v5390_v43  ;;  %v5478_v57 = vadd.f32 %v5477_v45, %v5405_v56  ;;  %v5423_v50 = vmax.f32 %v5145_v54, 0.0  ;;  %9035 = vmatmul.mubr.msk.bf16.vlgmr.msra.gmra.mrb[52].mxu1 %vm408_vm2, %v11002_v62  ;;  %9037 = vmatmul.mubr.msk.bf16.vlgmr.msra.gmra.mrb[52].mxu0 %vm408_vm2, %v11002_v62  ;;  %v5200_v2 = vadd.f32 %v5199_v44, %v9989_v6 }
 0x283   : > { %v5424_v63 = vmax.f32 %v5147_v59, 0.0  ;;  %7902 = vmatpush1.bf16.msra.mxu1 %v9539_v30  ;;  %7955 = vmatpush1.bf16.msra.mxu0 %v9542_v37  ;;  %v5408_v48 = vmax.f32 %v5196_v58, 0.0  ;;  %v5425_v13 = vmax.f32 %v5198_v1, 0.0 }
 0x284   : > { %v5479_v10 = vadd.f32 %v5478_v57, %v5406_v55  ;;  %v5497_v45 = vadd.f32 %v5496_v52, %v5423_v50  ;;  %7837 = vmatprep.mubr.bf16.mxu1 %v9569_v0  ;;  %7890 = vmatprep.mubr.bf16.mxu0 %v9569_v0  ;;  %v5426_v23 = vmax.f32 %v5200_v2, 0.0 }
 0x285   : > { %v5236_v8 = vpop.f32.mrb[204].mxu1  ;;  %v5289_v12 = vpop.f32.mrb[204].mxu0  ;;  %7903 = vmatprep.subr.bf16.mxu1 %v7522_v47  ;;  %7956 = vmatprep.subr.bf16.mxu0 %v7528_v49 }
 0x286   : > { %v5480_v61 = vadd.f32 %v5479_v10, %v5407_v46  ;;  %v5498_v51 = vadd.f32 %v5497_v45, %v5424_v63  ;;  %v5237_v19 = vadd.f32 %v5236_v8, %v9979_v3  ;;  %v5238_v17 = vpop.f32.mrb[205].mxu1  ;;  %v5290_v42 = vadd.f32 %v5289_v12, %v9979_v3  ;;  %v5291_v9 = vpop.f32.mrb[205].mxu0 }
 0x287   : > { %v5239_v52 = vadd.f32 %v5238_v17, %v9979_v3  ;;  %v5240_v18 = vpop.f32.mrb[206].mxu1  ;;  %v5293_v20 = vpop.f32.mrb[206].mxu0  ;;  %7904 = vmatpush1.bf16.msra.mxu1 %v7519_v4  ;;  %7957 = vmatpush1.bf16.msra.mxu0 %v7525_v5  ;;  %v5292_v28 = vadd.f32 %v5291_v9, %v9979_v3 }
 0x288   : > { %v5481_v21 = vadd.f32 %v5480_v61, %v5408_v48  ;;  %v5499_v22 = vadd.f32 %v5498_v51, %v5425_v13  ;;  %v5373_v25 = vmax.f32 %v5237_v19, 0.0  ;;  %v5241_v24 = vadd.f32 %v5240_v18, %v9991_v7  ;;  %v5242_v33 = vpop.f32.mrb[207].mxu1  ;;  %v5295_v26 = vpop.f32.mrb[207].mxu0 }
 0x289   : > { %v5374_v27 = vmax.f32 %v5239_v52, 0.0  ;;  %v5375_v30 = vmax.f32 %v5290_v42, 0.0  ;;  %v5243_v37 = vadd.f32 %v5242_v33, %v9991_v7  ;;  %v5294_v29 = vadd.f32 %v5293_v20, %v9991_v7 }
 0x28a   : > { %v5500_v31 = vadd.f32 %v5499_v22, %v5426_v23  ;;  %v5444_v36 = vadd.f32 %v5443_v32, %v5373_v25  ;;  %v5391_v16 = vmax.f32 %v5241_v24, 0.0  ;;  %9036 = vmatmul.mubr.msk.bf16.gmra.mrb[56].mxu1 %vm408_vm2, %v11027_v34  ;;  %9038 = vmatmul.mubr.msk.bf16.gmra.mrb[56].mxu0 %vm408_vm2, %v11027_v34  ;;  %v5296_v41 = vadd.f32 %v5295_v26, %v9991_v7 }
 0x28b   : > { %v5392_v38 = vmax.f32 %v5243_v37, 0.0  ;;  %7933 = vmatprep.mubr.bf16.mxu1 %v9569_v0  ;;  %7986 = vmatprep.mubr.bf16.mxu0 %v9569_v0  ;;  %v5376_v39 = vmax.f32 %v5292_v28, 0.0  ;;  %v5393_v35 = vmax.f32 %v5294_v29, 0.0 }
 0x28c   : > { %v5445_v43 = vadd.f32 %v5444_v36, %v5374_v27  ;;  %v5463_v40 = vadd.f32 %v5462_v60, %v5391_v16  ;;  %v5394_v44 = vmax.f32 %v5296_v41, 0.0 }
 0x28d   : > { %v5246_v47 = vpop.f32.mrb[208].mxu1  ;;  %v5299_v15 = vpop.f32.mrb[208].mxu0 }
 0x28e   : > { %v5446_v49 = vadd.f32 %v5445_v43, %v5375_v30  ;;  %v5464_v32 = vadd.f32 %v5463_v40, %v5392_v38  ;;  %v5247_v11 = vadd.f32 %v5246_v47, %v9977_v14  ;;  %v5248_v56 = vpop.f32.mrb[209].mxu1  ;;  %v5300_v54 = vadd.f32 %v5299_v15, %v9977_v14  ;;  %v5301_v53 = vpop.f32.mrb[209].mxu0 }
 0x28f   : > { %v5249_v55 = vadd.f32 %v5248_v56, %v9977_v14  ;;  %v5250_v46 = vpop.f32.mrb[210].mxu1  ;;  %v5303_v59 = vpop.f32.mrb[210].mxu0  ;;  %v5302_v10 = vadd.f32 %v5301_v53, %v9977_v14 }
 0x290   : > { %v5447_v58 = vadd.f32 %v5446_v49, %v5376_v39  ;;  %v5465_v57 = vadd.f32 %v5464_v32, %v5393_v35  ;;  %v5409_v60 = vmax.f32 %v5247_v11, 0.0  ;;  %v5251_v50 = vadd.f32 %v5250_v46, %v9989_v6  ;;  %v5252_v1 = vpop.f32.mrb[211].mxu1  ;;  %v5305_v63 = vpop.f32.mrb[211].mxu0 }
 0x291   : > { %v5410_v2 = vmax.f32 %v5249_v55, 0.0  ;;  %v5411_v4 = vmax.f32 %v5300_v54, 0.0  ;;  %v5253_v5 = vadd.f32 %v5252_v1, %v9989_v6  ;;  %v5304_v8 = vadd.f32 %v5303_v59, %v9989_v6 }
 0x292   : > { %v5466_v45 = vadd.f32 %v5465_v57, %v5394_v44  ;;  %v5482_v48 = vadd.f32 %v5481_v21, %v5409_v60  ;;  %v5427_v13 = vmax.f32 %v5251_v50, 0.0  ;;  %9039 = vmatmul.mubr.msk.bf16.vlgmr.msra.gmra.mrb[60].mxu1 %vm408_vm2, %v11002_v62  ;;  %9041 = vmatmul.mubr.msk.bf16.vlgmr.msra.gmra.mrb[60].mxu0 %vm408_vm2, %v11002_v62  ;;  %v5306_v61 = vadd.f32 %v5305_v63, %v9989_v6 }
 0x293   : > { %v5428_v12 = vmax.f32 %v5253_v5, 0.0  ;;  %7943 = vmatprep.mubr.bf16.mxu1 %v9569_v0  ;;  %7996 = vmatprep.mubr.bf16.mxu0 %v9569_v0  ;;  %v5412_v17 = vmax.f32 %v5302_v10, 0.0  ;;  %v5429_v42 = vmax.f32 %v5304_v8, 0.0 }
 0x294   : > { %v5483_v51 = vadd.f32 %v5482_v48, %v5410_v2  ;;  %v5501_v19 = vadd.f32 %v5500_v31, %v5427_v13  ;;  %v5430_v25 = vmax.f32 %v5306_v61, 0.0 }
 0x295   : > { %v5342_v9 = vpop.f32.mrb[212].mxu1  ;;  %v5800_v23 = vpop.f32.mrb[212].mxu0 }
 0x296   : > { %v5484_v52 = vadd.f32 %v5483_v51, %v5411_v4  ;;  %v5502_v18 = vadd.f32 %v5501_v19, %v5428_v12  ;;  %v5343_v20 = vadd.f32 %v5342_v9, %v9979_v3  ;;  %v5344_v21 = vpop.f32.mrb[213].mxu1  ;;  %v5801_v62 = vadd.f32 %v5800_v23, %v9979_v3  ;;  %v5802_v22 = vpop.f32.mrb[213].mxu0 }
 0x297   : > { %v5345_v24 = vadd.f32 %v5344_v21, %v9979_v3  ;;  %v5346_v33 = vpop.f32.mrb[214].mxu1  ;;  %v5803_v0 = vadd.f32 %v5802_v22, %v9979_v3  ;;  %v5804_v26 = vpop.f32.mrb[214].mxu0 }
 0x298   : > { %v5485_v27 = vadd.f32 %v5484_v52, %v5412_v17  ;;  %v5503_v30 = vadd.f32 %v5502_v18, %v5429_v42  ;;  %v5377_v37 = vmax.f32 %v5343_v20, 0.0  ;;  %v5347_v28 = vadd.f32 %v5346_v33, %v9991_v7  ;;  %v5348_v31 = vpop.f32.mrb[215].mxu1  ;;  %v5806_v36 = vpop.f32.mrb[215].mxu0 }
 0x299   : > { %v5378_v16 = vmax.f32 %v5345_v24, 0.0  ;;  %v6243_v29 = vmax.f32 %v5801_v62, 0.0  ;;  %v5349_v38 = vadd.f32 %v5348_v31, %v9991_v7  ;;  %v6244_v41 = vmax.f32 %v5803_v0, 0.0 }
 0x29a   : > { %v5504_v43 = vadd.f32 %v5503_v30, %v5430_v25  ;;  %v5448_v40 = vadd.f32 %v5447_v58, %v5377_v37  ;;  %v5395_v39 = vmax.f32 %v5347_v28, 0.0  ;;  %v5805_v35 = vadd.f32 %v5804_v26, %v9991_v7  ;;  %9040 = vmatmul.mubr.msk.bf16.gmra.mrb[64].mxu1 %vm408_vm2, %v11027_v34  ;;  %9042 = vmatmul.mubr.msk.bf16.gmra.mrb[64].mxu0 %vm408_vm2, %v11027_v34 }
 0x29b   : > { %v5396_v47 = vmax.f32 %v5349_v38, 0.0  ;;  %v6315_v15 = vadd.f32 %v6244_v41, %v6243_v29  ;;  %v5807_v49 = vadd.f32 %v5806_v36, %v9991_v7 }
 0x29c   : > { %v5467_v32 = vadd.f32 %v5466_v45, %v5395_v39  ;;  %v6261_v11 = vmax.f32 %v5805_v35, 0.0  ;;  %v5449_v56 = vadd.f32 %v5448_v40, %v5378_v16 }
 0x29d   : > { %v6262_v54 = vmax.f32 %v5807_v49, 0.0  ;;  %v5352_v53 = vpop.f32.mrb[216].mxu1  ;;  %v5810_v46 = vpop.f32.mrb[216].mxu0 }
 0x29e   : > { %v5353_v44 = vadd.f32 %v5352_v53, %v9977_v14  ;;  %v5354_v55 = vpop.f32.mrb[217].mxu1  ;;  %5450 = vadd.xlane.f32.xlu1 %v5449_v56  ;;  %v5468_v59 = vadd.f32 %v5467_v32, %v5396_v47  ;;  %v5811_v34 = vadd.f32 %v5810_v46, %v9977_v14  ;;  %v5812_v50 = vpop.f32.mrb[217].mxu0 }
 0x29f   : > { %v6334_v58 = vadd.f32 %v6262_v54, %v6261_v11  ;;  %v5355_v57 = vadd.f32 %v5354_v55, %v9977_v14  ;;  %v5356_v60 = vpop.f32.mrb[218].mxu1  ;;  %v5813_v4 = vadd.f32 %v5812_v50, %v9977_v14  ;;  %v5814_v5 = vpop.f32.mrb[218].mxu0 }
 0x2a0   : > { %v5413_v1 = vmax.f32 %v5353_v44, 0.0  ;;  %v5357_v63 = vadd.f32 %v5356_v60, %v9989_v6  ;;  %v5358_v2 = vpop.f32.mrb[219].mxu1  ;;  %5469 = vadd.xlane.f32.xlu0 %v5468_v59  ;;  %v6279_v45 = vmax.f32 %v5811_v34, 0.0  ;;  %v5815_v13 = vadd.f32 %v5814_v5, %v9989_v6  ;;  %v5816_v8 = vpop.f32.mrb[219].mxu0 }
 0x2a1   : > { %v5414_v10 = vmax.f32 %v5355_v57, 0.0  ;;  %v5359_v48 = vadd.f32 %v5358_v2, %v9989_v6  ;;  %v6280_v51 = vmax.f32 %v5813_v4, 0.0  ;;  %v5817_v19 = vadd.f32 %v5816_v8, %v9989_v6 }
 0x2a2   : > { %v5486_v12 = vadd.f32 %v5485_v27, %v5413_v1  ;;  %v5431_v61 = vmax.f32 %v5357_v63, 0.0  ;;  %v6297_v42 = vmax.f32 %v5815_v13, 0.0 }
 0x2a3   : > { %v5432_v17 = vmax.f32 %v5359_v48, 0.0  ;;  %v6353_v23 = vadd.f32 %v6280_v51, %v6279_v45  ;;  %v6298_v52 = vmax.f32 %v5817_v19, 0.0 }
 0x2a4   : > { %v5505_v9 = vadd.f32 %v5504_v43, %v5431_v61  ;;  %v5487_v18 = vadd.f32 %v5486_v12, %v5414_v10 }
 0x2a5   : > { %v5853_v20 = vpop.f32.mrb[220].mxu1  ;;  %v5906_v21 = vpop.f32.mrb[220].mxu0  ;;  %v6372_v62 = vadd.f32 %v6298_v52, %v6297_v42 }
 0x2a6   : > { %v5854_v22 = vadd.f32 %v5853_v20, %v9979_v3  ;;  %v5855_v25 = vpop.f32.mrb[221].mxu1  ;;  %5488 = vadd.xlane.f32.xlu1 %v5487_v18  ;;  %v5907_v24 = vadd.f32 %v5906_v21, %v9979_v3  ;;  %v5506_v33 = vadd.f32 %v5505_v9, %v5432_v17  ;;  %v5908_v27 = vpop.f32.mrb[221].mxu0 }
 0x2a7   : > { %v5856_v0 = vadd.f32 %v5855_v25, %v9979_v3  ;;  %v5857_v26 = vpop.f32.mrb[222].mxu1  ;;  %v5910_v31 = vpop.f32.mrb[222].mxu0  ;;  %v5909_v29 = vadd.f32 %v5908_v27, %v9979_v3 }
 0x2a8   : > { %v6245_v30 = vmax.f32 %v5854_v22, 0.0  ;;  %v5858_v37 = vadd.f32 %v5857_v26, %v9991_v7  ;;  %v5859_v28 = vpop.f32.mrb[223].mxu1  ;;  %5507 = vadd.xlane.f32.xlu0 %v5506_v33  ;;  %v5911_v38 = vadd.f32 %v5910_v31, %v9991_v7  ;;  %v5912_v41 = vpop.f32.mrb[223].mxu0  ;;  %v6247_v39 = vmax.f32 %v5907_v24, 0.0 }
 0x2a9   : > { %v6246_v36 = vmax.f32 %v5856_v0, 0.0  ;;  %v5860_v16 = vadd.f32 %v5859_v28, %v9991_v7  ;;  %v5913_v47 = vadd.f32 %v5912_v41, %v9991_v7  ;;  %v6248_v11 = vmax.f32 %v5909_v29, 0.0 }
 0x2aa   : > { %v6316_v43 = vadd.f32 %v6315_v15, %v6245_v30  ;;  %v6263_v40 = vmax.f32 %v5858_v37, 0.0  ;;  %v6265_v56 = vmax.f32 %v5911_v38, 0.0 }
 0x2ab   : > { %v6264_v35 = vmax.f32 %v5860_v16, 0.0  ;;  %v6266_v15 = vmax.f32 %v5913_v47, 0.0 }
 0x2ac   : > { %v6317_v49 = vadd.f32 %v6316_v43, %v6246_v36  ;;  %v6335_v32 = vadd.f32 %v6334_v58, %v6263_v40 }
 0x2ad   : > { %v5863_v54 = vpop.f32.mrb[224].mxu1  ;;  %v5916_v53 = vpop.f32.mrb[224].mxu0 }
 0x2ae   : > { %v6318_v44 = vadd.f32 %v6317_v49, %v6247_v39  ;;  %v6336_v55 = vadd.f32 %v6335_v32, %v6264_v35  ;;  %v5864_v46 = vadd.f32 %v5863_v54, %v9977_v14  ;;  %v5865_v59 = vpop.f32.mrb[225].mxu1  ;;  %v5917_v57 = vadd.f32 %v5916_v53, %v9977_v14  ;;  %v5918_v60 = vpop.f32.mrb[225].mxu0 }
 0x2af   : > { %v5866_v34 = vadd.f32 %v5865_v59, %v9977_v14  ;;  %v5867_v50 = vpop.f32.mrb[226].mxu1  ;;  %v5920_v1 = vpop.f32.mrb[226].mxu0  ;;  %v5919_v8 = vadd.f32 %v5918_v60, %v9977_v14 }
 0x2b0   : > { %v6319_v63 = vadd.f32 %v6318_v44, %v6248_v11  ;;  %v6337_v2 = vadd.f32 %v6336_v55, %v6265_v56  ;;  %v6281_v58 = vmax.f32 %v5864_v46, 0.0  ;;  %v5868_v4 = vadd.f32 %v5867_v50, %v9989_v6  ;;  %v5869_v5 = vpop.f32.mrb[227].mxu1  ;;  %v5922_v10 = vpop.f32.mrb[227].mxu0 }
 0x2b1   : > { %v6282_v45 = vmax.f32 %v5866_v34, 0.0  ;;  %v6283_v48 = vmax.f32 %v5917_v57, 0.0  ;;  %v5870_v13 = vadd.f32 %v5869_v5, %v9989_v6  ;;  %v5921_v19 = vadd.f32 %v5920_v1, %v9989_v6 }
 0x2b2   : > { %v6338_v12 = vadd.f32 %v6337_v2, %v6266_v15  ;;  %v6354_v61 = vadd.f32 %v6353_v23, %v6281_v58  ;;  %v6299_v51 = vmax.f32 %v5868_v4, 0.0  ;;  %v5923_v42 = vadd.f32 %v5922_v10, %v9989_v6 }
 0x2b3   : > { %v6300_v17 = vmax.f32 %v5870_v13, 0.0  ;;  %v6284_v18 = vmax.f32 %v5919_v8, 0.0  ;;  %v6301_v20 = vmax.f32 %v5921_v19, 0.0 }
 0x2b4   : > { %v6355_v9 = vadd.f32 %v6354_v61, %v6282_v45  ;;  %v6373_v52 = vadd.f32 %v6372_v62, %v6299_v51  ;;  %v6302_v27 = vmax.f32 %v5923_v42, 0.0 }
 0x2b5   : > { %v5959_v21 = vpop.f32.mrb[228].mxu1  ;;  %v6012_v22 = vpop.f32.mrb[228].mxu0 }
 0x2b6   : > { %v6356_v25 = vadd.f32 %v6355_v9, %v6283_v48  ;;  %v6374_v24 = vadd.f32 %v6373_v52, %v6300_v17  ;;  %v5960_v33 = vadd.f32 %v5959_v21, %v9979_v3  ;;  %v5961_v0 = vpop.f32.mrb[229].mxu1  ;;  %v6013_v26 = vadd.f32 %v6012_v22, %v9979_v3  ;;  %v6014_v23 = vpop.f32.mrb[229].mxu0 }
 0x2b7   : > { %v5962_v30 = vadd.f32 %v5961_v0, %v9979_v3  ;;  %v5963_v37 = vpop.f32.mrb[230].mxu1  ;;  %v6016_v28 = vpop.f32.mrb[230].mxu0  ;;  %v6015_v39 = vadd.f32 %v6014_v23, %v9979_v3 }
 0x2b8   : > { %v6357_v31 = vadd.f32 %v6356_v25, %v6284_v18  ;;  %v6375_v36 = vadd.f32 %v6374_v24, %v6301_v20  ;;  %v6249_v62 = vmax.f32 %v5960_v33, 0.0  ;;  %v5964_v16 = vadd.f32 %v5963_v37, %v9991_v7  ;;  %v5965_v29 = vpop.f32.mrb[231].mxu1  ;;  %v6018_v38 = vpop.f32.mrb[231].mxu0 }
 0x2b9   : > { %v6250_v41 = vmax.f32 %v5962_v30, 0.0  ;;  %v6251_v43 = vmax.f32 %v6013_v26, 0.0  ;;  %v5966_v40 = vadd.f32 %v5965_v29, %v9991_v7  ;;  %v6017_v32 = vadd.f32 %v6016_v28, %v9991_v7 }
 0x2ba   : > { %v6376_v35 = vadd.f32 %v6375_v36, %v6302_v27  ;;  %v6320_v47 = vadd.f32 %v6319_v63, %v6249_v62  ;;  %v6267_v49 = vmax.f32 %v5964_v16, 0.0  ;;  %v6019_v56 = vadd.f32 %v6018_v38, %v9991_v7 }
 0x2bb   : > { %v6268_v11 = vmax.f32 %v5966_v40, 0.0  ;;  %v6252_v44 = vmax.f32 %v6015_v39, 0.0  ;;  %v6269_v55 = vmax.f32 %v6017_v32, 0.0 }
 0x2bc   : > { %v6321_v54 = vadd.f32 %v6320_v47, %v6250_v41  ;;  %v6339_v53 = vadd.f32 %v6338_v12, %v6267_v49  ;;  %v6270_v63 = vmax.f32 %v6019_v56, 0.0 }
 0x2bd   : > { %v5969_v46 = vpop.f32.mrb[232].mxu1  ;;  %v6022_v59 = vpop.f32.mrb[232].mxu0 }
 0x2be   : > { %v6322_v57 = vadd.f32 %v6321_v54, %v6251_v43  ;;  %v6340_v60 = vadd.f32 %v6339_v53, %v6268_v11  ;;  %v5970_v15 = vadd.f32 %v5969_v46, %v9977_v14  ;;  %v5971_v34 = vpop.f32.mrb[233].mxu1  ;;  %v6023_v50 = vadd.f32 %v6022_v59, %v9977_v14  ;;  %v6024_v1 = vpop.f32.mrb[233].mxu0 }
 0x2bf   : > { %v5972_v2 = vadd.f32 %v5971_v34, %v9977_v14  ;;  %v5973_v58 = vpop.f32.mrb[234].mxu1  ;;  %v6026_v4 = vpop.f32.mrb[234].mxu0  ;;  %v6025_v19 = vadd.f32 %v6024_v1, %v9977_v14 }
 0x2c0   : > { %v6323_v5 = vadd.f32 %v6322_v57, %v6252_v44  ;;  %v6341_v10 = vadd.f32 %v6340_v60, %v6269_v55  ;;  %v6285_v45 = vmax.f32 %v5970_v15, 0.0  ;;  %v5974_v48 = vadd.f32 %v5973_v58, %v9989_v6  ;;  %v5975_v13 = vpop.f32.mrb[235].mxu1  ;;  %v6028_v8 = vpop.f32.mrb[235].mxu0 }
 0x2c1   : > { %v6286_v12 = vmax.f32 %v5972_v2, 0.0  ;;  %v6287_v61 = vmax.f32 %v6023_v50, 0.0  ;;  %v5976_v51 = vadd.f32 %v5975_v13, %v9989_v6  ;;  %v6027_v52 = vadd.f32 %v6026_v4, %v9989_v6 }
 0x2c2   : > { %v6342_v17 = vadd.f32 %v6341_v10, %v6270_v63  ;;  %v6358_v42 = vadd.f32 %v6357_v31, %v6285_v45  ;;  %v6303_v9 = vmax.f32 %v5974_v48, 0.0  ;;  %v6029_v20 = vadd.f32 %v6028_v8, %v9989_v6 }
 0x2c3   : > { %v6304_v18 = vmax.f32 %v5976_v51, 0.0  ;;  %v6288_v25 = vmax.f32 %v6025_v19, 0.0  ;;  %v6305_v24 = vmax.f32 %v6027_v52, 0.0 }
 0x2c4   : > { %v6359_v21 = vadd.f32 %v6358_v42, %v6286_v12  ;;  %v6377_v22 = vadd.f32 %v6376_v35, %v6303_v9  ;;  %v6306_v31 = vmax.f32 %v6029_v20, 0.0 }
 0x2c5   : > { %v6065_v33 = vpop.f32.mrb[236].mxu1  ;;  %v6118_v0 = vpop.f32.mrb[236].mxu0 }
 0x2c6   : > { %v6360_v26 = vadd.f32 %v6359_v21, %v6287_v61  ;;  %v6378_v23 = vadd.f32 %v6377_v22, %v6304_v18  ;;  %v6066_v27 = vadd.f32 %v6065_v33, %v9979_v3  ;;  %v6067_v30 = vpop.f32.mrb[237].mxu1  ;;  %v6119_v37 = vadd.f32 %v6118_v0, %v9979_v3  ;;  %v6120_v28 = vpop.f32.mrb[237].mxu0 }
 0x2c7   : > { %v6068_v36 = vadd.f32 %v6067_v30, %v9979_v3  ;;  %v6069_v62 = vpop.f32.mrb[238].mxu1  ;;  %v6122_v16 = vpop.f32.mrb[238].mxu0  ;;  %v6121_v32 = vadd.f32 %v6120_v28, %v9979_v3 }
 0x2c8   : > { %v6361_v29 = vadd.f32 %v6360_v26, %v6288_v25  ;;  %v6379_v38 = vadd.f32 %v6378_v23, %v6305_v24  ;;  %v6253_v41 = vmax.f32 %v6066_v27, 0.0  ;;  %v6070_v43 = vadd.f32 %v6069_v62, %v9991_v7  ;;  %v6071_v40 = vpop.f32.mrb[239].mxu1  ;;  %v6124_v39 = vpop.f32.mrb[239].mxu0 }
 0x2c9   : > { %v6254_v35 = vmax.f32 %v6068_v36, 0.0  ;;  %v6255_v47 = vmax.f32 %v6119_v37, 0.0  ;;  %v6072_v49 = vadd.f32 %v6071_v40, %v9991_v7  ;;  %v6123_v53 = vadd.f32 %v6122_v16, %v9991_v7 }
 0x2ca   : > { %v6380_v11 = vadd.f32 %v6379_v38, %v6306_v31  ;;  %v6324_v56 = vadd.f32 %v6323_v5, %v6253_v41  ;;  %v6271_v54 = vmax.f32 %v6070_v43, 0.0  ;;  %v6125_v55 = vadd.f32 %v6124_v39, %v9991_v7 }
 0x2cb   : > { %v6272_v44 = vmax.f32 %v6072_v49, 0.0  ;;  %v6256_v57 = vmax.f32 %v6121_v32, 0.0  ;;  %v6273_v60 = vmax.f32 %v6123_v53, 0.0 }
 0x2cc   : > { %v6325_v46 = vadd.f32 %v6324_v56, %v6254_v35  ;;  %v6343_v59 = vadd.f32 %v6342_v17, %v6271_v54  ;;  %v6274_v5 = vmax.f32 %v6125_v55, 0.0 }
 0x2cd   : > { %v6075_v15 = vpop.f32.mrb[240].mxu1  ;;  %v6128_v34 = vpop.f32.mrb[240].mxu0 }
 0x2ce   : > { %v6326_v50 = vadd.f32 %v6325_v46, %v6255_v47  ;;  %v6344_v1 = vadd.f32 %v6343_v59, %v6272_v44  ;;  %v6076_v63 = vadd.f32 %v6075_v15, %v9977_v14  ;;  %v6077_v2 = vpop.f32.mrb[241].mxu1  ;;  %v6129_v58 = vadd.f32 %v6128_v34, %v9977_v14  ;;  %v6130_v4 = vpop.f32.mrb[241].mxu0 }
 0x2cf   : > { %v6078_v10 = vadd.f32 %v6077_v2, %v9977_v14  ;;  %v6079_v45 = vpop.f32.mrb[242].mxu1  ;;  %v6132_v48 = vpop.f32.mrb[242].mxu0  ;;  %v6131_v52 = vadd.f32 %v6130_v4, %v9977_v14 }
 0x2d0   : > { %v6327_v13 = vadd.f32 %v6326_v50, %v6256_v57  ;;  %v6345_v8 = vadd.f32 %v6344_v1, %v6273_v60  ;;  %v6289_v12 = vmax.f32 %v6076_v63, 0.0  ;;  %v6080_v61 = vadd.f32 %v6079_v45, %v9989_v6  ;;  %v6081_v51 = vpop.f32.mrb[243].mxu1  ;;  %v6134_v19 = vpop.f32.mrb[243].mxu0 }
 0x2d1   : > { %v6290_v17 = vmax.f32 %v6078_v10, 0.0  ;;  %v6291_v42 = vmax.f32 %v6129_v58, 0.0  ;;  %v6082_v9 = vadd.f32 %v6081_v51, %v9989_v6  ;;  %v6133_v22 = vadd.f32 %v6132_v48, %v9989_v6 }
 0x2d2   : > { %v6346_v18 = vadd.f32 %v6345_v8, %v6274_v5  ;;  %v6362_v20 = vadd.f32 %v6361_v29, %v6289_v12  ;;  %v6307_v21 = vmax.f32 %v6080_v61, 0.0  ;;  %v6135_v24 = vadd.f32 %v6134_v19, %v9989_v6 }
 0x2d3   : > { %v6308_v25 = vmax.f32 %v6082_v9, 0.0  ;;  %v6292_v26 = vmax.f32 %v6131_v52, 0.0  ;;  %v6309_v23 = vmax.f32 %v6133_v22, 0.0 }
 0x2d4   : > { %v6363_v33 = vadd.f32 %v6362_v20, %v6290_v17  ;;  %v6381_v0 = vadd.f32 %v6380_v11, %v6307_v21  ;;  %v6310_v29 = vmax.f32 %v6135_v24, 0.0 }
 0x2d5   : > { %v6171_v27 = vpop.f32.mrb[244].mxu1  ;;  %v6224_v30 = vpop.f32.mrb[244].mxu0 }
 0x2d6   : > { %v6364_v37 = vadd.f32 %v6363_v33, %v6291_v42  ;;  %v6382_v28 = vadd.f32 %v6381_v0, %v6308_v25  ;;  %v6172_v31 = vadd.f32 %v6171_v27, %v9979_v3  ;;  %v6173_v36 = vpop.f32.mrb[245].mxu1  ;;  %v6225_v62 = vadd.f32 %v6224_v30, %v9979_v3  ;;  %v6226_v16 = vpop.f32.mrb[245].mxu0 }
 0x2d7   : > { %v6174_v38 = vadd.f32 %v6173_v36, %v9979_v3  ;;  %v6175_v41 = vpop.f32.mrb[246].mxu1  ;;  %v6228_v43 = vpop.f32.mrb[246].mxu0  ;;  %v6227_v15 = vadd.f32 %v6226_v16, %v9979_v3 }
 0x2d8   : > { %v6365_v40 = vadd.f32 %v6364_v37, %v6292_v26  ;;  %v6383_v39 = vadd.f32 %v6382_v28, %v6309_v23  ;;  %v6257_v35 = vmax.f32 %v6172_v31, 0.0  ;;  %v6176_v47 = vadd.f32 %v6175_v41, %v9991_v7  ;;  %v6177_v49 = vpop.f32.mrb[247].mxu1  ;;  %v6230_v32 = vpop.f32.mrb[247].mxu0 }
 0x2d9   : > { %v6258_v11 = vmax.f32 %v6174_v38, 0.0  ;;  %v6259_v56 = vmax.f32 %v6225_v62, 0.0  ;;  %v6178_v54 = vadd.f32 %v6177_v49, %v9991_v7  ;;  %v6229_v46 = vadd.f32 %v6228_v43, %v9991_v7 }
 0x2da   : > { %v6384_v53 = vadd.f32 %v6383_v39, %v6310_v29  ;;  %v6328_v44 = vadd.f32 %v6327_v13, %v6257_v35  ;;  %v6275_v55 = vmax.f32 %v6176_v47, 0.0  ;;  %v6231_v50 = vadd.f32 %v6230_v32, %v9991_v7 }
 0x2db   : > { %v6276_v59 = vmax.f32 %v6178_v54, 0.0  ;;  %v6277_v34 = vmax.f32 %v6229_v46, 0.0  ;;  %v6260_v42 = vmax.f32 %v6227_v15, 0.0 }
 0x2dc   : > { %v6329_v57 = vadd.f32 %v6328_v44, %v6258_v11  ;;  %v6347_v60 = vadd.f32 %v6346_v18, %v6275_v55  ;;  %v6278_v9 = vmax.f32 %v6231_v50, 0.0 }
 0x2dd   : > { %v6181_v1 = vpop.f32.mrb[248].mxu1  ;;  %v6234_v63 = vpop.f32.mrb[248].mxu0 }
 0x2de   : > { %v6330_v2 = vadd.f32 %v6329_v57, %v6259_v56  ;;  %v6348_v58 = vadd.f32 %v6347_v60, %v6276_v59  ;;  %v6182_v4 = vadd.f32 %v6181_v1, %v9977_v14  ;;  %v6183_v5 = vpop.f32.mrb[249].mxu1  ;;  %v6235_v10 = vadd.f32 %v6234_v63, %v9977_v14  ;;  %v6236_v45 = vpop.f32.mrb[249].mxu0 }
 0x2df   : > { %v6184_v48 = vadd.f32 %v6183_v5, %v9977_v14  ;;  %v6185_v13 = vpop.f32.mrb[250].mxu1  ;;  %v6238_v8 = vpop.f32.mrb[250].mxu0  ;;  %v6237_v33 = vadd.f32 %v6236_v45, %v9977_v14 }
 0x2e0   : > { %v6349_v12 = vadd.f32 %v6348_v58, %v6277_v34  ;;  %v6293_v61 = vmax.f32 %v6182_v4, 0.0  ;;  %v6186_v51 = vadd.f32 %v6185_v13, %v9989_v6  ;;  %v6187_v19 = vpop.f32.mrb[251].mxu1  ;;  %v6240_v17 = vpop.f32.mrb[251].mxu0  ;;  %v6295_v22 = vmax.f32 %v6235_v10, 0.0 }
 0x2e1   : > { %v6294_v52 = vmax.f32 %v6184_v48, 0.0  ;;  %v6188_v18 = vadd.f32 %v6187_v19, %v9989_v6  ;;  %v6239_v25 = vadd.f32 %v6238_v8, %v9989_v6  ;;  %v6331_v0 = vadd.f32 %v6330_v2, %v6260_v42 }
 0x2e2   : > { %v6366_v20 = vadd.f32 %v6365_v40, %v6293_v61  ;;  %v6311_v21 = vmax.f32 %v6186_v51, 0.0  ;;  %v6350_v26 = vadd.f32 %v6349_v12, %v6278_v9  ;;  %v6241_v30 = vadd.f32 %v6240_v17, %v9989_v6 }
 0x2e3   : > { %v6312_v24 = vmax.f32 %v6188_v18, 0.0  ;;  %6332 = vadd.xlane.f32.xlu1 %v6331_v0  ;;  %v6313_v62 = vmax.f32 %v6239_v25, 0.0  ;;  %v6296_v41 = vmax.f32 %v6237_v33, 0.0 }
 0x2e4   : > { %v6367_v23 = vadd.f32 %v6366_v20, %v6294_v52  ;;  %v6385_v27 = vadd.f32 %v6384_v53, %v6311_v21  ;;  %6351 = vadd.xlane.f32.xlu0 %v6350_v26  ;;  %v6314_v44 = vmax.f32 %v6241_v30, 0.0 }
 0x2e5   : > { %v6682_v37 = vpop.f32.mrb[252].mxu1  ;;  %v6735_v28 = vpop.f32.mrb[252].mxu0 }
 0x2e6   : > { %v6368_v31 = vadd.f32 %v6367_v23, %v6295_v22  ;;  %v6386_v36 = vadd.f32 %v6385_v27, %v6312_v24  ;;  %v6683_v16 = vadd.f32 %v6682_v37, %v9979_v3  ;;  %v6684_v29 = vpop.f32.mrb[253].mxu1  ;;  %v6737_v38 = vpop.f32.mrb[253].mxu0  ;;  %v6736_v39 = vadd.f32 %v6735_v28, %v9979_v3 }
 0x2e7   : > { %v6685_v43 = vadd.f32 %v6684_v29, %v9979_v3  ;;  %v6686_v40 = vpop.f32.mrb[254].mxu1  ;;  %v6738_v35 = vadd.f32 %v6737_v38, %v9979_v3  ;;  %v6739_v47 = vpop.f32.mrb[254].mxu0 }
 0x2e8   : > { %v6387_v49 = vadd.f32 %v6386_v36, %v6313_v62  ;;  %v7125_v32 = vmax.f32 %v6683_v16, 0.0  ;;  %v6687_v11 = vadd.f32 %v6686_v40, %v9991_v7  ;;  %v6688_v56 = vpop.f32.mrb[255].mxu1  ;;  %v6740_v54 = vadd.f32 %v6739_v47, %v9991_v7  ;;  %v6741_v53 = vpop.f32.mrb[255].mxu0 }
 0x2e9   : > { %v7126_v55 = vmax.f32 %v6685_v43, 0.0  ;;  %v7127_v46 = vmax.f32 %v6736_v39, 0.0  ;;  %v6689_v59 = vadd.f32 %v6688_v56, %v9991_v7  ;;  %v7128_v60 = vmax.f32 %v6738_v35, 0.0 }
 0x2ea   : > { %v7143_v57 = vmax.f32 %v6687_v11, 0.0  ;;  %v7145_v15 = vmax.f32 %v6740_v54, 0.0  ;;  %v6742_v34 = vadd.f32 %v6741_v53, %v9991_v7  ;;  %v6369_v63 = vadd.f32 %v6368_v31, %v6296_v41 }
 0x2eb   : > { %v7197_v50 = vadd.f32 %v7126_v55, %v7125_v32  ;;  %v7144_v1 = vmax.f32 %v6689_v59, 0.0  ;;  %v6388_v2 = vadd.f32 %v6387_v49, %v6314_v44 }
 0x2ec   : > { %6370 = vadd.xlane.f32.xlu1 %v6369_v63  ;;  %v7146_v45 = vmax.f32 %v6742_v34, 0.0 }
 0x2ed   : > { %v7198_v58 = vadd.f32 %v7197_v50, %v7127_v46  ;;  %v7216_v4 = vadd.f32 %v7144_v1, %v7143_v57  ;;  %6389 = vadd.xlane.f32.xlu0 %v6388_v2  ;;  %v6692_v5 = vpop.f32.mrb[0].mxu1  ;;  %v6745_v10 = vpop.f32.mrb[0].mxu0 }
 0x2ee   : > { %v6693_v48 = vadd.f32 %v6692_v5, %v9977_v14  ;;  %v6694_v13 = vpop.f32.mrb[1].mxu1  ;;  %v6746_v8 = vadd.f32 %v6745_v10, %v9977_v14  ;;  %v6747_v12 = vpop.f32.mrb[1].mxu0 }
 0x2ef   : > { %v7199_v61 = vadd.f32 %v7198_v58, %v7128_v60  ;;  %v7217_v51 = vadd.f32 %v7216_v4, %v7145_v15  ;;  %v6695_v19 = vadd.f32 %v6694_v13, %v9977_v14  ;;  %v6696_v17 = vpop.f32.mrb[2].mxu1  ;;  %v6748_v42 = vadd.f32 %v6747_v12, %v9977_v14  ;;  %v6749_v9 = vpop.f32.mrb[2].mxu0 }
 0x2f0   : > { %v7161_v52 = vmax.f32 %v6693_v48, 0.0  ;;  %v6697_v18 = vadd.f32 %v6696_v17, %v9989_v6  ;;  %v6698_v20 = vpop.f32.mrb[3].mxu1  ;;  %v6750_v21 = vadd.f32 %v6749_v9, %v9989_v6  ;;  %v6751_v22 = vpop.f32.mrb[3].mxu0  ;;  %v7163_v33 = vmax.f32 %v6746_v8, 0.0 }
 0x2f1   : > { %v7218_v25 = vadd.f32 %v7217_v51, %v7146_v45  ;;  %v7162_v24 = vmax.f32 %v6695_v19, 0.0  ;;  %v6699_v0 = vadd.f32 %v6698_v20, %v9989_v6  ;;  %v7164_v23 = vmax.f32 %v6748_v42, 0.0 }
 0x2f2   : > { %v7179_v26 = vmax.f32 %v6697_v18, 0.0  ;;  %v7181_v37 = vmax.f32 %v6750_v21, 0.0  ;;  %v6752_v28 = vadd.f32 %v6751_v22, %v9989_v6 }
 0x2f3   : > { %v7235_v27 = vadd.f32 %v7162_v24, %v7161_v52  ;;  %v7180_v30 = vmax.f32 %v6699_v0, 0.0 }
 0x2f4   : > { %v7182_v35 = vmax.f32 %v6752_v28, 0.0 }
 0x2f5   : > { %v7236_v31 = vadd.f32 %v7235_v27, %v7163_v33  ;;  %v7254_v36 = vadd.f32 %v7180_v30, %v7179_v26  ;;  %v6788_v62 = vpop.f32.mrb[4].mxu1  ;;  %v6841_v16 = vpop.f32.mrb[4].mxu0 }
 0x2f6   : > { %v6789_v29 = vadd.f32 %v6788_v62, %v9979_v3  ;;  %v6790_v38 = vpop.f32.mrb[5].mxu1  ;;  %v6842_v41 = vadd.f32 %v6841_v16, %v9979_v3  ;;  %v6843_v43 = vpop.f32.mrb[5].mxu0 }
 0x2f7   : > { %v7237_v40 = vadd.f32 %v7236_v31, %v7164_v23  ;;  %v7255_v39 = vadd.f32 %v7254_v36, %v7181_v37  ;;  %v6791_v47 = vadd.f32 %v6790_v38, %v9979_v3  ;;  %v6792_v49 = vpop.f32.mrb[6].mxu1  ;;  %v6845_v32 = vpop.f32.mrb[6].mxu0  ;;  %v6844_v53 = vadd.f32 %v6843_v43, %v9979_v3 }
 0x2f8   : > { %v7129_v11 = vmax.f32 %v6789_v29, 0.0  ;;  %v6793_v56 = vadd.f32 %v6792_v49, %v9991_v7  ;;  %v6794_v54 = vpop.f32.mrb[7].mxu1  ;;  %v6847_v44 = vpop.f32.mrb[7].mxu0  ;;  %v6846_v57 = vadd.f32 %v6845_v32, %v9991_v7  ;;  %v7131_v34 = vmax.f32 %v6842_v41, 0.0 }
 0x2f9   : > { %v7256_v55 = vadd.f32 %v7255_v39, %v7182_v35  ;;  %v7130_v46 = vmax.f32 %v6791_v47, 0.0  ;;  %v6795_v59 = vadd.f32 %v6794_v54, %v9991_v7  ;;  %v6848_v1 = vadd.f32 %v6847_v44, %v9991_v7 }
 0x2fa   : > { %v7200_v60 = vadd.f32 %v7199_v61, %v7129_v11  ;;  %v7147_v15 = vmax.f32 %v6793_v56, 0.0  ;;  %v7132_v58 = vmax.f32 %v6844_v53, 0.0  ;;  %v7149_v4 = vmax.f32 %v6846_v57, 0.0 }
 0x2fb   : > { %v7148_v50 = vmax.f32 %v6795_v59, 0.0  ;;  %v7150_v61 = vmax.f32 %v6848_v1, 0.0 }
 0x2fc   : > { %v7201_v63 = vadd.f32 %v7200_v60, %v7130_v46  ;;  %v7219_v2 = vadd.f32 %v7218_v25, %v7147_v15 }
 0x2fd   : > { %v6798_v5 = vpop.f32.mrb[8].mxu1  ;;  %v6851_v10 = vpop.f32.mrb[8].mxu0 }
 0x2fe   : > { %v7202_v45 = vadd.f32 %v7201_v63, %v7131_v34  ;;  %v7220_v48 = vadd.f32 %v7219_v2, %v7148_v50  ;;  %v6799_v13 = vadd.f32 %v6798_v5, %v9977_v14  ;;  %v6800_v8 = vpop.f32.mrb[9].mxu1  ;;  %v6852_v12 = vadd.f32 %v6851_v10, %v9977_v14  ;;  %v6853_v51 = vpop.f32.mrb[9].mxu0 }
 0x2ff   : > { %v6801_v19 = vadd.f32 %v6800_v8, %v9977_v14  ;;  %v6802_v17 = vpop.f32.mrb[10].mxu1  ;;  %v6855_v42 = vpop.f32.mrb[10].mxu0  ;;  %v6854_v0 = vadd.f32 %v6853_v51, %v9977_v14 }
 0x300   : > { %v7203_v9 = vadd.f32 %v7202_v45, %v7132_v58  ;;  %v7221_v52 = vadd.f32 %v7220_v48, %v7149_v4  ;;  %v7165_v18 = vmax.f32 %v6799_v13, 0.0  ;;  %v6803_v20 = vadd.f32 %v6802_v17, %v9989_v6  ;;  %v6804_v21 = vpop.f32.mrb[11].mxu1  ;;  %v6857_v22 = vpop.f32.mrb[11].mxu0 }
 0x301   : > { %v7166_v25 = vmax.f32 %v6801_v19, 0.0  ;;  %v7167_v24 = vmax.f32 %v6852_v12, 0.0  ;;  %v6805_v33 = vadd.f32 %v6804_v21, %v9989_v6  ;;  %v6856_v30 = vadd.f32 %v6855_v42, %v9989_v6 }
 0x302   : > { %v7222_v26 = vadd.f32 %v7221_v52, %v7150_v61  ;;  %v7238_v23 = vadd.f32 %v7237_v40, %v7165_v18  ;;  %v7183_v27 = vmax.f32 %v6803_v20, 0.0  ;;  %v6858_v28 = vadd.f32 %v6857_v22, %v9989_v6 }
 0x303   : > { %v7184_v37 = vmax.f32 %v6805_v33, 0.0  ;;  %v7168_v62 = vmax.f32 %v6854_v0, 0.0  ;;  %v7185_v16 = vmax.f32 %v6856_v30, 0.0 }
 0x304   : > { %v7239_v31 = vadd.f32 %v7238_v23, %v7166_v25  ;;  %v7257_v36 = vadd.f32 %v7256_v55, %v7183_v27  ;;  %v7186_v49 = vmax.f32 %v6858_v28, 0.0 }
 0x305   : > { %v6894_v29 = vpop.f32.mrb[12].mxu1  ;;  %v6947_v38 = vpop.f32.mrb[12].mxu0 }
 0x306   : > { %v7240_v41 = vadd.f32 %v7239_v31, %v7167_v24  ;;  %v7258_v43 = vadd.f32 %v7257_v36, %v7184_v37  ;;  %v6895_v39 = vadd.f32 %v6894_v29, %v9979_v3  ;;  %v6896_v35 = vpop.f32.mrb[13].mxu1  ;;  %v6948_v47 = vadd.f32 %v6947_v38, %v9979_v3  ;;  %v6949_v40 = vpop.f32.mrb[13].mxu0 }
 0x307   : > { %v6897_v32 = vadd.f32 %v6896_v35, %v9979_v3  ;;  %v6898_v11 = vpop.f32.mrb[14].mxu1  ;;  %v6951_v56 = vpop.f32.mrb[14].mxu0  ;;  %v6950_v34 = vadd.f32 %v6949_v40, %v9979_v3 }
 0x308   : > { %v7241_v54 = vadd.f32 %v7240_v41, %v7168_v62  ;;  %v7259_v53 = vadd.f32 %v7258_v43, %v7185_v16  ;;  %v7133_v44 = vmax.f32 %v6895_v39, 0.0  ;;  %v6899_v55 = vadd.f32 %v6898_v11, %v9991_v7  ;;  %v6900_v46 = vpop.f32.mrb[15].mxu1  ;;  %v6953_v59 = vpop.f32.mrb[15].mxu0 }
 0x309   : > { %v7134_v57 = vmax.f32 %v6897_v32, 0.0  ;;  %v7135_v60 = vmax.f32 %v6948_v47, 0.0  ;;  %v6901_v15 = vadd.f32 %v6900_v46, %v9991_v7  ;;  %v6952_v2 = vadd.f32 %v6951_v56, %v9991_v7 }
 0x30a   : > { %v7260_v50 = vadd.f32 %v7259_v53, %v7186_v49  ;;  %v7204_v1 = vadd.f32 %v7203_v9, %v7133_v44  ;;  %v7151_v63 = vmax.f32 %v6899_v55, 0.0  ;;  %v6954_v4 = vadd.f32 %v6953_v59, %v9991_v7 }
 0x30b   : > { %v7152_v58 = vmax.f32 %v6901_v15, 0.0  ;;  %v7136_v45 = vmax.f32 %v6950_v34, 0.0  ;;  %v7153_v48 = vmax.f32 %v6952_v2, 0.0 }
 0x30c   : > { %v7205_v5 = vadd.f32 %v7204_v1, %v7134_v57  ;;  %v7223_v10 = vadd.f32 %v7222_v26, %v7151_v63  ;;  %v7154_v9 = vmax.f32 %v6954_v4, 0.0 }
 0x30d   : > { %v6904_v13 = vpop.f32.mrb[16].mxu1  ;;  %v6957_v8 = vpop.f32.mrb[16].mxu0 }
 0x30e   : > { %v7206_v12 = vadd.f32 %v7205_v5, %v7135_v60  ;;  %v7224_v51 = vadd.f32 %v7223_v10, %v7152_v58  ;;  %v6905_v61 = vadd.f32 %v6904_v13, %v9977_v14  ;;  %v6906_v19 = vpop.f32.mrb[17].mxu1  ;;  %v6958_v17 = vadd.f32 %v6957_v8, %v9977_v14  ;;  %v6959_v42 = vpop.f32.mrb[17].mxu0 }
 0x30f   : > { %v6907_v52 = vadd.f32 %v6906_v19, %v9977_v14  ;;  %v6908_v18 = vpop.f32.mrb[18].mxu1  ;;  %v6961_v20 = vpop.f32.mrb[18].mxu0  ;;  %v6960_v30 = vadd.f32 %v6959_v42, %v9977_v14 }
 0x310   : > { %v7207_v21 = vadd.f32 %v7206_v12, %v7136_v45  ;;  %v7225_v22 = vadd.f32 %v7224_v51, %v7153_v48  ;;  %v7169_v25 = vmax.f32 %v6905_v61, 0.0  ;;  %v6909_v24 = vadd.f32 %v6908_v18, %v9989_v6  ;;  %v6910_v33 = vpop.f32.mrb[19].mxu1  ;;  %v6963_v0 = vpop.f32.mrb[19].mxu0 }
 0x311   : > { %v7170_v26 = vmax.f32 %v6907_v52, 0.0  ;;  %v7171_v23 = vmax.f32 %v6958_v17, 0.0  ;;  %v6911_v27 = vadd.f32 %v6910_v33, %v9989_v6  ;;  %v6962_v36 = vadd.f32 %v6961_v20, %v9989_v6 }
 0x312   : > { %v7226_v37 = vadd.f32 %v7225_v22, %v7154_v9  ;;  %v7242_v28 = vadd.f32 %v7241_v54, %v7169_v25  ;;  %v7187_v31 = vmax.f32 %v6909_v24, 0.0  ;;  %v6964_v16 = vadd.f32 %v6963_v0, %v9989_v6 }
 0x313   : > { %v7188_v62 = vmax.f32 %v6911_v27, 0.0  ;;  %v7172_v41 = vmax.f32 %v6960_v30, 0.0  ;;  %v7189_v40 = vmax.f32 %v6962_v36, 0.0 }
 0x314   : > { %v7243_v29 = vadd.f32 %v7242_v28, %v7170_v26  ;;  %v7261_v38 = vadd.f32 %v7260_v50, %v7187_v31  ;;  %v7190_v56 = vmax.f32 %v6964_v16, 0.0 }
 0x315   : > { %v7000_v43 = vpop.f32.mrb[20].mxu1  ;;  %v7053_v39 = vpop.f32.mrb[20].mxu0 }
 0x316   : > { %v7244_v35 = vadd.f32 %v7243_v29, %v7171_v23  ;;  %v7262_v47 = vadd.f32 %v7261_v38, %v7188_v62  ;;  %v7001_v49 = vadd.f32 %v7000_v43, %v9979_v3  ;;  %v7002_v32 = vpop.f32.mrb[21].mxu1  ;;  %v7055_v11 = vpop.f32.mrb[21].mxu0  ;;  %v7054_v57 = vadd.f32 %v7053_v39, %v9979_v3 }
 0x317   : > { %v7003_v54 = vadd.f32 %v7002_v32, %v9979_v3  ;;  %v7004_v53 = vpop.f32.mrb[22].mxu1  ;;  %v7057_v44 = vpop.f32.mrb[22].mxu0  ;;  %v7056_v2 = vadd.f32 %v7055_v11, %v9979_v3 }
 0x318   : > { %v7245_v55 = vadd.f32 %v7244_v35, %v7172_v41  ;;  %v7263_v46 = vadd.f32 %v7262_v47, %v7189_v40  ;;  %v7137_v59 = vmax.f32 %v7001_v49, 0.0  ;;  %v7006_v60 = vpop.f32.mrb[23].mxu1  ;;  %v7059_v15 = vpop.f32.mrb[23].mxu0  ;;  %v7005_v50 = vadd.f32 %v7004_v53, %v9991_v7 }
 0x319   : > { %v7138_v34 = vmax.f32 %v7003_v54, 0.0  ;;  %v7007_v58 = vadd.f32 %v7006_v60, %v9991_v7  ;;  %v7058_v5 = vadd.f32 %v7057_v44, %v9991_v7  ;;  %v7060_v10 = vadd.f32 %v7059_v15, %v9991_v7 }
 0x31a   : > { %v7264_v1 = vadd.f32 %v7263_v46, %v7190_v56  ;;  %v7208_v63 = vadd.f32 %v7207_v21, %v7137_v59  ;;  %v7155_v4 = vmax.f32 %v7005_v50, 0.0  ;;  %v7139_v45 = vmax.f32 %v7054_v57, 0.0 }
 0x31b   : > { %v7156_v13 = vmax.f32 %v7007_v58, 0.0  ;;  %v7140_v61 = vmax.f32 %v7056_v2, 0.0  ;;  %v7157_v52 = vmax.f32 %v7058_v5, 0.0  ;;  %v7158_v20 = vmax.f32 %v7060_v10, 0.0 }
 0x31c   : > { %v7209_v48 = vadd.f32 %v7208_v63, %v7138_v34  ;;  %v7227_v8 = vadd.f32 %v7226_v37, %v7155_v4 }
 0x31d   : > { %v7010_v12 = vpop.f32.mrb[24].mxu1  ;;  %v7063_v51 = vpop.f32.mrb[24].mxu0 }
 0x31e   : > { %v7210_v19 = vadd.f32 %v7209_v48, %v7139_v45  ;;  %v7011_v17 = vadd.f32 %v7010_v12, %v9977_v14  ;;  %v7012_v42 = vpop.f32.mrb[25].mxu1  ;;  %v7065_v9 = vpop.f32.mrb[25].mxu0  ;;  %v7228_v18 = vadd.f32 %v7227_v8, %v7156_v13  ;;  %v7064_v0 = vadd.f32 %v7063_v51, %v9977_v14 }
 0x31f   : > { %v7013_v21 = vadd.f32 %v7012_v42, %v9977_v14  ;;  %v7014_v22 = vpop.f32.mrb[26].mxu1  ;;  %v7067_v25 = vpop.f32.mrb[26].mxu0  ;;  %v7066_v28 = vadd.f32 %v7065_v9, %v9977_v14 }
 0x320   : > { %v7211_v24 = vadd.f32 %v7210_v19, %v7140_v61  ;;  %v7173_v33 = vmax.f32 %v7011_v17, 0.0  ;;  %v7015_v26 = vadd.f32 %v7014_v22, %v9989_v6  ;;  %v7016_v23 = vpop.f32.mrb[27].mxu1  ;;  %v7069_v27 = vpop.f32.mrb[27].mxu0  ;;  %v7229_v30 = vadd.f32 %v7228_v18, %v7157_v52 }
 0x321   : > { %v7174_v37 = vmax.f32 %v7013_v21, 0.0  ;;  %v7068_v31 = vadd.f32 %v7067_v25, %v9989_v6  ;;  %v7017_v16 = vadd.f32 %v7016_v23, %v9989_v6  ;;  %v7070_v38 = vadd.f32 %v7069_v27, %v9989_v6 }
 0x322   : > { %v7246_v36 = vadd.f32 %v7245_v55, %v7173_v33  ;;  %v7191_v62 = vmax.f32 %v7015_v26, 0.0  ;;  %v7230_v29 = vadd.f32 %v7229_v30, %v7158_v20  ;;  %v7175_v41 = vmax.f32 %v7064_v0, 0.0 }
 0x323   : > { %v7192_v35 = vmax.f32 %v7017_v16, 0.0  ;;  %v7176_v47 = vmax.f32 %v7066_v28, 0.0  ;;  %v7193_v40 = vmax.f32 %v7068_v31, 0.0  ;;  %v7194_v46 = vmax.f32 %v7070_v38, 0.0 }
 0x324   : > { %v7247_v43 = vadd.f32 %v7246_v36, %v7174_v37  ;;  %v7265_v39 = vadd.f32 %v7264_v1, %v7191_v62 }
 0x325   : > { %v7106_v49 = vpop.f32.mrb[28].mxu1  ;;  %v7564_v32 = vpop.f32.mrb[28].mxu0 }
 0x326   : > { %v7248_v11 = vadd.f32 %v7247_v43, %v7175_v41  ;;  %v7266_v56 = vadd.f32 %v7265_v39, %v7192_v35  ;;  %v7107_v54 = vadd.f32 %v7106_v49, %v9979_v3  ;;  %v7565_v53 = vadd.f32 %v7564_v32, %v9979_v3  ;;  %v7108_v44 = vpop.f32.mrb[29].mxu1  ;;  %v7566_v55 = vpop.f32.mrb[29].mxu0 }
 0x327   : > { %v7109_v59 = vadd.f32 %v7108_v44, %v9979_v3  ;;  %v7567_v57 = vadd.f32 %v7566_v55, %v9979_v3  ;;  %v7110_v60 = vpop.f32.mrb[30].mxu1  ;;  %v7568_v15 = vpop.f32.mrb[30].mxu0 }
 0x328   : > { %v7249_v34 = vadd.f32 %v7248_v11, %v7176_v47  ;;  %v7267_v50 = vadd.f32 %v7266_v56, %v7193_v40  ;;  %v7141_v1 = vmax.f32 %v7107_v54, 0.0  ;;  %v8007_v63 = vmax.f32 %v7565_v53, 0.0  ;;  %v7112_v2 = vpop.f32.mrb[31].mxu1  ;;  %v7570_v58 = vpop.f32.mrb[31].mxu0 }
 0x329   : > { %v7142_v4 = vmax.f32 %v7109_v59, 0.0  ;;  %v8008_v5 = vmax.f32 %v7567_v57, 0.0  ;;  %v7111_v10 = vadd.f32 %v7110_v60, %v9991_v7  ;;  %v7569_v45 = vadd.f32 %v7568_v15, %v9991_v7 }
 0x32a   : > { %v7268_v48 = vadd.f32 %v7267_v50, %v7194_v46  ;;  %v7212_v13 = vadd.f32 %v7211_v24, %v7141_v1  ;;  %v7113_v8 = vadd.f32 %v7112_v2, %v9991_v7  ;;  %v7571_v12 = vadd.f32 %v7570_v58, %v9991_v7 }
 0x32b   : > { %v8079_v51 = vadd.f32 %v8008_v5, %v8007_v63  ;;  %v7159_v61 = vmax.f32 %v7111_v10, 0.0  ;;  %v8025_v19 = vmax.f32 %v7569_v45, 0.0 }
 0x32c   : > { %v7160_v17 = vmax.f32 %v7113_v8, 0.0  ;;  %v8026_v42 = vmax.f32 %v7571_v12, 0.0  ;;  %v7213_v9 = vadd.f32 %v7212_v13, %v7142_v4 }
 0x32d   : > { %v7231_v52 = vadd.f32 %v7230_v29, %v7159_v61  ;;  %v7116_v18 = vpop.f32.mrb[32].mxu1  ;;  %v7574_v20 = vpop.f32.mrb[32].mxu0 }
 0x32e   : > { %v8098_v21 = vadd.f32 %v8026_v42, %v8025_v19  ;;  %v7117_v22 = vadd.f32 %v7116_v18, %v9977_v14  ;;  %v7575_v25 = vadd.f32 %v7574_v20, %v9977_v14  ;;  %v7118_v33 = vpop.f32.mrb[33].mxu1  ;;  %7214 = vadd.xlane.f32.xlu1 %v7213_v9  ;;  %v7576_v0 = vpop.f32.mrb[33].mxu0 }
 0x32f   : > { %v7119_v24 = vadd.f32 %v7118_v33, %v9977_v14  ;;  %v7120_v26 = vpop.f32.mrb[34].mxu1  ;;  %v7232_v23 = vadd.f32 %v7231_v52, %v7160_v17  ;;  %v7577_v37 = vadd.f32 %v7576_v0, %v9977_v14  ;;  %v7578_v31 = vpop.f32.mrb[34].mxu0 }
 0x330   : > { %v7177_v27 = vmax.f32 %v7117_v22, 0.0  ;;  %v8043_v30 = vmax.f32 %v7575_v25, 0.0  ;;  %v7121_v28 = vadd.f32 %v7120_v26, %v9989_v6  ;;  %v7122_v36 = vpop.f32.mrb[35].mxu1  ;;  %v7579_v16 = vadd.f32 %v7578_v31, %v9989_v6  ;;  %v7580_v38 = vpop.f32.mrb[35].mxu0 }
 0x331   : > { %v7178_v62 = vmax.f32 %v7119_v24, 0.0  ;;  %v7123_v29 = vadd.f32 %v7122_v36, %v9989_v6  ;;  %7233 = vadd.xlane.f32.xlu0 %v7232_v23  ;;  %v8044_v43 = vmax.f32 %v7577_v37, 0.0  ;;  %v7581_v35 = vadd.f32 %v7580_v38, %v9989_v6 }
 0x332   : > { %v7250_v41 = vadd.f32 %v7249_v34, %v7177_v27  ;;  %v7195_v39 = vmax.f32 %v7121_v28, 0.0  ;;  %v8061_v47 = vmax.f32 %v7579_v16, 0.0 }
 0x333   : > { %v7196_v40 = vmax.f32 %v7123_v29, 0.0  ;;  %v8117_v49 = vadd.f32 %v8044_v43, %v8043_v30  ;;  %v8062_v11 = vmax.f32 %v7581_v35, 0.0 }
 0x334   : > { %v7269_v32 = vadd.f32 %v7268_v48, %v7195_v39  ;;  %v7251_v53 = vadd.f32 %v7250_v41, %v7178_v62 }
 0x335   : > { %v7617_v56 = vpop.f32.mrb[36].mxu1  ;;  %v7670_v54 = vpop.f32.mrb[36].mxu0  ;;  %v8136_v44 = vadd.f32 %v8062_v11, %v8061_v47 }
 0x336   : > { %v7618_v55 = vadd.f32 %v7617_v56, %v9979_v3  ;;  %v7619_v46 = vpop.f32.mrb[37].mxu1  ;;  %v7672_v57 = vpop.f32.mrb[37].mxu0  ;;  %7252 = vadd.xlane.f32.xlu1 %v7251_v53  ;;  %v7270_v15 = vadd.f32 %v7269_v32, %v7196_v40  ;;  %v7671_v50 = vadd.f32 %v7670_v54, %v9979_v3 }
 0x337   : > { %v7620_v59 = vadd.f32 %v7619_v46, %v9979_v3  ;;  %v7621_v60 = vpop.f32.mrb[38].mxu1  ;;  %v7674_v63 = vpop.f32.mrb[38].mxu0  ;;  %v7673_v4 = vadd.f32 %v7672_v57, %v9979_v3 }
 0x338   : > { %v8009_v34 = vmax.f32 %v7618_v55, 0.0  ;;  %v7622_v1 = vadd.f32 %v7621_v60, %v9991_v7  ;;  %v7623_v2 = vpop.f32.mrb[39].mxu1  ;;  %v7676_v10 = vpop.f32.mrb[39].mxu0  ;;  %7271 = vadd.xlane.f32.xlu0 %v7270_v15  ;;  %v7675_v13 = vadd.f32 %v7674_v63, %v9991_v7  ;;  %v8011_v61 = vmax.f32 %v7671_v50, 0.0 }
 0x339   : > { %v8010_v58 = vmax.f32 %v7620_v59, 0.0  ;;  %v7624_v5 = vadd.f32 %v7623_v2, %v9991_v7  ;;  %v7677_v12 = vadd.f32 %v7676_v10, %v9991_v7  ;;  %v8012_v42 = vmax.f32 %v7673_v4, 0.0 }
 0x33a   : > { %v8080_v45 = vadd.f32 %v8079_v51, %v8009_v34  ;;  %v8027_v48 = vmax.f32 %v7622_v1, 0.0  ;;  %v8029_v20 = vmax.f32 %v7675_v13, 0.0 }
 0x33b   : > { %v8028_v8 = vmax.f32 %v7624_v5, 0.0  ;;  %v8030_v51 = vmax.f32 %v7677_v12, 0.0 }
 0x33c   : > { %v8081_v19 = vadd.f32 %v8080_v45, %v8010_v58  ;;  %v8099_v17 = vadd.f32 %v8098_v21, %v8027_v48 }
 0x33d   : > { %v7627_v9 = vpop.f32.mrb[40].mxu1  ;;  %v7680_v52 = vpop.f32.mrb[40].mxu0 }
 0x33e   : > { %v8082_v18 = vadd.f32 %v8081_v19, %v8011_v61  ;;  %v8100_v22 = vadd.f32 %v8099_v17, %v8028_v8  ;;  %v7628_v25 = vadd.f32 %v7627_v9, %v9977_v14  ;;  %v7629_v33 = vpop.f32.mrb[41].mxu1  ;;  %v7682_v24 = vpop.f32.mrb[41].mxu0  ;;  %v7681_v21 = vadd.f32 %v7680_v52, %v9977_v14 }
 0x33f   : > { %v7630_v0 = vadd.f32 %v7629_v33, %v9977_v14  ;;  %v7631_v26 = vpop.f32.mrb[42].mxu1  ;;  %v7684_v23 = vpop.f32.mrb[42].mxu0  ;;  %v7683_v38 = vadd.f32 %v7682_v24, %v9977_v14 }
 0x340   : > { %v8083_v27 = vadd.f32 %v8082_v18, %v8012_v42  ;;  %v8101_v30 = vadd.f32 %v8100_v22, %v8029_v20  ;;  %v8045_v37 = vmax.f32 %v7628_v25, 0.0  ;;  %v7633_v28 = vpop.f32.mrb[43].mxu1  ;;  %v7686_v31 = vpop.f32.mrb[43].mxu0  ;;  %v7632_v62 = vadd.f32 %v7631_v26, %v9989_v6 }
 0x341   : > { %v8046_v36 = vmax.f32 %v7630_v0, 0.0  ;;  %v7634_v41 = vadd.f32 %v7633_v28, %v9989_v6  ;;  %v7685_v39 = vadd.f32 %v7684_v23, %v9989_v6  ;;  %v8047_v35 = vmax.f32 %v7681_v21, 0.0 }
 0x342   : > { %v8102_v16 = vadd.f32 %v8101_v30, %v8030_v51  ;;  %v8118_v29 = vadd.f32 %v8117_v49, %v8045_v37  ;;  %v8063_v43 = vmax.f32 %v7632_v62, 0.0  ;;  %v7687_v11 = vadd.f32 %v7686_v31, %v9989_v6 }
 0x343   : > { %v8064_v40 = vmax.f32 %v7634_v41, 0.0  ;;  %v8048_v53 = vmax.f32 %v7683_v38, 0.0  ;;  %v8065_v57 = vmax.f32 %v7685_v39, 0.0 }
 0x344   : > { %v8119_v47 = vadd.f32 %v8118_v29, %v8046_v36  ;;  %v8137_v32 = vadd.f32 %v8136_v44, %v8063_v43  ;;  %v8066_v5 = vmax.f32 %v7687_v11, 0.0 }
 0x345   : > { %v7723_v56 = vpop.f32.mrb[44].mxu1  ;;  %v7776_v54 = vpop.f32.mrb[44].mxu0 }
 0x346   : > { %v8120_v55 = vadd.f32 %v8119_v47, %v8047_v35  ;;  %v7724_v46 = vadd.f32 %v7723_v56, %v9979_v3  ;;  %v7725_v49 = vpop.f32.mrb[45].mxu1  ;;  %v7778_v59 = vpop.f32.mrb[45].mxu0  ;;  %v8138_v60 = vadd.f32 %v8137_v32, %v8064_v40  ;;  %v7777_v44 = vadd.f32 %v7776_v54, %v9979_v3 }
 0x347   : > { %v7726_v15 = vadd.f32 %v7725_v49, %v9979_v3  ;;  %v7727_v34 = vpop.f32.mrb[46].mxu1  ;;  %v7780_v50 = vpop.f32.mrb[46].mxu0  ;;  %v7779_v48 = vadd.f32 %v7778_v59, %v9979_v3 }
 0x348   : > { %v8121_v1 = vadd.f32 %v8120_v55, %v8048_v53  ;;  %v8013_v63 = vmax.f32 %v7724_v46, 0.0  ;;  %v7728_v2 = vadd.f32 %v7727_v34, %v9991_v7  ;;  %v7729_v58 = vpop.f32.mrb[47].mxu1  ;;  %v7782_v4 = vpop.f32.mrb[47].mxu0  ;;  %v8139_v10 = vadd.f32 %v8138_v60, %v8065_v57 }
 0x349   : > { %v8014_v45 = vmax.f32 %v7726_v15, 0.0  ;;  %v7781_v12 = vadd.f32 %v7780_v50, %v9991_v7  ;;  %v7730_v61 = vadd.f32 %v7729_v58, %v9991_v7  ;;  %v7783_v17 = vadd.f32 %v7782_v4, %v9991_v7 }
 0x34a   : > { %v8084_v13 = vadd.f32 %v8083_v27, %v8013_v63  ;;  %v8031_v8 = vmax.f32 %v7728_v2, 0.0  ;;  %v8140_v19 = vadd.f32 %v8139_v10, %v8066_v5  ;;  %v8015_v42 = vmax.f32 %v7777_v44, 0.0 }
 0x34b   : > { %v8032_v18 = vmax.f32 %v7730_v61, 0.0  ;;  %v8016_v20 = vmax.f32 %v7779_v48, 0.0  ;;  %v8033_v24 = vmax.f32 %v7781_v12, 0.0  ;;  %v8034_v27 = vmax.f32 %v7783_v17, 0.0 }
 0x34c   : > { %v8085_v9 = vadd.f32 %v8084_v13, %v8014_v45  ;;  %v8103_v52 = vadd.f32 %v8102_v16, %v8031_v8 }
 0x34d   : > { %v7733_v22 = vpop.f32.mrb[48].mxu1  ;;  %v7786_v25 = vpop.f32.mrb[48].mxu0 }
 0x34e   : > { %v8086_v33 = vadd.f32 %v8085_v9, %v8015_v42  ;;  %v8104_v51 = vadd.f32 %v8103_v52, %v8032_v18  ;;  %v7734_v0 = vadd.f32 %v7733_v22, %v9977_v14  ;;  %v7735_v26 = vpop.f32.mrb[49].mxu1  ;;  %v7788_v23 = vpop.f32.mrb[49].mxu0  ;;  %v7787_v62 = vadd.f32 %v7786_v25, %v9977_v14 }
 0x34f   : > { %v7736_v30 = vadd.f32 %v7735_v26, %v9977_v14  ;;  %v7737_v37 = vpop.f32.mrb[50].mxu1  ;;  %v7790_v21 = vpop.f32.mrb[50].mxu0  ;;  %v7789_v35 = vadd.f32 %v7788_v23, %v9977_v14 }
 0x350   : > { %v8087_v28 = vadd.f32 %v8086_v33, %v8016_v20  ;;  %v8105_v31 = vadd.f32 %v8104_v51, %v8033_v24  ;;  %v8049_v36 = vmax.f32 %v7734_v0, 0.0  ;;  %v7739_v16 = vpop.f32.mrb[51].mxu1  ;;  %v7792_v29 = vpop.f32.mrb[51].mxu0  ;;  %v7738_v41 = vadd.f32 %v7737_v37, %v9989_v6 }
 0x351   : > { %v8050_v38 = vmax.f32 %v7736_v30, 0.0  ;;  %v7740_v47 = vadd.f32 %v7739_v16, %v9989_v6  ;;  %v7791_v32 = vadd.f32 %v7790_v21, %v9989_v6  ;;  %v8051_v11 = vmax.f32 %v7787_v62, 0.0 }
 0x352   : > { %v8106_v43 = vadd.f32 %v8105_v31, %v8034_v27  ;;  %v8122_v39 = vadd.f32 %v8121_v1, %v8049_v36  ;;  %v8067_v40 = vmax.f32 %v7738_v41, 0.0  ;;  %v7793_v55 = vadd.f32 %v7792_v29, %v9989_v6 }
 0x353   : > { %v8068_v54 = vmax.f32 %v7740_v47, 0.0  ;;  %v8052_v59 = vmax.f32 %v7789_v35, 0.0  ;;  %v8069_v50 = vmax.f32 %v7791_v32, 0.0 }
 0x354   : > { %v8123_v56 = vadd.f32 %v8122_v39, %v8050_v38  ;;  %v8141_v53 = vadd.f32 %v8140_v19, %v8067_v40  ;;  %v8070_v13 = vmax.f32 %v7793_v55, 0.0 }
 0x355   : > { %v7829_v46 = vpop.f32.mrb[52].mxu1  ;;  %v7882_v49 = vpop.f32.mrb[52].mxu0 }
 0x356   : > { %v8124_v57 = vadd.f32 %v8123_v56, %v8051_v11  ;;  %v7830_v60 = vadd.f32 %v7829_v46, %v9979_v3  ;;  %v7831_v15 = vpop.f32.mrb[53].mxu1  ;;  %v7884_v34 = vpop.f32.mrb[53].mxu0  ;;  %v8142_v1 = vadd.f32 %v8141_v53, %v8068_v54  ;;  %v7883_v5 = vadd.f32 %v7882_v49, %v9979_v3 }
 0x357   : > { %v7832_v63 = vadd.f32 %v7831_v15, %v9979_v3  ;;  %v7833_v44 = vpop.f32.mrb[54].mxu1  ;;  %v7886_v2 = vpop.f32.mrb[54].mxu0  ;;  %v7885_v61 = vadd.f32 %v7884_v34, %v9979_v3 }
 0x358   : > { %v8125_v58 = vadd.f32 %v8124_v57, %v8052_v59  ;;  %v8017_v4 = vmax.f32 %v7830_v60, 0.0  ;;  %v7834_v10 = vadd.f32 %v7833_v44, %v9991_v7  ;;  %v7835_v45 = vpop.f32.mrb[55].mxu1  ;;  %v7888_v48 = vpop.f32.mrb[55].mxu0  ;;  %v8143_v8 = vadd.f32 %v8142_v1, %v8069_v50 }
 0x359   : > { %v8018_v12 = vmax.f32 %v7832_v63, 0.0  ;;  %v7887_v42 = vadd.f32 %v7886_v2, %v9991_v7  ;;  %v7836_v9 = vadd.f32 %v7835_v45, %v9991_v7  ;;  %v7889_v18 = vadd.f32 %v7888_v48, %v9991_v7 }
 0x35a   : > { %v8088_v19 = vadd.f32 %v8087_v28, %v8017_v4  ;;  %v8035_v17 = vmax.f32 %v7834_v10, 0.0  ;;  %v8144_v52 = vadd.f32 %v8143_v8, %v8070_v13  ;;  %v8019_v20 = vmax.f32 %v7883_v5, 0.0 }
 0x35b   : > { %v8036_v33 = vmax.f32 %v7836_v9, 0.0  ;;  %v8020_v24 = vmax.f32 %v7885_v61, 0.0  ;;  %v8037_v23 = vmax.f32 %v7887_v42, 0.0  ;;  %v8038_v28 = vmax.f32 %v7889_v18, 0.0 }
 0x35c   : > { %v8089_v22 = vadd.f32 %v8088_v19, %v8018_v12  ;;  %v8107_v25 = vadd.f32 %v8106_v43, %v8035_v17 }
 0x35d   : > { %v7839_v51 = vpop.f32.mrb[56].mxu1  ;;  %v7892_v0 = vpop.f32.mrb[56].mxu0 }
 0x35e   : > { %v8090_v26 = vadd.f32 %v8089_v22, %v8019_v20  ;;  %v8108_v27 = vadd.f32 %v8107_v25, %v8036_v33  ;;  %v7840_v30 = vadd.f32 %v7839_v51, %v9977_v14  ;;  %v7841_v37 = vpop.f32.mrb[57].mxu1  ;;  %v7894_v21 = vpop.f32.mrb[57].mxu0  ;;  %v7893_v41 = vadd.f32 %v7892_v0, %v9977_v14 }
 0x35f   : > { %v7842_v31 = vadd.f32 %v7841_v37, %v9977_v14  ;;  %v7843_v36 = vpop.f32.mrb[58].mxu1  ;;  %v7896_v62 = vpop.f32.mrb[58].mxu0  ;;  %v7895_v11 = vadd.f32 %v7894_v21, %v9977_v14 }
 0x360   : > { %v8091_v16 = vadd.f32 %v8090_v26, %v8020_v24  ;;  %v8109_v29 = vadd.f32 %v8108_v27, %v8037_v23  ;;  %v8053_v38 = vmax.f32 %v7840_v30, 0.0  ;;  %v7845_v43 = vpop.f32.mrb[59].mxu1  ;;  %v7898_v39 = vpop.f32.mrb[59].mxu0  ;;  %v7844_v47 = vadd.f32 %v7843_v36, %v9989_v6 }
 0x361   : > { %v8054_v35 = vmax.f32 %v7842_v31, 0.0  ;;  %v7846_v56 = vadd.f32 %v7845_v43, %v9989_v6  ;;  %v7897_v53 = vadd.f32 %v7896_v62, %v9989_v6  ;;  %v8055_v55 = vmax.f32 %v7893_v41, 0.0 }
 0x362   : > { %v8110_v40 = vadd.f32 %v8109_v29, %v8038_v28  ;;  %v8126_v32 = vadd.f32 %v8125_v58, %v8053_v38  ;;  %v8071_v54 = vmax.f32 %v7844_v47, 0.0  ;;  %v7899_v57 = vadd.f32 %v7898_v39, %v9989_v6 }
 0x363   : > { %v8072_v49 = vmax.f32 %v7846_v56, 0.0  ;;  %v8056_v34 = vmax.f32 %v7895_v11, 0.0  ;;  %v8073_v2 = vmax.f32 %v7897_v53, 0.0 }
 0x364   : > { %v8127_v46 = vadd.f32 %v8126_v32, %v8054_v35  ;;  %v8145_v59 = vadd.f32 %v8144_v52, %v8071_v54  ;;  %v8074_v19 = vmax.f32 %v7899_v57, 0.0 }
 0x365   : > { %v7935_v60 = vpop.f32.mrb[60].mxu1  ;;  %v7988_v15 = vpop.f32.mrb[60].mxu0 }
 0x366   : > { %v8128_v50 = vadd.f32 %v8127_v46, %v8055_v55  ;;  %v7936_v1 = vadd.f32 %v7935_v60, %v9979_v3  ;;  %v7937_v63 = vpop.f32.mrb[61].mxu1  ;;  %v7990_v44 = vpop.f32.mrb[61].mxu0  ;;  %v8146_v58 = vadd.f32 %v8145_v59, %v8072_v49  ;;  %v7989_v13 = vadd.f32 %v7988_v15, %v9979_v3 }
 0x367   : > { %v7938_v4 = vadd.f32 %v7937_v63, %v9979_v3  ;;  %v7939_v5 = vpop.f32.mrb[62].mxu1  ;;  %v7992_v10 = vpop.f32.mrb[62].mxu0  ;;  %v7991_v22 = vadd.f32 %v7990_v44, %v9979_v3 }
 0x368   : > { %v8129_v45 = vadd.f32 %v8128_v50, %v8056_v34  ;;  %v8021_v48 = vmax.f32 %v7936_v1, 0.0  ;;  %v7940_v8 = vadd.f32 %v7939_v5, %v9991_v7  ;;  %v7941_v12 = vpop.f32.mrb[63].mxu1  ;;  %v7994_v61 = vpop.f32.mrb[63].mxu0  ;;  %v8147_v17 = vadd.f32 %v8146_v58, %v8073_v2 }
 0x369   : > { %v8022_v42 = vmax.f32 %v7938_v4, 0.0  ;;  %v7942_v18 = vadd.f32 %v7941_v12, %v9991_v7  ;;  %v8023_v25 = vmax.f32 %v7989_v13, 0.0  ;;  %v7993_v0 = vadd.f32 %v7992_v10, %v9991_v7  ;;  %v1040_v4 = vpop.xlane.xlu0 %1039  ;;  %v1059_v10 = vpop.xlane.xlu1 %1058 }
 0x36a   : > { %v8092_v9 = vadd.f32 %v8091_v16, %v8021_v48  ;;  %v8039_v52 = vmax.f32 %v7940_v8, 0.0  ;;  %v8148_v20 = vadd.f32 %v8147_v17, %v8074_v19  ;;  %v7995_v31 = vadd.f32 %v7994_v61, %v9991_v7 }
 0x36b   : > { %v8040_v51 = vmax.f32 %v7942_v18, 0.0  ;;  %v8024_v29 = vmax.f32 %v7991_v22, 0.0  ;;  %v8041_v35 = vmax.f32 %v7993_v0, 0.0 }
 0x36c   : > { %v8093_v33 = vadd.f32 %v8092_v9, %v8022_v42  ;;  %v8111_v24 = vadd.f32 %v8110_v40, %v8039_v52  ;;  %v8042_v53 = vmax.f32 %v7995_v31, 0.0 }
 0x36d   : > { %v7945_v26 = vpop.f32.mrb[64].mxu1  ;;  %v7998_v23 = vpop.f32.mrb[64].mxu0 }
 0x36e   : > { %v8112_v27 = vadd.f32 %v8111_v24, %v8040_v51  ;;  %v7946_v30 = vadd.f32 %v7945_v26, %v9977_v14  ;;  %v7947_v37 = vpop.f32.mrb[65].mxu1  ;;  %v8000_v21 = vpop.f32.mrb[65].mxu0  ;;  %v8094_v28 = vadd.f32 %v8093_v33, %v8023_v25  ;;  %v7999_v36 = vadd.f32 %v7998_v23, %v9977_v14 }
 0x36f   : > { %v7948_v3 = vadd.f32 %v7947_v37, %v9977_v14  ;;  %v7949_v62 = vpop.f32.mrb[66].mxu1  ;;  %v8002_v16 = vpop.f32.mrb[66].mxu0  ;;  %v8001_v40 = vadd.f32 %v8000_v21, %v9977_v14  ;;  %v1099_v37 = vmul.f32 0.00043402778, %v1040_v4  ;;  %v1100_v21 = vmul.f32 0.00043402778, %v1059_v10 }
 0x370   : > { %v8057_v38 = vmax.f32 %v7946_v30, 0.0  ;;  %v7950_v41 = vadd.f32 %v7949_v62, %v9989_v6  ;;  %v7951_v43 = vpop.f32.mrb[67].mxu1  ;;  %v8004_v39 = vpop.f32.mrb[67].mxu0  ;;  %v8003_v56 = vadd.f32 %v8002_v16, %v9989_v6  ;;  %v8095_v54 = vadd.f32 %v8094_v28, %v8024_v29 }
 0x371   : > { %v8058_v47 = vmax.f32 %v7948_v3, 0.0  ;;  %v7952_v32 = vadd.f32 %v7951_v43, %v9989_v6  ;;  %v8059_v55 = vmax.f32 %v7999_v36, 0.0  ;;  %v8005_v57 = vadd.f32 %v8004_v39, %v9989_v6  ;;  %v1078_v5 = vpop.xlane.xlu0 %1077  ;;  %v1923_v48 = vpop.xlane.xlu1 %1922 }
 0x372   : > { %v8130_v11 = vadd.f32 %v8129_v45, %v8057_v38  ;;  %v8075_v7 = vmax.f32 %v7950_v41, 0.0  ;;  %8096 = vadd.xlane.f32.xlu1 %v8095_v54  ;;  %v8113_v60 = vadd.f32 %v8112_v27, %v8041_v35  ;;  %v8060_v15 = vmax.f32 %v8001_v40, 0.0 }
 0x373   : > { %v8076_v46 = vmax.f32 %v7952_v32, 0.0  ;;  %v8077_v34 = vmax.f32 %v8003_v56, 0.0  ;;  %v8078_v63 = vmax.f32 %v8005_v57, 0.0  ;;  %v1981_v28 = vmul.f32 0.00043402778, %v1923_v48 }
 0x374   : > { %v8131_v49 = vadd.f32 %v8130_v11, %v8058_v47  ;;  %v8149_v59 = vadd.f32 %v8148_v20, %v8075_v7  ;;  %v8114_v14 = vadd.f32 %v8113_v60, %v8042_v53  ;;  %v1101_v36 = vmul.f32 0.00043402778, %v1078_v5 }
 0x375   : > { %v1097_v45 = vpop.xlane.xlu0 %1096  ;;  %v1961_v13 = vpop.xlane.xlu1 %1960  ;;  %v8160_v47 = vsel %vm8159_vm3, %v1099_v37, %v1981_v28 }
 0x376   : > { %v8150_v50 = vadd.f32 %v8149_v59, %v8076_v46  ;;  %v8132_v1 = vadd.f32 %v8131_v49, %v8059_v55  ;;  %8115 = vadd.xlane.f32.xlu0 %v8114_v14  ;;  %v1983_v3 = vmul.f32 0.00043402778, %v1961_v13  ;;  %v1102_v16 = vmul.f32 0.00043402778, %v1097_v45 }
 0x378   : > { %v8133_v44 = vadd.f32 %v8132_v1, %v8060_v15  ;;  %v8151_v2 = vadd.f32 %v8150_v50, %v8077_v34  ;;  %v8162_v7 = vsel %vm8159_vm3, %v1101_v36, %v1983_v3 }
 0x379   : > { %v1942_v6 = vpop.xlane.xlu0 %1941  ;;  %v2805_v12 = vpop.xlane.xlu1 %2804 }
 0x37a   : > { %8134 = vadd.xlane.f32.xlu1 %v8133_v44  ;;  %v8152_v58 = vadd.f32 %v8151_v2, %v8078_v63  ;;  %v1982_v31 = vmul.f32 0.00043402778, %v1942_v6  ;;  %v2863_v29 = vmul.f32 0.00043402778, %v2805_v12 }
 0x37c   : > { %8153 = vadd.xlane.f32.xlu0 %v8152_v58  ;;  %v8161_v40 = vsel %vm8159_vm3, %v1100_v21, %v1982_v31  ;;  %v8165_v53 = vsel %vm8164_vm4, %v8160_v47, %v2863_v29 }
 0x37d   : > { %v1980_v8 = vpop.xlane.xlu0 %1979  ;;  %v2843_v19 = vpop.xlane.xlu1 %2842 }
 0x37e   : > { %v1984_v62 = vmul.f32 0.00043402778, %v1980_v8  ;;  %v2865_v39 = vmul.f32 0.00043402778, %v2843_v19 }
 0x380   : > { %v8163_v56 = vsel %vm8159_vm3, %v1102_v16, %v1984_v62  ;;  %v8167_v57 = vsel %vm8164_vm4, %v8162_v7, %v2865_v39 }
 0x381   : > { %v2824_v61 = vpop.xlane.xlu0 %2823  ;;  %v3687_v42 = vpop.xlane.xlu1 %3686 }
 0x382   : > { %v2864_v38 = vmul.f32 0.00043402778, %v2824_v61  ;;  %v3745_v32 = vmul.f32 0.00043402778, %v3687_v42 }
 0x384   : > { %v8166_v55 = vsel %vm8164_vm4, %v8161_v40, %v2864_v38  ;;  %v8170_v34 = vsel %vm8169_vm5, %v8165_v53, %v3745_v32 }
 0x385   : > { %v2862_v17 = vpop.xlane.xlu0 %2861  ;;  %v3725_v52 = vpop.xlane.xlu1 %3724 }
 0x386   : > { %v2866_v35 = vmul.f32 0.00043402778, %v2862_v17  ;;  %v3747_v1 = vmul.f32 0.00043402778, %v3725_v52 }
 0x388   : > { %v8168_v60 = vsel %vm8164_vm4, %v8163_v56, %v2866_v35  ;;  %v8172_v52 = vsel %vm8169_vm5, %v8167_v57, %v3747_v1 }
 0x389   : > { %v3706_v9 = vpop.xlane.xlu0 %3705  ;;  %v4569_v20 = vpop.xlane.xlu1 %4568 }
 0x38a   : > { %v3746_v11 = vmul.f32 0.00043402778, %v3706_v9  ;;  %v4627_v54 = vmul.f32 0.00043402778, %v4569_v20 }
 0x38c   : > { %v8171_v50 = vsel %vm8169_vm5, %v8166_v55, %v3746_v11  ;;  %v8175_v63 = vsel %vm8174_vm6, %v8170_v34, %v4627_v54 }
 0x38d   : > { %v11401_v18 = vpop.xlane.xlu0 %3743  ;;  %v4607_v25 = vpop.xlane.xlu1 %4606 }
 0x38e   : > { %v4629_v2 = vmul.f32 0.00043402778, %v4607_v25  ;;  %v3748_v13 = vmul.f32 0.00043402778, %v11401_v18 }
 0x391   : > { %v4588_v22 = vpop.xlane.xlu0 %4587  ;;  %v5451_v24 = vpop.xlane.xlu1 %5450 }
 0x392   : > { %v5509_v46 = vmul.f32 0.00043402778, %v5451_v24  ;;  %v4628_v44 = vmul.f32 0.00043402778, %v4588_v22  ;;  %v8177_v24 = vsel %vm8174_vm6, %v8172_v52, %v4629_v2 }
 0x394   : > { %v8180_v58 = vsel %vm8179_vm7, %v8175_v63, %v5509_v46  ;;  %v8176_v19 = vsel %vm8174_vm6, %v8171_v50, %v4628_v44 }
 0x395   : > { %v11403_v33 = vpop.xlane.xlu0 %4625  ;;  %v5489_v0 = vpop.xlane.xlu1 %5488 }
 0x396   : > { %v5511_v8 = vmul.f32 0.00043402778, %v5489_v0  ;;  %v4630_v17 = vmul.f32 0.00043402778, %v11403_v33 }
 0x399   : > { %v5470_v51 = vpop.xlane.xlu0 %5469  ;;  %v6333_v23 = vpop.xlane.xlu1 %6332 }
 0x39a   : > { %v6391_v15 = vmul.f32 0.00043402778, %v6333_v23  ;;  %v5510_v4 = vmul.f32 0.00043402778, %v5470_v51  ;;  %v8173_v23 = vsel %vm8169_vm5, %v8168_v60, %v3748_v13 }
 0x39b   : > { %v8178_v21 = vsel %vm8174_vm6, %v8173_v23, %v4630_v17 }
 0x39c   : > { %v8185_v45 = vsel %vm8184_vm8, %v8180_v58, %v6391_v15  ;;  %v8181_v20 = vsel %vm8179_vm7, %v8176_v19, %v5510_v4 }
 0x39d   : > { %v11405_v26 = vpop.xlane.xlu0 %5507  ;;  %v6371_v30 = vpop.xlane.xlu1 %6370 }
 0x39e   : > { %v6393_v42 = vmul.f32 0.00043402778, %v6371_v30  ;;  %v5512_v22 = vmul.f32 0.00043402778, %v11405_v26 }
 0x3a0   : > { %v8183_v3 = vsel %vm8179_vm7, %v8178_v21, %v5512_v22 }
 0x3a1   : > { %v6352_v27 = vpop.xlane.xlu0 %6351 }
 0x3a2   : > { %v6392_v48 = vmul.f32 0.00043402778, %v6352_v27  ;;  %v8182_v27 = vsel %vm8179_vm7, %v8177_v24, %v5511_v8 }
 0x3a3   : > { %v8187_v28 = vsel %vm8184_vm8, %v8182_v27, %v6393_v42 }
 0x3a4   : > { %v8186_v51 = vsel %vm8184_vm8, %v8181_v20, %v6392_v48 }
 0x3a5   : > { %v6390_v41 = vpop.xlane.xlu0 %6389 }
 0x3a6   : > { %v6394_v0 = vmul.f32 0.00043402778, %v6390_v41 }
 0x3a8   : > { %v8188_v29 = vsel %vm8184_vm8, %v8183_v3, %v6394_v0 }
 0x3bb   : > { %v7215_v43 = vpop.xlane.xlu1 %7214 }
 0x3bc   : > { %v7273_v14 = vmul.f32 0.00043402778, %v7215_v43 }
 0x3be   : > { %v7234_v49 = vpop.xlane.xlu0 %7233  ;;  %v8190_v12 = vsel %vm8189_vm9, %v8185_v45, %v7273_v14 }
 0x3bf   : > { %v7274_v61 = vmul.f32 0.00043402778, %v7234_v49 }
 0x3c1   : > { %v8191_v30 = vsel %vm8189_vm9, %v8186_v51, %v7274_v61 }
 0x3c3   : > { %v7253_v59 = vpop.xlane.xlu1 %7252 }
 0x3c4   : > { %v7275_v25 = vmul.f32 0.00043402778, %v7253_v59 }
 0x3c5   : > { %v7272_v5 = vpop.xlane.xlu0 %7271 }
 0x3c6   : > { %v7276_v37 = vmul.f32 0.00043402778, %v7272_v5  ;;  %v8192_v62 = vsel %vm8189_vm9, %v8187_v28, %v7275_v25 }
 0x3c8   : > { %v8193_v43 = vsel %vm8189_vm9, %v8188_v29, %v7276_v37 }
 0x3ff   : > { %v8097_v10 = vpop.xlane.xlu1 %8096 }
 0x400   : > { %v8155_v6 = vmul.f32 0.00043402778, %v8097_v10 }
 0x402   : > { %v8195_v9 = vsel %vm8194_vm10, %v8190_v12, %v8155_v6 }
 0x403   : > { %8200 = vst.msk [vmem:[%s11424_s28] sm:$0xff] %vm8199_vm11, %v8195_v9  ;;  %v8116_v18 = vpop.xlane.xlu0 %8115 }
 0x404   : > { %v8156_v33 = vmul.f32 0.00043402778, %v8116_v18 }
 0x406   : > { %v8196_v31 = vsel %vm8194_vm10, %v8191_v30, %v8156_v33 }
 0x407   : > { %v8135_v26 = vpop.xlane.xlu1 %8134  ;;  %8201 = vst.msk [vmem:[%s11424_s28 + $0x8] sm:$0xff] %vm8199_vm11, %v8196_v31 }
 0x408   : > { %v8157_v36 = vmul.f32 0.00043402778, %v8135_v26 }
 0x409   : > { %v8154_v16 = vpop.xlane.xlu0 %8153 }
 0x40a   : > { %v8197_v38 = vsel %vm8194_vm10, %v8192_v62, %v8157_v36  ;;  %v8158_v41 = vmul.f32 0.00043402778, %v8154_v16 }
 0x40b   : > { %8202 = vst.msk [vmem:[%s11424_s28 + $0x10] sm:$0xff] %vm8199_vm11, %v8197_v38 }
 0x40c   : > { %v8198_v39 = vsel %vm8194_vm10, %v8193_v43, %v8158_v41 }
 0x40d   : > { %8203 = vst.msk [vmem:[%s11424_s28 + $0x18] sm:$0xff] %vm8199_vm11, %v8198_v39 }
 0x40e PF: > { %s13_s12 = sadd.s32 1, %s9567_s12  }
 0x40f   : > { %p10_p4 = scmp.ge.s32.totalorder %s13_s12, 4  }
 0x411   :  { %12 = sbr.rel (!%p10_p4) target bundleno = 1 (0x1), region = 70 }

// kernel: fen_forward.3
= control target key start
LH: loop header
LB: loop body
LE: loop exit
PB: predicated region body
PF: predicated region fallthrough
CT: control target
= control target key end

     0   :  { %v14001_v7 = vmov 0.0   ;;  %vm289_vm0 = vcmask 261120   ;;  %s13991_s0 = inlined_call_operand.vmem [shape: f32[9,2,32], index: 0, kind: input, shape index: {}]   ;;  %s13992_s1 = inlined_call_operand.vmem [shape: f32[32,1280], index: 1, kind: input, shape index: {}]   ;;  %s13993_s2 = inlined_call_operand.vmem [shape: f32[1,1280], index: 2, kind: input, shape index: {}]   ;;  %s13994_s3 = inlined_call_operand.vmem [shape: f32[1280,64], index: 3, kind: input, shape index: {}]   ;;  %s13995_s4 = inlined_call_operand.vmem [shape: f32[1,64], index: 4, kind: input, shape index: {}]   ;;  %s13996_s5 = inlined_call_operand.vmem [shape: f32[9,64,32], index: 5, kind: input, shape index: {}]   ;;  %s13997_s6 = inlined_call_operand.vmem [shape: f32[1,32], index: 6, kind: input, shape index: {}]   ;;  %s13998_s7 = inlined_call_operand.vmem [shape: f32[32,16], index: 7, kind: input, shape index: {}]   ;;  %s13999_s8 = inlined_call_operand.vmem [shape: f32[1,16], index: 8, kind: input, shape index: {}]   ;;  %s14000_s9 = inlined_call_operand.hbm [shape: f32[2,16], index: 9, kind: output, shape index: {}]  }
   0x1   :  { %v34_v0 = vld [vmem:[%s13992_s1 + $0x8] sm:$0xff]  ;;  %v44_v1 = vld [vmem:[%s13992_s1 + $0x58] sm:$0xff]  ;;  %v33_v5 = vld [vmem:[%s13992_s1] sm:$0xff]  ;;  %357 = vmatprep.mubr.f32.mxu0 %v14001_v7  ;;  %428 = vmatprep.mubr.f32.mxu1 %v14001_v7 }
   0x2   :  { %v36_v2 = vld [vmem:[%s13992_s1 + $0x18] sm:$0xff]  ;;  %v11608_v3 = vpack.c.bf16 %v44_v1, %v34_v0  ;;  %v46_v4 = vld [vmem:[%s13992_s1 + $0x68] sm:$0xff]  ;;  %v43_v6 = vld [vmem:[%s13992_s1 + $0x50] sm:$0xff] }
   0x3   :  { %v11621_v8 = vpack.c.bf16 %v46_v4, %v36_v2  ;;  %v11623_v9 = vpack.c.bf16 %v43_v6, %v33_v5  ;;  %v35_v10 = vld [vmem:[%s13992_s1 + $0x10] sm:$0xff]  ;;  %v45_v11 = vld [vmem:[%s13992_s1 + $0x60] sm:$0xff]  ;;  %v54_v12 = vld [vmem:[%s13992_s1 + $0xa8] sm:$0xff] }
   0x4   :  { %14265 = vst [vmem:[#allocation5_spill] sm:$0xff] %v11608_v3  ;;  %9602 = vmatprep.subr.bf16.mxu0 %v11608_v3  ;;  %v11635_v13 = vpack.c.bf16 %v45_v11, %v35_v10  ;;  %v64_v14 = vld [vmem:[%s13992_s1 + $0xf8] sm:$0xff]  ;;  %v66_v16 = vld [vmem:[%s13992_s1 + $0x108] sm:$0xff]  ;;  %v53_v19 = vld [vmem:[%s13992_s1 + $0xa0] sm:$0xff] }
   0x5   :  { %14266 = vst [vmem:[#allocation6_spill] sm:$0xff] %v11621_v8  ;;  %14267 = vst [vmem:[#allocation7_spill] sm:$0xff] %v11623_v9  ;;  %v56_v15 = vld [vmem:[%s13992_s1 + $0xb8] sm:$0xff]  ;;  %9610 = vmatprep.subr.bf16.mxu1 %v11621_v8  ;;  %9604 = vmatpush1.bf16.msra.mxu0 %v11623_v9  ;;  %v11648_v17 = vpack.c.bf16 %v64_v14, %v54_v12  ;;  %v63_v20 = vld [vmem:[%s13992_s1 + $0xf0] sm:$0xff] }
   0x6   :  { %14268 = vst [vmem:[#allocation8_spill] sm:$0xff] %v11635_v13  ;;  %v11650_v18 = vpack.c.bf16 %v66_v16, %v56_v15  ;;  %v55_v21 = vld [vmem:[%s13992_s1 + $0xb0] sm:$0xff]  ;;  %9612 = vmatpush1.bf16.msra.mxu1 %v11635_v13  ;;  %v11662_v22 = vpack.c.bf16 %v63_v20, %v53_v19  ;;  %v65_v23 = vld [vmem:[%s13992_s1 + $0x100] sm:$0xff]  ;;  %v38_v24 = vld [vmem:[%s13992_s1 + $0x28] sm:$0xff] }
   0x7   :  { %14269 = vst [vmem:[#allocation9_spill] sm:$0xff] %v11648_v17  ;;  %9606 = vmatprep.subr.bf16.mxu0 %v11648_v17  ;;  %v11672_v25 = vpack.c.bf16 %v65_v23, %v55_v21  ;;  %v11677_v26 = vld [vmem:[%s13991_s0] sm:$0x3]  ;;  %v48_v27 = vld [vmem:[%s13992_s1 + $0x78] sm:$0xff]  ;;  %v50_v29 = vld [vmem:[%s13992_s1 + $0x88] sm:$0xff] }
   0x8   :  { %14270 = vst [vmem:[#allocation10_spill] sm:$0xff] %v11650_v18  ;;  %14271 = vst [vmem:[#allocation11_spill] sm:$0xff] %v11662_v22  ;;  %9614 = vmatprep.subr.bf16.mxu1 %v11650_v18  ;;  %v40_v28 = vld [vmem:[%s13992_s1 + $0x38] sm:$0xff]  ;;  %v11688_v30 = vpack.c.bf16 %v48_v27, %v38_v24  ;;  %v37_v32 = vld [vmem:[%s13992_s1 + $0x20] sm:$0xff] }
   0x9   :  { %14272 = vst [vmem:[#allocation12_spill] sm:$0xff] %v11672_v25  ;;  %v11690_v31 = vpack.c.bf16 %v50_v29, %v40_v28  ;;  %v47_v33 = vld [vmem:[%s13992_s1 + $0x70] sm:$0xff]  ;;  %9608 = vmatpush1.bf16.msra.mxu0 %v11662_v22  ;;  %v49_v36 = vld [vmem:[%s13992_s1 + $0x80] sm:$0xff]  ;;  %v58_v37 = vld [vmem:[%s13992_s1 + $0xc8] sm:$0xff] }
   0xa   :  { %14273 = vst [vmem:[#allocation13_spill] sm:$0xff] %v11688_v30  ;;  %v39_v34 = vld [vmem:[%s13992_s1 + $0x30] sm:$0xff]  ;;  %v11702_v35 = vpack.c.bf16 %v47_v33, %v37_v32  ;;  %v68_v38 = vld [vmem:[%s13992_s1 + $0x118] sm:$0xff]  ;;  %9616 = vmatpush1.bf16.msra.mxu1 %v11672_v25  ;;  %9618 = vmatprep.subr.bf16.mxu0 %v11688_v30  ;;  %v70_v42 = vld [vmem:[%s13992_s1 + $0x128] sm:$0xff] }
   0xb   :  { %14274 = vst [vmem:[#allocation14_spill] sm:$0xff] %v11690_v31  ;;  %v11715_v39 = vpack.c.bf16 %v49_v36, %v39_v34  ;;  %v11717_v40 = vpack.c.bf16 %v68_v38, %v58_v37  ;;  %v60_v41 = vld [vmem:[%s13992_s1 + $0xd8] sm:$0xff]  ;;  %v57_v43 = vld [vmem:[%s13992_s1 + $0xc0] sm:$0xff]  ;;  %9626 = vmatprep.subr.bf16.mxu1 %v11690_v31  ;;  %v67_v45 = vld [vmem:[%s13992_s1 + $0x110] sm:$0xff] }
   0xc   :  { %14275 = vst [vmem:[#allocation15_spill] sm:$0xff] %v11702_v35  ;;  %v11729_v44 = vpack.c.bf16 %v70_v42, %v60_v41  ;;  %v59_v46 = vld [vmem:[%s13992_s1 + $0xd0] sm:$0xff]  ;;  %v69_v47 = vld [vmem:[%s13992_s1 + $0x120] sm:$0xff]  ;;  %7628 = vmatmul.mubr.msk.f32.vlgmr.msra.gmra.mrb[0].mxu0 %vm289_vm0, %v11677_v26  ;;  %v42_v48 = vld [vmem:[%s13992_s1 + $0x48] sm:$0xff]  ;;  %v11751_v50 = vpack.c.bf16 %v67_v45, %v57_v43 }
   0xd   :  { %14276 = vst [vmem:[#allocation16_spill] sm:$0xff] %v11715_v39  ;;  %14277 = vst [vmem:[#allocation17_spill] sm:$0xff] %v11717_v40  ;;  %v52_v49 = vld [vmem:[%s13992_s1 + $0x98] sm:$0xff]  ;;  %7629 = vmatmul.mubr.msk.f32.vlgmr.msra.gmra.mrb[0].mxu1 %vm289_vm0, %v11677_v26  ;;  %9620 = vmatpush1.bf16.msra.mxu0 %v11702_v35  ;;  %v11755_v51 = vpack.c.bf16 %v69_v47, %v59_v46  ;;  %v41_v53 = vld [vmem:[%s13992_s1 + $0x40] sm:$0xff] }
   0xe   :  { %14278 = vst [vmem:[#allocation18_spill] sm:$0xff] %v11729_v44  ;;  %14279 = vst [vmem:[#allocation19_spill] sm:$0xff] %v11751_v50  ;;  %9628 = vmatpush1.bf16.msra.mxu1 %v11715_v39  ;;  %9622 = vmatprep.subr.bf16.mxu0 %v11717_v40  ;;  %v11757_v52 = vpack.c.bf16 %v52_v49, %v42_v48  ;;  %v51_v54 = vld [vmem:[%s13992_s1 + $0x90] sm:$0xff]  ;;  %v91_v55 = vld [vmem:[%s13994_s3 + $0x80] sm:$0xff] }
   0xf   :  { %14280 = vst [vmem:[#allocation20_spill] sm:$0xff] %v11755_v51  ;;  %9630 = vmatprep.subr.bf16.mxu1 %v11729_v44  ;;  %499 = vmatprep.mubr.f32.mxu0 %v14001_v7  ;;  %v62_v56 = vld [vmem:[%s13992_s1 + $0xe8] sm:$0xff]  ;;  %v72_v57 = vld [vmem:[%s13992_s1 + $0x138] sm:$0xff]  ;;  %v75_v60 = vld [vmem:[%s13994_s3] sm:$0xff]  ;;  %v11789_v62 = vpack.c.bf16 %v51_v54, %v41_v53 }
  0x10   :  { %14281 = vst [vmem:[#allocation21_spill] sm:$0xff] %v11757_v52  ;;  %v92_v58 = vld [vmem:[%s13994_s3 + $0x88] sm:$0xff]  ;;  %570 = vmatprep.mubr.f32.mxu1 %v14001_v7  ;;  %v93_v63 = vld [vmem:[%s13994_s3 + $0x90] sm:$0xff]  ;;  %v94_v0 = vld [vmem:[%s13994_s3 + $0x98] sm:$0xff]  ;;  %v11799_v1 = vpack.c.bf16 %v72_v57, %v62_v56 }
  0x11   :  { %v11780_v59 = vpack.c.bf16 %v92_v58, %v91_v55  ;;  %v76_v61 = vld [vmem:[%s13994_s3 + $0x8] sm:$0xff]  ;;  %9624 = vmatpush1.bf16.msra.mxu0 %v11751_v50  ;;  %14283 = vst [vmem:[#allocation23_spill] sm:$0xff] %v11789_v62  ;;  %v61_v2 = vld [vmem:[%s13992_s1 + $0xe0] sm:$0xff]  ;;  %v71_v4 = vld [vmem:[%s13992_s1 + $0x130] sm:$0xff]  ;;  %v11818_v11 = vpack.c.bf16 %v94_v0, %v93_v63 }
  0x12   :  { %9632 = vmatpush1.bf16.msra.mxu1 %v11755_v51  ;;  %9634 = vmatprep.subr.bf16.mxu0 %v11757_v52  ;;  %14284 = vst [vmem:[#allocation24_spill] sm:$0xff] %v11799_v1  ;;  %v123_v5 = vld [vmem:[%s13994_s3 + $0x180] sm:$0xff]  ;;  %v124_v6 = vld [vmem:[%s13994_s3 + $0x188] sm:$0xff]  ;;  %v11814_v10 = vpack.c.bf16 %v76_v61, %v75_v60  ;;  %v77_v12 = vld [vmem:[%s13994_s3 + $0x10] sm:$0xff]  ;;  %v11829_v15 = vpack.c.bf16 %v71_v4, %v61_v2 }
  0x13   :  { %14282 = vst [vmem:[#allocation22_spill] sm:$0xff] %v11780_v59  ;;  %9642 = vmatprep.subr.bf16.mxu1 %v11780_v59  ;;  %14286 = vst [vmem:[#allocation26_spill] sm:$0xff] %v11818_v11  ;;  %v78_v14 = vld [vmem:[%s13994_s3 + $0x18] sm:$0xff]  ;;  %v95_v16 = vld [vmem:[%s13994_s3 + $0xa0] sm:$0xff]  ;;  %v11839_v20 = vpack.c.bf16 %v124_v6, %v123_v5 }
  0x14   :  { %14285 = vst [vmem:[#allocation25_spill] sm:$0xff] %v11814_v10  ;;  %7630 = vmatmul.mubr.msk.f32.vlgmr.msra.gmra.mrb[2].mxu0 %vm289_vm0, %v11677_v26  ;;  %14287 = vst [vmem:[#allocation27_spill] sm:$0xff] %v11829_v15  ;;  %v96_v19 = vld [vmem:[%s13994_s3 + $0xa8] sm:$0xff]  ;;  %v107_v21 = vld [vmem:[%s13994_s3 + $0x100] sm:$0xff]  ;;  %v11854_v28 = vpack.c.bf16 %v78_v14, %v77_v12 }
  0x15   :  { %7631 = vmatmul.mubr.msk.f32.vlgmr.msra.gmra.mrb[2].mxu1 %vm289_vm0, %v11677_v26  ;;  %9636 = vmatpush1.bf16.msra.mxu0 %v11789_v62  ;;  %14288 = vst [vmem:[#allocation28_spill] sm:$0xff] %v11839_v20  ;;  %v108_v23 = vld [vmem:[%s13994_s3 + $0x108] sm:$0xff]  ;;  %v125_v24 = vld [vmem:[%s13994_s3 + $0x190] sm:$0xff]  ;;  %v126_v27 = vld [vmem:[%s13994_s3 + $0x198] sm:$0xff]  ;;  %v11857_v29 = vpack.c.bf16 %v96_v19, %v95_v16 }
  0x16   :  { %9638 = vmatprep.subr.bf16.mxu0 %v11799_v1  ;;  %641 = vmatprep.mubr.f32.mxu0 %v14001_v7  ;;  %14289 = vst [vmem:[#allocation29_spill] sm:$0xff] %v11854_v28  ;;  %v79_v32 = vld [vmem:[%s13994_s3 + $0x20] sm:$0xff]  ;;  %v80_v33 = vld [vmem:[%s13994_s3 + $0x28] sm:$0xff]  ;;  %v11866_v34 = vpack.c.bf16 %v108_v23, %v107_v21  ;;  %v97_v36 = vld [vmem:[%s13994_s3 + $0xb0] sm:$0xff]  ;;  %v11875_v38 = vpack.c.bf16 %v126_v27, %v125_v24 }
  0x17   :  { %9644 = vmatpush3.bf16.msra.mxu1 %v11814_v10  ;;  %14290 = vst [vmem:[#allocation30_spill] sm:$0xff] %v11857_v29  ;;  %v98_v37 = vld [vmem:[%s13994_s3 + $0xb8] sm:$0xff]  ;;  %v109_v41 = vld [vmem:[%s13994_s3 + $0x110] sm:$0xff]  ;;  %v127_v43 = vld [vmem:[%s13994_s3 + $0x1a0] sm:$0xff]  ;;  %v11890_v46 = vpack.c.bf16 %v80_v33, %v79_v32 }
  0x18   :  { %9646 = vmatprep.subr.bf16.mxu1 %v11818_v11  ;;  %14291 = vst [vmem:[#allocation31_spill] sm:$0xff] %v11866_v34  ;;  %14292 = vst [vmem:[#allocation32_spill] sm:$0xff] %v11875_v38  ;;  %v110_v42 = vld [vmem:[%s13994_s3 + $0x118] sm:$0xff]  ;;  %v128_v45 = vld [vmem:[%s13994_s3 + $0x1a8] sm:$0xff]  ;;  %v11895_v47 = vpack.c.bf16 %v98_v37, %v97_v36 }
  0x19   :  { %9640 = vmatpush1.bf16.msra.mxu0 %v11829_v15  ;;  %14293 = vst [vmem:[#allocation33_spill] sm:$0xff] %v11890_v46  ;;  %v81_v48 = vld [vmem:[%s13994_s3 + $0x30] sm:$0xff]  ;;  %v82_v49 = vld [vmem:[%s13994_s3 + $0x38] sm:$0xff]  ;;  %v11904_v53 = vpack.c.bf16 %v110_v42, %v109_v41  ;;  %v100_v54 = vld [vmem:[%s13994_s3 + $0xc8] sm:$0xff]  ;;  %v11913_v55 = vpack.c.bf16 %v128_v45, %v127_v43 }
  0x1a   :  { %9674 = vmatprep.subr.bf16.mxu0 %v11839_v20  ;;  %14294 = vst [vmem:[#allocation34_spill] sm:$0xff] %v11895_v47  ;;  %v111_v56 = vld [vmem:[%s13994_s3 + $0x120] sm:$0xff]  ;;  %v112_v57 = vld [vmem:[%s13994_s3 + $0x128] sm:$0xff]  ;;  %v129_v58 = vld [vmem:[%s13994_s3 + $0x1b0] sm:$0xff]  ;;  %v11928_v61 = vpack.c.bf16 %v82_v49, %v81_v48 }
  0x1b   :  { %9648 = vmatpush3.bf16.msra.mxu1 %v11854_v28  ;;  %14295 = vst [vmem:[#allocation35_spill] sm:$0xff] %v11904_v53  ;;  %14296 = vst [vmem:[#allocation36_spill] sm:$0xff] %v11913_v55  ;;  %v130_v60 = vld [vmem:[%s13994_s3 + $0x1b8] sm:$0xff]  ;;  %v83_v0 = vld [vmem:[%s13994_s3 + $0x40] sm:$0xff]  ;;  %v11940_v4 = vpack.c.bf16 %v112_v57, %v111_v56 }
  0x1c   :  { %7632 = vmatmul.mubr.msk.f32.vlgmr.msra.gmra.mrb[4].mxu0 %vm289_vm0, %v11677_v26  ;;  %9650 = vmatprep.subr.bf16.mxu1 %v11857_v29  ;;  %v99_v26 = vld [vmem:[%s13994_s3 + $0xc0] sm:$0xff]  ;;  %14297 = vst [vmem:[#allocation37_spill] sm:$0xff] %v11928_v61  ;;  %v84_v2 = vld [vmem:[%s13994_s3 + $0x48] sm:$0xff]  ;;  %v101_v5 = vld [vmem:[%s13994_s3 + $0xd0] sm:$0xff] }
  0x1d   :  { %9676 = vmatpush3.bf16.msra.mxu0 %v11866_v34  ;;  %v11931_v63 = vpack.c.bf16 %v100_v54, %v99_v26  ;;  %14299 = vst [vmem:[#allocation39_spill] sm:$0xff] %v11940_v4  ;;  %v102_v6 = vld [vmem:[%s13994_s3 + $0xd8] sm:$0xff] }
  0x1e   :  { %9678 = vmatprep.subr.bf16.mxu0 %v11875_v38 }
  0x1f   :  { %9652 = vmatpush3.bf16.msra.mxu1 %v11890_v46  ;;  %14298 = vst [vmem:[#allocation38_spill] sm:$0xff] %v11931_v63 }
  0x20   :  { %9654 = vmatprep.subr.bf16.mxu1 %v11895_v47 }
  0x21   :  { %9680 = vmatpush3.bf16.msra.mxu0 %v11904_v53 }
  0x22   :  { %14 = vsyncpa [#allocation3], 0  ;;  %9682 = vmatprep.subr.bf16.mxu0 %v11913_v55  ;;  %v11949_v12 = vpack.c.bf16 %v130_v60, %v129_v58  ;;  %v113_v14 = vld [vmem:[%s13994_s3 + $0x130] sm:$0xff]  ;;  %v114_v16 = vld [vmem:[%s13994_s3 + $0x138] sm:$0xff]  ;;  %v11964_v23 = vpack.c.bf16 %v84_v2, %v83_v0  ;;  %v11967_v24 = vpack.c.bf16 %v102_v6, %v101_v5  ;;  %vm11547_vm1 = vmmov 0   ;;  %s11548_s23 = smov [#allocation2]  }
  0x23   :  { %9656 = vmatpush3.bf16.msra.mxu1 %v11928_v61  ;;  %v131_v19 = vld [vmem:[%s13994_s3 + $0x1c0] sm:$0xff]  ;;  %v132_v21 = vld [vmem:[%s13994_s3 + $0x1c8] sm:$0xff]  ;;  %v85_v27 = vld [vmem:[%s13994_s3 + $0x50] sm:$0xff]  ;;  %v11976_v33 = vpack.c.bf16 %v114_v16, %v113_v14  ;;  %vm1751_vm2 = vcmask 523264   ;;  %vm7612_vm3 = vcmask 123904  }
  0x24   :  { %14300 = vst [vmem:[#allocation40_spill] sm:$0xff] %v11949_v12  ;;  %14301 = vst [vmem:[#allocation41_spill] sm:$0xff] %v11964_v23  ;;  %9658 = vmatprep.subr.bf16.mxu1 %v11931_v63  ;;  %v86_v32 = vld [vmem:[%s13994_s3 + $0x58] sm:$0xff]  ;;  %v103_v36 = vld [vmem:[%s13994_s3 + $0xe0] sm:$0xff]  ;;  %v11985_v41 = vpack.c.bf16 %v132_v21, %v131_v19 }
  0x25   :  { %14302 = vst [vmem:[#allocation42_spill] sm:$0xff] %v11967_v24  ;;  %9684 = vmatpush3.bf16.msra.mxu0 %v11940_v4  ;;  %14303 = vst [vmem:[#allocation43_spill] sm:$0xff] %v11976_v33  ;;  %v104_v37 = vld [vmem:[%s13994_s3 + $0xe8] sm:$0xff]  ;;  %v115_v42 = vld [vmem:[%s13994_s3 + $0x140] sm:$0xff]  ;;  %v12000_v49 = vpack.c.bf16 %v86_v32, %v85_v27 }
  0x26   :  { %9686 = vmatprep.subr.bf16.mxu0 %v11949_v12  ;;  %14304 = vst [vmem:[#allocation44_spill] sm:$0xff] %v11985_v41  ;;  %v116_v43 = vld [vmem:[%s13994_s3 + $0x148] sm:$0xff]  ;;  %v133_v45 = vld [vmem:[%s13994_s3 + $0x1d0] sm:$0xff]  ;;  %v134_v48 = vld [vmem:[%s13994_s3 + $0x1d8] sm:$0xff]  ;;  %v12003_v26 = vpack.c.bf16 %v104_v37, %v103_v36 }
  0x27   :  { %9660 = vmatpush3.bf16.msra.mxu1 %v11964_v23  ;;  %14305 = vst [vmem:[#allocation45_spill] sm:$0xff] %v12000_v49  ;;  %v87_v54 = vld [vmem:[%s13994_s3 + $0x60] sm:$0xff]  ;;  %v88_v56 = vld [vmem:[%s13994_s3 + $0x68] sm:$0xff]  ;;  %v12012_v57 = vpack.c.bf16 %v116_v43, %v115_v42  ;;  %v12015_v58 = vpack.c.bf16 %v134_v48, %v133_v45  ;;  %v117_v60 = vld [vmem:[%s13994_s3 + $0x150] sm:$0xff] }
  0x28   :  { %9662 = vmatprep.subr.bf16.mxu1 %v11967_v24  ;;  %14306 = vst [vmem:[#allocation46_spill] sm:$0xff] %v12003_v26  ;;  %v118_v0 = vld [vmem:[%s13994_s3 + $0x158] sm:$0xff]  ;;  %v135_v2 = vld [vmem:[%s13994_s3 + $0x1e0] sm:$0xff]  ;;  %v136_v5 = vld [vmem:[%s13994_s3 + $0x1e8] sm:$0xff]  ;;  %v12030_v6 = vpack.c.bf16 %v88_v56, %v87_v54 }
  0x29   :  { %9688 = vmatpush3.bf16.msra.mxu0 %v11976_v33  ;;  %14307 = vst [vmem:[#allocation47_spill] sm:$0xff] %v12012_v57  ;;  %14308 = vst [vmem:[#allocation48_spill] sm:$0xff] %v12015_v58  ;;  %v12034_v14 = vpack.c.bf16 %v118_v0, %v117_v60  ;;  %v12037_v16 = vpack.c.bf16 %v136_v5, %v135_v2  ;;  %v119_v19 = vld [vmem:[%s13994_s3 + $0x160] sm:$0xff]  ;;  %v120_v21 = vld [vmem:[%s13994_s3 + $0x168] sm:$0xff] }
  0x2a   :  { %9690 = vmatprep.subr.bf16.mxu0 %v11985_v41  ;;  %14309 = vst [vmem:[#allocation49_spill] sm:$0xff] %v12030_v6  ;;  %v12047_v27 = vpack.c.bf16 %v120_v21, %v119_v19  ;;  %v105_v32 = vld [vmem:[%s13994_s3 + $0xf0] sm:$0xff]  ;;  %v106_v36 = vld [vmem:[%s13994_s3 + $0xf8] sm:$0xff]  ;;  %v155_v5 = vld [vmem:[%s13994_s3 + $0x280] sm:$0xff] }
  0x2b   :  { %9664 = vmatpush3.bf16.msra.mxu1 %v12000_v49  ;;  %14310 = vst [vmem:[#allocation50_spill] sm:$0xff] %v12034_v14  ;;  %14311 = vst [vmem:[#allocation51_spill] sm:$0xff] %v12037_v16  ;;  %v137_v37 = vld [vmem:[%s13994_s3 + $0x1f0] sm:$0xff]  ;;  %v12060_v42 = vpack.c.bf16 %v106_v36, %v105_v32  ;;  %v138_v43 = vld [vmem:[%s13994_s3 + $0x1f8] sm:$0xff] }
  0x2c   :  { %9666 = vmatprep.subr.bf16.mxu1 %v12003_v26  ;;  %14312 = vst [vmem:[#allocation52_spill] sm:$0xff] %v12047_v27  ;;  %v89_v45 = vld [vmem:[%s13994_s3 + $0x70] sm:$0xff]  ;;  %v90_v48 = vld [vmem:[%s13994_s3 + $0x78] sm:$0xff]  ;;  %v12071_v54 = vpack.c.bf16 %v138_v43, %v137_v37  ;;  %v156_v19 = vld [vmem:[%s13994_s3 + $0x288] sm:$0xff]  ;;  %v239_v43 = vlaneseq }
  0x2d   :  { %9692 = vmatpush3.bf16.msra.mxu0 %v12012_v57  ;;  %14313 = vst [vmem:[#allocation53_spill] sm:$0xff] %v12060_v42  ;;  %v12073_v56 = vpack.c.bf16 %v90_v48, %v89_v45  ;;  %v121_v60 = vld [vmem:[%s13994_s3 + $0x170] sm:$0xff]  ;;  %v122_v0 = vld [vmem:[%s13994_s3 + $0x178] sm:$0xff]  ;;  %v187_v21 = vld [vmem:[%s13994_s3 + $0x380] sm:$0xff]  ;;  %v12096_v32 = vpack.c.bf16 %v156_v19, %v155_v5 }
  0x2e   :  { %9694 = vmatprep.subr.bf16.mxu0 %v12015_v58  ;;  %14314 = vst [vmem:[#allocation54_spill] sm:$0xff] %v12071_v54  ;;  %v12082_v2 = vpack.c.bf16 %v122_v0, %v121_v60  ;;  %v188_v36 = vld [vmem:[%s13994_s3 + $0x388] sm:$0xff]  ;;  %v12105_v45 = vshrl.u32 %v239_v43, 7  ;;  %v12113_v5 = vld [vmem:[%s13993_s2] sm:$0xff]  ;;  %v145_v41 = vld [vmem:[%s13994_s3 + $0x230] sm:$0xff] }
  0x2f   :  { %9668 = vmatpush3.bf16.msra.mxu1 %v12030_v6  ;;  %14315 = vst [vmem:[#allocation55_spill] sm:$0xff] %v12073_v56  ;;  %14317 = vst [vmem:[#allocation57_spill] sm:$0xff] %v12096_v32  ;;  %v12101_v37 = vpack.c.bf16 %v188_v36, %v187_v21 }
  0x30   :  { %9670 = vmatprep.subr.bf16.mxu1 %v12060_v42  ;;  %14316 = vst [vmem:[#allocation56_spill] sm:$0xff] %v12082_v2  ;;  %v14011_v48 = vsub.s32 0, %v12105_v45  ;;  %v249_v60 = vsub.s32 2, %v12105_v45  ;;  %v14012_v0 = vsub.s32 1, %v12105_v45  ;;  %v253_v19 = vsub.s32 3, %v12105_v45 }
  0x31   :  { %9696 = vmatpush3.bf16.msra.mxu0 %v12034_v14  ;;  %14318 = vst [vmem:[#allocation58_spill] sm:$0xff] %v12101_v37  ;;  %v261_v14 = vsub.s32 5, %v12105_v45 }
  0x32   :  { %9698 = vmatprep.subr.bf16.mxu0 %v12037_v16  ;;  %v12119_v21 = vrot.slane %v12113_v5, %v14011_v48  ;;  %v12122_v36 = vrot.slane %v12113_v5, %v249_v60  ;;  %v12127_v43 = vrot.slane %v12113_v5, %v14012_v0  ;;  %v12130_v7 = vrot.slane %v12113_v5, %v253_v19  ;;  %v139_v48 = vld [vmem:[%s13994_s3 + $0x200] sm:$0xff]  ;;  %v140_v60 = vld [vmem:[%s13994_s3 + $0x208] sm:$0xff]  ;;  %v158_v16 = vld [vmem:[%s13994_s3 + $0x298] sm:$0xff] }
  0x33   :  { %9672 = vmatpush3.bf16.msra.mxu1 %v12073_v56  ;;  %v171_v0 = vld [vmem:[%s13994_s3 + $0x300] sm:$0xff]  ;;  %v12162_v58 = vpack.c.bf16 %v140_v60, %v139_v48  ;;  %v12189_v60 = vrot.slane %v12113_v5, %v261_v14 }
  0x34   :  { %9706 = vmatprep.subr.bf16.mxu1 %v12096_v32  ;;  %14319 = vst [vmem:[#allocation59_spill] sm:$0xff] %v12119_v21  ;;  %14320 = vst [vmem:[#allocation60_spill] sm:$0xff] %v12122_v36 }
  0x35   :  { %9700 = vmatpush3.bf16.msra.mxu0 %v12047_v27  ;;  %14321 = vst [vmem:[#allocation61_spill] sm:$0xff] %v12127_v43  ;;  %14322 = vst [vmem:[#allocation62_spill] sm:$0xff] %v12130_v7 }
  0x36   :  { %9702 = vmatprep.subr.bf16.mxu0 %v12071_v54  ;;  %14323 = vst [vmem:[#allocation63_spill] sm:$0xff] %v12162_v58  ;;  %14327 = vst [vmem:[#allocation67_spill] sm:$0xff] %v12189_v60 }
  0x39   :  { %9704 = vmatpush3.bf16.msra.mxu0 %v12082_v2 }
  0x3a   :  { %9738 = vmatprep.subr.bf16.mxu0 %v12101_v37 }
  0xdf   :  { %v359_v37 = vpop.f32.mrb[0].mxu0 }
  0xe0   :  { %v360_v2 = vadd.f32 %v359_v37, %v12119_v21  ;;  %v430_v54 = vpop.f32.mrb[0].mxu1  ;;  %v361_v27 = vpop.f32.mrb[1].mxu0  ;;  %v172_v37 = vld [vmem:[%s13994_s3 + $0x308] sm:$0xff]  ;;  %v157_v21 = vld [vmem:[%s13994_s3 + $0x290] sm:$0xff] }
  0xe1   :  { %v431_v19 = vadd.f32 %v430_v54, %v12122_v36  ;;  %v362_v32 = vadd.f32 %v361_v27, %v12127_v43  ;;  %v432_v56 = vpop.f32.mrb[1].mxu1  ;;  %v189_v27 = vld [vmem:[%s13994_s3 + $0x390] sm:$0xff]  ;;  %v190_v36 = vld [vmem:[%s13994_s3 + $0x398] sm:$0xff]  ;;  %v269_v43 = vsub.s32 7, %v12105_v45  ;;  %v12164_v26 = vpack.c.bf16 %v172_v37, %v171_v0  ;;  %v159_v0 = vld [vmem:[%s13994_s3 + $0x2a0] sm:$0xff] }
  0xe2   :  { %v648_v42 = vmax.f32 %v360_v2, 0.0  ;;  %v433_v54 = vadd.f32 %v432_v56, %v12130_v7  ;;  %v12166_v49 = vpack.c.bf16 %v158_v16, %v157_v21  ;;  %v141_v56 = vld [vmem:[%s13994_s3 + $0x210] sm:$0xff]  ;;  %v142_v2 = vld [vmem:[%s13994_s3 + $0x218] sm:$0xff]  ;;  %v12177_v48 = vpack.c.bf16 %v190_v36, %v189_v27  ;;  %v160_v21 = vld [vmem:[%s13994_s3 + $0x2a8] sm:$0xff] }
  0xe3   :  { %v649_v6 = vmax.f32 %v362_v32, 0.0  ;;  %14324 = vst [vmem:[#allocation64_spill] sm:$0xff] %v12164_v26  ;;  %v173_v7 = vld [vmem:[%s13994_s3 + $0x310] sm:$0xff]  ;;  %v650_v32 = vmax.f32 %v431_v19, 0.0  ;;  %v174_v16 = vld [vmem:[%s13994_s3 + $0x318] sm:$0xff]  ;;  %v192_v36 = vld [vmem:[%s13994_s3 + $0x3a8] sm:$0xff]  ;;  %v12198_v19 = vrot.slane %v12113_v5, %v269_v43  ;;  %v12201_v37 = vpack.c.bf16 %v142_v2, %v141_v56 }
  0xe4   :  { %v651_v57 = vmax.f32 %v433_v54, 0.0  ;;  %14325 = vst [vmem:[#allocation65_spill] sm:$0xff] %v12166_v49  ;;  %14326 = vst [vmem:[#allocation66_spill] sm:$0xff] %v12177_v48  ;;  %v143_v43 = vld [vmem:[%s13994_s3 + $0x220] sm:$0xff]  ;;  %v144_v54 = vld [vmem:[%s13994_s3 + $0x228] sm:$0xff] }
  0xe5   :  { %728 = vmatprep.mubr.f32.mxu1 %v649_v6  ;;  %v191_v6 = vld [vmem:[%s13994_s3 + $0x3a0] sm:$0xff]  ;;  %14328 = vst [vmem:[#allocation68_spill] sm:$0xff] %v12198_v19  ;;  %14329 = vst [vmem:[#allocation69_spill] sm:$0xff] %v12201_v37 }
  0xe6   :  { %798 = vmatprep.mubr.f32.mxu0 %v651_v57  ;;  %729 = vmatmul.mubr.f32.vlgmr.msra.gmra.mrb[4].mxu1 %v648_v42  ;;  %v12207_v57 = vpack.c.bf16 %v174_v16, %v173_v7  ;;  %v12209_v42 = vpack.c.bf16 %v160_v21, %v159_v0  ;;  %v175_v27 = vld [vmem:[%s13994_s3 + $0x320] sm:$0xff]  ;;  %v12223_v7 = vpack.c.bf16 %v192_v36, %v191_v6  ;;  %v161_v16 = vld [vmem:[%s13994_s3 + $0x2b0] sm:$0xff]  ;;  %v162_v0 = vld [vmem:[%s13994_s3 + $0x2b8] sm:$0xff] }
  0xe7   :  { %799 = vmatmul.mubr.f32.vlgmr.msra.gmra.mrb[6].mxu0 %v650_v32  ;;  %9708 = vmatpush3.bf16.msra.mxu1 %v12162_v58  ;;  %v12203_v14 = vpop.f32.mrb[2].mxu0  ;;  %v176_v32 = vld [vmem:[%s13994_s3 + $0x328] sm:$0xff]  ;;  %v193_v6 = vld [vmem:[%s13994_s3 + $0x3b0] sm:$0xff]  ;;  %v194_v36 = vld [vmem:[%s13994_s3 + $0x3b8] sm:$0xff] }
  0xe8   :  { %9740 = vmatpush3.bf16.msra.mxu0 %v12164_v26  ;;  %9710 = vmatprep.subr.bf16.mxu1 %v12166_v49  ;;  %14330 = vst [vmem:[#allocation70_spill] sm:$0xff] %v12207_v57  ;;  %14331 = vst [vmem:[#allocation71_spill] sm:$0xff] %v12209_v42  ;;  %v12220_v56 = vpop.f32.mrb[2].mxu1  ;;  %v503_v2 = vpop.f32.mrb[3].mxu0  ;;  %v12243_v49 = vpack.c.bf16 %v144_v54, %v143_v43  ;;  %v177_v43 = vld [vmem:[%s13994_s3 + $0x330] sm:$0xff] }
  0xe9   :  { %9742 = vmatprep.subr.bf16.mxu0 %v12177_v48  ;;  %14332 = vst [vmem:[#allocation72_spill] sm:$0xff] %v12223_v7  ;;  %v504_v21 = vadd.f32 %v503_v2, %v12189_v60  ;;  %v574_v26 = vpop.f32.mrb[3].mxu1  ;;  %v12247_v2 = vpack.c.bf16 %v176_v32, %v175_v27  ;;  %v12249_v60 = vpack.c.bf16 %v162_v0, %v161_v16  ;;  %v178_v27 = vld [vmem:[%s13994_s3 + $0x338] sm:$0xff]  ;;  %v163_v32 = vld [vmem:[%s13994_s3 + $0x2c0] sm:$0xff]  ;;  %v164_v16 = vld [vmem:[%s13994_s3 + $0x2c8] sm:$0xff] }
  0xea   :  { %v575_v48 = vadd.f32 %v574_v26, %v12198_v19  ;;  %14333 = vst [vmem:[#allocation73_spill] sm:$0xff] %v12243_v49  ;;  %v146_v26 = vld [vmem:[%s13994_s3 + $0x238] sm:$0xff]  ;;  %v196_v0 = vld [vmem:[%s13994_s3 + $0x3c8] sm:$0xff]  ;;  %v12287_v19 = vpack.c.bf16 %v164_v16, %v163_v32  ;;  %v165_v32 = vld [vmem:[%s13994_s3 + $0x2d0] sm:$0xff] }
  0xeb   :  { %9712 = vmatpush3.bf16.msra.mxu1 %v12201_v37  ;;  %v653_v58 = vmax.f32 %v504_v21, 0.0  ;;  %14334 = vst [vmem:[#allocation74_spill] sm:$0xff] %v12247_v2  ;;  %14335 = vst [vmem:[#allocation75_spill] sm:$0xff] %v12249_v60  ;;  %v12261_v21 = vpack.c.bf16 %v194_v36, %v193_v6  ;;  %v12279_v6 = vpack.c.bf16 %v146_v26, %v145_v41  ;;  %v179_v41 = vld [vmem:[%s13994_s3 + $0x340] sm:$0xff]  ;;  %v166_v16 = vld [vmem:[%s13994_s3 + $0x2d8] sm:$0xff] }
  0xec   :  { %9744 = vmatpush3.bf16.msra.mxu0 %v12207_v57  ;;  %9714 = vmatprep.subr.bf16.mxu1 %v12209_v42  ;;  %v655_v54 = vmax.f32 %v575_v48, 0.0  ;;  %v195_v48 = vld [vmem:[%s13994_s3 + $0x3c0] sm:$0xff]  ;;  %14339 = vst [vmem:[#allocation79_spill] sm:$0xff] %v12287_v19  ;;  %v12325_v57 = vpack.c.bf16 %v166_v16, %v165_v32  ;;  %v168_v32 = vld [vmem:[%s13994_s3 + $0x2e8] sm:$0xff] }
  0xed   :  { %9746 = vmatprep.subr.bf16.mxu0 %v12223_v7  ;;  %14336 = vst [vmem:[#allocation76_spill] sm:$0xff] %v12261_v21  ;;  %868 = vmatprep.mubr.f32.mxu1 %v653_v58  ;;  %14337 = vst [vmem:[#allocation77_spill] sm:$0xff] %v12279_v6  ;;  %v12285_v58 = vpack.c.bf16 %v178_v27, %v177_v43  ;;  %v147_v7 = vld [vmem:[%s13994_s3 + $0x240] sm:$0xff]  ;;  %v12301_v43 = vpack.c.bf16 %v196_v0, %v195_v48  ;;  %v180_v27 = vld [vmem:[%s13994_s3 + $0x348] sm:$0xff] }
  0xee   :  { %938 = vmatprep.mubr.f32.mxu0 %v655_v54  ;;  %v148_v54 = vld [vmem:[%s13994_s3 + $0x248] sm:$0xff]  ;;  %v198_v48 = vld [vmem:[%s13994_s3 + $0x3d8] sm:$0xff]  ;;  %14343 = vst [vmem:[#allocation83_spill] sm:$0xff] %v12325_v57  ;;  %v199_v16 = vld [vmem:[%s13994_s3 + $0x3e0] sm:$0xff] }
  0xef   :  { %9716 = vmatpush3.bf16.msra.mxu1 %v12243_v49  ;;  %v12281_v36 = vpop.f32.mrb[4].mxu0  ;;  %14338 = vst [vmem:[#allocation78_spill] sm:$0xff] %v12285_v58  ;;  %14340 = vst [vmem:[#allocation80_spill] sm:$0xff] %v12301_v43  ;;  %v12319_v0 = vpack.c.bf16 %v148_v54, %v147_v7  ;;  %v150_v49 = vld [vmem:[%s13994_s3 + $0x258] sm:$0xff]  ;;  %v181_v7 = vld [vmem:[%s13994_s3 + $0x350] sm:$0xff] }
  0xf0   :  { %9748 = vmatpush3.bf16.msra.mxu0 %v12247_v2  ;;  %9718 = vmatprep.subr.bf16.mxu1 %v12249_v60  ;;  %v12298_v26 = vpop.f32.mrb[5].mxu0  ;;  %v197_v2 = vld [vmem:[%s13994_s3 + $0x3d0] sm:$0xff]  ;;  %v151_v42 = vld [vmem:[%s13994_s3 + $0x260] sm:$0xff] }
  0xf1   :  { %9750 = vmatprep.subr.bf16.mxu0 %v12261_v21  ;;  %14341 = vst [vmem:[#allocation81_spill] sm:$0xff] %v12319_v0  ;;  %v12323_v21 = vpack.c.bf16 %v180_v27, %v179_v41  ;;  %v149_v60 = vld [vmem:[%s13994_s3 + $0x250] sm:$0xff]  ;;  %v12337_v54 = vpack.c.bf16 %v198_v48, %v197_v2  ;;  %v182_v41 = vld [vmem:[%s13994_s3 + $0x358] sm:$0xff]  ;;  %v167_v27 = vld [vmem:[%s13994_s3 + $0x2e0] sm:$0xff]  ;;  %v257_v48 = vsub.s32 4, %v12105_v45 }
  0xf2   :  { %v200_v2 = vld [vmem:[%s13994_s3 + $0x3e8] sm:$0xff] }
  0xf3   :  { %9720 = vmatpush3.bf16.msra.mxu1 %v12279_v6  ;;  %14342 = vst [vmem:[#allocation82_spill] sm:$0xff] %v12323_v21  ;;  %14344 = vst [vmem:[#allocation84_spill] sm:$0xff] %v12337_v54  ;;  %v12363_v6 = vpack.c.bf16 %v168_v32, %v167_v27  ;;  %v170_v27 = vld [vmem:[%s13994_s3 + $0x2f8] sm:$0xff]  ;;  %v12387_v32 = vrot.slane %v12113_v5, %v257_v48  ;;  %v12404_v48 = vld [vmem:[%s13993_s2 + $0x8] sm:$0x3] }
  0xf4   :  { %9752 = vmatpush3.bf16.msra.mxu0 %v12285_v58  ;;  %9722 = vmatprep.subr.bf16.mxu1 %v12287_v19  ;;  %v265_v58 = vsub.s32 6, %v12105_v45  ;;  %v12361_v19 = vpack.c.bf16 %v182_v41, %v181_v7  ;;  %v184_v7 = vld [vmem:[%s13994_s3 + $0x368] sm:$0xff]  ;;  %v169_v41 = vld [vmem:[%s13994_s3 + $0x2f0] sm:$0xff] }
  0xf5   :  { %9754 = vmatprep.subr.bf16.mxu0 %v12301_v43  ;;  %v12356_v43 = vpack.c.bf16 %v150_v49, %v149_v60  ;;  %14347 = vst [vmem:[#allocation87_spill] sm:$0xff] %v12363_v6  ;;  %v183_v49 = vld [vmem:[%s13994_s3 + $0x360] sm:$0xff]  ;;  %v12375_v60 = vpack.c.bf16 %v200_v2, %v199_v16  ;;  %14349 = vst [vmem:[#allocation89_spill] sm:$0xff] %v12387_v32  ;;  %v201_v16 = vld [vmem:[%s13994_s3 + $0x3f0] sm:$0xff]  ;;  %v12410_v37 = vpack.c.bf16 %v170_v27, %v169_v41 }
  0xf6   :  { %14346 = vst [vmem:[#allocation86_spill] sm:$0xff] %v12361_v19  ;;  %v202_v2 = vld [vmem:[%s13994_s3 + $0x3f8] sm:$0xff]  ;;  %v220_v41 = vld [vmem:[%s13994_s3 + $0x488] sm:$0xff]  ;;  %v502_v27 = vadd.f32 %v12203_v14, %v12387_v32 }
  0xf7   :  { %9724 = vmatpush3.bf16.msra.mxu1 %v12319_v0  ;;  %14345 = vst [vmem:[#allocation85_spill] sm:$0xff] %v12356_v43  ;;  %v152_v0 = vld [vmem:[%s13994_s3 + $0x268] sm:$0xff]  ;;  %14348 = vst [vmem:[#allocation88_spill] sm:$0xff] %v12375_v60 }
  0xf8   :  { %9756 = vmatpush3.bf16.msra.mxu0 %v12323_v21  ;;  %9726 = vmatprep.subr.bf16.mxu1 %v12325_v57  ;;  %v12399_v21 = vpack.c.bf16 %v152_v0, %v151_v42  ;;  %v12408_v57 = vpack.c.bf16 %v184_v7, %v183_v49  ;;  %14353 = vst [vmem:[#allocation93_spill] sm:$0xff] %v12410_v37  ;;  %v154_v42 = vld [vmem:[%s13994_s3 + $0x278] sm:$0xff]  ;;  %v219_v7 = vld [vmem:[%s13994_s3 + $0x480] sm:$0xff]  ;;  %v204_v14 = vld [vmem:[%s13994_s3 + $0x408] sm:$0xff] }
  0xf9   :  { %9758 = vmatprep.subr.bf16.mxu0 %v12337_v54  ;;  %v12397_v54 = vrot.slane %v12113_v5, %v265_v58  ;;  %v153_v5 = vld [vmem:[%s13994_s3 + $0x270] sm:$0xff]  ;;  %v12422_v0 = vpack.c.bf16 %v202_v2, %v201_v16  ;;  %v186_v49 = vld [vmem:[%s13994_s3 + $0x378] sm:$0xff] }
  0xfa   :  { %14351 = vst [vmem:[#allocation91_spill] sm:$0xff] %v12399_v21  ;;  %14352 = vst [vmem:[#allocation92_spill] sm:$0xff] %v12408_v57  ;;  %v185_v58 = vld [vmem:[%s13994_s3 + $0x370] sm:$0xff] }
  0xfb   :  { %9728 = vmatpush3.bf16.msra.mxu1 %v12356_v43  ;;  %14350 = vst [vmem:[#allocation90_spill] sm:$0xff] %v12397_v54  ;;  %14354 = vst [vmem:[#allocation94_spill] sm:$0xff] %v12422_v0  ;;  %v573_v2 = vadd.f32 %v12220_v56, %v12397_v54  ;;  %v12449_v43 = vpack.c.bf16 %v220_v41, %v219_v7  ;;  %v221_v56 = vld [vmem:[%s13994_s3 + $0x490] sm:$0xff] }
  0xfc   :  { %9760 = vmatpush3.bf16.msra.mxu0 %v12361_v19  ;;  %9730 = vmatprep.subr.bf16.mxu1 %v12363_v6  ;;  %v14355_v19 = vsub.s32 1, %v12105_v45  ;;  %v12447_v6 = vpack.c.bf16 %v186_v49, %v185_v58 }
  0xfd   :  { %9762 = vmatprep.subr.bf16.mxu0 %v12375_v60  ;;  %v12443_v60 = vpack.c.bf16 %v154_v42, %v153_v5  ;;  %14359 = vst [vmem:[#allocation98_spill] sm:$0xff] %v12449_v43  ;;  %v222_v5 = vld [vmem:[%s13994_s3 + $0x498] sm:$0xff]  ;;  %v652_v42 = vmax.f32 %v502_v27, 0.0  ;;  %v654_v49 = vmax.f32 %v573_v2, 0.0  ;;  %v224_v2 = vld [vmem:[%s13994_s3 + $0x4a8] sm:$0xff] }
  0xfe   :  { %v12438_v16 = vrot.slane %v12404_v48, %v14355_v19  ;;  %14358 = vst [vmem:[#allocation97_spill] sm:$0xff] %v12447_v6  ;;  %v203_v19 = vld [vmem:[%s13994_s3 + $0x400] sm:$0xff]  ;;  %v12471_v41 = vpack.c.bf16 %v222_v5, %v221_v56  ;;  %v206_v27 = vld [vmem:[%s13994_s3 + $0x418] sm:$0xff] }
  0xff   :  { %9732 = vmatpush3.bf16.msra.mxu1 %v12399_v21  ;;  %14357 = vst [vmem:[#allocation96_spill] sm:$0xff] %v12443_v60  ;;  %v12467_v7 = vpack.c.bf16 %v204_v14, %v203_v19  ;;  %v207_v5 = vld [vmem:[%s13994_s3 + $0x420] sm:$0xff] }
 0x100   :  { %14356 = vst [vmem:[#allocation95_spill] sm:$0xff] %v12438_v16  ;;  %9764 = vmatpush3.bf16.msra.mxu0 %v12408_v57  ;;  %9734 = vmatprep.subr.bf16.mxu1 %v12410_v37  ;;  %v646_v58 = vadd.f32 %v12298_v26, %v12438_v16  ;;  %14361 = vst [vmem:[#allocation100_spill] sm:$0xff] %v12471_v41  ;;  %v223_v26 = vld [vmem:[%s13994_s3 + $0x4a0] sm:$0xff] }
 0x101   :  { %9766 = vmatprep.subr.bf16.mxu0 %v12422_v0  ;;  %14360 = vst [vmem:[#allocation99_spill] sm:$0xff] %v12467_v7  ;;  %v205_v0 = vld [vmem:[%s13994_s3 + $0x410] sm:$0xff]  ;;  %v12491_v56 = vpack.c.bf16 %v224_v2, %v223_v26  ;;  %v12515_v26 = vld [vmem:[%s13991_s0 + $0x2] sm:$0x3] }
 0x102   :  { %v657_v19 = vmax.f32 %v646_v58, 0.0  ;;  %v12487_v14 = vpack.c.bf16 %v206_v27, %v205_v0  ;;  %v14364_v58 = vmov 0.0   ;;  %v225_v0 = vld [vmem:[%s13994_s3 + $0x4b0] sm:$0xff] }
 0x103   :  { %9736 = vmatpush3.bf16.msra.mxu1 %v12443_v60  ;;  %14363 = vst [vmem:[#allocation102_spill] sm:$0xff] %v12491_v56 }
 0x104   :  { %9768 = vmatpush3.bf16.msra.mxu0 %v12447_v6  ;;  %9770 = vmatprep.subr.bf16.mxu1 %v12449_v43  ;;  %14362 = vst [vmem:[#allocation101_spill] sm:$0xff] %v12487_v14 }
 0x105   :  { %9802 = vmatprep.subr.bf16.mxu0 %v11608_v3  ;;  %v217_v3 = vld [vmem:[%s13994_s3 + $0x470] sm:$0xff] }
 0x106   :  { %869 = vmatmul.mubr.f32.vlgmr.msra.gmra.mrb[6].mxu1 %v652_v42  ;;  %v208_v42 = vld [vmem:[%s13994_s3 + $0x428] sm:$0xff] }
 0x107   :  { %939 = vmatmul.mubr.f32.vlgmr.msra.gmra.mrb[8].mxu0 %v654_v49  ;;  %9772 = vmatpush3.bf16.msra.mxu1 %v12467_v7  ;;  %v226_v49 = vld [vmem:[%s13994_s3 + $0x4b8] sm:$0xff]  ;;  %v12508_v27 = vpack.c.bf16 %v208_v42, %v207_v5  ;;  %v227_v5 = vld [vmem:[%s13994_s3 + $0x4c0] sm:$0xff]  ;;  %v228_v42 = vld [vmem:[%s13994_s3 + $0x4c8] sm:$0xff] }
 0x108   :  { %9804 = vmatpush1.bf16.msra.mxu0 %v11623_v9  ;;  %9774 = vmatprep.subr.bf16.mxu1 %v12471_v41  ;;  %v12517_v2 = vpack.c.bf16 %v226_v49, %v225_v0  ;;  %v12539_v49 = vpack.c.bf16 %v228_v42, %v227_v5  ;;  %v231_v9 = vld [vmem:[%s13994_s3 + $0x4e0] sm:$0xff] }
 0x109   :  { %9806 = vmatprep.subr.bf16.mxu0 %v11648_v17  ;;  %1091 = vmatprep.mubr.f32.mxu0 %v14364_v58  ;;  %14365 = vst [vmem:[#allocation103_spill] sm:$0xff] %v12508_v27  ;;  %v209_v17 = vld [vmem:[%s13994_s3 + $0x430] sm:$0xff] }
 0x10a   :  { %1008 = vmatprep.mubr.f32.mxu1 %v657_v19  ;;  %14366 = vst [vmem:[#allocation104_spill] sm:$0xff] %v12517_v2  ;;  %v210_v19 = vld [vmem:[%s13994_s3 + $0x438] sm:$0xff]  ;;  %14368 = vst [vmem:[#allocation106_spill] sm:$0xff] %v12539_v49 }
 0x10b   :  { %9776 = vmatpush3.bf16.msra.mxu1 %v12487_v14  ;;  %v12535_v0 = vpack.c.bf16 %v210_v19, %v209_v17  ;;  %v229_v17 = vld [vmem:[%s13994_s3 + $0x4d0] sm:$0xff]  ;;  %v230_v19 = vld [vmem:[%s13994_s3 + $0x4d8] sm:$0xff] }
 0x10c   :  { %9808 = vmatpush1.bf16.msra.mxu0 %v11662_v22  ;;  %9778 = vmatprep.subr.bf16.mxu1 %v12491_v56  ;;  %v212_v22 = vld [vmem:[%s13994_s3 + $0x448] sm:$0xff]  ;;  %v12560_v42 = vpack.c.bf16 %v230_v19, %v229_v17  ;;  %v215_v19 = vld [vmem:[%s13994_s3 + $0x460] sm:$0xff] }
 0x10d   :  { %9810 = vmatprep.subr.bf16.mxu0 %v11621_v8  ;;  %14367 = vst [vmem:[#allocation105_spill] sm:$0xff] %v12535_v0  ;;  %v211_v8 = vld [vmem:[%s13994_s3 + $0x440] sm:$0xff] }
 0x10e   :  { %v12556_v5 = vpack.c.bf16 %v212_v22, %v211_v8  ;;  %14370 = vst [vmem:[#allocation108_spill] sm:$0xff] %v12560_v42  ;;  %v232_v8 = vld [vmem:[%s13994_s3 + $0x4e8] sm:$0xff] }
 0x10f   :  { %7635 = vmatmul.mubr.msk.f32.vlgmr.msra.gmra.mrb[10].mxu0 %vm289_vm0, %v12515_v26  ;;  %9780 = vmatpush3.bf16.msra.mxu1 %v12508_v27  ;;  %v12581_v17 = vpack.c.bf16 %v232_v8, %v231_v9  ;;  %v14373_v9 = vsub.s32 0, %v12105_v45 }
 0x110   :  { %9812 = vmatpush1.bf16.msra.mxu0 %v11635_v13  ;;  %9782 = vmatprep.subr.bf16.mxu1 %v12517_v2  ;;  %14369 = vst [vmem:[#allocation107_spill] sm:$0xff] %v12556_v5  ;;  %v214_v13 = vld [vmem:[%s13994_s3 + $0x458] sm:$0xff] }
 0x111   :  { %9814 = vmatprep.subr.bf16.mxu0 %v11650_v18  ;;  %1162 = vmatprep.mubr.f32.mxu0 %v14364_v58  ;;  %v213_v18 = vld [vmem:[%s13994_s3 + $0x450] sm:$0xff]  ;;  %14372 = vst [vmem:[#allocation110_spill] sm:$0xff] %v12581_v17 }
 0x112   :  { %v12578_v22 = vpack.c.bf16 %v214_v13, %v213_v18  ;;  %v234_v13 = vld [vmem:[%s13994_s3 + $0x4f8] sm:$0xff]  ;;  %v12601_v18 = vrot.slane %v12404_v48, %v14373_v9  ;;  %v14385_v9 = vld [vmem:[#allocation50_spill] sm:$0xff] }
 0x113   :  { %9784 = vmatpush3.bf16.msra.mxu1 %v12535_v0  ;;  %v14381_v48 = vld [vmem:[#allocation47_spill] sm:$0xff] }
 0x114   :  { %9816 = vmatpush1.bf16.msra.mxu0 %v11672_v25  ;;  %9786 = vmatprep.subr.bf16.mxu1 %v12539_v49  ;;  %14371 = vst [vmem:[#allocation109_spill] sm:$0xff] %v12578_v22  ;;  %v216_v25 = vld [vmem:[%s13994_s3 + $0x468] sm:$0xff]  ;;  %14374 = vst [vmem:[#allocation111_spill] sm:$0xff] %v12601_v18 }
 0x115   :  { %9818 = vmatprep.subr.bf16.mxu0 %v11688_v30  ;;  %v233_v30 = vld [vmem:[%s13994_s3 + $0x4f0] sm:$0xff]  ;;  %v12604_v8 = vpack.c.bf16 %v216_v25, %v215_v19  ;;  %v644_v25 = vadd.f32 %v12281_v36, %v12601_v18  ;;  %v14383_v19 = vld [vmem:[#allocation49_spill] sm:$0xff] }
 0x116   :  { %v14380_v36 = vld [vmem:[#allocation46_spill] sm:$0xff] }
 0x117   :  { %7636 = vmatmul.mubr.msk.f32.vlgmr.msra.gmra.mrb[12].mxu0 %vm289_vm0, %v12515_v26  ;;  %9788 = vmatpush3.bf16.msra.mxu1 %v12556_v5  ;;  %14375 = vst [vmem:[#allocation112_spill] sm:$0xff] %v12604_v8 }
 0x118   :  { %9790 = vmatprep.subr.bf16.mxu1 %v12560_v42  ;;  %9820 = vmatpush1.bf16.msra.mxu0 %v11702_v35  ;;  %v12607_v35 = vpack.c.bf16 %v234_v13, %v233_v30  ;;  %v656_v30 = vmax.f32 %v644_v25, 0.0  ;;  %v14384_v13 = vld [vmem:[#allocation53_spill] sm:$0xff]  ;;  %v14386_v25 = vld [vmem:[#allocation51_spill] sm:$0xff] }
 0x119   :  { %9822 = vmatprep.subr.bf16.mxu0 %v11717_v40  ;;  %1233 = vmatprep.mubr.f32.mxu0 %v14364_v58  ;;  %v218_v40 = vld [vmem:[%s13994_s3 + $0x478] sm:$0xff] }
 0x11a   :  { %14376 = vst [vmem:[#allocation113_spill] sm:$0xff] %v12607_v35  ;;  %v12620_v45 = vpack.c.bf16 %v218_v40, %v217_v3  ;;  %v14378_v3 = vld [vmem:[#allocation44_spill] sm:$0xff]  ;;  %v14379_v40 = vld [vmem:[#allocation45_spill] sm:$0xff] }
 0x11b   :  { %9792 = vmatpush3.bf16.msra.mxu1 %v12578_v22 }
 0x11c   :  { %9794 = vmatprep.subr.bf16.mxu1 %v12581_v17  ;;  %9824 = vmatpush1.bf16.msra.mxu0 %v11751_v50  ;;  %14377 = vst [vmem:[#allocation114_spill] sm:$0xff] %v12620_v45 }
 0x11d   :  { %9826 = vmatprep.subr.bf16.mxu0 %v11690_v31 }
 0x11f   :  { %9796 = vmatpush3.bf16.msra.mxu1 %v12604_v8  ;;  %7637 = vmatmul.mubr.msk.f32.vlgmr.msra.gmra.mrb[14].mxu0 %vm289_vm0, %v12515_v26 }
 0x120   :  { %9798 = vmatprep.subr.bf16.mxu1 %v12607_v35  ;;  %9828 = vmatpush1.bf16.msra.mxu0 %v11715_v39 }
 0x121   :  { %9830 = vmatprep.subr.bf16.mxu0 %v11729_v44  ;;  %1304 = vmatprep.mubr.f32.mxu0 %v14364_v58 }
 0x123   :  { %9800 = vmatpush3.bf16.msra.mxu1 %v12620_v45 }
 0x124   :  { %9832 = vmatpush1.bf16.msra.mxu0 %v11755_v51  ;;  %9834 = vmatprep.subr.bf16.mxu1 %v11757_v52 }
 0x125   :  { %9842 = vmatprep.subr.bf16.mxu0 %v11780_v59 }
 0x126   :  { %1009 = vmatmul.mubr.f32.vlgmr.msra.gmra.mrb[8].mxu1 %v656_v30  ;;  %v14387_v30 = vld [vmem:[#allocation55_spill] sm:$0xff] }
 0x127   :  { %7638 = vmatmul.mubr.msk.f32.vlgmr.msra.gmra.mrb[16].mxu0 %vm289_vm0, %v12515_v26  ;;  %9836 = vmatpush1.bf16.msra.mxu1 %v11789_v62 }
 0x128   :  { %9838 = vmatprep.subr.bf16.mxu1 %v11799_v1  ;;  %1375 = vmatprep.mubr.f32.mxu1 %v14364_v58 }
 0x129   :  { %9844 = vmatpush3.bf16.msra.mxu0 %v11814_v10 }
 0x12a   :  { %9846 = vmatprep.subr.bf16.mxu0 %v11818_v11 }
 0x12b   :  { %9840 = vmatpush1.bf16.msra.mxu1 %v11829_v15 }
 0x12c   :  { %9874 = vmatprep.subr.bf16.mxu1 %v11839_v20 }
 0x12d   :  { %9848 = vmatpush3.bf16.msra.mxu0 %v11854_v28 }
 0x12e   :  { %7639 = vmatmul.mubr.msk.f32.vlgmr.msra.gmra.mrb[10].mxu1 %vm289_vm0, %v12515_v26  ;;  %9850 = vmatprep.subr.bf16.mxu0 %v11857_v29  ;;  %v14382_v26 = vld [vmem:[#allocation48_spill] sm:$0xff] }
 0x12f   :  { %9876 = vmatpush3.bf16.msra.mxu1 %v11866_v34 }
 0x130   :  { %9878 = vmatprep.subr.bf16.mxu1 %v11875_v38 }
 0x131   :  { %9852 = vmatpush3.bf16.msra.mxu0 %v11890_v46 }
 0x132   :  { %9854 = vmatprep.subr.bf16.mxu0 %v11895_v47 }
 0x133   :  { %9880 = vmatpush3.bf16.msra.mxu1 %v11904_v53 }
 0x134   :  { %9882 = vmatprep.subr.bf16.mxu1 %v11913_v55 }
 0x135   :  { %9856 = vmatpush3.bf16.msra.mxu0 %v11928_v61 }
 0x136   :  { %9858 = vmatprep.subr.bf16.mxu0 %v11931_v63  ;;  %v14392_v63 = vld [vmem:[#allocation58_spill] sm:$0xff] }
 0x137   :  { %9884 = vmatpush3.bf16.msra.mxu1 %v11940_v4 }
 0x138   :  { %9886 = vmatprep.subr.bf16.mxu1 %v11949_v12 }
 0x139   :  { %9860 = vmatpush3.bf16.msra.mxu0 %v11964_v23  ;;  %v14389_v23 = vld [vmem:[#allocation52_spill] sm:$0xff] }
 0x13a   :  { %9862 = vmatprep.subr.bf16.mxu0 %v11967_v24  ;;  %v14388_v24 = vld [vmem:[#allocation57_spill] sm:$0xff] }
 0x13b   :  { %9888 = vmatpush3.bf16.msra.mxu1 %v11976_v33 }
 0x13c   :  { %9890 = vmatprep.subr.bf16.mxu1 %v14378_v3 }
 0x13d   :  { %9864 = vmatpush3.bf16.msra.mxu0 %v14379_v40  ;;  %v14390_v40 = vld [vmem:[#allocation54_spill] sm:$0xff] }
 0x13e   :  { %9866 = vmatprep.subr.bf16.mxu0 %v14380_v36  ;;  %v14391_v36 = vld [vmem:[#allocation56_spill] sm:$0xff] }
 0x13f   :  { %9892 = vmatpush3.bf16.msra.mxu1 %v14381_v48 }
 0x140   :  { %9894 = vmatprep.subr.bf16.mxu1 %v14382_v26 }
 0x141   :  { %9868 = vmatpush3.bf16.msra.mxu0 %v14383_v19 }
 0x142   :  { %9870 = vmatprep.subr.bf16.mxu0 %v14384_v13  ;;  %v12676_v13 = vld [vmem:[%s13995_s4] ss:$0 sm:$0xff] }
 0x143   :  { %9896 = vmatpush3.bf16.msra.mxu1 %v14385_v9  ;;  %v14394_v9 = vld [vmem:[#allocation61_spill] sm:$0xff] }
 0x144   :  { %9898 = vmatprep.subr.bf16.mxu1 %v14386_v25 }
 0x145   :  { %9872 = vmatpush3.bf16.msra.mxu0 %v14387_v30 }
 0x146   :  { %9906 = vmatprep.subr.bf16.mxu0 %v14388_v24 }
 0x147   :  { %9900 = vmatpush3.bf16.msra.mxu1 %v14389_v23 }
 0x148   :  { %9902 = vmatprep.subr.bf16.mxu1 %v14390_v40  ;;  %v14393_v40 = vld [vmem:[#allocation59_spill] sm:$0xff] }
 0x14b   :  { %9904 = vmatpush3.bf16.msra.mxu1 %v14391_v36 }
 0x14c   :  { %9938 = vmatprep.subr.bf16.mxu1 %v14392_v63 }
 0x1b9   :  { %v7790_v61 = vpop.f32.mrb[4].mxu1 }
 0x1ba   :  { %v7825_v19 = vpop.f32.mrb[6].mxu0  ;;  %v7791_v47 = vpop.f32.mrb[5].mxu1 }
 0x1bb   :  { %v7792_v46 = vadd.f32 %v7791_v47, %v7790_v61  ;;  %v7826_v30 = vpop.f32.mrb[7].mxu0 }
 0x1bc   :  { %v7827_v29 = vadd.f32 %v7826_v30, %v7825_v19  ;;  %v14404_v30 = vld [vmem:[#allocation66_spill] sm:$0xff] }
 0x1bd   :  { %v731_v24 = vadd.f32 %v7792_v46, %v12676_v13  ;;  %v14395_v46 = vld [vmem:[#allocation63_spill] sm:$0xff] }
 0x1bf   :  { %v801_v28 = vadd.f32 %v7827_v29, %v731_v24  ;;  %v14396_v24 = vld [vmem:[#allocation60_spill] sm:$0xff] }
 0x1d9   :  { %v7860_v11 = vpop.f32.mrb[6].mxu1 }
 0x1da   :  { %v7895_v10 = vpop.f32.mrb[8].mxu0  ;;  %v7861_v59 = vpop.f32.mrb[7].mxu1 }
 0x1db   :  { %v7862_v51 = vadd.f32 %v7861_v59, %v7860_v11  ;;  %v7896_v44 = vpop.f32.mrb[9].mxu0  ;;  %v14397_v11 = vld [vmem:[#allocation65_spill] sm:$0xff] }
 0x1dc   :  { %v7897_v39 = vadd.f32 %v7896_v44, %v7895_v10  ;;  %v14398_v44 = vld [vmem:[#allocation62_spill] sm:$0xff]  ;;  %v14399_v10 = vld [vmem:[#allocation69_spill] sm:$0xff] }
 0x1dd   :  { %v871_v31 = vadd.f32 %v7862_v51, %v801_v28  ;;  %v14400_v28 = vld [vmem:[#allocation71_spill] sm:$0xff] }
 0x1df   :  { %v941_v63 = vadd.f32 %v7897_v39, %v871_v31 }
 0x1e2   :  { %v1093_v36 = vpop.f32.mrb[10].mxu0 }
 0x1e3   :  { %v1094_v23 = vadd.f32 %v1093_v36, %v14393_v40  ;;  %v1095_v25 = vpop.f32.mrb[11].mxu0  ;;  %v14402_v36 = vld [vmem:[#allocation64_spill] sm:$0xff] }
 0x1e4   :  { %v1096_v26 = vadd.f32 %v1095_v25, %v14394_v9  ;;  %v14403_v25 = vld [vmem:[#allocation75_spill] sm:$0xff] }
 0x1e5   :  { %v1382_v61 = vmax.f32 %v1094_v23, 0.0  ;;  %v14401_v23 = vld [vmem:[#allocation73_spill] sm:$0xff] }
 0x1e6   :  { %v1383_v47 = vmax.f32 %v1096_v26, 0.0 }
 0x1e8   :  { %1456 = vmatprep.mubr.f32.mxu0 %v1383_v47 }
 0x1e9   :  { %1457 = vmatmul.mubr.f32.vlgmr.msra.gmra.mrb[18].mxu0 %v1382_v61  ;;  %v14405_v61 = vld [vmem:[#allocation67_spill] sm:$0xff] }
 0x1ea   :  { %9908 = vmatpush3.bf16.msra.mxu0 %v14395_v46  ;;  %v1164_v29 = vpop.f32.mrb[12].mxu0 }
 0x1eb   :  { %v1165_v19 = vadd.f32 %v1164_v29, %v14396_v24  ;;  %v1166_v59 = vpop.f32.mrb[13].mxu0  ;;  %9910 = vmatprep.subr.bf16.mxu0 %v14397_v11  ;;  %v14411_v24 = vld [vmem:[#allocation74_spill] sm:$0xff] }
 0x1ec   :  { %v1167_v31 = vadd.f32 %v1166_v59, %v14398_v44  ;;  %v14407_v59 = vld [vmem:[#allocation70_spill] sm:$0xff]  ;;  %v14408_v44 = vld [vmem:[#allocation79_spill] sm:$0xff] }
 0x1ed   :  { %v1384_v39 = vmax.f32 %v1165_v19, 0.0  ;;  %v14406_v19 = vld [vmem:[#allocation77_spill] sm:$0xff] }
 0x1ee   :  { %v1385_v51 = vmax.f32 %v1167_v31, 0.0  ;;  %9912 = vmatpush3.bf16.msra.mxu0 %v14399_v10 }
 0x1ef   :  { %9914 = vmatprep.subr.bf16.mxu0 %v14400_v28  ;;  %v14412_v28 = vld [vmem:[#allocation83_spill] sm:$0xff] }
 0x1f0   :  { %1526 = vmatprep.mubr.f32.mxu1 %v1385_v51 }
 0x1f1   :  { %1527 = vmatmul.mubr.f32.vlgmr.msra.gmra.mrb[12].mxu1 %v1384_v39  ;;  %v14409_v39 = vld [vmem:[#allocation72_spill] sm:$0xff] }
 0x1f2   :  { %9916 = vmatpush3.bf16.msra.mxu0 %v14401_v23  ;;  %9940 = vmatpush3.bf16.msra.mxu1 %v14402_v36  ;;  %v1235_v26 = vpop.f32.mrb[14].mxu0  ;;  %v14410_v36 = vld [vmem:[#allocation81_spill] sm:$0xff] }
 0x1f3   :  { %9918 = vmatprep.subr.bf16.mxu0 %v14403_v25  ;;  %9942 = vmatprep.subr.bf16.mxu1 %v14404_v30  ;;  %v1237_v47 = vpop.f32.mrb[15].mxu0 }
 0x1f4   :  { %v1238_v29 = vadd.f32 %v1237_v47, %v14405_v61  ;;  %v14413_v47 = vld [vmem:[#allocation76_spill] sm:$0xff] }
 0x1f6   :  { %9920 = vmatpush3.bf16.msra.mxu0 %v14406_v19  ;;  %9944 = vmatpush3.bf16.msra.mxu1 %v14407_v59  ;;  %v1387_v31 = vmax.f32 %v1238_v29, 0.0  ;;  %v14414_v59 = vld [vmem:[#allocation68_spill] sm:$0xff] }
 0x1f7   :  { %9922 = vmatprep.subr.bf16.mxu0 %v14408_v44  ;;  %9946 = vmatprep.subr.bf16.mxu1 %v14409_v39  ;;  %v14415_v44 = vld [vmem:[#allocation85_spill] sm:$0xff] }
 0x1f8   :  { %1596 = vmatprep.mubr.f32.mxu0 %v1387_v31  ;;  %v14416_v31 = vld [vmem:[#allocation78_spill] sm:$0xff] }
 0x1f9   :  { %v7930_v51 = vpop.f32.mrb[8].mxu1 }
 0x1fa   :  { %9924 = vmatpush3.bf16.msra.mxu0 %v14410_v36  ;;  %9948 = vmatpush3.bf16.msra.mxu1 %v14411_v24  ;;  %v7931_v25 = vpop.f32.mrb[9].mxu1  ;;  %v1306_v30 = vpop.f32.mrb[16].mxu0  ;;  %v14417_v36 = vld [vmem:[#allocation87_spill] sm:$0xff]  ;;  %v14418_v24 = vld [vmem:[#allocation80_spill] sm:$0xff] }
 0x1fb   :  { %v7932_v23 = vadd.f32 %v7931_v25, %v7930_v51  ;;  %9926 = vmatprep.subr.bf16.mxu0 %v14412_v28  ;;  %9950 = vmatprep.subr.bf16.mxu1 %v14413_v47  ;;  %v1308_v61 = vpop.f32.mrb[17].mxu0  ;;  %v1236_v25 = vadd.f32 %v1235_v26, %v12387_v32  ;;  %v14419_v47 = vld [vmem:[#allocation82_spill] sm:$0xff] }
 0x1fc   :  { %v1309_v29 = vadd.f32 %v1308_v61, %v14414_v59 }
 0x1fd   :  { %v12701_v19 = vadd.f32 %v7932_v23, %v941_v63  ;;  %v14420_v63 = vld [vmem:[#allocation84_spill] sm:$0xff] }
 0x1fe   :  { %9928 = vmatpush3.bf16.msra.mxu0 %v14415_v44  ;;  %9952 = vmatpush3.bf16.msra.mxu1 %v14416_v31  ;;  %v1389_v39 = vmax.f32 %v1309_v29, 0.0  ;;  %v1386_v29 = vmax.f32 %v1236_v25, 0.0  ;;  %v14421_v31 = vld [vmem:[#allocation86_spill] sm:$0xff] }
 0x1ff   :  { %9930 = vmatprep.subr.bf16.mxu0 %v14417_v36  ;;  %9954 = vmatprep.subr.bf16.mxu1 %v14418_v24 }
 0x200   :  { %1666 = vmatprep.mubr.f32.mxu1 %v1389_v39  ;;  %v14422_v39 = vld [vmem:[#allocation88_spill] sm:$0xff] }
 0x201   :  { %v1377_v51 = vpop.f32.mrb[10].mxu1 }
 0x202   :  { %9932 = vmatpush3.bf16.msra.mxu0 %v12399_v21  ;;  %9956 = vmatpush3.bf16.msra.mxu1 %v14419_v47  ;;  %v1379_v61 = vpop.f32.mrb[11].mxu1  ;;  %v1307_v47 = vadd.f32 %v1306_v30, %v12397_v54  ;;  %v1378_v30 = vadd.f32 %v1377_v51, %v12601_v18  ;;  %v7640_v51 = vld [vmem:[%s13996_s5 + $0x40] sm:$0xff] }
 0x203   :  { %9934 = vmatprep.subr.bf16.mxu0 %v12410_v37  ;;  %9958 = vmatprep.subr.bf16.mxu1 %v14420_v63  ;;  %v1380_v23 = vadd.f32 %v1379_v61, %v12438_v16  ;;  %v14423_v63 = vld [vmem:[#allocation94_spill] sm:$0xff]  ;;  %v14424_v61 = vld [vmem:[#allocation5_spill] sm:$0xff] }
 0x204   :  { %v1388_v25 = vmax.f32 %v1307_v47, 0.0  ;;  %v1390_v47 = vmax.f32 %v1378_v30, 0.0  ;;  %v7641_v30 = vld [vmem:[%s13996_s5 + $0x48] sm:$0xff] }
 0x205   :  { %v1391_v26 = vmax.f32 %v1380_v23, 0.0  ;;  %v14425_v23 = vld [vmem:[#allocation7_spill] sm:$0xff]  ;;  %v14430_v54 = vld [vmem:[#allocation17_spill] sm:$0xff] }
 0x206   :  { %9936 = vmatpush3.bf16.msra.mxu0 %v12443_v60  ;;  %9960 = vmatpush3.bf16.msra.mxu1 %v14421_v31 }
 0x207   :  { %9962 = vmatprep.subr.bf16.mxu1 %v14422_v39  ;;  %9970 = vmatprep.subr.bf16.mxu0 %v12449_v43 }
 0x209   :  { %1597 = vmatmul.mubr.f32.vlgmr.msra.gmra.mrb[20].mxu0 %v1386_v29  ;;  %v14426_v29 = vld [vmem:[#allocation9_spill] sm:$0xff] }
 0x20a   :  { %9964 = vmatpush3.bf16.msra.mxu1 %v12408_v57  ;;  %9972 = vmatpush3.bf16.msra.mxu0 %v12467_v7 }
 0x20b   :  { %9966 = vmatprep.subr.bf16.mxu1 %v14423_v63  ;;  %9974 = vmatprep.subr.bf16.mxu0 %v12471_v41  ;;  %v14429_v63 = vld [vmem:[#allocation15_spill] sm:$0xff] }
 0x20c   :  { %1736 = vmatprep.mubr.f32.mxu0 %v1391_v26  ;;  %v14427_v26 = vld [vmem:[#allocation11_spill] sm:$0xff] }
 0x20e   :  { %9968 = vmatpush3.bf16.msra.mxu1 %v12447_v6  ;;  %9976 = vmatpush3.bf16.msra.mxu0 %v12487_v14 }
 0x20f   :  { %9978 = vmatprep.subr.bf16.mxu0 %v12491_v56 }
 0x211   :  { %1667 = vmatmul.mubr.f32.vlgmr.msra.gmra.mrb[14].mxu1 %v1388_v25  ;;  %v14428_v25 = vld [vmem:[#allocation13_spill] sm:$0xff] }
 0x212   :  { %9980 = vmatpush3.bf16.msra.mxu0 %v12508_v27  ;;  %9435 = vmatprep.mubr.msk.f32.mxu1 %vm11547_vm1, %v14364_v58 }
 0x213   :  { %9982 = vmatprep.subr.bf16.mxu0 %v12517_v2 }
 0x216   :  { %9984 = vmatpush3.bf16.msra.mxu0 %v12535_v0 }
 0x217   :  { %9986 = vmatprep.subr.bf16.mxu0 %v12539_v49 }
 0x21a   :  { %9988 = vmatpush3.bf16.msra.mxu0 %v12556_v5 }
 0x21b   :  { %9990 = vmatprep.subr.bf16.mxu0 %v12560_v42 }
 0x21e   :  { %9992 = vmatpush3.bf16.msra.mxu0 %v12578_v22 }
 0x21f   :  { %9994 = vmatprep.subr.bf16.mxu0 %v12581_v17 }
 0x222   :  { %9996 = vmatpush3.bf16.msra.mxu0 %v12604_v8 }
 0x223   :  { %9998 = vmatprep.subr.bf16.mxu0 %v12607_v35 }
 0x226   :  { %10000 = vmatpush3.bf16.msra.mxu0 %v12620_v45 }
 0x227   :  { %10026 = vmatprep.subr.bf16.mxu0 %v14424_v61  ;;  %v12759_v61 = vld [vmem:[%s13991_s0 + $0x4] sm:$0x3] }
 0x229   :  { %1737 = vmatmul.mubr.f32.vlgmr.msra.gmra.mrb[22].mxu0 %v1390_v47  ;;  %v7642_v47 = vld [vmem:[%s13996_s5 + $0x50] sm:$0xff] }
 0x22a   :  { %10028 = vmatpush1.bf16.msra.mxu0 %v14425_v23  ;;  %1967 = vmatprep.mubr.f32.mxu0 %v14364_v58  ;;  %v14155_v23 = vmov 0.0|0.0  }
 0x22b   :  { %10030 = vmatprep.subr.bf16.mxu0 %v14426_v29  ;;  %10001 = vmatprep.subr.bf16.mxu1 %v14155_v23  ;;  %v10002_v29 = vpack.c.bf16 %v7641_v30, %v7640_v51  ;;  %v7644_v51 = vld [vmem:[%s13996_s5 + $0x60] sm:$0xff]  ;;  %v7645_v30 = vld [vmem:[%s13996_s5 + $0x68] sm:$0xff] }
 0x22c   :  { %v10008_v57 = vpack.c.bf16 %v7645_v30, %v7644_v51  ;;  %v14433_v51 = vld [vmem:[#allocation51_spill] sm:$0xff]  ;;  %v14434_v30 = vld [vmem:[#allocation52_spill] sm:$0xff] }
 0x22d   :  { %10003 = vmatpush3.bf16.msra.mxu1 %v10002_v29 }
 0x22e   :  { %10032 = vmatpush1.bf16.msra.mxu0 %v14427_v26  ;;  %v7643_v26 = vld [vmem:[%s13996_s5 + $0x58] sm:$0xff]  ;;  %10004 = vmatprep.subr.bf16.mxu1 %v14155_v23 }
 0x22f   :  { %10042 = vmatprep.subr.bf16.mxu0 %v14428_v25  ;;  %v10005_v6 = vpack.c.bf16 %v7643_v26, %v7642_v47  ;;  %v14431_v26 = vld [vmem:[#allocation48_spill] sm:$0xff]  ;;  %v14432_v47 = vld [vmem:[#allocation50_spill] sm:$0xff] }
 0x231   :  { %7651 = vmatmul.mubr.msk.f32.vlgmr.msra.gmra.mrb[24].mxu0 %vm289_vm0, %v12759_v61  ;;  %10006 = vmatpush3.bf16.msra.mxu1 %v10005_v6  ;;  %v7646_v6 = vld [vmem:[%s13996_s5 + $0x70] sm:$0xff] }
 0x232   :  { %10044 = vmatpush1.bf16.msra.mxu0 %v14429_v63  ;;  %2109 = vmatprep.mubr.f32.mxu0 %v14364_v58 }
 0x233   :  { %10046 = vmatprep.subr.bf16.mxu0 %v14430_v54  ;;  %10007 = vmatprep.subr.bf16.mxu1 %v14155_v23 }
 0x235   :  { %10009 = vmatpush3.bf16.msra.mxu1 %v10008_v57  ;;  %v7647_v57 = vld [vmem:[%s13996_s5 + $0x78] sm:$0xff] }
 0x236   :  { %10048 = vmatpush1.bf16.msra.mxu0 %v11751_v50  ;;  %10010 = vmatprep.subr.bf16.mxu1 %v14155_v23  ;;  %v10011_v29 = vpack.c.bf16 %v7647_v57, %v7646_v6  ;;  %v14435_v6 = vld [vmem:[#allocation54_spill] sm:$0xff]  ;;  %v14436_v57 = vld [vmem:[#allocation56_spill] sm:$0xff] }
 0x237   :  { %10058 = vmatprep.subr.bf16.mxu0 %v11757_v52 }
 0x239   :  { %7653 = vmatmul.mubr.msk.f32.vlgmr.msra.gmra.mrb[26].mxu0 %vm289_vm0, %v12759_v61  ;;  %10012 = vmatpush3.bf16.msra.mxu1 %v10011_v29  ;;  %v14437_v29 = vld [vmem:[#allocation58_spill] sm:$0xff] }
 0x23a   :  { %10060 = vmatpush1.bf16.msra.mxu0 %v11789_v62  ;;  %2251 = vmatprep.mubr.f32.mxu0 %v14364_v58 }
 0x23b   :  { %10062 = vmatprep.subr.bf16.mxu0 %v11799_v1  ;;  %10013 = vmatprep.subr.bf16.mxu1 %v14155_v23 }
 0x23e   :  { %10064 = vmatpush1.bf16.msra.mxu0 %v11829_v15 }
 0x23f   :  { %10098 = vmatprep.subr.bf16.mxu0 %v11839_v20 }
 0x241   :  { %7655 = vmatmul.mubr.msk.f32.vlgmr.msra.gmra.mrb[28].mxu0 %vm289_vm0, %v12759_v61 }
 0x242   :  { %10100 = vmatpush3.bf16.msra.mxu0 %v11866_v34 }
 0x243   :  { %10102 = vmatprep.subr.bf16.mxu0 %v11875_v38 }
 0x246   :  { %10104 = vmatpush3.bf16.msra.mxu0 %v11904_v53 }
 0x247   :  { %10106 = vmatprep.subr.bf16.mxu0 %v11913_v55 }
 0x24a   :  { %10108 = vmatpush3.bf16.msra.mxu0 %v11940_v4 }
 0x24b   :  { %10110 = vmatprep.subr.bf16.mxu0 %v11949_v12 }
 0x24e   :  { %10112 = vmatpush3.bf16.msra.mxu0 %v11976_v33 }
 0x24f   :  { %10114 = vmatprep.subr.bf16.mxu0 %v14378_v3 }
 0x252   :  { %10116 = vmatpush3.bf16.msra.mxu0 %v14381_v48 }
 0x253   :  { %10118 = vmatprep.subr.bf16.mxu0 %v14431_v26 }
 0x256   :  { %10120 = vmatpush3.bf16.msra.mxu0 %v14432_v47 }
 0x257   :  { %10122 = vmatprep.subr.bf16.mxu0 %v14433_v51 }
 0x25a   :  { %10124 = vmatpush3.bf16.msra.mxu0 %v14434_v30 }
 0x25b   :  { %10126 = vmatprep.subr.bf16.mxu0 %v14435_v6 }
 0x25e   :  { %10128 = vmatpush3.bf16.msra.mxu0 %v14436_v57 }
 0x25f   :  { %10162 = vmatprep.subr.bf16.mxu0 %v14437_v29  ;;  %v1014_v29 = vld [vmem:[%s13996_s5] sm:$0xff] }
 0x2bc   :  { %v7965_v23 = vpop.f32.mrb[18].mxu0 }
 0x2bd   :  { %v7966_v33 = vpop.f32.mrb[19].mxu0 }
 0x2be   :  { %v7967_v12 = vadd.f32 %v7966_v33, %v7965_v23  ;;  %v1015_v33 = vld [vmem:[%s13996_s5 + $0x8] sm:$0xff] }
 0x2bf   :  { %v1019_v23 = vld [vmem:[%s13996_s5 + $0x28] sm:$0xff] }
 0x2c0   :  { %v1459_v48 = vadd.f32 %v7967_v12, %v12676_v13 }
 0x2c4   :  { %v8000_v3 = vpop.f32.mrb[12].mxu1 }
 0x2c5   :  { %v8001_v4 = vpop.f32.mrb[13].mxu1 }
 0x2c6   :  { %v8002_v26 = vadd.f32 %v8001_v4, %v8000_v3  ;;  %v10014_v3 = vpack.c.bf16 %v1015_v33, %v1014_v29  ;;  %v14441_v29 = vld [vmem:[#allocation10_spill] sm:$0xff]  ;;  %v14442_v33 = vld [vmem:[#allocation12_spill] sm:$0xff] }
 0x2c8   :  { %v1529_v55 = vadd.f32 %v8002_v26, %v1459_v48 }
 0x2dc   :  { %v8035_v47 = vpop.f32.mrb[20].mxu0 }
 0x2dd   :  { %v8036_v53 = vpop.f32.mrb[21].mxu0 }
 0x2de   :  { %v8037_v51 = vadd.f32 %v8036_v53, %v8035_v47  ;;  %v1016_v53 = vld [vmem:[%s13996_s5 + $0x10] sm:$0xff] }
 0x2df   :  { %v1020_v47 = vld [vmem:[%s13996_s5 + $0x30] sm:$0xff] }
 0x2e0   :  { %v1599_v38 = vadd.f32 %v8037_v51, %v1529_v55  ;;  %v14438_v55 = vmov 0.0|0.0   ;;  %v1021_v51 = vld [vmem:[%s13996_s5 + $0x38] sm:$0xff] }
 0x2e4   :  { %v8070_v30 = vpop.f32.mrb[14].mxu1 }
 0x2e5   :  { %v8071_v34 = vpop.f32.mrb[15].mxu1 }
 0x2e6   :  { %v8072_v6 = vadd.f32 %v8071_v34, %v8070_v30  ;;  %v1017_v34 = vld [vmem:[%s13996_s5 + $0x18] sm:$0xff]  ;;  %v10023_v30 = vpack.c.bf16 %v1021_v51, %v1020_v47  ;;  %v14454_v47 = vld [vmem:[#allocation37_spill] sm:$0xff]  ;;  %v14455_v51 = vld [vmem:[#allocation38_spill] sm:$0xff] }
 0x2e8   :  { %v1669_v20 = vadd.f32 %v8072_v6, %v1599_v38  ;;  %v10017_v38 = vpack.c.bf16 %v1017_v34, %v1016_v53  ;;  %v14439_v6 = vld [vmem:[#allocation6_spill] sm:$0xff]  ;;  %v14448_v53 = vld [vmem:[#allocation25_spill] sm:$0xff] }
 0x2e9   :  { %v14449_v34 = vld [vmem:[#allocation26_spill] sm:$0xff] }
 0x2fc   :  { %v8105_v57 = vpop.f32.mrb[22].mxu0 }
 0x2fd   :  { %v8106_v12 = vpop.f32.mrb[23].mxu0 }
 0x2fe   :  { %v8107_v4 = vadd.f32 %v8106_v12, %v8105_v57  ;;  %v14440_v57 = vld [vmem:[#allocation8_spill] sm:$0xff]  ;;  %v14443_v12 = vld [vmem:[#allocation14_spill] sm:$0xff] }
 0x300   :  { %v1739_v48 = vadd.f32 %v8107_v4, %v1669_v20  ;;  %v1018_v20 = vld [vmem:[%s13996_s5 + $0x20] sm:$0xff] }
 0x301   :  { %v10020_v26 = vpack.c.bf16 %v1019_v23, %v1018_v20  ;;  %v14444_v4 = vld [vmem:[#allocation16_spill] sm:$0xff]  ;;  %v14451_v20 = vld [vmem:[#allocation30_spill] sm:$0xff]  ;;  %v14452_v23 = vld [vmem:[#allocation33_spill] sm:$0xff] }
 0x302   :  { %9436 = vmatmul.mubr.msk.f32.vlgmr.msra.gmra.mrb[16].mxu1 %vm1751_vm2, %v1739_v48  ;;  %v14447_v48 = vld [vmem:[#allocation22_spill] sm:$0xff] }
 0x303   :  { %10015 = vmatpush3.bf16.msra.mxu1 %v10014_v3  ;;  %9454 = vmatprep.mubr.msk.f32.mxu1 %vm11547_vm1, %v14364_v58  ;;  %v14445_v3 = vld [vmem:[#allocation18_spill] sm:$0xff] }
 0x304   :  { %10016 = vmatprep.subr.bf16.mxu1 %v14438_v55 }
 0x307   :  { %10018 = vmatpush3.bf16.msra.mxu1 %v10017_v38  ;;  %v14450_v38 = vld [vmem:[#allocation29_spill] sm:$0xff] }
 0x308   :  { %10019 = vmatprep.subr.bf16.mxu1 %v14438_v55 }
 0x30b   :  { %10021 = vmatpush3.bf16.msra.mxu1 %v10020_v26  ;;  %v14453_v26 = vld [vmem:[#allocation34_spill] sm:$0xff] }
 0x30c   :  { %10022 = vmatprep.subr.bf16.mxu1 %v14438_v55 }
 0x30f   :  { %10024 = vmatpush3.bf16.msra.mxu1 %v10023_v30  ;;  %v14456_v30 = vld [vmem:[#allocation41_spill] sm:$0xff] }
 0x310   :  { %10034 = vmatprep.subr.bf16.mxu1 %v14439_v6 }
 0x312   :  { %9455 = vmatmul.mubr.msk.f32.vlgmr.msra.gmra.mrb[18].mxu1 %vm1751_vm2, %v12701_v19  ;;  %v14446_v19 = vld [vmem:[#allocation20_spill] sm:$0xff] }
 0x313   :  { %10036 = vmatpush1.bf16.msra.mxu1 %v14440_v57  ;;  %2038 = vmatprep.mubr.f32.mxu1 %v14364_v58 }
 0x314   :  { %10038 = vmatprep.subr.bf16.mxu1 %v14441_v29 }
 0x317   :  { %10040 = vmatpush1.bf16.msra.mxu1 %v14442_v33 }
 0x318   :  { %10050 = vmatprep.subr.bf16.mxu1 %v14443_v12 }
 0x31a   :  { %7652 = vmatmul.mubr.msk.f32.vlgmr.msra.gmra.mrb[20].mxu1 %vm289_vm0, %v12759_v61 }
 0x31b   :  { %10052 = vmatpush1.bf16.msra.mxu1 %v14444_v4  ;;  %2180 = vmatprep.mubr.f32.mxu1 %v14364_v58 }
 0x31c   :  { %10054 = vmatprep.subr.bf16.mxu1 %v14445_v3 }
 0x31f   :  { %10056 = vmatpush1.bf16.msra.mxu1 %v14446_v19  ;;  %v14462_v19 = vld [vmem:[#allocation55_spill] sm:$0xff] }
 0x320   :  { %10066 = vmatprep.subr.bf16.mxu1 %v14447_v48  ;;  %v14457_v48 = vld [vmem:[#allocation42_spill] sm:$0xff] }
 0x322   :  { %7654 = vmatmul.mubr.msk.f32.vlgmr.msra.gmra.mrb[22].mxu1 %vm289_vm0, %v12759_v61  ;;  %v14458_v61 = vld [vmem:[#allocation45_spill] sm:$0xff] }
 0x323   :  { %10068 = vmatpush3.bf16.msra.mxu1 %v14448_v53  ;;  %v14459_v53 = vld [vmem:[#allocation46_spill] sm:$0xff] }
 0x324   :  { %10070 = vmatprep.subr.bf16.mxu1 %v14449_v34  ;;  %v14460_v34 = vld [vmem:[#allocation49_spill] sm:$0xff] }
 0x327   :  { %10072 = vmatpush3.bf16.msra.mxu1 %v14450_v38  ;;  %v14461_v38 = vld [vmem:[#allocation53_spill] sm:$0xff] }
 0x328   :  { %10074 = vmatprep.subr.bf16.mxu1 %v14451_v20  ;;  %v1969_v20 = vpop.f32.mrb[24].mxu0 }
 0x32b   :  { %10076 = vmatpush3.bf16.msra.mxu1 %v14452_v23  ;;  %v1970_v23 = vadd.f32 %v1969_v20, %v14393_v40  ;;  %v14465_v20 = vld [vmem:[#allocation73_spill] sm:$0xff]  ;;  %v14466_v40 = vld [vmem:[#allocation75_spill] sm:$0xff] }
 0x32c   :  { %10078 = vmatprep.subr.bf16.mxu1 %v14453_v26  ;;  %v1971_v26 = vpop.f32.mrb[25].mxu0 }
 0x32f   :  { %10080 = vmatpush3.bf16.msra.mxu1 %v14454_v47  ;;  %v1972_v47 = vadd.f32 %v1971_v26, %v14394_v9  ;;  %v14467_v26 = vld [vmem:[#allocation77_spill] sm:$0xff] }
 0x330   :  { %10082 = vmatprep.subr.bf16.mxu1 %v14455_v51  ;;  %v2258_v51 = vmax.f32 %v1970_v23, 0.0  ;;  %v14468_v23 = vld [vmem:[#allocation79_spill] sm:$0xff]  ;;  %v14469_v9 = vld [vmem:[#allocation81_spill] sm:$0xff] }
 0x333   :  { %10084 = vmatpush3.bf16.msra.mxu1 %v14456_v30  ;;  %v14463_v30 = vld [vmem:[#allocation57_spill] sm:$0xff] }
 0x334   :  { %10086 = vmatprep.subr.bf16.mxu1 %v14457_v48  ;;  %v2259_v48 = vmax.f32 %v1972_v47, 0.0 }
 0x336   :  { %2332 = vmatprep.mubr.f32.mxu1 %v2259_v48  ;;  %v2111_v48 = vpop.f32.mrb[26].mxu0 }
 0x337   :  { %10088 = vmatpush3.bf16.msra.mxu1 %v14458_v61  ;;  %v2112_v47 = vadd.f32 %v2111_v48, %v12387_v32 }
 0x338   :  { %10090 = vmatprep.subr.bf16.mxu1 %v14459_v53 }
 0x33b   :  { %10092 = vmatpush3.bf16.msra.mxu1 %v14460_v34 }
 0x33c   :  { %10094 = vmatprep.subr.bf16.mxu1 %v14461_v38  ;;  %v14464_v38 = vld [vmem:[#allocation71_spill] sm:$0xff] }
 0x33f   :  { %10096 = vmatpush3.bf16.msra.mxu1 %v14462_v19 }
 0x340   :  { %10130 = vmatprep.subr.bf16.mxu1 %v14463_v30 }
 0x342   :  { %2333 = vmatmul.mubr.f32.vlgmr.msra.gmra.mrb[24].mxu1 %v2258_v51  ;;  %v2113_v51 = vpop.f32.mrb[27].mxu0 }
 0x343   :  { %10132 = vmatpush3.bf16.msra.mxu1 %v14395_v46 }
 0x344   :  { %10134 = vmatprep.subr.bf16.mxu1 %v14397_v11 }
 0x347   :  { %10136 = vmatpush3.bf16.msra.mxu1 %v14399_v10 }
 0x348   :  { %10138 = vmatprep.subr.bf16.mxu1 %v14464_v38 }
 0x34b   :  { %10140 = vmatpush3.bf16.msra.mxu1 %v14465_v20 }
 0x34c   :  { %10142 = vmatprep.subr.bf16.mxu1 %v14466_v40 }
 0x34f   :  { %10144 = vmatpush3.bf16.msra.mxu1 %v14467_v26  ;;  %v2262_v26 = vmax.f32 %v2112_v47, 0.0 }
 0x350   :  { %10146 = vmatprep.subr.bf16.mxu1 %v14468_v23  ;;  %v14470_v23 = vld [vmem:[#allocation67_spill] sm:$0xff] }
 0x353   :  { %10148 = vmatpush3.bf16.msra.mxu1 %v14469_v9  ;;  %v2114_v9 = vadd.f32 %v2113_v51, %v14470_v23 }
 0x354   :  { %10150 = vmatprep.subr.bf16.mxu1 %v14412_v28 }
 0x355   :  { %v2263_v28 = vmax.f32 %v2114_v9, 0.0  ;;  %v2253_v9 = vpop.f32.mrb[28].mxu0 }
 0x357   :  { %10152 = vmatpush3.bf16.msra.mxu1 %v14415_v44  ;;  %2472 = vmatprep.mubr.f32.mxu1 %v2263_v28  ;;  %v2255_v28 = vpop.f32.mrb[29].mxu0 }
 0x358   :  { %10154 = vmatprep.subr.bf16.mxu1 %v14417_v36  ;;  %v2256_v48 = vadd.f32 %v2255_v28, %v12438_v16 }
 0x35a   :  { %v2267_v47 = vmax.f32 %v2256_v48, 0.0 }
 0x35b   :  { %10156 = vmatpush3.bf16.msra.mxu1 %v12399_v21 }
 0x35c   :  { %10158 = vmatprep.subr.bf16.mxu1 %v12410_v37 }
 0x35f   :  { %10160 = vmatpush3.bf16.msra.mxu1 %v12443_v60 }
 0x360   :  { %10194 = vmatprep.subr.bf16.mxu1 %v12449_v43 }
 0x362   :  { %2473 = vmatmul.mubr.f32.vlgmr.msra.gmra.mrb[26].mxu1 %v2262_v26  ;;  %v2254_v26 = vadd.f32 %v2253_v9, %v12601_v18  ;;  %v14472_v18 = vld [vmem:[#allocation62_spill] sm:$0xff] }
 0x363   :  { %10196 = vmatpush3.bf16.msra.mxu1 %v12467_v7  ;;  %2612 = vmatprep.mubr.f32.mxu1 %v2267_v47 }
 0x364   :  { %10198 = vmatprep.subr.bf16.mxu1 %v12471_v41  ;;  %v2266_v51 = vmax.f32 %v2254_v26, 0.0 }
 0x367   :  { %10200 = vmatpush3.bf16.msra.mxu1 %v12487_v14 }
 0x368   :  { %10202 = vmatprep.subr.bf16.mxu1 %v12491_v56 }
 0x36b   :  { %10204 = vmatpush3.bf16.msra.mxu1 %v12508_v27 }
 0x36c   :  { %10206 = vmatprep.subr.bf16.mxu1 %v12517_v2 }
 0x36f   :  { %10208 = vmatpush3.bf16.msra.mxu1 %v12535_v0 }
 0x370   :  { %10210 = vmatprep.subr.bf16.mxu1 %v12539_v49 }
 0x373   :  { %10212 = vmatpush3.bf16.msra.mxu1 %v12556_v5 }
 0x374   :  { %10214 = vmatprep.subr.bf16.mxu1 %v12560_v42  ;;  %v14485_v42 = vld [vmem:[#allocation97_spill] sm:$0xff] }
 0x377   :  { %10216 = vmatpush3.bf16.msra.mxu1 %v12578_v22  ;;  %v14476_v22 = vld [vmem:[#allocation72_spill] sm:$0xff] }
 0x378   :  { %10218 = vmatprep.subr.bf16.mxu1 %v12581_v17 }
 0x37b   :  { %10220 = vmatpush3.bf16.msra.mxu1 %v12604_v8 }
 0x37c   :  { %10222 = vmatprep.subr.bf16.mxu1 %v12607_v35  ;;  %v14471_v35 = vld [vmem:[#allocation60_spill] sm:$0xff] }
 0x37f   :  { %10224 = vmatpush3.bf16.msra.mxu1 %v12620_v45 }
 0x380   :  { %10254 = vmatprep.subr.bf16.mxu1 %v14428_v25 }
 0x382   :  { %2613 = vmatmul.mubr.f32.vlgmr.msra.gmra.mrb[28].mxu1 %v2266_v51 }
 0x383   :  { %10256 = vmatpush1.bf16.msra.mxu1 %v14429_v63  ;;  %2912 = vmatprep.mubr.f32.mxu1 %v14364_v58 }
 0x384   :  { %10258 = vmatprep.subr.bf16.mxu1 %v14430_v54  ;;  %v14473_v54 = vld [vmem:[#allocation64_spill] sm:$0xff] }
 0x387   :  { %10260 = vmatpush1.bf16.msra.mxu1 %v11751_v50 }
 0x388   :  { %10270 = vmatprep.subr.bf16.mxu1 %v11757_v52  ;;  %v14474_v52 = vld [vmem:[#allocation66_spill] sm:$0xff] }
 0x3d5   :  { %v1821_v9 = vpop.f32.mrb[16].mxu1 }
 0x3d6   :  { %v9437_v28 = vpop.f32.mrb[17].mxu1 }
 0x3e5   :  { %v1894_v48 = vpop.f32.mrb[18].mxu1 }
 0x3e6   :  { %v12918_v26 = vadd.f32 %v1894_v48, %v1821_v9  ;;  %v9456_v47 = vpop.f32.mrb[19].mxu1  ;;  %v14475_v48 = vld [vmem:[#allocation70_spill] sm:$0xff] }
 0x3ed   :  { %v2040_v45 = vpop.f32.mrb[20].mxu1 }
 0x3ee   :  { %v2041_v25 = vadd.f32 %v2040_v45, %v14471_v35  ;;  %v2042_v51 = vpop.f32.mrb[21].mxu1  ;;  %v14477_v45 = vld [vmem:[#allocation74_spill] sm:$0xff] }
 0x3ef   :  { %v2043_v63 = vadd.f32 %v2042_v51, %v14472_v18  ;;  %v14482_v51 = vld [vmem:[#allocation92_spill] sm:$0xff] }
 0x3f0   :  { %v2260_v17 = vmax.f32 %v2041_v25, 0.0  ;;  %v14481_v25 = vld [vmem:[#allocation84_spill] sm:$0xff] }
 0x3f1   :  { %v2261_v8 = vmax.f32 %v2043_v63, 0.0  ;;  %v14478_v63 = vld [vmem:[#allocation76_spill] sm:$0xff] }
 0x3f3   :  { %2402 = vmatprep.mubr.f32.mxu0 %v2261_v8  ;;  %v14479_v8 = vld [vmem:[#allocation78_spill] sm:$0xff] }
 0x3f4   :  { %2403 = vmatmul.mubr.f32.vlgmr.msra.gmra.mrb[30].mxu0 %v2260_v17  ;;  %v14480_v17 = vld [vmem:[#allocation82_spill] sm:$0xff] }
 0x3f5   :  { %10164 = vmatpush3.bf16.msra.mxu0 %v14473_v54  ;;  %v2182_v50 = vpop.f32.mrb[22].mxu1 }
 0x3f6   :  { %10166 = vmatprep.subr.bf16.mxu0 %v14474_v52  ;;  %v2184_v28 = vpop.f32.mrb[23].mxu1 }
 0x3f7   :  { %v2185_v9 = vadd.f32 %v2184_v28, %v14414_v59  ;;  %v14483_v28 = vld [vmem:[#allocation90_spill] sm:$0xff] }
 0x3f9   :  { %10168 = vmatpush3.bf16.msra.mxu0 %v14475_v48  ;;  %v2265_v47 = vmax.f32 %v2185_v9, 0.0  ;;  %v2183_v9 = vadd.f32 %v2182_v50, %v14483_v28  ;;  %v7656_v50 = vld [vmem:[%s13996_s5 + $0x80] sm:$0xff] }
 0x3fa   :  { %10170 = vmatprep.subr.bf16.mxu0 %v14476_v22 }
 0x3fb   :  { %2542 = vmatprep.mubr.f32.mxu0 %v2265_v47  ;;  %v14484_v47 = vld [vmem:[#allocation94_spill] sm:$0xff]  ;;  %v2264_v5 = vmax.f32 %v2183_v9, 0.0 }
 0x3fc   :  { %v7657_v9 = vld [vmem:[%s13996_s5 + $0x88] sm:$0xff] }
 0x3fd   :  { %10172 = vmatpush3.bf16.msra.mxu0 %v14477_v45 }
 0x3fe   :  { %10174 = vmatprep.subr.bf16.mxu0 %v14478_v63 }
 0x401   :  { %10176 = vmatpush3.bf16.msra.mxu0 %v14479_v8 }
 0x402   :  { %10178 = vmatprep.subr.bf16.mxu0 %v14418_v24 }
 0x405   :  { %10180 = vmatpush3.bf16.msra.mxu0 %v14480_v17 }
 0x406   :  { %10182 = vmatprep.subr.bf16.mxu0 %v14481_v25 }
 0x409   :  { %10184 = vmatpush3.bf16.msra.mxu0 %v14421_v31 }
 0x40a   :  { %10186 = vmatprep.subr.bf16.mxu0 %v14422_v39 }
 0x40d   :  { %10188 = vmatpush3.bf16.msra.mxu0 %v14482_v51 }
 0x40e   :  { %10190 = vmatprep.subr.bf16.mxu0 %v14484_v47 }
 0x411   :  { %10192 = vmatpush3.bf16.msra.mxu0 %v14485_v42  ;;  %v10226_v42 = vpack.c.bf16 %v7657_v9, %v7656_v50 }
 0x412   :  { %10225 = vmatprep.subr.bf16.mxu0 %v14438_v55 }
 0x414   :  { %2543 = vmatmul.mubr.f32.vlgmr.msra.gmra.mrb[32].mxu0 %v2264_v5  ;;  %v7658_v5 = vld [vmem:[%s13996_s5 + $0x90] sm:$0xff] }
 0x415   :  { %9473 = vmatprep.mubr.msk.f32.mxu0 %vm11547_vm1, %v14364_v58  ;;  %v8158_v49 = vpop.f32.mrb[24].mxu1  ;;  %10227 = vmatpush3.bf16.msra.mxu0 %v10226_v42  ;;  %v7662_v42 = vld [vmem:[%s13996_s5 + $0xb0] sm:$0xff] }
 0x416   :  { %v8159_v0 = vpop.f32.mrb[25].mxu1  ;;  %10228 = vmatprep.subr.bf16.mxu0 %v14438_v55 }
 0x417   :  { %v8160_v2 = vadd.f32 %v8159_v0, %v8158_v49  ;;  %v7659_v0 = vld [vmem:[%s13996_s5 + $0x98] sm:$0xff] }
 0x418   :  { %v10229_v49 = vpack.c.bf16 %v7659_v0, %v7658_v5  ;;  %v7663_v5 = vld [vmem:[%s13996_s5 + $0xb8] sm:$0xff] }
 0x419   :  { %v10235_v0 = vpack.c.bf16 %v7663_v5, %v7662_v42  ;;  %v14491_v42 = vld [vmem:[#allocation36_spill] sm:$0xff]  ;;  %v14492_v5 = vld [vmem:[#allocation39_spill] sm:$0xff] }
 0x41a   :  { %10230 = vmatpush3.bf16.msra.mxu0 %v10229_v49  ;;  %v14486_v49 = vld [vmem:[#allocation5_spill] sm:$0xff] }
 0x41b   :  { %10231 = vmatprep.subr.bf16.mxu0 %v14438_v55 }
 0x435   :  { %v8228_v27 = vpop.f32.mrb[26].mxu1 }
 0x436   :  { %v8229_v56 = vpop.f32.mrb[27].mxu1 }
 0x437   :  { %v8230_v14 = vadd.f32 %v8229_v56, %v8228_v27  ;;  %v7660_v56 = vld [vmem:[%s13996_s5 + $0xa0] sm:$0xff]  ;;  %v7661_v27 = vld [vmem:[%s13996_s5 + $0xa8] sm:$0xff] }
 0x438   :  { %v10232_v50 = vpack.c.bf16 %v7661_v27, %v7660_v56  ;;  %v7665_v56 = vld [vmem:[%s13991_s0 + $0x6] sm:$0x3]  ;;  %v14488_v27 = vld [vmem:[#allocation31_spill] sm:$0xff] }
 0x439   :  { %7668 = vmatmul.mubr.msk.f32.vlgmr.msra.gmra.mrb[30].mxu1 %vm289_vm0, %v7665_v56 }
 0x43a   :  { %10233 = vmatpush3.bf16.msra.mxu0 %v10232_v50  ;;  %10272 = vmatpush1.bf16.msra.mxu1 %v11789_v62  ;;  %v14489_v50 = vld [vmem:[#allocation32_spill] sm:$0xff]  ;;  %v14494_v62 = vld [vmem:[#allocation43_spill] sm:$0xff] }
 0x43b   :  { %10234 = vmatprep.subr.bf16.mxu0 %v14438_v55  ;;  %3054 = vmatprep.mubr.f32.mxu1 %v14364_v58 }
 0x43c   :  { %10274 = vmatprep.subr.bf16.mxu1 %v11799_v1  ;;  %v14495_v1 = vld [vmem:[#allocation44_spill] sm:$0xff] }
 0x43e   :  { %10236 = vmatpush3.bf16.msra.mxu0 %v10235_v0  ;;  %10276 = vmatpush1.bf16.msra.mxu1 %v11829_v15  ;;  %v14493_v0 = vld [vmem:[#allocation40_spill] sm:$0xff]  ;;  %v14496_v15 = vld [vmem:[#allocation47_spill] sm:$0xff] }
 0x43f   :  { %10238 = vmatprep.subr.bf16.mxu0 %v14486_v49  ;;  %v14498_v49 = vld [vmem:[#allocation50_spill] sm:$0xff] }
 0x441   :  { %7670 = vmatmul.mubr.msk.f32.vlgmr.msra.gmra.mrb[32].mxu1 %vm289_vm0, %v7665_v56 }
 0x455   :  { %v8298_v9 = vpop.f32.mrb[28].mxu1 }
 0x456   :  { %v8299_v41 = vpop.f32.mrb[29].mxu1 }
 0x457   :  { %v8300_v47 = vadd.f32 %v8299_v41, %v8298_v9  ;;  %v14487_v41 = vld [vmem:[#allocation28_spill] sm:$0xff]  ;;  %v14490_v9 = vld [vmem:[#allocation35_spill] sm:$0xff] }
 0x458   :  { %10310 = vmatprep.subr.bf16.mxu1 %v14487_v41  ;;  %v14497_v41 = vld [vmem:[#allocation48_spill] sm:$0xff] }
 0x459   :  { %10312 = vmatpush3.bf16.msra.mxu1 %v14488_v27  ;;  %v14499_v27 = vld [vmem:[#allocation51_spill] sm:$0xff] }
 0x45a   :  { %10314 = vmatprep.subr.bf16.mxu1 %v14489_v50  ;;  %v14500_v50 = vld [vmem:[#allocation52_spill] sm:$0xff] }
 0x45d   :  { %10316 = vmatpush3.bf16.msra.mxu1 %v14490_v9  ;;  %v14501_v9 = vld [vmem:[#allocation54_spill] sm:$0xff] }
 0x45e   :  { %10318 = vmatprep.subr.bf16.mxu1 %v14491_v42  ;;  %v14502_v42 = vld [vmem:[#allocation56_spill] sm:$0xff] }
 0x461   :  { %10320 = vmatpush3.bf16.msra.mxu1 %v14492_v5  ;;  %v14503_v5 = vld [vmem:[#allocation58_spill] sm:$0xff] }
 0x462   :  { %10322 = vmatprep.subr.bf16.mxu1 %v14493_v0 }
 0x465   :  { %10324 = vmatpush3.bf16.msra.mxu1 %v14494_v62 }
 0x466   :  { %10326 = vmatprep.subr.bf16.mxu1 %v14495_v1  ;;  %v2335_v1 = vadd.f32 %v8160_v2, %v12676_v13  ;;  %v14512_v2 = vld [vmem:[#allocation30_spill] sm:$0xff]  ;;  %v14513_v13 = vld [vmem:[#allocation33_spill] sm:$0xff] }
 0x469   :  { %10328 = vmatpush3.bf16.msra.mxu1 %v14496_v15 }
 0x46a   :  { %10330 = vmatprep.subr.bf16.mxu1 %v14497_v41 }
 0x46d   :  { %10332 = vmatpush3.bf16.msra.mxu1 %v14498_v49 }
 0x46e   :  { %10334 = vmatprep.subr.bf16.mxu1 %v14499_v27 }
 0x471   :  { %10336 = vmatpush3.bf16.msra.mxu1 %v14500_v50  ;;  %v14504_v50 = vld [vmem:[#allocation7_spill] sm:$0xff] }
 0x472   :  { %10338 = vmatprep.subr.bf16.mxu1 %v14501_v9 }
 0x475   :  { %10340 = vmatpush3.bf16.msra.mxu1 %v14502_v42  ;;  %v14505_v42 = vld [vmem:[#allocation9_spill] sm:$0xff] }
 0x476   :  { %10374 = vmatprep.subr.bf16.mxu1 %v14503_v5  ;;  %v14506_v5 = vld [vmem:[#allocation11_spill] sm:$0xff] }
 0x4c7   :  { %v8193_v0 = vpop.f32.mrb[30].mxu0 }
 0x4c8   :  { %v8194_v62 = vpop.f32.mrb[31].mxu0 }
 0x4c9   :  { %v8195_v55 = vadd.f32 %v8194_v62, %v8193_v0  ;;  %v14507_v62 = vld [vmem:[#allocation20_spill] sm:$0xff] }
 0x4cb   :  { %v2405_v15 = vadd.f32 %v8195_v55, %v2335_v1  ;;  %v14508_v1 = vld [vmem:[#allocation22_spill] sm:$0xff] }
 0x4cc   :  { %v14514_v55 = vld [vmem:[#allocation34_spill] sm:$0xff] }
 0x4cd   :  { %v2475_v7 = vadd.f32 %v8230_v14, %v2405_v15  ;;  %v14509_v15 = vld [vmem:[#allocation25_spill] sm:$0xff] }
 0x4ce   :  { %v14511_v14 = vld [vmem:[#allocation29_spill] sm:$0xff] }
 0x4e7   :  { %v8263_v41 = vpop.f32.mrb[32].mxu0 }
 0x4e8   :  { %v8264_v51 = vpop.f32.mrb[33].mxu0 }
 0x4e9   :  { %v8265_v49 = vadd.f32 %v8264_v51, %v8263_v41  ;;  %v14515_v51 = vld [vmem:[#allocation37_spill] sm:$0xff] }
 0x4eb   :  { %v2545_v28 = vadd.f32 %v8265_v49, %v2475_v7  ;;  %v14510_v7 = vld [vmem:[#allocation26_spill] sm:$0xff] }
 0x4ec   :  { %v14518_v49 = vld [vmem:[#allocation42_spill] sm:$0xff] }
 0x4ed   :  { %v2615_v27 = vadd.f32 %v8300_v47, %v2545_v28  ;;  %v14516_v28 = vld [vmem:[#allocation38_spill] sm:$0xff]  ;;  %v14517_v47 = vld [vmem:[#allocation41_spill] sm:$0xff] }
 0x4ef   :  { %9474 = vmatmul.mubr.msk.f32.vlgmr.msra.gmra.mrb[34].mxu0 %vm1751_vm2, %v2615_v27 }
 0x4f0   :  { %10240 = vmatpush1.bf16.msra.mxu0 %v14504_v50  ;;  %2770 = vmatprep.mubr.f32.mxu0 %v14364_v58 }
 0x4f1   :  { %10242 = vmatprep.subr.bf16.mxu0 %v14505_v42 }
 0x4f4   :  { %10244 = vmatpush1.bf16.msra.mxu0 %v14506_v5 }
 0x4f5   :  { %10246 = vmatprep.subr.bf16.mxu0 %v14439_v6 }
 0x4f7   :  { %7666 = vmatmul.mubr.msk.f32.vlgmr.msra.gmra.mrb[36].mxu0 %vm289_vm0, %v7665_v56 }
 0x4f8   :  { %10248 = vmatpush1.bf16.msra.mxu0 %v14440_v57  ;;  %2841 = vmatprep.mubr.f32.mxu0 %v14364_v58 }
 0x4f9   :  { %10250 = vmatprep.subr.bf16.mxu0 %v14441_v29 }
 0x4fc   :  { %10252 = vmatpush1.bf16.msra.mxu0 %v14442_v33 }
 0x4fd   :  { %10262 = vmatprep.subr.bf16.mxu0 %v14443_v12 }
 0x4ff   :  { %7667 = vmatmul.mubr.msk.f32.vlgmr.msra.gmra.mrb[38].mxu0 %vm289_vm0, %v7665_v56 }
 0x500   :  { %10264 = vmatpush1.bf16.msra.mxu0 %v14444_v4  ;;  %2983 = vmatprep.mubr.f32.mxu0 %v14364_v58 }
 0x501   :  { %10266 = vmatprep.subr.bf16.mxu0 %v14445_v3 }
 0x504   :  { %10268 = vmatpush1.bf16.msra.mxu0 %v14507_v62 }
 0x505   :  { %10278 = vmatprep.subr.bf16.mxu0 %v14508_v1 }
 0x507   :  { %7669 = vmatmul.mubr.msk.f32.vlgmr.msra.gmra.mrb[40].mxu0 %vm289_vm0, %v7665_v56  ;;  %v14519_v56 = vld [vmem:[#allocation53_spill] sm:$0xff] }
 0x508   :  { %10280 = vmatpush3.bf16.msra.mxu0 %v14509_v15 }
 0x509   :  { %10282 = vmatprep.subr.bf16.mxu0 %v14510_v7 }
 0x50c   :  { %10284 = vmatpush3.bf16.msra.mxu0 %v14511_v14  ;;  %v2914_v41 = vpop.f32.mrb[30].mxu1 }
 0x50d   :  { %10286 = vmatprep.subr.bf16.mxu0 %v14512_v2  ;;  %v2916_v27 = vpop.f32.mrb[31].mxu1 }
 0x510   :  { %10288 = vmatpush3.bf16.msra.mxu0 %v14513_v13  ;;  %v14521_v13 = vld [vmem:[#allocation61_spill] sm:$0xff] }
 0x511   :  { %10290 = vmatprep.subr.bf16.mxu0 %v14514_v55 }
 0x514   :  { %10292 = vmatpush3.bf16.msra.mxu0 %v14515_v51  ;;  %v13032_v0 = vpop.f32.mrb[32].mxu1 }
 0x515   :  { %10294 = vmatprep.subr.bf16.mxu0 %v14516_v28  ;;  %v3058_v28 = vpop.f32.mrb[33].mxu1 }
 0x518   :  { %10296 = vmatpush3.bf16.msra.mxu0 %v14517_v47 }
 0x519   :  { %10298 = vmatprep.subr.bf16.mxu0 %v14518_v49 }
 0x51c   :  { %10300 = vmatpush3.bf16.msra.mxu0 %v14458_v61 }
 0x51d   :  { %10302 = vmatprep.subr.bf16.mxu0 %v14459_v53  ;;  %v2917_v53 = vadd.f32 %v2916_v27, %v14470_v23 }
 0x520   :  { %10304 = vmatpush3.bf16.msra.mxu0 %v14460_v34  ;;  %v14520_v34 = vld [vmem:[#allocation59_spill] sm:$0xff] }
 0x521   :  { %10306 = vmatprep.subr.bf16.mxu0 %v14519_v56 }
 0x524   :  { %10308 = vmatpush3.bf16.msra.mxu0 %v14462_v19 }
 0x525   :  { %10342 = vmatprep.subr.bf16.mxu0 %v14463_v30  ;;  %v3066_v30 = vmax.f32 %v2917_v53, 0.0 }
 0x5c2   :  { %v2696_v47 = vpop.f32.mrb[34].mxu0 }
 0x5c3   :  { %v13035_v49 = vadd.f32 %v2696_v47, %v12918_v26  ;;  %v9475_v61 = vpop.f32.mrb[35].mxu0 }
 0x5ca   :  { %v2772_v51 = vpop.f32.mrb[36].mxu0 }
 0x5cb   :  { %v2773_v55 = vadd.f32 %v2772_v51, %v14520_v34  ;;  %v2774_v56 = vpop.f32.mrb[37].mxu0 }
 0x5cc   :  { %v2775_v19 = vadd.f32 %v2774_v56, %v14521_v13  ;;  %v14525_v56 = vld [vmem:[#allocation83_spill] sm:$0xff] }
 0x5cd   :  { %v3061_v14 = vmax.f32 %v2773_v55, 0.0  ;;  %v14524_v55 = vld [vmem:[#allocation81_spill] sm:$0xff] }
 0x5ce   :  { %v3062_v2 = vmax.f32 %v2775_v19, 0.0 }
 0x5d0   :  { %3135 = vmatprep.mubr.f32.mxu0 %v3062_v2  ;;  %v14523_v2 = vld [vmem:[#allocation79_spill] sm:$0xff] }
 0x5d1   :  { %3136 = vmatmul.mubr.f32.vlgmr.msra.gmra.mrb[42].mxu0 %v3061_v14 }
 0x5d2   :  { %10344 = vmatpush3.bf16.msra.mxu0 %v14395_v46  ;;  %v2843_v7 = vpop.f32.mrb[38].mxu0  ;;  %3275 = vmatprep.mubr.f32.mxu0 %v3066_v30 }
 0x5d3   :  { %v2844_v26 = vadd.f32 %v2843_v7, %v14471_v35  ;;  %v2845_v61 = vpop.f32.mrb[39].mxu0  ;;  %10346 = vmatprep.subr.bf16.mxu0 %v14397_v11  ;;  %v14522_v7 = vld [vmem:[#allocation77_spill] sm:$0xff] }
 0x5d4   :  { %v2846_v47 = vadd.f32 %v2845_v61, %v14472_v18  ;;  %v3059_v61 = vadd.f32 %v3058_v28, %v12438_v16  ;;  %v14530_v28 = vld [vmem:[#allocation100_spill] sm:$0xff] }
 0x5d5   :  { %v3063_v51 = vmax.f32 %v2844_v26, 0.0  ;;  %v2915_v26 = vadd.f32 %v2914_v41, %v12387_v32 }
 0x5d6   :  { %v3064_v27 = vmax.f32 %v2846_v47, 0.0  ;;  %10348 = vmatpush3.bf16.msra.mxu0 %v14399_v10  ;;  %v3070_v41 = vmax.f32 %v3059_v61, 0.0  ;;  %v14534_v61 = vmov 0.0|0.0  }
 0x5d7   :  { %10350 = vmatprep.subr.bf16.mxu0 %v14464_v38  ;;  %v3065_v47 = vmax.f32 %v2915_v26, 0.0 }
 0x5d8   :  { %3205 = vmatprep.mubr.f32.mxu1 %v3064_v27 }
 0x5d9   :  { %3206 = vmatmul.mubr.f32.vlgmr.msra.gmra.mrb[34].mxu1 %v3063_v51  ;;  %v14526_v51 = vld [vmem:[#allocation90_spill] sm:$0xff] }
 0x5da   :  { %10352 = vmatpush3.bf16.msra.mxu0 %v14465_v20  ;;  %10376 = vmatpush3.bf16.msra.mxu1 %v14473_v54  ;;  %v2985_v19 = vpop.f32.mrb[40].mxu0 }
 0x5db   :  { %10354 = vmatprep.subr.bf16.mxu0 %v14466_v40  ;;  %10378 = vmatprep.subr.bf16.mxu1 %v14474_v52  ;;  %v2987_v53 = vpop.f32.mrb[41].mxu0  ;;  %v2986_v27 = vadd.f32 %v2985_v19, %v14526_v51  ;;  %v14535_v19 = vld [vmem:[#allocation103_spill] sm:$0xff] }
 0x5dc   :  { %v2988_v30 = vadd.f32 %v2987_v53, %v14414_v59  ;;  %v14527_v53 = vld [vmem:[#allocation92_spill] sm:$0xff] }
 0x5dd   :  { %v3067_v26 = vmax.f32 %v2986_v27, 0.0  ;;  %v14539_v27 = vld [vmem:[#allocation107_spill] sm:$0xff] }
 0x5de   :  { %10356 = vmatpush3.bf16.msra.mxu0 %v14522_v7  ;;  %10380 = vmatpush3.bf16.msra.mxu1 %v14475_v48  ;;  %v3068_v14 = vmax.f32 %v2988_v30, 0.0  ;;  %v14528_v30 = vld [vmem:[#allocation99_spill] sm:$0xff] }
 0x5df   :  { %10358 = vmatprep.subr.bf16.mxu0 %v14523_v2  ;;  %10382 = vmatprep.subr.bf16.mxu1 %v14476_v22 }
 0x5e0   :  { %3345 = vmatprep.mubr.f32.mxu1 %v3068_v14  ;;  %v14529_v14 = vld [vmem:[#allocation94_spill] sm:$0xff] }
 0x5e2   :  { %10360 = vmatpush3.bf16.msra.mxu0 %v14524_v55  ;;  %10384 = vmatpush3.bf16.msra.mxu1 %v14477_v45 }
 0x5e3   :  { %10362 = vmatprep.subr.bf16.mxu0 %v14525_v56  ;;  %10386 = vmatprep.subr.bf16.mxu1 %v14478_v63 }
 0x5e6   :  { %10364 = vmatpush3.bf16.msra.mxu0 %v14415_v44  ;;  %10388 = vmatpush3.bf16.msra.mxu1 %v14479_v8 }
 0x5e7   :  { %10366 = vmatprep.subr.bf16.mxu0 %v14417_v36  ;;  %10390 = vmatprep.subr.bf16.mxu1 %v14418_v24 }
 0x5ea   :  { %10368 = vmatpush3.bf16.msra.mxu0 %v12399_v21  ;;  %10392 = vmatpush3.bf16.msra.mxu1 %v14480_v17 }
 0x5eb   :  { %10370 = vmatprep.subr.bf16.mxu0 %v12410_v37  ;;  %10394 = vmatprep.subr.bf16.mxu1 %v14481_v25 }
 0x5ee   :  { %10372 = vmatpush3.bf16.msra.mxu0 %v12443_v60  ;;  %10396 = vmatpush3.bf16.msra.mxu1 %v14421_v31  ;;  %v14531_v60 = vld [vmem:[#allocation97_spill] sm:$0xff] }
 0x5ef   :  { %10398 = vmatprep.subr.bf16.mxu1 %v14422_v39  ;;  %10406 = vmatprep.subr.bf16.mxu0 %v12449_v43  ;;  %v14532_v31 = vld [vmem:[#allocation101_spill] sm:$0xff]  ;;  %v14533_v39 = vld [vmem:[#allocation102_spill] sm:$0xff] }
 0x5f1   :  { %3276 = vmatmul.mubr.f32.vlgmr.msra.gmra.mrb[44].mxu0 %v3065_v47  ;;  %v14536_v47 = vld [vmem:[#allocation104_spill] sm:$0xff] }
 0x5f2   :  { %10400 = vmatpush3.bf16.msra.mxu1 %v14527_v53  ;;  %10408 = vmatpush3.bf16.msra.mxu0 %v14528_v30  ;;  %v14545_v30 = vld [vmem:[#allocation113_spill] sm:$0xff] }
 0x5f3   :  { %10402 = vmatprep.subr.bf16.mxu1 %v14529_v14  ;;  %10410 = vmatprep.subr.bf16.mxu0 %v14530_v28  ;;  %v14537_v14 = vld [vmem:[#allocation105_spill] sm:$0xff] }
 0x5f4   :  { %3415 = vmatprep.mubr.f32.mxu0 %v3070_v41  ;;  %v14538_v41 = vld [vmem:[#allocation106_spill] sm:$0xff]  ;;  %v14547_v53 = vld [vmem:[#allocation13_spill] sm:$0xff] }
 0x5f6   :  { %10404 = vmatpush3.bf16.msra.mxu1 %v14531_v60  ;;  %10412 = vmatpush3.bf16.msra.mxu0 %v14532_v31  ;;  %v14540_v60 = vld [vmem:[#allocation108_spill] sm:$0xff]  ;;  %v14541_v31 = vld [vmem:[#allocation109_spill] sm:$0xff] }
 0x5f7   :  { %10414 = vmatprep.subr.bf16.mxu0 %v14533_v39  ;;  %10437 = vmatprep.subr.bf16.mxu1 %v14534_v61  ;;  %v14542_v39 = vld [vmem:[#allocation110_spill] sm:$0xff] }
 0x5f9   :  { %3346 = vmatmul.mubr.f32.vlgmr.msra.gmra.mrb[36].mxu1 %v3067_v26  ;;  %v14543_v26 = vld [vmem:[#allocation112_spill] sm:$0xff] }
 0x5fa   :  { %10416 = vmatpush3.bf16.msra.mxu0 %v14535_v19  ;;  %9492 = vmatprep.mubr.msk.f32.mxu1 %vm11547_vm1, %v14364_v58  ;;  %v14544_v19 = vld [vmem:[#allocation111_spill] sm:$0xff] }
 0x5fb   :  { %10418 = vmatprep.subr.bf16.mxu0 %v14536_v47  ;;  %v3057_v28 = vadd.f32 %v13032_v0, %v14544_v19  ;;  %v14546_v47 = vld [vmem:[#allocation114_spill] sm:$0xff]  ;;  %v7671_v0 = vld [vmem:[%s13996_s5 + $0xc0] sm:$0xff] }
 0x5fc   :  { %v14566_v19 = vld [vmem:[#allocation48_spill] sm:$0xff] }
 0x5fe   :  { %10420 = vmatpush3.bf16.msra.mxu0 %v14537_v14  ;;  %v3069_v14 = vmax.f32 %v3057_v28, 0.0  ;;  %v7672_v28 = vld [vmem:[%s13996_s5 + $0xc8] sm:$0xff] }
 0x5ff   :  { %10422 = vmatprep.subr.bf16.mxu0 %v14538_v41 }
 0x602   :  { %10424 = vmatpush3.bf16.msra.mxu0 %v14539_v27  ;;  %v14548_v27 = vld [vmem:[#allocation15_spill] sm:$0xff] }
 0x603   :  { %10426 = vmatprep.subr.bf16.mxu0 %v14540_v60  ;;  %v14567_v60 = vld [vmem:[#allocation50_spill] sm:$0xff] }
 0x606   :  { %10428 = vmatpush3.bf16.msra.mxu0 %v14541_v31  ;;  %v14549_v31 = vld [vmem:[#allocation17_spill] sm:$0xff] }
 0x607   :  { %10430 = vmatprep.subr.bf16.mxu0 %v14542_v39  ;;  %v14550_v39 = vld [vmem:[#allocation19_spill] sm:$0xff] }
 0x60a   :  { %10432 = vmatpush3.bf16.msra.mxu0 %v14543_v26  ;;  %v14551_v26 = vld [vmem:[#allocation21_spill] sm:$0xff] }
 0x60b   :  { %10434 = vmatprep.subr.bf16.mxu0 %v14545_v30  ;;  %v14562_v30 = vld [vmem:[#allocation40_spill] sm:$0xff] }
 0x60e   :  { %10436 = vmatpush3.bf16.msra.mxu0 %v14546_v47 }
 0x60f   :  { %10466 = vmatprep.subr.bf16.mxu0 %v14547_v53  ;;  %v7676_v53 = vld [vmem:[%s13996_s5 + $0xe8] sm:$0xff] }
 0x611   :  { %3416 = vmatmul.mubr.f32.vlgmr.msra.gmra.mrb[46].mxu0 %v3069_v14  ;;  %v7673_v14 = vld [vmem:[%s13996_s5 + $0xd0] sm:$0xff] }
 0x612   :  { %10468 = vmatpush1.bf16.msra.mxu0 %v14548_v27  ;;  %3715 = vmatprep.mubr.f32.mxu0 %v14364_v58  ;;  %v10438_v27 = vpack.c.bf16 %v7672_v28, %v7671_v0  ;;  %v14552_v28 = vld [vmem:[#allocation5_spill] sm:$0xff] }
 0x613   :  { %10470 = vmatprep.subr.bf16.mxu0 %v14549_v31  ;;  %v7674_v31 = vld [vmem:[%s13996_s5 + $0xd8] sm:$0xff] }
 0x614   :  { %10439 = vmatpush3.bf16.msra.mxu1 %v10438_v27  ;;  %v7678_v27 = vld [vmem:[%s13996_s5 + $0xf8] sm:$0xff] }
 0x615   :  { %10440 = vmatprep.subr.bf16.mxu1 %v14534_v61 }
 0x616   :  { %10472 = vmatpush1.bf16.msra.mxu0 %v14550_v39  ;;  %v10441_v39 = vpack.c.bf16 %v7674_v31, %v7673_v14  ;;  %v7677_v31 = vld [vmem:[%s13996_s5 + $0xf0] sm:$0xff]  ;;  %v14556_v14 = vld [vmem:[#allocation28_spill] sm:$0xff] }
 0x617   :  { %10482 = vmatprep.subr.bf16.mxu0 %v14551_v26  ;;  %v7675_v26 = vld [vmem:[%s13996_s5 + $0xe0] sm:$0xff]  ;;  %v10447_v0 = vpack.c.bf16 %v7678_v27, %v7677_v31  ;;  %v14557_v31 = vld [vmem:[#allocation31_spill] sm:$0xff] }
 0x618   :  { %10442 = vmatpush3.bf16.msra.mxu1 %v10441_v39  ;;  %v10444_v47 = vpack.c.bf16 %v7676_v53, %v7675_v26  ;;  %v13134_v39 = vld [vmem:[%s13991_s0 + $0x8] sm:$0x3]  ;;  %v14553_v53 = vld [vmem:[#allocation23_spill] sm:$0xff]  ;;  %v14558_v27 = vld [vmem:[#allocation32_spill] sm:$0xff] }
 0x619   :  { %10443 = vmatprep.subr.bf16.mxu1 %v14534_v61  ;;  %7683 = vmatmul.mubr.msk.f32.vlgmr.msra.gmra.mrb[48].mxu0 %vm289_vm0, %v13134_v39  ;;  %v14555_v26 = vld [vmem:[#allocation27_spill] sm:$0xff] }
 0x61a   :  { %10484 = vmatpush1.bf16.msra.mxu0 %v14553_v53  ;;  %3857 = vmatprep.mubr.f32.mxu0 %v14364_v58  ;;  %v14561_v53 = vld [vmem:[#allocation39_spill] sm:$0xff] }
 0x61c   :  { %10445 = vmatpush3.bf16.msra.mxu1 %v10444_v47  ;;  %v14554_v47 = vld [vmem:[#allocation24_spill] sm:$0xff] }
 0x61d   :  { %10446 = vmatprep.subr.bf16.mxu1 %v14534_v61  ;;  %10486 = vmatprep.subr.bf16.mxu0 %v14554_v47  ;;  %v14563_v47 = vld [vmem:[#allocation43_spill] sm:$0xff] }
 0x61e   :  { %10488 = vmatpush1.bf16.msra.mxu0 %v14555_v26  ;;  %v14564_v26 = vld [vmem:[#allocation44_spill] sm:$0xff] }
 0x61f   :  { %10522 = vmatprep.subr.bf16.mxu0 %v14556_v14  ;;  %v14565_v14 = vld [vmem:[#allocation47_spill] sm:$0xff] }
 0x620   :  { %10448 = vmatpush3.bf16.msra.mxu1 %v10447_v0  ;;  %v14559_v0 = vld [vmem:[#allocation35_spill] sm:$0xff] }
 0x621   :  { %10450 = vmatprep.subr.bf16.mxu1 %v14552_v28  ;;  %7685 = vmatmul.mubr.msk.f32.vlgmr.msra.gmra.mrb[50].mxu0 %vm289_vm0, %v13134_v39  ;;  %v14560_v28 = vld [vmem:[#allocation36_spill] sm:$0xff] }
 0x622   :  { %10524 = vmatpush3.bf16.msra.mxu0 %v14557_v31  ;;  %v14568_v31 = vld [vmem:[#allocation51_spill] sm:$0xff] }
 0x623   :  { %10526 = vmatprep.subr.bf16.mxu0 %v14558_v27  ;;  %v14569_v27 = vld [vmem:[#allocation52_spill] sm:$0xff] }
 0x626   :  { %10528 = vmatpush3.bf16.msra.mxu0 %v14559_v0 }
 0x627   :  { %10530 = vmatprep.subr.bf16.mxu0 %v14560_v28  ;;  %v14570_v28 = vld [vmem:[#allocation56_spill] sm:$0xff] }
 0x62a   :  { %10532 = vmatpush3.bf16.msra.mxu0 %v14561_v53  ;;  %v14571_v53 = vld [vmem:[#allocation58_spill] sm:$0xff] }
 0x62b   :  { %10534 = vmatprep.subr.bf16.mxu0 %v14562_v30 }
 0x62e   :  { %10536 = vmatpush3.bf16.msra.mxu0 %v14563_v47 }
 0x62f   :  { %10538 = vmatprep.subr.bf16.mxu0 %v14564_v26 }
 0x632   :  { %10540 = vmatpush3.bf16.msra.mxu0 %v14565_v14 }
 0x633   :  { %10542 = vmatprep.subr.bf16.mxu0 %v14566_v19  ;;  %v13164_v19 = vld [vmem:[%s13995_s4] ss:$0 sm:$0xff] }
 0x636   :  { %10544 = vmatpush3.bf16.msra.mxu0 %v14567_v60 }
 0x637   :  { %10546 = vmatprep.subr.bf16.mxu0 %v14568_v31 }
 0x63a   :  { %10548 = vmatpush3.bf16.msra.mxu0 %v14569_v27 }
 0x63b   :  { %10550 = vmatprep.subr.bf16.mxu0 %v14501_v9 }
 0x63e   :  { %10552 = vmatpush3.bf16.msra.mxu0 %v14570_v28 }
 0x63f   :  { %10586 = vmatprep.subr.bf16.mxu0 %v14571_v53 }
 0x6a4   :  { %v8342_v30 = vpop.f32.mrb[42].mxu0 }
 0x6a5   :  { %v8343_v47 = vpop.f32.mrb[43].mxu0 }
 0x6a6   :  { %v8344_v0 = vadd.f32 %v8343_v47, %v8342_v30 }
 0x6a8   :  { %v3138_v31 = vadd.f32 %v13164_v19, %v8344_v0 }
 0x6ac   :  { %v8377_v26 = vpop.f32.mrb[34].mxu1 }
 0x6ad   :  { %v8378_v41 = vpop.f32.mrb[35].mxu1 }
 0x6ae   :  { %v8379_v60 = vadd.f32 %v8378_v41, %v8377_v26  ;;  %v14580_v41 = vld [vmem:[#allocation42_spill] sm:$0xff]  ;;  %v14584_v26 = vld [vmem:[#allocation53_spill] sm:$0xff] }
 0x6b0   :  { %v3208_v27 = vadd.f32 %v8379_v60, %v3138_v31  ;;  %v14574_v60 = vld [vmem:[#allocation30_spill] sm:$0xff]  ;;  %v14586_v31 = vld [vmem:[#allocation57_spill] sm:$0xff] }
 0x6c4   :  { %v8412_v14 = vpop.f32.mrb[44].mxu0 }
 0x6c5   :  { %v8413_v9 = vpop.f32.mrb[45].mxu0 }
 0x6c6   :  { %v8414_v61 = vadd.f32 %v8413_v9, %v8412_v14  ;;  %v14577_v9 = vld [vmem:[#allocation37_spill] sm:$0xff]  ;;  %v14585_v14 = vld [vmem:[#allocation55_spill] sm:$0xff] }
 0x6c8   :  { %v3278_v28 = vadd.f32 %v8414_v61, %v3208_v27  ;;  %v14579_v61 = vld [vmem:[#allocation41_spill] sm:$0xff] }
 0x6cc   :  { %v8447_v51 = vpop.f32.mrb[36].mxu1 }
 0x6cd   :  { %v8448_v53 = vpop.f32.mrb[37].mxu1 }
 0x6ce   :  { %v8449_v43 = vadd.f32 %v8448_v53, %v8447_v51  ;;  %v14578_v51 = vld [vmem:[#allocation38_spill] sm:$0xff]  ;;  %v14583_v53 = vld [vmem:[#allocation49_spill] sm:$0xff] }
 0x6d0   :  { %v3348_v16 = vadd.f32 %v8449_v43, %v3278_v28  ;;  %v14573_v43 = vld [vmem:[#allocation29_spill] sm:$0xff] }
 0x6d1   :  { %v14581_v28 = vld [vmem:[#allocation45_spill] sm:$0xff] }
 0x6e4   :  { %v8482_v30 = vpop.f32.mrb[46].mxu0 }
 0x6e5   :  { %v8483_v47 = vpop.f32.mrb[47].mxu0 }
 0x6e6   :  { %v8484_v25 = vadd.f32 %v8483_v47, %v8482_v30 }
 0x6e8   :  { %v3418_v37 = vadd.f32 %v8484_v25, %v3348_v16  ;;  %v14575_v16 = vld [vmem:[#allocation33_spill] sm:$0xff]  ;;  %v14576_v25 = vld [vmem:[#allocation34_spill] sm:$0xff] }
 0x6ea   :  { %9493 = vmatmul.mubr.msk.f32.vlgmr.msra.gmra.mrb[38].mxu1 %vm1751_vm2, %v3418_v37  ;;  %v14572_v37 = vld [vmem:[#allocation26_spill] sm:$0xff] }
 0x6eb   :  { %10452 = vmatpush1.bf16.msra.mxu1 %v14504_v50  ;;  %3573 = vmatprep.mubr.f32.mxu1 %v14364_v58 }
 0x6ec   :  { %10454 = vmatprep.subr.bf16.mxu1 %v14505_v42  ;;  %v3717_v27 = vpop.f32.mrb[48].mxu0 }
 0x6ed   :  { %v3719_v0 = vpop.f32.mrb[49].mxu0 }
 0x6ef   :  { %10456 = vmatpush1.bf16.msra.mxu1 %v14506_v5 }
 0x6f0   :  { %10458 = vmatprep.subr.bf16.mxu1 %v14439_v6 }
 0x6f2   :  { %7681 = vmatmul.mubr.msk.f32.vlgmr.msra.gmra.mrb[40].mxu1 %vm289_vm0, %v13134_v39 }
 0x6f3   :  { %10460 = vmatpush1.bf16.msra.mxu1 %v14440_v57  ;;  %3644 = vmatprep.mubr.f32.mxu1 %v14364_v58 }
 0x6f4   :  { %10462 = vmatprep.subr.bf16.mxu1 %v14441_v29  ;;  %v13205_v30 = vpop.f32.mrb[50].mxu0 }
 0x6f5   :  { %v3861_v47 = vpop.f32.mrb[51].mxu0 }
 0x6f7   :  { %10464 = vmatpush1.bf16.msra.mxu1 %v14442_v33 }
 0x6f8   :  { %10474 = vmatprep.subr.bf16.mxu1 %v14443_v12 }
 0x6fa   :  { %7682 = vmatmul.mubr.msk.f32.vlgmr.msra.gmra.mrb[42].mxu1 %vm289_vm0, %v13134_v39 }
 0x6fb   :  { %10476 = vmatpush1.bf16.msra.mxu1 %v14444_v4  ;;  %3786 = vmatprep.mubr.f32.mxu1 %v14364_v58 }
 0x6fc   :  { %10478 = vmatprep.subr.bf16.mxu1 %v14445_v3 }
 0x6ff   :  { %10480 = vmatpush1.bf16.msra.mxu1 %v14507_v62 }
 0x700   :  { %10490 = vmatprep.subr.bf16.mxu1 %v14508_v1 }
 0x702   :  { %7684 = vmatmul.mubr.msk.f32.vlgmr.msra.gmra.mrb[44].mxu1 %vm289_vm0, %v13134_v39  ;;  %v14582_v39 = vld [vmem:[#allocation46_spill] sm:$0xff] }
 0x703   :  { %10492 = vmatpush3.bf16.msra.mxu1 %v14509_v15 }
 0x704   :  { %10494 = vmatprep.subr.bf16.mxu1 %v14572_v37 }
 0x707   :  { %10496 = vmatpush3.bf16.msra.mxu1 %v14573_v43 }
 0x708   :  { %10498 = vmatprep.subr.bf16.mxu1 %v14574_v60 }
 0x70b   :  { %10500 = vmatpush3.bf16.msra.mxu1 %v14575_v16 }
 0x70c   :  { %10502 = vmatprep.subr.bf16.mxu1 %v14576_v25 }
 0x70f   :  { %10504 = vmatpush3.bf16.msra.mxu1 %v14577_v9 }
 0x710   :  { %10506 = vmatprep.subr.bf16.mxu1 %v14578_v51 }
 0x713   :  { %10508 = vmatpush3.bf16.msra.mxu1 %v14579_v61 }
 0x714   :  { %10510 = vmatprep.subr.bf16.mxu1 %v14580_v41 }
 0x717   :  { %10512 = vmatpush3.bf16.msra.mxu1 %v14581_v28 }
 0x718   :  { %10514 = vmatprep.subr.bf16.mxu1 %v14582_v39  ;;  %v3720_v39 = vadd.f32 %v3719_v0, %v14470_v23 }
 0x71b   :  { %10516 = vmatpush3.bf16.msra.mxu1 %v14583_v53 }
 0x71c   :  { %10518 = vmatprep.subr.bf16.mxu1 %v14584_v26 }
 0x71f   :  { %10520 = vmatpush3.bf16.msra.mxu1 %v14585_v14 }
 0x720   :  { %10554 = vmatprep.subr.bf16.mxu1 %v14586_v31  ;;  %v3869_v31 = vmax.f32 %v3720_v39, 0.0 }
 0x7bd   :  { %v3499_v61 = vpop.f32.mrb[38].mxu1 }
 0x7be   :  { %v13208_v41 = vadd.f32 %v3499_v61, %v13035_v49  ;;  %v9494_v28 = vpop.f32.mrb[39].mxu1 }
 0x7c5   :  { %v3575_v51 = vpop.f32.mrb[40].mxu1 }
 0x7c6   :  { %v3576_v53 = vadd.f32 %v3575_v51, %v14520_v34  ;;  %v3577_v26 = vpop.f32.mrb[41].mxu1 }
 0x7c7   :  { %v3578_v14 = vadd.f32 %v3577_v26, %v14521_v13  ;;  %v14587_v26 = vld [vmem:[#allocation93_spill] sm:$0xff] }
 0x7c8   :  { %v3864_v25 = vmax.f32 %v3576_v53, 0.0  ;;  %v3718_v53 = vadd.f32 %v3717_v27, %v12387_v32 }
 0x7c9   :  { %v3865_v9 = vmax.f32 %v3578_v14, 0.0  ;;  %v14588_v14 = vld [vmem:[#allocation84_spill] sm:$0xff] }
 0x7cb   :  { %3938 = vmatprep.mubr.f32.mxu1 %v3865_v9 }
 0x7cc   :  { %3939 = vmatmul.mubr.f32.vlgmr.msra.gmra.mrb[46].mxu1 %v3864_v25 }
 0x7cd   :  { %10556 = vmatpush3.bf16.msra.mxu1 %v14395_v46  ;;  %v3646_v16 = vpop.f32.mrb[42].mxu1  ;;  %4078 = vmatprep.mubr.f32.mxu1 %v3869_v31  ;;  %v14589_v31 = vld [vmem:[#allocation95_spill] sm:$0xff] }
 0x7ce   :  { %v3647_v49 = vadd.f32 %v3646_v16, %v14471_v35  ;;  %v3648_v61 = vpop.f32.mrb[43].mxu1  ;;  %10558 = vmatprep.subr.bf16.mxu1 %v14397_v11 }
 0x7cf   :  { %v3649_v28 = vadd.f32 %v3648_v61, %v14472_v18  ;;  %v3868_v61 = vmax.f32 %v3718_v53, 0.0 }
 0x7d0   :  { %v3866_v51 = vmax.f32 %v3647_v49, 0.0  ;;  %v3862_v49 = vadd.f32 %v3861_v47, %v14589_v31  ;;  %v14598_v47 = vld [vmem:[#allocation100_spill] sm:$0xff] }
 0x7d1   :  { %v3867_v0 = vmax.f32 %v3649_v28, 0.0  ;;  %10560 = vmatpush3.bf16.msra.mxu1 %v14399_v10  ;;  %v14590_v28 = vld [vmem:[#allocation96_spill] sm:$0xff] }
 0x7d2   :  { %10562 = vmatprep.subr.bf16.mxu1 %v14464_v38  ;;  %v3873_v27 = vmax.f32 %v3862_v49, 0.0  ;;  %v14602_v49 = vmov 0.0|0.0  }
 0x7d3   :  { %4008 = vmatprep.mubr.f32.mxu0 %v3867_v0  ;;  %v14592_v0 = vld [vmem:[#allocation88_spill] sm:$0xff] }
 0x7d4   :  { %4009 = vmatmul.mubr.f32.vlgmr.msra.gmra.mrb[52].mxu0 %v3866_v51  ;;  %v14591_v51 = vld [vmem:[#allocation86_spill] sm:$0xff] }
 0x7d5   :  { %10564 = vmatpush3.bf16.msra.mxu1 %v14465_v20  ;;  %10588 = vmatpush3.bf16.msra.mxu0 %v14473_v54  ;;  %v3788_v25 = vpop.f32.mrb[44].mxu1 }
 0x7d6   :  { %10566 = vmatprep.subr.bf16.mxu1 %v14466_v40  ;;  %10590 = vmatprep.subr.bf16.mxu0 %v14474_v52  ;;  %v3790_v16 = vpop.f32.mrb[45].mxu1 }
 0x7d7   :  { %v3791_v9 = vadd.f32 %v3790_v16, %v14414_v59  ;;  %v14593_v16 = vld [vmem:[#allocation98_spill] sm:$0xff] }
 0x7d9   :  { %10568 = vmatpush3.bf16.msra.mxu1 %v14522_v7  ;;  %10592 = vmatpush3.bf16.msra.mxu0 %v14475_v48  ;;  %v3871_v39 = vmax.f32 %v3791_v9, 0.0  ;;  %v14594_v9 = vld [vmem:[#allocation90_spill] sm:$0xff] }
 0x7da   :  { %10570 = vmatprep.subr.bf16.mxu1 %v14523_v2  ;;  %10594 = vmatprep.subr.bf16.mxu0 %v14476_v22 }
 0x7db   :  { %4148 = vmatprep.mubr.f32.mxu0 %v3871_v39  ;;  %v3789_v39 = vadd.f32 %v3788_v25, %v14594_v9  ;;  %v14603_v25 = vld [vmem:[#allocation103_spill] sm:$0xff] }
 0x7dd   :  { %10572 = vmatpush3.bf16.msra.mxu1 %v14524_v55  ;;  %10596 = vmatpush3.bf16.msra.mxu0 %v14477_v45  ;;  %v3870_v53 = vmax.f32 %v3789_v39, 0.0  ;;  %v14607_v39 = vld [vmem:[#allocation107_spill] sm:$0xff] }
 0x7de   :  { %10574 = vmatprep.subr.bf16.mxu1 %v14525_v56  ;;  %10598 = vmatprep.subr.bf16.mxu0 %v14478_v63 }
 0x7e1   :  { %10576 = vmatpush3.bf16.msra.mxu1 %v14415_v44  ;;  %10600 = vmatpush3.bf16.msra.mxu0 %v14479_v8 }
 0x7e2   :  { %10578 = vmatprep.subr.bf16.mxu1 %v14417_v36  ;;  %10602 = vmatprep.subr.bf16.mxu0 %v14418_v24 }
 0x7e5   :  { %10580 = vmatpush3.bf16.msra.mxu1 %v12399_v21  ;;  %10604 = vmatpush3.bf16.msra.mxu0 %v14480_v17  ;;  %v14595_v17 = vld [vmem:[#allocation92_spill] sm:$0xff] }
 0x7e6   :  { %10582 = vmatprep.subr.bf16.mxu1 %v14587_v26  ;;  %10606 = vmatprep.subr.bf16.mxu0 %v14588_v14  ;;  %v14596_v26 = vld [vmem:[#allocation99_spill] sm:$0xff]  ;;  %v14597_v14 = vld [vmem:[#allocation94_spill] sm:$0xff] }
 0x7e9   :  { %10584 = vmatpush3.bf16.msra.mxu1 %v14590_v28  ;;  %10608 = vmatpush3.bf16.msra.mxu0 %v14591_v51  ;;  %v14599_v28 = vld [vmem:[#allocation97_spill] sm:$0xff] }
 0x7ea   :  { %10610 = vmatprep.subr.bf16.mxu0 %v14592_v0  ;;  %10618 = vmatprep.subr.bf16.mxu1 %v14593_v16  ;;  %v14600_v51 = vld [vmem:[#allocation101_spill] sm:$0xff]  ;;  %v14601_v0 = vld [vmem:[#allocation102_spill] sm:$0xff] }
 0x7ec   :  { %4079 = vmatmul.mubr.f32.vlgmr.msra.gmra.mrb[48].mxu1 %v3868_v61  ;;  %v14604_v61 = vld [vmem:[#allocation104_spill] sm:$0xff] }
 0x7ed   :  { %10612 = vmatpush3.bf16.msra.mxu0 %v14595_v17  ;;  %10620 = vmatpush3.bf16.msra.mxu1 %v14596_v26  ;;  %v14613_v26 = vld [vmem:[#allocation113_spill] sm:$0xff] }
 0x7ee   :  { %10614 = vmatprep.subr.bf16.mxu0 %v14597_v14  ;;  %10622 = vmatprep.subr.bf16.mxu1 %v14598_v47  ;;  %v14605_v14 = vld [vmem:[#allocation105_spill] sm:$0xff] }
 0x7ef   :  { %4218 = vmatprep.mubr.f32.mxu1 %v3873_v27  ;;  %v14606_v27 = vld [vmem:[#allocation106_spill] sm:$0xff]  ;;  %v14615_v17 = vld [vmem:[#allocation13_spill] sm:$0xff] }
 0x7f1   :  { %10616 = vmatpush3.bf16.msra.mxu0 %v14599_v28  ;;  %10624 = vmatpush3.bf16.msra.mxu1 %v14600_v51  ;;  %v14608_v28 = vld [vmem:[#allocation108_spill] sm:$0xff]  ;;  %v14609_v51 = vld [vmem:[#allocation109_spill] sm:$0xff] }
 0x7f2   :  { %10626 = vmatprep.subr.bf16.mxu1 %v14601_v0  ;;  %10649 = vmatprep.subr.bf16.mxu0 %v14602_v49  ;;  %v14610_v0 = vld [vmem:[#allocation110_spill] sm:$0xff] }
 0x7f4   :  { %4149 = vmatmul.mubr.f32.vlgmr.msra.gmra.mrb[54].mxu0 %v3870_v53  ;;  %v14611_v53 = vld [vmem:[#allocation112_spill] sm:$0xff] }
 0x7f5   :  { %10628 = vmatpush3.bf16.msra.mxu1 %v14603_v25  ;;  %9511 = vmatprep.mubr.msk.f32.mxu0 %vm11547_vm1, %v14364_v58  ;;  %v14612_v25 = vld [vmem:[#allocation111_spill] sm:$0xff] }
 0x7f6   :  { %10630 = vmatprep.subr.bf16.mxu1 %v14604_v61  ;;  %v3860_v47 = vadd.f32 %v13205_v30, %v14612_v25  ;;  %v14614_v61 = vld [vmem:[#allocation114_spill] sm:$0xff]  ;;  %v7686_v30 = vld [vmem:[%s13996_s5 + $0x100] sm:$0xff]  ;;  %v14631_v25 = vld [vmem:[#allocation43_spill] sm:$0xff] }
 0x7f9   :  { %10632 = vmatpush3.bf16.msra.mxu1 %v14605_v14  ;;  %v3872_v14 = vmax.f32 %v3860_v47, 0.0  ;;  %v7687_v47 = vld [vmem:[%s13996_s5 + $0x108] sm:$0xff] }
 0x7fa   :  { %10634 = vmatprep.subr.bf16.mxu1 %v14606_v27 }
 0x7fd   :  { %10636 = vmatpush3.bf16.msra.mxu1 %v14607_v39  ;;  %v14616_v39 = vld [vmem:[#allocation15_spill] sm:$0xff] }
 0x7fe   :  { %10638 = vmatprep.subr.bf16.mxu1 %v14608_v28  ;;  %v14635_v28 = vld [vmem:[#allocation50_spill] sm:$0xff] }
 0x801   :  { %10640 = vmatpush3.bf16.msra.mxu1 %v14609_v51  ;;  %v14617_v51 = vld [vmem:[#allocation17_spill] sm:$0xff] }
 0x802   :  { %10642 = vmatprep.subr.bf16.mxu1 %v14610_v0  ;;  %v14618_v0 = vld [vmem:[#allocation19_spill] sm:$0xff] }
 0x805   :  { %10644 = vmatpush3.bf16.msra.mxu1 %v14611_v53  ;;  %v14619_v53 = vld [vmem:[#allocation21_spill] sm:$0xff] }
 0x806   :  { %10646 = vmatprep.subr.bf16.mxu1 %v14613_v26  ;;  %v14629_v26 = vld [vmem:[#allocation39_spill] sm:$0xff] }
 0x809   :  { %10648 = vmatpush3.bf16.msra.mxu1 %v14614_v61 }
 0x80a   :  { %10678 = vmatprep.subr.bf16.mxu1 %v14615_v17  ;;  %v7691_v17 = vld [vmem:[%s13996_s5 + $0x128] sm:$0xff] }
 0x80c   :  { %4219 = vmatmul.mubr.f32.vlgmr.msra.gmra.mrb[50].mxu1 %v3872_v14  ;;  %v7688_v14 = vld [vmem:[%s13996_s5 + $0x110] sm:$0xff] }
 0x80d   :  { %10680 = vmatpush1.bf16.msra.mxu1 %v14616_v39  ;;  %4518 = vmatprep.mubr.f32.mxu1 %v14364_v58  ;;  %v10650_v39 = vpack.c.bf16 %v7687_v47, %v7686_v30  ;;  %v14620_v47 = vld [vmem:[#allocation5_spill] sm:$0xff] }
 0x80e   :  { %10682 = vmatprep.subr.bf16.mxu1 %v14617_v51  ;;  %v7689_v51 = vld [vmem:[%s13996_s5 + $0x118] sm:$0xff] }
 0x80f   :  { %10651 = vmatpush3.bf16.msra.mxu0 %v10650_v39  ;;  %v7693_v39 = vld [vmem:[%s13996_s5 + $0x138] sm:$0xff] }
 0x810   :  { %10652 = vmatprep.subr.bf16.mxu0 %v14602_v49 }
 0x811   :  { %10684 = vmatpush1.bf16.msra.mxu1 %v14618_v0  ;;  %v10653_v0 = vpack.c.bf16 %v7689_v51, %v7688_v14  ;;  %v7692_v51 = vld [vmem:[%s13996_s5 + $0x130] sm:$0xff]  ;;  %v14624_v14 = vld [vmem:[#allocation28_spill] sm:$0xff] }
 0x812   :  { %10694 = vmatprep.subr.bf16.mxu1 %v14619_v53  ;;  %v7690_v53 = vld [vmem:[%s13996_s5 + $0x120] sm:$0xff]  ;;  %v10659_v30 = vpack.c.bf16 %v7693_v39, %v7692_v51  ;;  %v14625_v51 = vld [vmem:[#allocation31_spill] sm:$0xff] }
 0x813   :  { %10654 = vmatpush3.bf16.msra.mxu0 %v10653_v0  ;;  %v10656_v61 = vpack.c.bf16 %v7691_v17, %v7690_v53  ;;  %v7695_v17 = vld [vmem:[%s13991_s0 + $0xa] sm:$0x3]  ;;  %v14621_v0 = vld [vmem:[#allocation23_spill] sm:$0xff]  ;;  %v14626_v39 = vld [vmem:[#allocation32_spill] sm:$0xff] }
 0x814   :  { %10655 = vmatprep.subr.bf16.mxu0 %v14602_v49  ;;  %7698 = vmatmul.mubr.msk.f32.vlgmr.msra.gmra.mrb[52].mxu1 %vm289_vm0, %v7695_v17  ;;  %v14623_v53 = vld [vmem:[#allocation27_spill] sm:$0xff] }
 0x815   :  { %10696 = vmatpush1.bf16.msra.mxu1 %v14621_v0  ;;  %4660 = vmatprep.mubr.f32.mxu1 %v14364_v58  ;;  %v14630_v0 = vld [vmem:[#allocation40_spill] sm:$0xff] }
 0x817   :  { %10657 = vmatpush3.bf16.msra.mxu0 %v10656_v61  ;;  %v14622_v61 = vld [vmem:[#allocation24_spill] sm:$0xff] }
 0x818   :  { %10658 = vmatprep.subr.bf16.mxu0 %v14602_v49  ;;  %10698 = vmatprep.subr.bf16.mxu1 %v14622_v61  ;;  %v14632_v61 = vld [vmem:[#allocation44_spill] sm:$0xff] }
 0x819   :  { %10700 = vmatpush1.bf16.msra.mxu1 %v14623_v53  ;;  %v14633_v53 = vld [vmem:[#allocation47_spill] sm:$0xff] }
 0x81a   :  { %10734 = vmatprep.subr.bf16.mxu1 %v14624_v14  ;;  %v14634_v14 = vld [vmem:[#allocation48_spill] sm:$0xff] }
 0x81b   :  { %10660 = vmatpush3.bf16.msra.mxu0 %v10659_v30  ;;  %v14627_v30 = vld [vmem:[#allocation35_spill] sm:$0xff] }
 0x81c   :  { %10662 = vmatprep.subr.bf16.mxu0 %v14620_v47  ;;  %7700 = vmatmul.mubr.msk.f32.vlgmr.msra.gmra.mrb[54].mxu1 %vm289_vm0, %v7695_v17  ;;  %v14628_v47 = vld [vmem:[#allocation36_spill] sm:$0xff] }
 0x81d   :  { %10736 = vmatpush3.bf16.msra.mxu1 %v14625_v51  ;;  %v14636_v51 = vld [vmem:[#allocation51_spill] sm:$0xff] }
 0x81e   :  { %10738 = vmatprep.subr.bf16.mxu1 %v14626_v39  ;;  %v14637_v39 = vld [vmem:[#allocation52_spill] sm:$0xff] }
 0x821   :  { %10740 = vmatpush3.bf16.msra.mxu1 %v14627_v30  ;;  %v14638_v30 = vld [vmem:[#allocation54_spill] sm:$0xff] }
 0x822   :  { %10742 = vmatprep.subr.bf16.mxu1 %v14628_v47  ;;  %v14639_v47 = vld [vmem:[#allocation56_spill] sm:$0xff] }
 0x825   :  { %10744 = vmatpush3.bf16.msra.mxu1 %v14629_v26  ;;  %v14640_v26 = vld [vmem:[#allocation58_spill] sm:$0xff] }
 0x826   :  { %10746 = vmatprep.subr.bf16.mxu1 %v14630_v0 }
 0x829   :  { %10748 = vmatpush3.bf16.msra.mxu1 %v14631_v25 }
 0x82a   :  { %10750 = vmatprep.subr.bf16.mxu1 %v14632_v61 }
 0x82d   :  { %10752 = vmatpush3.bf16.msra.mxu1 %v14633_v53 }
 0x82e   :  { %10754 = vmatprep.subr.bf16.mxu1 %v14634_v14 }
 0x831   :  { %10756 = vmatpush3.bf16.msra.mxu1 %v14635_v28 }
 0x832   :  { %10758 = vmatprep.subr.bf16.mxu1 %v14636_v51 }
 0x835   :  { %10760 = vmatpush3.bf16.msra.mxu1 %v14637_v39 }
 0x836   :  { %10762 = vmatprep.subr.bf16.mxu1 %v14638_v30 }
 0x839   :  { %10764 = vmatpush3.bf16.msra.mxu1 %v14639_v47 }
 0x83a   :  { %10798 = vmatprep.subr.bf16.mxu1 %v14640_v26 }
 0x89f   :  { %v8526_v0 = vpop.f32.mrb[46].mxu1 }
 0x8a0   :  { %v8527_v25 = vpop.f32.mrb[47].mxu1 }
 0x8a1   :  { %v8528_v27 = vadd.f32 %v8527_v25, %v8526_v0  ;;  %v14651_v25 = vld [vmem:[#allocation55_spill] sm:$0xff] }
 0x8a3   :  { %v3941_v53 = vadd.f32 %v13164_v19, %v8528_v27  ;;  %v14652_v27 = vld [vmem:[#allocation57_spill] sm:$0xff] }
 0x8a7   :  { %v8561_v61 = vpop.f32.mrb[52].mxu0 }
 0x8a8   :  { %v8562_v49 = vpop.f32.mrb[53].mxu0 }
 0x8a9   :  { %v8563_v14 = vadd.f32 %v8562_v49, %v8561_v61  ;;  %v14650_v49 = vld [vmem:[#allocation53_spill] sm:$0xff] }
 0x8ab   :  { %v4011_v9 = vadd.f32 %v8563_v14, %v3941_v53 }
 0x8bf   :  { %v8596_v28 = vpop.f32.mrb[48].mxu1 }
 0x8c0   :  { %v8597_v16 = vpop.f32.mrb[49].mxu1 }
 0x8c1   :  { %v8598_v51 = vadd.f32 %v8597_v16, %v8596_v28  ;;  %v14647_v28 = vld [vmem:[#allocation45_spill] sm:$0xff]  ;;  %v14648_v16 = vld [vmem:[#allocation46_spill] sm:$0xff] }
 0x8c3   :  { %v4081_v31 = vadd.f32 %v8598_v51, %v4011_v9  ;;  %v14649_v9 = vld [vmem:[#allocation49_spill] sm:$0xff] }
 0x8c7   :  { %v8631_v39 = vpop.f32.mrb[54].mxu0 }
 0x8c8   :  { %v8632_v21 = vpop.f32.mrb[55].mxu0 }
 0x8c9   :  { %v8633_v30 = vadd.f32 %v8632_v21, %v8631_v39  ;;  %v14641_v21 = vld [vmem:[#allocation33_spill] sm:$0xff] }
 0x8cb   :  { %v4151_v32 = vadd.f32 %v8633_v30, %v4081_v31  ;;  %v14646_v31 = vld [vmem:[#allocation42_spill] sm:$0xff] }
 0x8df   :  { %v8666_v47 = vpop.f32.mrb[50].mxu1 }
 0x8e0   :  { %v8667_v24 = vpop.f32.mrb[51].mxu1 }
 0x8e1   :  { %v8668_v26 = vadd.f32 %v8667_v24, %v8666_v47  ;;  %v14643_v24 = vld [vmem:[#allocation37_spill] sm:$0xff] }
 0x8e3   :  { %v4221_v36 = vadd.f32 %v8668_v26, %v4151_v32  ;;  %v14642_v32 = vld [vmem:[#allocation34_spill] sm:$0xff]  ;;  %v14645_v26 = vld [vmem:[#allocation41_spill] sm:$0xff] }
 0x8e5   :  { %9512 = vmatmul.mubr.msk.f32.vlgmr.msra.gmra.mrb[56].mxu0 %vm1751_vm2, %v4221_v36  ;;  %v14644_v36 = vld [vmem:[#allocation38_spill] sm:$0xff] }
 0x8e6   :  { %10664 = vmatpush1.bf16.msra.mxu0 %v14504_v50  ;;  %4376 = vmatprep.mubr.f32.mxu0 %v14364_v58 }
 0x8e7   :  { %10666 = vmatprep.subr.bf16.mxu0 %v14505_v42  ;;  %v4520_v47 = vpop.f32.mrb[52].mxu1 }
 0x8ea   :  { %10668 = vmatpush1.bf16.msra.mxu0 %v14506_v5 }
 0x8eb   :  { %10670 = vmatprep.subr.bf16.mxu0 %v14439_v6 }
 0x8ed   :  { %7696 = vmatmul.mubr.msk.f32.vlgmr.msra.gmra.mrb[58].mxu0 %vm289_vm0, %v7695_v17 }
 0x8ee   :  { %10672 = vmatpush1.bf16.msra.mxu0 %v14440_v57  ;;  %4447 = vmatprep.mubr.f32.mxu0 %v14364_v58 }
 0x8ef   :  { %10674 = vmatprep.subr.bf16.mxu0 %v14441_v29 }
 0x8f2   :  { %10676 = vmatpush1.bf16.msra.mxu0 %v14442_v33 }
 0x8f3   :  { %10686 = vmatprep.subr.bf16.mxu0 %v14443_v12 }
 0x8f5   :  { %7697 = vmatmul.mubr.msk.f32.vlgmr.msra.gmra.mrb[60].mxu0 %vm289_vm0, %v7695_v17 }
 0x8f6   :  { %10688 = vmatpush1.bf16.msra.mxu0 %v14444_v4  ;;  %4589 = vmatprep.mubr.f32.mxu0 %v14364_v58 }
 0x8f7   :  { %10690 = vmatprep.subr.bf16.mxu0 %v14445_v3 }
 0x8fa   :  { %10692 = vmatpush1.bf16.msra.mxu0 %v14507_v62 }
 0x8fb   :  { %10702 = vmatprep.subr.bf16.mxu0 %v14508_v1 }
 0x8fd   :  { %7699 = vmatmul.mubr.msk.f32.vlgmr.msra.gmra.mrb[62].mxu0 %vm289_vm0, %v7695_v17  ;;  %v4522_v17 = vpop.f32.mrb[53].mxu1 }
 0x8fe   :  { %10704 = vmatpush3.bf16.msra.mxu0 %v14509_v15  ;;  %v13366_v0 = vpop.f32.mrb[54].mxu1  ;;  %v4523_v30 = vadd.f32 %v4522_v17, %v14470_v23 }
 0x8ff   :  { %10706 = vmatprep.subr.bf16.mxu0 %v14572_v37  ;;  %v4664_v61 = vpop.f32.mrb[55].mxu1 }
 0x902   :  { %10708 = vmatpush3.bf16.msra.mxu0 %v14573_v43 }
 0x903   :  { %10710 = vmatprep.subr.bf16.mxu0 %v14574_v60 }
 0x906   :  { %10712 = vmatpush3.bf16.msra.mxu0 %v14641_v21 }
 0x907   :  { %10714 = vmatprep.subr.bf16.mxu0 %v14642_v32 }
 0x90a   :  { %10716 = vmatpush3.bf16.msra.mxu0 %v14643_v24 }
 0x90b   :  { %10718 = vmatprep.subr.bf16.mxu0 %v14644_v36 }
 0x90e   :  { %10720 = vmatpush3.bf16.msra.mxu0 %v14645_v26 }
 0x90f   :  { %10722 = vmatprep.subr.bf16.mxu0 %v14646_v31 }
 0x912   :  { %10724 = vmatpush3.bf16.msra.mxu0 %v14647_v28 }
 0x913   :  { %10726 = vmatprep.subr.bf16.mxu0 %v14648_v16 }
 0x916   :  { %10728 = vmatpush3.bf16.msra.mxu0 %v14649_v9 }
 0x917   :  { %10730 = vmatprep.subr.bf16.mxu0 %v14650_v49 }
 0x91a   :  { %10732 = vmatpush3.bf16.msra.mxu0 %v14651_v25 }
 0x91b   :  { %10766 = vmatprep.subr.bf16.mxu0 %v14652_v27  ;;  %v4672_v27 = vmax.f32 %v4523_v30, 0.0 }
 0x9b8   :  { %v4302_v53 = vpop.f32.mrb[56].mxu0 }
 0x9b9   :  { %v13369_v14 = vadd.f32 %v4302_v53, %v13208_v41  ;;  %v9513_v51 = vpop.f32.mrb[57].mxu0 }
 0x9c0   :  { %v4378_v39 = vpop.f32.mrb[58].mxu0 }
 0x9c1   :  { %v4379_v9 = vadd.f32 %v4378_v39, %v14520_v34  ;;  %v4380_v49 = vpop.f32.mrb[59].mxu0 }
 0x9c2   :  { %v4381_v25 = vadd.f32 %v4380_v49, %v14521_v13  ;;  %v14653_v49 = vld [vmem:[#allocation87_spill] sm:$0xff] }
 0x9c3   :  { %v4667_v28 = vmax.f32 %v4379_v9, 0.0 }
 0x9c4   :  { %v4668_v16 = vmax.f32 %v4381_v25, 0.0  ;;  %v14654_v25 = vld [vmem:[#allocation80_spill] sm:$0xff] }
 0x9c6   :  { %4741 = vmatprep.mubr.f32.mxu0 %v4668_v16 }
 0x9c7   :  { %4742 = vmatmul.mubr.f32.vlgmr.msra.gmra.mrb[64].mxu0 %v4667_v28 }
 0x9c8   :  { %10768 = vmatpush3.bf16.msra.mxu0 %v14395_v46  ;;  %v4449_v31 = vpop.f32.mrb[60].mxu0  ;;  %4881 = vmatprep.mubr.f32.mxu0 %v4672_v27  ;;  %v14655_v27 = vld [vmem:[#allocation89_spill] sm:$0xff] }
 0x9c9   :  { %v4450_v41 = vadd.f32 %v4449_v31, %v14471_v35  ;;  %v4451_v53 = vpop.f32.mrb[61].mxu0  ;;  %10770 = vmatprep.subr.bf16.mxu0 %v14397_v11  ;;  %v4521_v30 = vadd.f32 %v4520_v47, %v14655_v27 }
 0x9ca   :  { %v4452_v17 = vadd.f32 %v4451_v53, %v14472_v18  ;;  %v14657_v53 = vld [vmem:[#allocation82_spill] sm:$0xff] }
 0x9cb   :  { %v4669_v51 = vmax.f32 %v4450_v41, 0.0  ;;  %v14656_v41 = vld [vmem:[#allocation91_spill] sm:$0xff] }
 0x9cc   :  { %v4670_v39 = vmax.f32 %v4452_v17, 0.0  ;;  %10772 = vmatpush3.bf16.msra.mxu0 %v14399_v10  ;;  %v14658_v17 = vld [vmem:[#allocation93_spill] sm:$0xff] }
 0x9cd   :  { %10774 = vmatprep.subr.bf16.mxu0 %v14464_v38 }
 0x9ce   :  { %4811 = vmatprep.mubr.f32.mxu1 %v4670_v39  ;;  %v14660_v39 = vld [vmem:[#allocation95_spill] sm:$0xff] }
 0x9cf   :  { %4812 = vmatmul.mubr.f32.vlgmr.msra.gmra.mrb[56].mxu1 %v4669_v51  ;;  %v14659_v51 = vld [vmem:[#allocation84_spill] sm:$0xff] }
 0x9d0   :  { %10776 = vmatpush3.bf16.msra.mxu0 %v14465_v20  ;;  %10800 = vmatpush3.bf16.msra.mxu1 %v14473_v54  ;;  %v4591_v28 = vpop.f32.mrb[62].mxu0 }
 0x9d1   :  { %10778 = vmatprep.subr.bf16.mxu0 %v14466_v40  ;;  %10802 = vmatprep.subr.bf16.mxu1 %v14474_v52  ;;  %v4593_v31 = vpop.f32.mrb[63].mxu0 }
 0x9d2   :  { %v4594_v16 = vadd.f32 %v4593_v31, %v14414_v59  ;;  %v4665_v31 = vadd.f32 %v4664_v61, %v14660_v39  ;;  %v14669_v61 = vld [vmem:[#allocation100_spill] sm:$0xff] }
 0x9d4   :  { %10780 = vmatpush3.bf16.msra.mxu0 %v14522_v7  ;;  %10804 = vmatpush3.bf16.msra.mxu1 %v14475_v48  ;;  %v4674_v9 = vmax.f32 %v4594_v16, 0.0  ;;  %v4671_v16 = vmax.f32 %v4521_v30, 0.0  ;;  %v4676_v47 = vmax.f32 %v4665_v31, 0.0  ;;  %v14673_v31 = vmov 0.0|0.0  }
 0x9d5   :  { %10782 = vmatprep.subr.bf16.mxu0 %v14523_v2  ;;  %10806 = vmatprep.subr.bf16.mxu1 %v14476_v22 }
 0x9d6   :  { %4951 = vmatprep.mubr.f32.mxu1 %v4674_v9  ;;  %v14661_v9 = vld [vmem:[#allocation96_spill] sm:$0xff] }
 0x9d8   :  { %10784 = vmatpush3.bf16.msra.mxu0 %v14524_v55  ;;  %10808 = vmatpush3.bf16.msra.mxu1 %v14477_v45 }
 0x9d9   :  { %10786 = vmatprep.subr.bf16.mxu0 %v14525_v56  ;;  %10810 = vmatprep.subr.bf16.mxu1 %v14478_v63 }
 0x9dc   :  { %10788 = vmatpush3.bf16.msra.mxu0 %v14415_v44  ;;  %10812 = vmatpush3.bf16.msra.mxu1 %v14479_v8  ;;  %v14662_v8 = vld [vmem:[#allocation86_spill] sm:$0xff] }
 0x9dd   :  { %10790 = vmatprep.subr.bf16.mxu0 %v14653_v49  ;;  %10814 = vmatprep.subr.bf16.mxu1 %v14654_v25  ;;  %v14663_v49 = vld [vmem:[#allocation88_spill] sm:$0xff]  ;;  %v14664_v25 = vld [vmem:[#allocation98_spill] sm:$0xff] }
 0x9e0   :  { %10792 = vmatpush3.bf16.msra.mxu0 %v14656_v41  ;;  %10816 = vmatpush3.bf16.msra.mxu1 %v14657_v53  ;;  %v14665_v41 = vld [vmem:[#allocation90_spill] sm:$0xff]  ;;  %v14666_v53 = vld [vmem:[#allocation92_spill] sm:$0xff] }
 0x9e1   :  { %10794 = vmatprep.subr.bf16.mxu0 %v14658_v17  ;;  %10818 = vmatprep.subr.bf16.mxu1 %v14659_v51  ;;  %v4592_v27 = vadd.f32 %v4591_v28, %v14665_v41  ;;  %v14667_v17 = vld [vmem:[#allocation99_spill] sm:$0xff]  ;;  %v14668_v51 = vld [vmem:[#allocation94_spill] sm:$0xff] }
 0x9e2   :  { %v14674_v28 = vld [vmem:[#allocation103_spill] sm:$0xff] }
 0x9e3   :  { %v4673_v30 = vmax.f32 %v4592_v27, 0.0  ;;  %v14678_v27 = vld [vmem:[#allocation107_spill] sm:$0xff] }
 0x9e4   :  { %10796 = vmatpush3.bf16.msra.mxu0 %v14661_v9  ;;  %10820 = vmatpush3.bf16.msra.mxu1 %v14662_v8  ;;  %v14670_v9 = vld [vmem:[#allocation97_spill] sm:$0xff] }
 0x9e5   :  { %10822 = vmatprep.subr.bf16.mxu1 %v14663_v49  ;;  %10830 = vmatprep.subr.bf16.mxu0 %v14664_v25  ;;  %v14671_v8 = vld [vmem:[#allocation101_spill] sm:$0xff]  ;;  %v14672_v49 = vld [vmem:[#allocation102_spill] sm:$0xff] }
 0x9e7   :  { %4882 = vmatmul.mubr.f32.vlgmr.msra.gmra.mrb[66].mxu0 %v4671_v16  ;;  %v14675_v16 = vld [vmem:[#allocation104_spill] sm:$0xff] }
 0x9e8   :  { %10824 = vmatpush3.bf16.msra.mxu1 %v14666_v53  ;;  %10832 = vmatpush3.bf16.msra.mxu0 %v14667_v17  ;;  %v14684_v17 = vld [vmem:[#allocation113_spill] sm:$0xff] }
 0x9e9   :  { %10826 = vmatprep.subr.bf16.mxu1 %v14668_v51  ;;  %10834 = vmatprep.subr.bf16.mxu0 %v14669_v61  ;;  %v14676_v51 = vld [vmem:[#allocation105_spill] sm:$0xff] }
 0x9ea   :  { %5021 = vmatprep.mubr.f32.mxu0 %v4676_v47  ;;  %v14677_v47 = vld [vmem:[#allocation106_spill] sm:$0xff]  ;;  %v14686_v53 = vld [vmem:[#allocation13_spill] sm:$0xff] }
 0x9ec   :  { %10828 = vmatpush3.bf16.msra.mxu1 %v14670_v9  ;;  %10836 = vmatpush3.bf16.msra.mxu0 %v14671_v8  ;;  %v14679_v9 = vld [vmem:[#allocation108_spill] sm:$0xff]  ;;  %v14680_v8 = vld [vmem:[#allocation109_spill] sm:$0xff] }
 0x9ed   :  { %10838 = vmatprep.subr.bf16.mxu0 %v14672_v49  ;;  %10861 = vmatprep.subr.bf16.mxu1 %v14673_v31  ;;  %v14681_v49 = vld [vmem:[#allocation110_spill] sm:$0xff] }
 0x9ef   :  { %4952 = vmatmul.mubr.f32.vlgmr.msra.gmra.mrb[58].mxu1 %v4673_v30  ;;  %v14682_v30 = vld [vmem:[#allocation112_spill] sm:$0xff] }
 0x9f0   :  { %10840 = vmatpush3.bf16.msra.mxu0 %v14674_v28  ;;  %9530 = vmatprep.mubr.msk.f32.mxu1 %vm11547_vm1, %v14364_v58  ;;  %v14683_v28 = vld [vmem:[#allocation111_spill] sm:$0xff] }
 0x9f1   :  { %10842 = vmatprep.subr.bf16.mxu0 %v14675_v16  ;;  %v4663_v61 = vadd.f32 %v13366_v0, %v14683_v28  ;;  %v14685_v16 = vld [vmem:[#allocation114_spill] sm:$0xff]  ;;  %v7701_v0 = vld [vmem:[%s13996_s5 + $0x140] sm:$0xff]  ;;  %v14702_v28 = vld [vmem:[#allocation43_spill] sm:$0xff] }
 0x9f4   :  { %10844 = vmatpush3.bf16.msra.mxu0 %v14676_v51  ;;  %v4675_v51 = vmax.f32 %v4663_v61, 0.0  ;;  %v7702_v61 = vld [vmem:[%s13996_s5 + $0x148] sm:$0xff] }
 0x9f5   :  { %10846 = vmatprep.subr.bf16.mxu0 %v14677_v47 }
 0x9f8   :  { %10848 = vmatpush3.bf16.msra.mxu0 %v14678_v27  ;;  %v14687_v27 = vld [vmem:[#allocation15_spill] sm:$0xff] }
 0x9f9   :  { %10850 = vmatprep.subr.bf16.mxu0 %v14679_v9  ;;  %v14706_v9 = vld [vmem:[#allocation50_spill] sm:$0xff] }
 0x9fc   :  { %10852 = vmatpush3.bf16.msra.mxu0 %v14680_v8  ;;  %v14688_v8 = vld [vmem:[#allocation17_spill] sm:$0xff] }
 0x9fd   :  { %10854 = vmatprep.subr.bf16.mxu0 %v14681_v49  ;;  %v14689_v49 = vld [vmem:[#allocation19_spill] sm:$0xff] }
 0xa00   :  { %10856 = vmatpush3.bf16.msra.mxu0 %v14682_v30  ;;  %v14690_v30 = vld [vmem:[#allocation21_spill] sm:$0xff] }
 0xa01   :  { %10858 = vmatprep.subr.bf16.mxu0 %v14684_v17  ;;  %v14700_v17 = vld [vmem:[#allocation39_spill] sm:$0xff] }
 0xa04   :  { %10860 = vmatpush3.bf16.msra.mxu0 %v14685_v16 }
 0xa05   :  { %10890 = vmatprep.subr.bf16.mxu0 %v14686_v53  ;;  %v7706_v53 = vld [vmem:[%s13996_s5 + $0x168] sm:$0xff] }
 0xa07   :  { %5022 = vmatmul.mubr.f32.vlgmr.msra.gmra.mrb[68].mxu0 %v4675_v51  ;;  %v7703_v51 = vld [vmem:[%s13996_s5 + $0x150] sm:$0xff] }
 0xa08   :  { %10892 = vmatpush1.bf16.msra.mxu0 %v14687_v27  ;;  %5321 = vmatprep.mubr.f32.mxu0 %v14364_v58  ;;  %v10862_v27 = vpack.c.bf16 %v7702_v61, %v7701_v0  ;;  %v14691_v61 = vld [vmem:[#allocation5_spill] sm:$0xff] }
 0xa09   :  { %10894 = vmatprep.subr.bf16.mxu0 %v14688_v8  ;;  %v7704_v8 = vld [vmem:[%s13996_s5 + $0x158] sm:$0xff] }
 0xa0a   :  { %10863 = vmatpush3.bf16.msra.mxu1 %v10862_v27  ;;  %v7708_v27 = vld [vmem:[%s13996_s5 + $0x178] sm:$0xff] }
 0xa0b   :  { %10864 = vmatprep.subr.bf16.mxu1 %v14673_v31 }
 0xa0c   :  { %10896 = vmatpush1.bf16.msra.mxu0 %v14689_v49  ;;  %v10865_v49 = vpack.c.bf16 %v7704_v8, %v7703_v51  ;;  %v7707_v8 = vld [vmem:[%s13996_s5 + $0x170] sm:$0xff]  ;;  %v14695_v51 = vld [vmem:[#allocation28_spill] sm:$0xff] }
 0xa0d   :  { %10906 = vmatprep.subr.bf16.mxu0 %v14690_v30  ;;  %v7705_v30 = vld [vmem:[%s13996_s5 + $0x160] sm:$0xff]  ;;  %v10871_v0 = vpack.c.bf16 %v7708_v27, %v7707_v8  ;;  %v14696_v8 = vld [vmem:[#allocation31_spill] sm:$0xff] }
 0xa0e   :  { %10866 = vmatpush3.bf16.msra.mxu1 %v10865_v49  ;;  %v10868_v16 = vpack.c.bf16 %v7706_v53, %v7705_v30  ;;  %v7710_v49 = vld [vmem:[%s13991_s0 + $0xc] sm:$0x3]  ;;  %v14692_v53 = vld [vmem:[#allocation23_spill] sm:$0xff]  ;;  %v14697_v27 = vld [vmem:[#allocation32_spill] sm:$0xff] }
 0xa0f   :  { %10867 = vmatprep.subr.bf16.mxu1 %v14673_v31  ;;  %7713 = vmatmul.mubr.msk.f32.vlgmr.msra.gmra.mrb[70].mxu0 %vm289_vm0, %v7710_v49  ;;  %v14694_v30 = vld [vmem:[#allocation27_spill] sm:$0xff] }
 0xa10   :  { %10908 = vmatpush1.bf16.msra.mxu0 %v14692_v53  ;;  %5463 = vmatprep.mubr.f32.mxu0 %v14364_v58  ;;  %v14701_v53 = vld [vmem:[#allocation40_spill] sm:$0xff] }
 0xa12   :  { %10869 = vmatpush3.bf16.msra.mxu1 %v10868_v16  ;;  %v14693_v16 = vld [vmem:[#allocation24_spill] sm:$0xff] }
 0xa13   :  { %10870 = vmatprep.subr.bf16.mxu1 %v14673_v31  ;;  %10910 = vmatprep.subr.bf16.mxu0 %v14693_v16  ;;  %v14703_v16 = vld [vmem:[#allocation44_spill] sm:$0xff] }
 0xa14   :  { %10912 = vmatpush1.bf16.msra.mxu0 %v14694_v30  ;;  %v14704_v30 = vld [vmem:[#allocation47_spill] sm:$0xff] }
 0xa15   :  { %10946 = vmatprep.subr.bf16.mxu0 %v14695_v51  ;;  %v14705_v51 = vld [vmem:[#allocation48_spill] sm:$0xff] }
 0xa16   :  { %10872 = vmatpush3.bf16.msra.mxu1 %v10871_v0  ;;  %v14698_v0 = vld [vmem:[#allocation35_spill] sm:$0xff] }
 0xa17   :  { %10874 = vmatprep.subr.bf16.mxu1 %v14691_v61  ;;  %7715 = vmatmul.mubr.msk.f32.vlgmr.msra.gmra.mrb[72].mxu0 %vm289_vm0, %v7710_v49  ;;  %v14699_v61 = vld [vmem:[#allocation36_spill] sm:$0xff] }
 0xa18   :  { %10948 = vmatpush3.bf16.msra.mxu0 %v14696_v8  ;;  %v14707_v8 = vld [vmem:[#allocation51_spill] sm:$0xff] }
 0xa19   :  { %10950 = vmatprep.subr.bf16.mxu0 %v14697_v27  ;;  %v14708_v27 = vld [vmem:[#allocation52_spill] sm:$0xff] }
 0xa1c   :  { %10952 = vmatpush3.bf16.msra.mxu0 %v14698_v0  ;;  %v14709_v0 = vld [vmem:[#allocation54_spill] sm:$0xff] }
 0xa1d   :  { %10954 = vmatprep.subr.bf16.mxu0 %v14699_v61  ;;  %v14710_v61 = vld [vmem:[#allocation56_spill] sm:$0xff] }
 0xa20   :  { %10956 = vmatpush3.bf16.msra.mxu0 %v14700_v17  ;;  %v14711_v17 = vld [vmem:[#allocation58_spill] sm:$0xff] }
 0xa21   :  { %10958 = vmatprep.subr.bf16.mxu0 %v14701_v53 }
 0xa24   :  { %10960 = vmatpush3.bf16.msra.mxu0 %v14702_v28 }
 0xa25   :  { %10962 = vmatprep.subr.bf16.mxu0 %v14703_v16 }
 0xa28   :  { %10964 = vmatpush3.bf16.msra.mxu0 %v14704_v30 }
 0xa29   :  { %10966 = vmatprep.subr.bf16.mxu0 %v14705_v51 }
 0xa2c   :  { %10968 = vmatpush3.bf16.msra.mxu0 %v14706_v9 }
 0xa2d   :  { %10970 = vmatprep.subr.bf16.mxu0 %v14707_v8 }
 0xa30   :  { %10972 = vmatpush3.bf16.msra.mxu0 %v14708_v27 }
 0xa31   :  { %10974 = vmatprep.subr.bf16.mxu0 %v14709_v0 }
 0xa34   :  { %10976 = vmatpush3.bf16.msra.mxu0 %v14710_v61 }
 0xa35   :  { %11010 = vmatprep.subr.bf16.mxu0 %v14711_v17 }
 0xa9a   :  { %v8710_v53 = vpop.f32.mrb[64].mxu0 }
 0xa9b   :  { %v8711_v28 = vpop.f32.mrb[65].mxu0 }
 0xa9c   :  { %v8712_v47 = vadd.f32 %v8711_v28, %v8710_v53 }
 0xa9e   :  { %v4744_v30 = vadd.f32 %v13164_v19, %v8712_v47  ;;  %v14716_v19 = vld [vmem:[#allocation53_spill] sm:$0xff] }
 0xaa2   :  { %v8745_v16 = vpop.f32.mrb[56].mxu1 }
 0xaa3   :  { %v8746_v31 = vpop.f32.mrb[57].mxu1 }
 0xaa4   :  { %v8747_v51 = vadd.f32 %v8746_v31, %v8745_v16 }
 0xaa6   :  { %v4814_v41 = vadd.f32 %v8747_v51, %v4744_v30 }
 0xaba   :  { %v8780_v9 = vpop.f32.mrb[66].mxu0 }
 0xabb   :  { %v8781_v25 = vpop.f32.mrb[67].mxu0 }
 0xabc   :  { %v8782_v8 = vadd.f32 %v8781_v25, %v8780_v9  ;;  %v14717_v25 = vld [vmem:[#allocation55_spill] sm:$0xff] }
 0xabe   :  { %v4884_v39 = vadd.f32 %v8782_v8, %v4814_v41  ;;  %v14718_v41 = vld [vmem:[#allocation57_spill] sm:$0xff] }
 0xac2   :  { %v8815_v27 = vpop.f32.mrb[58].mxu1 }
 0xac3   :  { %v8816_v44 = vpop.f32.mrb[59].mxu1 }
 0xac4   :  { %v8817_v0 = vadd.f32 %v8816_v44, %v8815_v27  ;;  %v14712_v44 = vld [vmem:[#allocation42_spill] sm:$0xff] }
 0xac6   :  { %v4954_v63 = vadd.f32 %v8817_v0, %v4884_v39 }
 0xada   :  { %v8850_v61 = vpop.f32.mrb[68].mxu0 }
 0xadb   :  { %v8851_v56 = vpop.f32.mrb[69].mxu0 }
 0xadc   :  { %v8852_v17 = vadd.f32 %v8851_v56, %v8850_v61  ;;  %v14715_v56 = vld [vmem:[#allocation49_spill] sm:$0xff] }
 0xade   :  { %v5024_v45 = vadd.f32 %v8852_v17, %v4954_v63  ;;  %v14714_v63 = vld [vmem:[#allocation46_spill] sm:$0xff] }
 0xae0   :  { %9531 = vmatmul.mubr.msk.f32.vlgmr.msra.gmra.mrb[60].mxu1 %vm1751_vm2, %v5024_v45  ;;  %v14713_v45 = vld [vmem:[#allocation45_spill] sm:$0xff] }
 0xae1   :  { %10876 = vmatpush1.bf16.msra.mxu1 %v14504_v50  ;;  %5179 = vmatprep.mubr.f32.mxu1 %v14364_v58 }
 0xae2   :  { %10878 = vmatprep.subr.bf16.mxu1 %v14505_v42  ;;  %v5323_v17 = vpop.f32.mrb[70].mxu0 }
 0xae3   :  { %v5325_v39 = vpop.f32.mrb[71].mxu0 }
 0xae4   :  { %v5326_v53 = vadd.f32 %v5325_v39, %v14470_v23 }
 0xae5   :  { %10880 = vmatpush1.bf16.msra.mxu1 %v14506_v5 }
 0xae6   :  { %10882 = vmatprep.subr.bf16.mxu1 %v14439_v6  ;;  %v5475_v27 = vmax.f32 %v5326_v53, 0.0 }
 0xae8   :  { %7711 = vmatmul.mubr.msk.f32.vlgmr.msra.gmra.mrb[62].mxu1 %vm289_vm0, %v7710_v49 }
 0xae9   :  { %10884 = vmatpush1.bf16.msra.mxu1 %v14440_v57  ;;  %5250 = vmatprep.mubr.f32.mxu1 %v14364_v58 }
 0xaea   :  { %10886 = vmatprep.subr.bf16.mxu1 %v14441_v29  ;;  %v13527_v9 = vpop.f32.mrb[72].mxu0 }
 0xaeb   :  { %v5467_v31 = vpop.f32.mrb[73].mxu0 }
 0xaed   :  { %10888 = vmatpush1.bf16.msra.mxu1 %v14442_v33 }
 0xaee   :  { %10898 = vmatprep.subr.bf16.mxu1 %v14443_v12 }
 0xaf0   :  { %7712 = vmatmul.mubr.msk.f32.vlgmr.msra.gmra.mrb[64].mxu1 %vm289_vm0, %v7710_v49 }
 0xaf1   :  { %10900 = vmatpush1.bf16.msra.mxu1 %v14444_v4  ;;  %5392 = vmatprep.mubr.f32.mxu1 %v14364_v58 }
 0xaf2   :  { %10902 = vmatprep.subr.bf16.mxu1 %v14445_v3 }
 0xaf5   :  { %10904 = vmatpush1.bf16.msra.mxu1 %v14507_v62 }
 0xaf6   :  { %10914 = vmatprep.subr.bf16.mxu1 %v14508_v1 }
 0xaf8   :  { %7714 = vmatmul.mubr.msk.f32.vlgmr.msra.gmra.mrb[66].mxu1 %vm289_vm0, %v7710_v49 }
 0xaf9   :  { %10916 = vmatpush3.bf16.msra.mxu1 %v14509_v15 }
 0xafa   :  { %10918 = vmatprep.subr.bf16.mxu1 %v14572_v37 }
 0xafd   :  { %10920 = vmatpush3.bf16.msra.mxu1 %v14573_v43 }
 0xafe   :  { %10922 = vmatprep.subr.bf16.mxu1 %v14574_v60 }
 0xb01   :  { %10924 = vmatpush3.bf16.msra.mxu1 %v14641_v21 }
 0xb02   :  { %10926 = vmatprep.subr.bf16.mxu1 %v14642_v32 }
 0xb05   :  { %10928 = vmatpush3.bf16.msra.mxu1 %v14643_v24 }
 0xb06   :  { %10930 = vmatprep.subr.bf16.mxu1 %v14644_v36 }
 0xb09   :  { %10932 = vmatpush3.bf16.msra.mxu1 %v14645_v26 }
 0xb0a   :  { %10934 = vmatprep.subr.bf16.mxu1 %v14712_v44 }
 0xb0d   :  { %10936 = vmatpush3.bf16.msra.mxu1 %v14713_v45 }
 0xb0e   :  { %10938 = vmatprep.subr.bf16.mxu1 %v14714_v63 }
 0xb11   :  { %10940 = vmatpush3.bf16.msra.mxu1 %v14715_v56 }
 0xb12   :  { %10942 = vmatprep.subr.bf16.mxu1 %v14716_v19 }
 0xb15   :  { %10944 = vmatpush3.bf16.msra.mxu1 %v14717_v25 }
 0xb16   :  { %10978 = vmatprep.subr.bf16.mxu1 %v14718_v41 }
 0xbb3   :  { %v5105_v28 = vpop.f32.mrb[60].mxu1 }
 0xbb4   :  { %v13530_v47 = vadd.f32 %v5105_v28, %v13369_v14  ;;  %v9532_v61 = vpop.f32.mrb[61].mxu1 }
 0xbbb   :  { %v5181_v49 = vpop.f32.mrb[62].mxu1 }
 0xbbc   :  { %v5182_v16 = vadd.f32 %v5181_v49, %v14520_v34  ;;  %v5183_v30 = vpop.f32.mrb[63].mxu1 }
 0xbbd   :  { %v5184_v51 = vadd.f32 %v5183_v30, %v14521_v13 }
 0xbbe   :  { %v5470_v0 = vmax.f32 %v5182_v16, 0.0 }
 0xbbf   :  { %v5471_v8 = vmax.f32 %v5184_v51, 0.0  ;;  %v14719_v51 = vld [vmem:[#allocation74_spill] sm:$0xff] }
 0xbc1   :  { %5544 = vmatprep.mubr.f32.mxu1 %v5471_v8  ;;  %v14720_v8 = vld [vmem:[#allocation83_spill] sm:$0xff] }
 0xbc2   :  { %5545 = vmatmul.mubr.f32.vlgmr.msra.gmra.mrb[68].mxu1 %v5470_v0  ;;  %v14722_v0 = vld [vmem:[#allocation85_spill] sm:$0xff] }
 0xbc3   :  { %10980 = vmatpush3.bf16.msra.mxu1 %v14395_v46  ;;  %v5252_v41 = vpop.f32.mrb[64].mxu1  ;;  %5684 = vmatprep.mubr.f32.mxu1 %v5475_v27  ;;  %v14721_v27 = vld [vmem:[#allocation76_spill] sm:$0xff] }
 0xbc4   :  { %v5253_v14 = vadd.f32 %v5252_v41, %v14471_v35  ;;  %v5254_v28 = vpop.f32.mrb[65].mxu1  ;;  %10982 = vmatprep.subr.bf16.mxu1 %v14397_v11 }
 0xbc5   :  { %v5255_v39 = vadd.f32 %v5254_v28, %v14472_v18  ;;  %v14724_v28 = vld [vmem:[#allocation87_spill] sm:$0xff] }
 0xbc6   :  { %v5472_v61 = vmax.f32 %v5253_v14, 0.0  ;;  %v14723_v14 = vld [vmem:[#allocation78_spill] sm:$0xff] }
 0xbc7   :  { %v5473_v49 = vmax.f32 %v5255_v39, 0.0  ;;  %10984 = vmatpush3.bf16.msra.mxu1 %v14399_v10  ;;  %v14725_v39 = vld [vmem:[#allocation80_spill] sm:$0xff] }
 0xbc8   :  { %10986 = vmatprep.subr.bf16.mxu1 %v14464_v38 }
 0xbc9   :  { %5614 = vmatprep.mubr.f32.mxu0 %v5473_v49 }
 0xbca   :  { %5615 = vmatmul.mubr.f32.vlgmr.msra.gmra.mrb[74].mxu0 %v5472_v61  ;;  %v14726_v61 = vld [vmem:[#allocation89_spill] sm:$0xff] }
 0xbcb   :  { %10988 = vmatpush3.bf16.msra.mxu1 %v14465_v20  ;;  %11012 = vmatpush3.bf16.msra.mxu0 %v14473_v54  ;;  %v5394_v53 = vpop.f32.mrb[66].mxu1  ;;  %v5324_v49 = vadd.f32 %v5323_v17, %v14726_v61 }
 0xbcc   :  { %10990 = vmatprep.subr.bf16.mxu1 %v14466_v40  ;;  %11014 = vmatprep.subr.bf16.mxu0 %v14474_v52  ;;  %v5396_v41 = vpop.f32.mrb[67].mxu1 }
 0xbcd   :  { %v5397_v16 = vadd.f32 %v5396_v41, %v14414_v59  ;;  %v14727_v41 = vld [vmem:[#allocation91_spill] sm:$0xff] }
 0xbcf   :  { %10992 = vmatpush3.bf16.msra.mxu1 %v14522_v7  ;;  %11016 = vmatpush3.bf16.msra.mxu0 %v14475_v48  ;;  %v5477_v30 = vmax.f32 %v5397_v16, 0.0  ;;  %v14728_v16 = vld [vmem:[#allocation82_spill] sm:$0xff] }
 0xbd0   :  { %10994 = vmatprep.subr.bf16.mxu1 %v14523_v2  ;;  %11018 = vmatprep.subr.bf16.mxu0 %v14476_v22 }
 0xbd1   :  { %5754 = vmatprep.mubr.f32.mxu0 %v5477_v30  ;;  %v14729_v30 = vld [vmem:[#allocation93_spill] sm:$0xff] }
 0xbd3   :  { %10996 = vmatpush3.bf16.msra.mxu1 %v14524_v55  ;;  %11020 = vmatpush3.bf16.msra.mxu0 %v14719_v51  ;;  %v14730_v51 = vld [vmem:[#allocation84_spill] sm:$0xff]  ;;  %v5474_v55 = vmax.f32 %v5324_v49, 0.0 }
 0xbd4   :  { %10998 = vmatprep.subr.bf16.mxu1 %v14720_v8  ;;  %11022 = vmatprep.subr.bf16.mxu0 %v14721_v27  ;;  %v14731_v8 = vld [vmem:[#allocation95_spill] sm:$0xff] }
 0xbd5   :  { %v5468_v27 = vadd.f32 %v5467_v31, %v14731_v8  ;;  %v14740_v31 = vld [vmem:[#allocation100_spill] sm:$0xff] }
 0xbd7   :  { %11000 = vmatpush3.bf16.msra.mxu1 %v14722_v0  ;;  %11024 = vmatpush3.bf16.msra.mxu0 %v14723_v14  ;;  %v14732_v0 = vld [vmem:[#allocation96_spill] sm:$0xff]  ;;  %v14733_v14 = vld [vmem:[#allocation86_spill] sm:$0xff]  ;;  %v5479_v17 = vmax.f32 %v5468_v27, 0.0  ;;  %v14744_v27 = vmov 0.0|0.0  }
 0xbd8   :  { %11002 = vmatprep.subr.bf16.mxu1 %v14724_v28  ;;  %11026 = vmatprep.subr.bf16.mxu0 %v14725_v39  ;;  %v14734_v28 = vld [vmem:[#allocation88_spill] sm:$0xff]  ;;  %v14735_v39 = vld [vmem:[#allocation98_spill] sm:$0xff] }
 0xbdb   :  { %11004 = vmatpush3.bf16.msra.mxu1 %v14727_v41  ;;  %11028 = vmatpush3.bf16.msra.mxu0 %v14728_v16  ;;  %v14736_v41 = vld [vmem:[#allocation90_spill] sm:$0xff]  ;;  %v14737_v16 = vld [vmem:[#allocation92_spill] sm:$0xff] }
 0xbdc   :  { %11006 = vmatprep.subr.bf16.mxu1 %v14729_v30  ;;  %11030 = vmatprep.subr.bf16.mxu0 %v14730_v51  ;;  %v5395_v61 = vadd.f32 %v5394_v53, %v14736_v41  ;;  %v14738_v30 = vld [vmem:[#allocation99_spill] sm:$0xff]  ;;  %v14739_v51 = vld [vmem:[#allocation94_spill] sm:$0xff]  ;;  %v14746_v53 = vld [vmem:[#allocation104_spill] sm:$0xff] }
 0xbde   :  { %v5476_v49 = vmax.f32 %v5395_v61, 0.0  ;;  %v14749_v61 = vld [vmem:[#allocation107_spill] sm:$0xff] }
 0xbdf   :  { %11008 = vmatpush3.bf16.msra.mxu1 %v14732_v0  ;;  %11032 = vmatpush3.bf16.msra.mxu0 %v14733_v14  ;;  %v14741_v0 = vld [vmem:[#allocation97_spill] sm:$0xff] }
 0xbe0   :  { %11034 = vmatprep.subr.bf16.mxu0 %v14734_v28  ;;  %11042 = vmatprep.subr.bf16.mxu1 %v14735_v39  ;;  %v14742_v14 = vld [vmem:[#allocation101_spill] sm:$0xff]  ;;  %v14743_v28 = vld [vmem:[#allocation102_spill] sm:$0xff] }
 0xbe2   :  { %5685 = vmatmul.mubr.f32.vlgmr.msra.gmra.mrb[70].mxu1 %v5474_v55  ;;  %v14745_v55 = vld [vmem:[#allocation103_spill] sm:$0xff] }
 0xbe3   :  { %11036 = vmatpush3.bf16.msra.mxu0 %v14737_v16  ;;  %11044 = vmatpush3.bf16.msra.mxu1 %v14738_v30  ;;  %v14755_v30 = vld [vmem:[#allocation113_spill] sm:$0xff] }
 0xbe4   :  { %11038 = vmatprep.subr.bf16.mxu0 %v14739_v51  ;;  %11046 = vmatprep.subr.bf16.mxu1 %v14740_v31  ;;  %v14747_v51 = vld [vmem:[#allocation105_spill] sm:$0xff] }
 0xbe5   :  { %5824 = vmatprep.mubr.f32.mxu1 %v5479_v17  ;;  %v14748_v17 = vld [vmem:[#allocation106_spill] sm:$0xff]  ;;  %v14757_v16 = vld [vmem:[#allocation13_spill] sm:$0xff] }
 0xbe7   :  { %11040 = vmatpush3.bf16.msra.mxu0 %v14741_v0  ;;  %11048 = vmatpush3.bf16.msra.mxu1 %v14742_v14  ;;  %v14750_v0 = vld [vmem:[#allocation108_spill] sm:$0xff]  ;;  %v14751_v14 = vld [vmem:[#allocation109_spill] sm:$0xff] }
 0xbe8   :  { %11050 = vmatprep.subr.bf16.mxu1 %v14743_v28  ;;  %11073 = vmatprep.subr.bf16.mxu0 %v14744_v27  ;;  %v14752_v28 = vld [vmem:[#allocation110_spill] sm:$0xff] }
 0xbea   :  { %5755 = vmatmul.mubr.f32.vlgmr.msra.gmra.mrb[76].mxu0 %v5476_v49  ;;  %v14753_v49 = vld [vmem:[#allocation112_spill] sm:$0xff] }
 0xbeb   :  { %11052 = vmatpush3.bf16.msra.mxu1 %v14745_v55  ;;  %9549 = vmatprep.mubr.msk.f32.mxu0 %vm11547_vm1, %v14364_v58  ;;  %v14754_v55 = vld [vmem:[#allocation111_spill] sm:$0xff] }
 0xbec   :  { %11054 = vmatprep.subr.bf16.mxu1 %v14746_v53  ;;  %v5466_v31 = vadd.f32 %v13527_v9, %v14754_v55  ;;  %v14756_v53 = vld [vmem:[#allocation114_spill] sm:$0xff]  ;;  %v7716_v9 = vld [vmem:[%s13996_s5 + $0x180] sm:$0xff] }
 0xbed   :  { %v14776_v55 = vld [vmem:[#allocation48_spill] sm:$0xff] }
 0xbef   :  { %11056 = vmatpush3.bf16.msra.mxu1 %v14747_v51  ;;  %v5478_v51 = vmax.f32 %v5466_v31, 0.0  ;;  %v7717_v31 = vld [vmem:[%s13996_s5 + $0x188] sm:$0xff] }
 0xbf0   :  { %11058 = vmatprep.subr.bf16.mxu1 %v14748_v17 }
 0xbf3   :  { %11060 = vmatpush3.bf16.msra.mxu1 %v14749_v61  ;;  %v14758_v61 = vld [vmem:[#allocation15_spill] sm:$0xff] }
 0xbf4   :  { %11062 = vmatprep.subr.bf16.mxu1 %v14750_v0  ;;  %v14777_v0 = vld [vmem:[#allocation50_spill] sm:$0xff] }
 0xbf7   :  { %11064 = vmatpush3.bf16.msra.mxu1 %v14751_v14  ;;  %v14759_v14 = vld [vmem:[#allocation17_spill] sm:$0xff] }
 0xbf8   :  { %11066 = vmatprep.subr.bf16.mxu1 %v14752_v28  ;;  %v14760_v28 = vld [vmem:[#allocation19_spill] sm:$0xff] }
 0xbfb   :  { %11068 = vmatpush3.bf16.msra.mxu1 %v14753_v49  ;;  %v14761_v49 = vld [vmem:[#allocation21_spill] sm:$0xff] }
 0xbfc   :  { %11070 = vmatprep.subr.bf16.mxu1 %v14755_v30  ;;  %v14772_v30 = vld [vmem:[#allocation40_spill] sm:$0xff] }
 0xbff   :  { %11072 = vmatpush3.bf16.msra.mxu1 %v14756_v53 }
 0xc00   :  { %11102 = vmatprep.subr.bf16.mxu1 %v14757_v16  ;;  %v7721_v16 = vld [vmem:[%s13996_s5 + $0x1a8] sm:$0xff] }
 0xc02   :  { %5825 = vmatmul.mubr.f32.vlgmr.msra.gmra.mrb[72].mxu1 %v5478_v51  ;;  %v7718_v51 = vld [vmem:[%s13996_s5 + $0x190] sm:$0xff] }
 0xc03   :  { %11104 = vmatpush1.bf16.msra.mxu1 %v14758_v61  ;;  %6124 = vmatprep.mubr.f32.mxu1 %v14364_v58  ;;  %v11074_v61 = vpack.c.bf16 %v7717_v31, %v7716_v9  ;;  %v14762_v31 = vld [vmem:[#allocation5_spill] sm:$0xff] }
 0xc04   :  { %11106 = vmatprep.subr.bf16.mxu1 %v14759_v14  ;;  %v7719_v14 = vld [vmem:[%s13996_s5 + $0x198] sm:$0xff] }
 0xc05   :  { %11075 = vmatpush3.bf16.msra.mxu0 %v11074_v61  ;;  %v7723_v61 = vld [vmem:[%s13996_s5 + $0x1b8] sm:$0xff] }
 0xc06   :  { %11076 = vmatprep.subr.bf16.mxu0 %v14744_v27 }
 0xc07   :  { %11108 = vmatpush1.bf16.msra.mxu1 %v14760_v28  ;;  %v11077_v28 = vpack.c.bf16 %v7719_v14, %v7718_v51  ;;  %v7722_v14 = vld [vmem:[%s13996_s5 + $0x1b0] sm:$0xff]  ;;  %v14766_v51 = vld [vmem:[#allocation28_spill] sm:$0xff] }
 0xc08   :  { %11118 = vmatprep.subr.bf16.mxu1 %v14761_v49  ;;  %v7720_v49 = vld [vmem:[%s13996_s5 + $0x1a0] sm:$0xff]  ;;  %v11083_v9 = vpack.c.bf16 %v7723_v61, %v7722_v14  ;;  %v14767_v14 = vld [vmem:[#allocation31_spill] sm:$0xff] }
 0xc09   :  { %11078 = vmatpush3.bf16.msra.mxu0 %v11077_v28  ;;  %v11080_v53 = vpack.c.bf16 %v7721_v16, %v7720_v49  ;;  %v13629_v28 = vld [vmem:[%s13991_s0 + $0xe] sm:$0x3]  ;;  %v14763_v16 = vld [vmem:[#allocation23_spill] sm:$0xff]  ;;  %v14768_v61 = vld [vmem:[#allocation32_spill] sm:$0xff] }
 0xc0a   :  { %11079 = vmatprep.subr.bf16.mxu0 %v14744_v27  ;;  %7728 = vmatmul.mubr.msk.f32.vlgmr.msra.gmra.mrb[74].mxu1 %vm289_vm0, %v13629_v28  ;;  %v14765_v49 = vld [vmem:[#allocation27_spill] sm:$0xff] }
 0xc0b   :  { %11120 = vmatpush1.bf16.msra.mxu1 %v14763_v16  ;;  %6266 = vmatprep.mubr.f32.mxu1 %v14364_v58  ;;  %v14771_v16 = vld [vmem:[#allocation39_spill] sm:$0xff] }
 0xc0d   :  { %11081 = vmatpush3.bf16.msra.mxu0 %v11080_v53  ;;  %v14764_v53 = vld [vmem:[#allocation24_spill] sm:$0xff] }
 0xc0e   :  { %11082 = vmatprep.subr.bf16.mxu0 %v14744_v27  ;;  %11122 = vmatprep.subr.bf16.mxu1 %v14764_v53  ;;  %v14773_v53 = vld [vmem:[#allocation43_spill] sm:$0xff] }
 0xc0f   :  { %11124 = vmatpush1.bf16.msra.mxu1 %v14765_v49  ;;  %v14774_v49 = vld [vmem:[#allocation44_spill] sm:$0xff] }
 0xc10   :  { %11158 = vmatprep.subr.bf16.mxu1 %v14766_v51  ;;  %v14775_v51 = vld [vmem:[#allocation47_spill] sm:$0xff] }
 0xc11   :  { %11084 = vmatpush3.bf16.msra.mxu0 %v11083_v9  ;;  %v14769_v9 = vld [vmem:[#allocation35_spill] sm:$0xff] }
 0xc12   :  { %11086 = vmatprep.subr.bf16.mxu0 %v14762_v31  ;;  %7730 = vmatmul.mubr.msk.f32.vlgmr.msra.gmra.mrb[76].mxu1 %vm289_vm0, %v13629_v28  ;;  %v14770_v31 = vld [vmem:[#allocation36_spill] sm:$0xff] }
 0xc13   :  { %11160 = vmatpush3.bf16.msra.mxu1 %v14767_v14  ;;  %v14778_v14 = vld [vmem:[#allocation51_spill] sm:$0xff] }
 0xc14   :  { %11162 = vmatprep.subr.bf16.mxu1 %v14768_v61  ;;  %v14779_v61 = vld [vmem:[#allocation52_spill] sm:$0xff] }
 0xc17   :  { %11164 = vmatpush3.bf16.msra.mxu1 %v14769_v9  ;;  %v14780_v9 = vld [vmem:[#allocation54_spill] sm:$0xff] }
 0xc18   :  { %11166 = vmatprep.subr.bf16.mxu1 %v14770_v31  ;;  %v14781_v31 = vld [vmem:[#allocation56_spill] sm:$0xff] }
 0xc1b   :  { %11168 = vmatpush3.bf16.msra.mxu1 %v14771_v16  ;;  %v14782_v16 = vld [vmem:[#allocation58_spill] sm:$0xff] }
 0xc1c   :  { %11170 = vmatprep.subr.bf16.mxu1 %v14772_v30 }
 0xc1f   :  { %11172 = vmatpush3.bf16.msra.mxu1 %v14773_v53 }
 0xc20   :  { %11174 = vmatprep.subr.bf16.mxu1 %v14774_v49 }
 0xc23   :  { %11176 = vmatpush3.bf16.msra.mxu1 %v14775_v51 }
 0xc24   :  { %11178 = vmatprep.subr.bf16.mxu1 %v14776_v55  ;;  %v13659_v55 = vld [vmem:[%s13995_s4] ss:$0 sm:$0xff] }
 0xc27   :  { %11180 = vmatpush3.bf16.msra.mxu1 %v14777_v0 }
 0xc28   :  { %11182 = vmatprep.subr.bf16.mxu1 %v14778_v14 }
 0xc2b   :  { %11184 = vmatpush3.bf16.msra.mxu1 %v14779_v61 }
 0xc2c   :  { %11186 = vmatprep.subr.bf16.mxu1 %v14780_v9 }
 0xc2f   :  { %11188 = vmatpush3.bf16.msra.mxu1 %v14781_v31 }
 0xc30   :  { %11222 = vmatprep.subr.bf16.mxu1 %v14782_v16 }
 0xc95   :  { %v8894_v30 = vpop.f32.mrb[68].mxu1 }
 0xc96   :  { %v8895_v53 = vpop.f32.mrb[69].mxu1 }
 0xc97   :  { %v8896_v17 = vadd.f32 %v8895_v53, %v8894_v30 }
 0xc99   :  { %v5547_v14 = vadd.f32 %v13659_v55, %v8896_v17 }
 0xc9d   :  { %v8929_v49 = vpop.f32.mrb[74].mxu0 }
 0xc9e   :  { %v8930_v27 = vpop.f32.mrb[75].mxu0 }
 0xc9f   :  { %v8931_v0 = vadd.f32 %v8930_v27, %v8929_v49 }
 0xca1   :  { %v5617_v61 = vadd.f32 %v8931_v0, %v5547_v14 }
 0xcb5   :  { %v8964_v51 = vpop.f32.mrb[70].mxu1 }
 0xcb6   :  { %v8965_v9 = vpop.f32.mrb[71].mxu1 }
 0xcb7   :  { %v8966_v41 = vadd.f32 %v8965_v9, %v8964_v51 }
 0xcb9   :  { %v5687_v31 = vadd.f32 %v8966_v41, %v5617_v61 }
 0xcbd   :  { %v8999_v39 = vpop.f32.mrb[76].mxu0 }
 0xcbe   :  { %v9000_v16 = vpop.f32.mrb[77].mxu0 }
 0xcbf   :  { %v9001_v8 = vadd.f32 %v9000_v16, %v8999_v39 }
 0xcc1   :  { %v5757_v22 = vadd.f32 %v9001_v8, %v5687_v31 }
 0xcd5   :  { %v9034_v30 = vpop.f32.mrb[72].mxu1 }
 0xcd6   :  { %v9035_v53 = vpop.f32.mrb[73].mxu1 }
 0xcd7   :  { %v9036_v2 = vadd.f32 %v9035_v53, %v9034_v30 }
 0xcd9   :  { %v5827_v48 = vadd.f32 %v9036_v2, %v5757_v22  ;;  %v14783_v22 = vld [vmem:[#allocation57_spill] sm:$0xff] }
 0xcdb   :  { %9550 = vmatmul.mubr.msk.f32.vlgmr.msra.gmra.mrb[78].mxu0 %vm1751_vm2, %v5827_v48 }
 0xcdc   :  { %11088 = vmatpush1.bf16.msra.mxu0 %v14504_v50  ;;  %5982 = vmatprep.mubr.f32.mxu0 %v14364_v58 }
 0xcdd   :  { %11090 = vmatprep.subr.bf16.mxu0 %v14505_v42  ;;  %v6126_v48 = vpop.f32.mrb[74].mxu1 }
 0xcde   :  { %v6128_v2 = vpop.f32.mrb[75].mxu1 }
 0xcdf   :  { %v6129_v31 = vadd.f32 %v6128_v2, %v14470_v23 }
 0xce0   :  { %11092 = vmatpush1.bf16.msra.mxu0 %v14506_v5 }
 0xce1   :  { %11094 = vmatprep.subr.bf16.mxu0 %v14439_v6  ;;  %v6278_v14 = vmax.f32 %v6129_v31, 0.0 }
 0xce3   :  { %7726 = vmatmul.mubr.msk.f32.vlgmr.msra.gmra.mrb[80].mxu0 %vm289_vm0, %v13629_v28 }
 0xce4   :  { %11096 = vmatpush1.bf16.msra.mxu0 %v14440_v57  ;;  %6053 = vmatprep.mubr.f32.mxu0 %v14364_v58 }
 0xce5   :  { %11098 = vmatprep.subr.bf16.mxu0 %v14441_v29  ;;  %v13700_v8 = vpop.f32.mrb[76].mxu1 }
 0xce6   :  { %v6270_v0 = vpop.f32.mrb[77].mxu1 }
 0xce8   :  { %11100 = vmatpush1.bf16.msra.mxu0 %v14442_v33 }
 0xce9   :  { %11110 = vmatprep.subr.bf16.mxu0 %v14443_v12 }
 0xceb   :  { %7727 = vmatmul.mubr.msk.f32.vlgmr.msra.gmra.mrb[82].mxu0 %vm289_vm0, %v13629_v28 }
 0xcec   :  { %11112 = vmatpush1.bf16.msra.mxu0 %v14444_v4  ;;  %6195 = vmatprep.mubr.f32.mxu0 %v14364_v58 }
 0xced   :  { %11114 = vmatprep.subr.bf16.mxu0 %v14445_v3 }
 0xcf0   :  { %11116 = vmatpush1.bf16.msra.mxu0 %v14507_v62 }
 0xcf1   :  { %11126 = vmatprep.subr.bf16.mxu0 %v14508_v1 }
 0xcf3   :  { %7729 = vmatmul.mubr.msk.f32.vlgmr.msra.gmra.mrb[84].mxu0 %vm289_vm0, %v13629_v28 }
 0xcf4   :  { %11128 = vmatpush3.bf16.msra.mxu0 %v14509_v15 }
 0xcf5   :  { %11130 = vmatprep.subr.bf16.mxu0 %v14572_v37 }
 0xcf8   :  { %11132 = vmatpush3.bf16.msra.mxu0 %v14573_v43 }
 0xcf9   :  { %11134 = vmatprep.subr.bf16.mxu0 %v14574_v60 }
 0xcfc   :  { %11136 = vmatpush3.bf16.msra.mxu0 %v14641_v21 }
 0xcfd   :  { %11138 = vmatprep.subr.bf16.mxu0 %v14642_v32 }
 0xd00   :  { %11140 = vmatpush3.bf16.msra.mxu0 %v14643_v24 }
 0xd01   :  { %11142 = vmatprep.subr.bf16.mxu0 %v14644_v36 }
 0xd04   :  { %11144 = vmatpush3.bf16.msra.mxu0 %v14645_v26 }
 0xd05   :  { %11146 = vmatprep.subr.bf16.mxu0 %v14712_v44 }
 0xd08   :  { %11148 = vmatpush3.bf16.msra.mxu0 %v14713_v45 }
 0xd09   :  { %11150 = vmatprep.subr.bf16.mxu0 %v14714_v63 }
 0xd0c   :  { %11152 = vmatpush3.bf16.msra.mxu0 %v14715_v56 }
 0xd0d   :  { %11154 = vmatprep.subr.bf16.mxu0 %v14716_v19 }
 0xd10   :  { %11156 = vmatpush3.bf16.msra.mxu0 %v14717_v25 }
 0xd11   :  { %11190 = vmatprep.subr.bf16.mxu0 %v14783_v22 }
 0xdae   :  { %v5908_v39 = vpop.f32.mrb[78].mxu0 }
 0xdaf   :  { %v13703_v41 = vadd.f32 %v5908_v39, %v13530_v47  ;;  %v9551_v27 = vpop.f32.mrb[79].mxu0 }
 0xdb6   :  { %v5984_v17 = vpop.f32.mrb[80].mxu0 }
 0xdb7   :  { %v5985_v28 = vadd.f32 %v5984_v17, %v14520_v34  ;;  %v5986_v16 = vpop.f32.mrb[81].mxu0 }
 0xdb8   :  { %v5987_v49 = vadd.f32 %v5986_v16, %v14521_v13 }
 0xdb9   :  { %v6273_v61 = vmax.f32 %v5985_v28, 0.0  ;;  %v14784_v28 = vld [vmem:[#allocation70_spill] sm:$0xff] }
 0xdba   :  { %v6274_v51 = vmax.f32 %v5987_v49, 0.0  ;;  %v14785_v49 = vld [vmem:[#allocation79_spill] sm:$0xff] }
 0xdbc   :  { %6347 = vmatprep.mubr.f32.mxu0 %v6274_v51  ;;  %v14786_v51 = vld [vmem:[#allocation72_spill] sm:$0xff] }
 0xdbd   :  { %6348 = vmatmul.mubr.f32.vlgmr.msra.gmra.mrb[86].mxu0 %v6273_v61  ;;  %v14788_v61 = vld [vmem:[#allocation74_spill] sm:$0xff] }
 0xdbe   :  { %11192 = vmatpush3.bf16.msra.mxu0 %v14395_v46  ;;  %v6055_v9 = vpop.f32.mrb[82].mxu0  ;;  %6487 = vmatprep.mubr.f32.mxu0 %v6278_v14  ;;  %v14787_v14 = vld [vmem:[#allocation81_spill] sm:$0xff] }
 0xdbf   :  { %v6056_v47 = vadd.f32 %v6055_v9, %v14471_v35  ;;  %v6057_v30 = vpop.f32.mrb[83].mxu0  ;;  %11194 = vmatprep.subr.bf16.mxu0 %v14397_v11  ;;  %v14789_v9 = vld [vmem:[#allocation83_spill] sm:$0xff] }
 0xdc0   :  { %v6058_v53 = vadd.f32 %v6057_v30, %v14472_v18  ;;  %v14791_v30 = vld [vmem:[#allocation85_spill] sm:$0xff] }
 0xdc1   :  { %v6275_v2 = vmax.f32 %v6056_v47, 0.0  ;;  %v14790_v47 = vld [vmem:[#allocation76_spill] sm:$0xff] }
 0xdc2   :  { %v6276_v39 = vmax.f32 %v6058_v53, 0.0  ;;  %11196 = vmatpush3.bf16.msra.mxu0 %v14399_v10  ;;  %v14792_v53 = vld [vmem:[#allocation78_spill] sm:$0xff] }
 0xdc3   :  { %11198 = vmatprep.subr.bf16.mxu0 %v14464_v38 }
 0xdc4   :  { %6417 = vmatprep.mubr.f32.mxu1 %v6276_v39  ;;  %v14794_v39 = vld [vmem:[#allocation80_spill] sm:$0xff] }
 0xdc5   :  { %6418 = vmatmul.mubr.f32.vlgmr.msra.gmra.mrb[78].mxu1 %v6275_v2  ;;  %v14793_v2 = vld [vmem:[#allocation87_spill] sm:$0xff] }
 0xdc6   :  { %11200 = vmatpush3.bf16.msra.mxu0 %v14465_v20  ;;  %11224 = vmatpush3.bf16.msra.mxu1 %v14473_v54  ;;  %v6197_v27 = vpop.f32.mrb[84].mxu0 }
 0xdc7   :  { %11202 = vmatprep.subr.bf16.mxu0 %v14466_v40  ;;  %11226 = vmatprep.subr.bf16.mxu1 %v14474_v52  ;;  %v6199_v17 = vpop.f32.mrb[85].mxu0 }
 0xdc8   :  { %v6200_v31 = vadd.f32 %v6199_v17, %v14414_v59  ;;  %v14795_v17 = vld [vmem:[#allocation89_spill] sm:$0xff] }
 0xdca   :  { %11204 = vmatpush3.bf16.msra.mxu0 %v14522_v7  ;;  %11228 = vmatpush3.bf16.msra.mxu1 %v14784_v28  ;;  %v6280_v16 = vmax.f32 %v6200_v31, 0.0  ;;  %v6127_v31 = vadd.f32 %v6126_v48, %v14795_v17 }
 0xdcb   :  { %11206 = vmatprep.subr.bf16.mxu0 %v14785_v49  ;;  %11230 = vmatprep.subr.bf16.mxu1 %v14786_v51  ;;  %v14796_v51 = vld [vmem:[#allocation91_spill] sm:$0xff] }
 0xdcc   :  { %6557 = vmatprep.mubr.f32.mxu1 %v6280_v16  ;;  %v14797_v16 = vld [vmem:[#allocation82_spill] sm:$0xff]  ;;  %v6277_v49 = vmax.f32 %v6127_v31, 0.0 }
 0xdce   :  { %11208 = vmatpush3.bf16.msra.mxu0 %v14787_v14  ;;  %11232 = vmatpush3.bf16.msra.mxu1 %v14788_v61  ;;  %v14798_v14 = vld [vmem:[#allocation93_spill] sm:$0xff]  ;;  %v14799_v61 = vld [vmem:[#allocation84_spill] sm:$0xff] }
 0xdcf   :  { %11210 = vmatprep.subr.bf16.mxu0 %v14789_v9  ;;  %11234 = vmatprep.subr.bf16.mxu1 %v14790_v47  ;;  %v14800_v9 = vld [vmem:[#allocation95_spill] sm:$0xff] }
 0xdd0   :  { %v6271_v47 = vadd.f32 %v6270_v0, %v14800_v9  ;;  %v14809_v0 = vld [vmem:[#allocation100_spill] sm:$0xff] }
 0xdd2   :  { %11212 = vmatpush3.bf16.msra.mxu0 %v14791_v30  ;;  %11236 = vmatpush3.bf16.msra.mxu1 %v14792_v53  ;;  %v14801_v30 = vld [vmem:[#allocation96_spill] sm:$0xff]  ;;  %v14802_v53 = vld [vmem:[#allocation86_spill] sm:$0xff]  ;;  %v6282_v48 = vmax.f32 %v6271_v47, 0.0  ;;  %v14813_v47 = vmov 0.0|0.0  }
 0xdd3   :  { %11214 = vmatprep.subr.bf16.mxu0 %v14793_v2  ;;  %11238 = vmatprep.subr.bf16.mxu1 %v14794_v39  ;;  %v14803_v2 = vld [vmem:[#allocation88_spill] sm:$0xff]  ;;  %v14804_v39 = vld [vmem:[#allocation98_spill] sm:$0xff] }
 0xdd6   :  { %11216 = vmatpush3.bf16.msra.mxu0 %v14796_v51  ;;  %11240 = vmatpush3.bf16.msra.mxu1 %v14797_v16  ;;  %v14805_v51 = vld [vmem:[#allocation90_spill] sm:$0xff]  ;;  %v14806_v16 = vld [vmem:[#allocation92_spill] sm:$0xff] }
 0xdd7   :  { %11218 = vmatprep.subr.bf16.mxu0 %v14798_v14  ;;  %11242 = vmatprep.subr.bf16.mxu1 %v14799_v61  ;;  %v6198_v17 = vadd.f32 %v6197_v27, %v14805_v51  ;;  %v14807_v14 = vld [vmem:[#allocation99_spill] sm:$0xff]  ;;  %v14808_v61 = vld [vmem:[#allocation94_spill] sm:$0xff] }
 0xdd8   :  { %v14814_v27 = vld [vmem:[#allocation103_spill] sm:$0xff] }
 0xdd9   :  { %v6279_v31 = vmax.f32 %v6198_v17, 0.0  ;;  %v14818_v17 = vld [vmem:[#allocation107_spill] sm:$0xff] }
 0xdda   :  { %11220 = vmatpush3.bf16.msra.mxu0 %v14801_v30  ;;  %11244 = vmatpush3.bf16.msra.mxu1 %v14802_v53  ;;  %v14810_v30 = vld [vmem:[#allocation97_spill] sm:$0xff] }
 0xddb   :  { %11246 = vmatprep.subr.bf16.mxu1 %v14803_v2  ;;  %11254 = vmatprep.subr.bf16.mxu0 %v14804_v39  ;;  %v14811_v53 = vld [vmem:[#allocation101_spill] sm:$0xff]  ;;  %v14812_v2 = vld [vmem:[#allocation102_spill] sm:$0xff] }
 0xddd   :  { %6488 = vmatmul.mubr.f32.vlgmr.msra.gmra.mrb[88].mxu0 %v6277_v49  ;;  %v14815_v49 = vld [vmem:[#allocation104_spill] sm:$0xff] }
 0xdde   :  { %11248 = vmatpush3.bf16.msra.mxu1 %v14806_v16  ;;  %11256 = vmatpush3.bf16.msra.mxu0 %v14807_v14  ;;  %v14824_v14 = vld [vmem:[#allocation113_spill] sm:$0xff] }
 0xddf   :  { %11250 = vmatprep.subr.bf16.mxu1 %v14808_v61  ;;  %11258 = vmatprep.subr.bf16.mxu0 %v14809_v0  ;;  %v14816_v61 = vld [vmem:[#allocation105_spill] sm:$0xff] }
 0xde0   :  { %6627 = vmatprep.mubr.f32.mxu0 %v6282_v48  ;;  %v14817_v48 = vld [vmem:[#allocation106_spill] sm:$0xff]  ;;  %v14826_v16 = vld [vmem:[#allocation13_spill] sm:$0xff] }
 0xde2   :  { %11252 = vmatpush3.bf16.msra.mxu1 %v14810_v30  ;;  %11260 = vmatpush3.bf16.msra.mxu0 %v14811_v53  ;;  %v14819_v30 = vld [vmem:[#allocation108_spill] sm:$0xff]  ;;  %v14820_v53 = vld [vmem:[#allocation109_spill] sm:$0xff] }
 0xde3   :  { %11262 = vmatprep.subr.bf16.mxu0 %v14812_v2  ;;  %11285 = vmatprep.subr.bf16.mxu1 %v14813_v47  ;;  %v14821_v2 = vld [vmem:[#allocation110_spill] sm:$0xff] }
 0xde5   :  { %6558 = vmatmul.mubr.f32.vlgmr.msra.gmra.mrb[80].mxu1 %v6279_v31  ;;  %v14822_v31 = vld [vmem:[#allocation112_spill] sm:$0xff] }
 0xde6   :  { %11264 = vmatpush3.bf16.msra.mxu0 %v14814_v27  ;;  %9568 = vmatprep.mubr.msk.f32.mxu1 %vm11547_vm1, %v14364_v58  ;;  %v14823_v27 = vld [vmem:[#allocation111_spill] sm:$0xff] }
 0xde7   :  { %11266 = vmatprep.subr.bf16.mxu0 %v14815_v49  ;;  %v6269_v0 = vadd.f32 %v13700_v8, %v14823_v27  ;;  %v14825_v49 = vld [vmem:[#allocation114_spill] sm:$0xff]  ;;  %v7731_v8 = vld [vmem:[%s13996_s5 + $0x1c0] sm:$0xff]  ;;  %v14842_v27 = vld [vmem:[#allocation43_spill] sm:$0xff] }
 0xdea   :  { %11268 = vmatpush3.bf16.msra.mxu0 %v14816_v61  ;;  %v6281_v61 = vmax.f32 %v6269_v0, 0.0  ;;  %v7732_v0 = vld [vmem:[%s13996_s5 + $0x1c8] sm:$0xff] }
 0xdeb   :  { %11270 = vmatprep.subr.bf16.mxu0 %v14817_v48 }
 0xdee   :  { %11272 = vmatpush3.bf16.msra.mxu0 %v14818_v17  ;;  %v14827_v17 = vld [vmem:[#allocation15_spill] sm:$0xff] }
 0xdef   :  { %11274 = vmatprep.subr.bf16.mxu0 %v14819_v30  ;;  %v14846_v30 = vld [vmem:[#allocation50_spill] sm:$0xff] }
 0xdf2   :  { %11276 = vmatpush3.bf16.msra.mxu0 %v14820_v53  ;;  %v14828_v53 = vld [vmem:[#allocation17_spill] sm:$0xff] }
 0xdf3   :  { %11278 = vmatprep.subr.bf16.mxu0 %v14821_v2  ;;  %v14829_v2 = vld [vmem:[#allocation19_spill] sm:$0xff] }
 0xdf6   :  { %11280 = vmatpush3.bf16.msra.mxu0 %v14822_v31  ;;  %v14830_v31 = vld [vmem:[#allocation21_spill] sm:$0xff] }
 0xdf7   :  { %11282 = vmatprep.subr.bf16.mxu0 %v14824_v14  ;;  %v14840_v14 = vld [vmem:[#allocation39_spill] sm:$0xff] }
 0xdfa   :  { %11284 = vmatpush3.bf16.msra.mxu0 %v14825_v49 }
 0xdfb   :  { %11314 = vmatprep.subr.bf16.mxu0 %v14826_v16  ;;  %v11286_v16 = vpack.c.bf16 %v7732_v0, %v7731_v8  ;;  %v7737_v8 = vld [vmem:[%s13996_s5 + $0x1f0] sm:$0xff]  ;;  %v7738_v0 = vld [vmem:[%s13996_s5 + $0x1f8] sm:$0xff] }
 0xdfd   :  { %6628 = vmatmul.mubr.f32.vlgmr.msra.gmra.mrb[90].mxu0 %v6281_v61  ;;  %v7733_v61 = vld [vmem:[%s13996_s5 + $0x1d0] sm:$0xff]  ;;  %11287 = vmatpush3.bf16.msra.mxu1 %v11286_v16  ;;  %v14831_v16 = vld [vmem:[#allocation5_spill] sm:$0xff] }
 0xdfe   :  { %11316 = vmatpush1.bf16.msra.mxu0 %v14827_v17  ;;  %6927 = vmatprep.mubr.f32.mxu0 %v14364_v58  ;;  %v7735_v17 = vld [vmem:[%s13996_s5 + $0x1e0] sm:$0xff] }
 0xdff   :  { %11318 = vmatprep.subr.bf16.mxu0 %v14828_v53  ;;  %v7734_v53 = vld [vmem:[%s13996_s5 + $0x1d8] sm:$0xff]  ;;  %11288 = vmatprep.subr.bf16.mxu1 %v14813_v47 }
 0xe02   :  { %11320 = vmatpush1.bf16.msra.mxu0 %v14829_v2  ;;  %v11289_v2 = vpack.c.bf16 %v7734_v53, %v7733_v61  ;;  %v11295_v61 = vpack.c.bf16 %v7738_v0, %v7737_v8  ;;  %v7740_v53 = vld [vmem:[%s13991_s0 + $0x10] sm:$0x3]  ;;  %v14836_v8 = vld [vmem:[#allocation31_spill] sm:$0xff]  ;;  %v14837_v0 = vld [vmem:[#allocation32_spill] sm:$0xff] }
 0xe03   :  { %11330 = vmatprep.subr.bf16.mxu0 %v14830_v31  ;;  %v7736_v31 = vld [vmem:[%s13996_s5 + $0x1e8] sm:$0xff] }
 0xe04   :  { %11290 = vmatpush3.bf16.msra.mxu1 %v11289_v2  ;;  %v11292_v49 = vpack.c.bf16 %v7736_v31, %v7735_v17  ;;  %v14833_v2 = vld [vmem:[#allocation24_spill] sm:$0xff]  ;;  %v14834_v17 = vld [vmem:[#allocation27_spill] sm:$0xff] }
 0xe05   :  { %11291 = vmatprep.subr.bf16.mxu1 %v14813_v47  ;;  %7743 = vmatmul.mubr.msk.f32.vlgmr.msra.gmra.mrb[92].mxu0 %vm289_vm0, %v7740_v53  ;;  %v14835_v31 = vld [vmem:[#allocation28_spill] sm:$0xff] }
 0xe06   :  { %7069 = vmatprep.mubr.f32.mxu0 %v14364_v58 }
 0xe08   :  { %11293 = vmatpush3.bf16.msra.mxu1 %v11292_v49  ;;  %v14832_v49 = vld [vmem:[#allocation23_spill] sm:$0xff] }
 0xe09   :  { %11294 = vmatprep.subr.bf16.mxu1 %v14813_v47  ;;  %11332 = vmatpush1.bf16.msra.mxu0 %v14832_v49  ;;  %v14841_v49 = vld [vmem:[#allocation40_spill] sm:$0xff] }
 0xe0a   :  { %11334 = vmatprep.subr.bf16.mxu0 %v14833_v2  ;;  %v14843_v2 = vld [vmem:[#allocation44_spill] sm:$0xff] }
 0xe0c   :  { %11296 = vmatpush3.bf16.msra.mxu1 %v11295_v61  ;;  %v14838_v61 = vld [vmem:[#allocation35_spill] sm:$0xff] }
 0xe0d   :  { %11298 = vmatprep.subr.bf16.mxu1 %v14831_v16  ;;  %11336 = vmatpush1.bf16.msra.mxu0 %v14834_v17  ;;  %v14839_v16 = vld [vmem:[#allocation36_spill] sm:$0xff]  ;;  %v14844_v17 = vld [vmem:[#allocation47_spill] sm:$0xff] }
 0xe0e   :  { %11370 = vmatprep.subr.bf16.mxu0 %v14835_v31  ;;  %v14845_v31 = vld [vmem:[#allocation48_spill] sm:$0xff] }
 0xe10   :  { %7745 = vmatmul.mubr.msk.f32.vlgmr.msra.gmra.mrb[94].mxu0 %vm289_vm0, %v7740_v53 }
 0xe11   :  { %11372 = vmatpush3.bf16.msra.mxu0 %v14836_v8  ;;  %v14847_v8 = vld [vmem:[#allocation51_spill] sm:$0xff] }
 0xe12   :  { %11374 = vmatprep.subr.bf16.mxu0 %v14837_v0  ;;  %v14848_v0 = vld [vmem:[#allocation52_spill] sm:$0xff] }
 0xe15   :  { %11376 = vmatpush3.bf16.msra.mxu0 %v14838_v61  ;;  %v14849_v61 = vld [vmem:[#allocation54_spill] sm:$0xff] }
 0xe16   :  { %11378 = vmatprep.subr.bf16.mxu0 %v14839_v16  ;;  %v14850_v16 = vld [vmem:[#allocation56_spill] sm:$0xff] }
 0xe19   :  { %11380 = vmatpush3.bf16.msra.mxu0 %v14840_v14  ;;  %v14851_v14 = vld [vmem:[#allocation58_spill] sm:$0xff] }
 0xe1a   :  { %11382 = vmatprep.subr.bf16.mxu0 %v14841_v49 }
 0xe1d   :  { %11384 = vmatpush3.bf16.msra.mxu0 %v14842_v27 }
 0xe1e   :  { %11386 = vmatprep.subr.bf16.mxu0 %v14843_v2 }
 0xe21   :  { %11388 = vmatpush3.bf16.msra.mxu0 %v14844_v17 }
 0xe22   :  { %11390 = vmatprep.subr.bf16.mxu0 %v14845_v31 }
 0xe25   :  { %11392 = vmatpush3.bf16.msra.mxu0 %v14846_v30 }
 0xe26   :  { %11394 = vmatprep.subr.bf16.mxu0 %v14847_v8 }
 0xe29   :  { %11396 = vmatpush3.bf16.msra.mxu0 %v14848_v0 }
 0xe2a   :  { %11398 = vmatprep.subr.bf16.mxu0 %v14849_v61 }
 0xe2d   :  { %11400 = vmatpush3.bf16.msra.mxu0 %v14850_v16 }
 0xe2e   :  { %11434 = vmatprep.subr.bf16.mxu0 %v14851_v14 }
 0xe90   :  { %v9078_v49 = vpop.f32.mrb[86].mxu0 }
 0xe91   :  { %v9079_v27 = vpop.f32.mrb[87].mxu0 }
 0xe92   :  { %v9080_v48 = vadd.f32 %v9079_v27, %v9078_v49  ;;  %v14875_v49 = vld [vmem:[#allocation98_spill] sm:$0xff] }
 0xe94   :  { %v6350_v17 = vadd.f32 %v13659_v55, %v9080_v48  ;;  %v14873_v48 = vld [vmem:[#allocation86_spill] sm:$0xff] }
 0xe98   :  { %v9113_v2 = vpop.f32.mrb[78].mxu1 }
 0xe99   :  { %v9114_v47 = vpop.f32.mrb[79].mxu1 }
 0xe9a   :  { %v9115_v31 = vadd.f32 %v9114_v47, %v9113_v2  ;;  %v14872_v47 = vld [vmem:[#allocation96_spill] sm:$0xff]  ;;  %v14876_v2 = vld [vmem:[#allocation90_spill] sm:$0xff] }
 0xe9c   :  { %v6420_v51 = vadd.f32 %v9115_v31, %v6350_v17  ;;  %v14877_v31 = vld [vmem:[#allocation92_spill] sm:$0xff] }
 0xeb0   :  { %v9148_v30 = vpop.f32.mrb[88].mxu0 }
 0xeb1   :  { %v9149_v39 = vpop.f32.mrb[89].mxu0 }
 0xeb2   :  { %v9150_v8 = vadd.f32 %v9149_v39, %v9148_v30  ;;  %v14878_v30 = vld [vmem:[#allocation99_spill] sm:$0xff] }
 0xeb4   :  { %v6490_v9 = vadd.f32 %v9150_v8, %v6420_v51  ;;  %v14871_v51 = vld [vmem:[#allocation95_spill] sm:$0xff]  ;;  %v14879_v8 = vld [vmem:[#allocation94_spill] sm:$0xff] }
 0xeb8   :  { %v9183_v0 = vpop.f32.mrb[80].mxu1 }
 0xeb9   :  { %v9184_v28 = vpop.f32.mrb[81].mxu1 }
 0xeba   :  { %v9185_v61 = vadd.f32 %v9184_v28, %v9183_v0  ;;  %v14870_v28 = vld [vmem:[#allocation84_spill] sm:$0xff] }
 0xebb   :  { %v14880_v0 = vld [vmem:[#allocation100_spill] sm:$0xff] }
 0xebc   :  { %v6560_v7 = vadd.f32 %v9185_v61, %v6490_v9 }
 0xed0   :  { %v9218_v16 = vpop.f32.mrb[90].mxu0 }
 0xed1   :  { %v9219_v59 = vpop.f32.mrb[91].mxu0 }
 0xed2   :  { %v9220_v14 = vadd.f32 %v9219_v59, %v9218_v16  ;;  %v14881_v16 = vld [vmem:[#allocation97_spill] sm:$0xff] }
 0xed4   :  { %v6630_v52 = vadd.f32 %v9220_v14, %v6560_v7  ;;  %v14882_v14 = vld [vmem:[#allocation101_spill] sm:$0xff] }
 0xed6   :  { %9569 = vmatmul.mubr.msk.f32.vlgmr.msra.gmra.mrb[82].mxu1 %vm1751_vm2, %v6630_v52 }
 0xed7   :  { %11300 = vmatpush1.bf16.msra.mxu1 %v14504_v50  ;;  %6785 = vmatprep.mubr.f32.mxu1 %v14364_v58 }
 0xed8   :  { %11302 = vmatprep.subr.bf16.mxu1 %v14505_v42  ;;  %v6929_v52 = vpop.f32.mrb[92].mxu0 }
 0xed9   :  { %v6931_v59 = vpop.f32.mrb[93].mxu0 }
 0xedb   :  { %11304 = vmatpush1.bf16.msra.mxu1 %v14506_v5 }
 0xedc   :  { %11306 = vmatprep.subr.bf16.mxu1 %v14439_v6 }
 0xede   :  { %7741 = vmatmul.mubr.msk.f32.vlgmr.msra.gmra.mrb[84].mxu1 %vm289_vm0, %v7740_v53 }
 0xedf   :  { %11308 = vmatpush1.bf16.msra.mxu1 %v14440_v57  ;;  %6856 = vmatprep.mubr.f32.mxu1 %v14364_v58 }
 0xee0   :  { %11310 = vmatprep.subr.bf16.mxu1 %v14441_v29 }
 0xee3   :  { %11312 = vmatpush1.bf16.msra.mxu1 %v14442_v33  ;;  %v13861_v6 = vpop.f32.mrb[94].mxu0 }
 0xee4   :  { %11322 = vmatprep.subr.bf16.mxu1 %v14443_v12  ;;  %v7073_v57 = vpop.f32.mrb[95].mxu0 }
 0xee5   :  { %v7074_v9 = vadd.f32 %v7073_v57, %v14871_v51  ;;  %v14885_v57 = vld [vmem:[#allocation103_spill] sm:$0xff] }
 0xee6   :  { %7742 = vmatmul.mubr.msk.f32.vlgmr.msra.gmra.mrb[86].mxu1 %vm289_vm0, %v7740_v53 }
 0xee7   :  { %11324 = vmatpush1.bf16.msra.mxu1 %v14444_v4  ;;  %6998 = vmatprep.mubr.f32.mxu1 %v14364_v58  ;;  %v7085_v27 = vmax.f32 %v7074_v9, 0.0 }
 0xee8   :  { %11326 = vmatprep.subr.bf16.mxu1 %v14445_v3  ;;  %v6932_v3 = vadd.f32 %v6931_v59, %v14470_v23  ;;  %v14884_v59 = vmov 0.0|0.0  }
 0xeeb   :  { %11328 = vmatpush1.bf16.msra.mxu1 %v14507_v62 }
 0xeec   :  { %11338 = vmatprep.subr.bf16.mxu1 %v14508_v1  ;;  %v7081_v1 = vmax.f32 %v6932_v3, 0.0  ;;  %v14889_v3 = vld [vmem:[#allocation107_spill] sm:$0xff] }
 0xeee   :  { %7744 = vmatmul.mubr.msk.f32.vlgmr.msra.gmra.mrb[88].mxu1 %vm289_vm0, %v7740_v53  ;;  %v14874_v53 = vld [vmem:[#allocation88_spill] sm:$0xff] }
 0xeef   :  { %11340 = vmatpush3.bf16.msra.mxu1 %v14509_v15 }
 0xef0   :  { %11342 = vmatprep.subr.bf16.mxu1 %v14572_v37 }
 0xef3   :  { %11344 = vmatpush3.bf16.msra.mxu1 %v14573_v43 }
 0xef4   :  { %11346 = vmatprep.subr.bf16.mxu1 %v14574_v60 }
 0xef7   :  { %11348 = vmatpush3.bf16.msra.mxu1 %v14641_v21  ;;  %v14854_v21 = vld [vmem:[#allocation77_spill] sm:$0xff] }
 0xef8   :  { %11350 = vmatprep.subr.bf16.mxu1 %v14642_v32  ;;  %v14855_v32 = vld [vmem:[#allocation70_spill] sm:$0xff] }
 0xefb   :  { %11352 = vmatpush3.bf16.msra.mxu1 %v14643_v24  ;;  %v14857_v24 = vld [vmem:[#allocation72_spill] sm:$0xff] }
 0xefc   :  { %11354 = vmatprep.subr.bf16.mxu1 %v14644_v36  ;;  %v14861_v36 = vld [vmem:[#allocation76_spill] sm:$0xff] }
 0xeff   :  { %11356 = vmatpush3.bf16.msra.mxu1 %v14645_v26  ;;  %v14862_v26 = vld [vmem:[#allocation85_spill] sm:$0xff] }
 0xf00   :  { %11358 = vmatprep.subr.bf16.mxu1 %v14712_v44  ;;  %v14863_v44 = vld [vmem:[#allocation78_spill] sm:$0xff] }
 0xf03   :  { %11360 = vmatpush3.bf16.msra.mxu1 %v14713_v45  ;;  %v14864_v45 = vld [vmem:[#allocation87_spill] sm:$0xff] }
 0xf04   :  { %11362 = vmatprep.subr.bf16.mxu1 %v14714_v63  ;;  %v14865_v63 = vld [vmem:[#allocation80_spill] sm:$0xff] }
 0xf07   :  { %11364 = vmatpush3.bf16.msra.mxu1 %v14715_v56  ;;  %v14866_v56 = vld [vmem:[#allocation89_spill] sm:$0xff] }
 0xf08   :  { %11366 = vmatprep.subr.bf16.mxu1 %v14716_v19  ;;  %v6930_v19 = vadd.f32 %v6929_v52, %v14866_v56  ;;  %v14883_v52 = vld [vmem:[#allocation102_spill] sm:$0xff] }
 0xf0a   :  { %v7080_v39 = vmax.f32 %v6930_v19, 0.0 }
 0xf0b   :  { %11368 = vmatpush3.bf16.msra.mxu1 %v14717_v25  ;;  %v14867_v25 = vld [vmem:[#allocation91_spill] sm:$0xff] }
 0xf0c   :  { %11402 = vmatprep.subr.bf16.mxu1 %v14783_v22  ;;  %v14868_v22 = vld [vmem:[#allocation82_spill] sm:$0xff] }
 0xfa9   :  { %v6711_v29 = vpop.f32.mrb[82].mxu1 }
 0xfaa   :  { %v13864_v33 = vadd.f32 %v6711_v29, %v13703_v41  ;;  %v9570_v12 = vpop.f32.mrb[83].mxu1  ;;  %v14869_v41 = vld [vmem:[#allocation93_spill] sm:$0xff]  ;;  %v14886_v29 = vld [vmem:[#allocation104_spill] sm:$0xff] }
 0xfab   :  { %v14887_v12 = vld [vmem:[#allocation105_spill] sm:$0xff] }
 0xfb1   :  { %v6787_v4 = vpop.f32.mrb[84].mxu1 }
 0xfb2   :  { %v6788_v50 = vadd.f32 %v6787_v4, %v14520_v34  ;;  %v6789_v42 = vpop.f32.mrb[85].mxu1  ;;  %v14888_v4 = vld [vmem:[#allocation106_spill] sm:$0xff] }
 0xfb3   :  { %v6790_v5 = vadd.f32 %v6789_v42, %v14521_v13  ;;  %v14853_v13 = vld [vmem:[#allocation68_spill] sm:$0xff]  ;;  %v14891_v42 = vld [vmem:[#allocation109_spill] sm:$0xff] }
 0xfb4   :  { %v7076_v15 = vmax.f32 %v6788_v50, 0.0  ;;  %v14890_v50 = vld [vmem:[#allocation108_spill] sm:$0xff] }
 0xfb5   :  { %v7077_v62 = vmax.f32 %v6790_v5, 0.0  ;;  %v14892_v5 = vld [vmem:[#allocation110_spill] sm:$0xff] }
 0xfb7   :  { %7150 = vmatprep.mubr.f32.mxu1 %v7077_v62  ;;  %v14893_v62 = vld [vmem:[#allocation112_spill] sm:$0xff] }
 0xfb8   :  { %7151 = vmatmul.mubr.f32.vlgmr.msra.gmra.mrb[90].mxu1 %v7076_v15 }
 0xfb9   :  { %11404 = vmatpush3.bf16.msra.mxu1 %v14395_v46  ;;  %v6858_v7 = vpop.f32.mrb[86].mxu1  ;;  %7290 = vmatprep.mubr.f32.mxu1 %v7081_v1  ;;  %v14894_v1 = vld [vmem:[#allocation111_spill] sm:$0xff] }
 0xfba   :  { %v6859_v37 = vadd.f32 %v6858_v7, %v14471_v35  ;;  %v6860_v43 = vpop.f32.mrb[87].mxu1  ;;  %11406 = vmatprep.subr.bf16.mxu1 %v14397_v11  ;;  %v14852_v35 = vld [vmem:[#allocation66_spill] sm:$0xff]  ;;  %v7072_v15 = vadd.f32 %v13861_v6, %v14894_v1  ;;  %v14895_v7 = vld [vmem:[#allocation113_spill] sm:$0xff]  ;;  %v7749_v6 = vld [vmem:[%s13996_s5 + $0x218] sm:$0xff] }
 0xfbb   :  { %v6861_v23 = vadd.f32 %v6860_v43, %v14472_v18 }
 0xfbc   :  { %v7078_v34 = vmax.f32 %v6859_v37, 0.0  ;;  %v14896_v37 = vld [vmem:[#allocation114_spill] sm:$0xff]  ;;  %v7084_v43 = vmax.f32 %v7072_v15, 0.0 }
 0xfbd   :  { %v7079_v60 = vmax.f32 %v6861_v23, 0.0  ;;  %11408 = vmatpush3.bf16.msra.mxu1 %v14399_v10  ;;  %v7746_v23 = vld [vmem:[%s13996_s5 + $0x200] sm:$0xff] }
 0xfbe   :  { %11410 = vmatprep.subr.bf16.mxu1 %v14464_v38  ;;  %v14856_v38 = vld [vmem:[#allocation79_spill] sm:$0xff] }
 0xfbf   :  { %7220 = vmatprep.mubr.f32.mxu0 %v7079_v60  ;;  %v7748_v60 = vld [vmem:[%s13996_s5 + $0x210] sm:$0xff] }
 0xfc0   :  { %7221 = vmatmul.mubr.f32.vlgmr.msra.gmra.mrb[96].mxu0 %v7078_v34  ;;  %v7747_v34 = vld [vmem:[%s13996_s5 + $0x208] sm:$0xff] }
 0xfc1   :  { %11412 = vmatpush3.bf16.msra.mxu1 %v14465_v20  ;;  %11436 = vmatpush3.bf16.msra.mxu0 %v14473_v54  ;;  %v7000_v46 = vpop.f32.mrb[88].mxu1  ;;  %v14858_v20 = vld [vmem:[#allocation81_spill] sm:$0xff]  ;;  %v14859_v54 = vld [vmem:[#allocation74_spill] sm:$0xff] }
 0xfc2   :  { %11414 = vmatprep.subr.bf16.mxu1 %v14466_v40  ;;  %11438 = vmatprep.subr.bf16.mxu0 %v14852_v35  ;;  %v7002_v11 = vpop.f32.mrb[89].mxu1  ;;  %v14860_v40 = vld [vmem:[#allocation83_spill] sm:$0xff]  ;;  %v7001_v17 = vadd.f32 %v7000_v46, %v14876_v2  ;;  %v11498_v46 = vpack.c.bf16 %v7747_v34, %v7746_v23  ;;  %v11501_v35 = vpack.c.bf16 %v7749_v6, %v7748_v60 }
 0xfc3   :  { %v7003_v18 = vadd.f32 %v7002_v11, %v14853_v13  ;;  %v7750_v11 = vld [vmem:[%s13996_s5 + $0x220] sm:$0xff]  ;;  %v7751_v13 = vld [vmem:[%s13996_s5 + $0x228] sm:$0xff] }
 0xfc4   :  { %v7082_v61 = vmax.f32 %v7001_v17, 0.0  ;;  %v7755_v17 = vld [vmem:[%s13997_s6] ss:$0 sm:$0xff] }
 0xfc5   :  { %11416 = vmatpush3.bf16.msra.mxu1 %v14854_v21  ;;  %11440 = vmatpush3.bf16.msra.mxu0 %v14855_v32  ;;  %v7083_v10 = vmax.f32 %v7003_v18, 0.0  ;;  %v11504_v18 = vpack.c.bf16 %v7751_v13, %v7750_v11  ;;  %v7752_v21 = vld [vmem:[%s13996_s5 + $0x230] sm:$0xff]  ;;  %v7753_v32 = vld [vmem:[%s13996_s5 + $0x238] sm:$0xff] }
 0xfc6   :  { %11418 = vmatprep.subr.bf16.mxu1 %v14856_v38  ;;  %11442 = vmatprep.subr.bf16.mxu0 %v14857_v24 }
 0xfc7   :  { %7360 = vmatprep.mubr.f32.mxu0 %v7083_v10  ;;  %v11507_v10 = vpack.c.bf16 %v7753_v32, %v7752_v21 }
 0xfc9   :  { %11420 = vmatpush3.bf16.msra.mxu1 %v14858_v20  ;;  %11444 = vmatpush3.bf16.msra.mxu0 %v14859_v54 }
 0xfca   :  { %11422 = vmatprep.subr.bf16.mxu1 %v14860_v40  ;;  %11446 = vmatprep.subr.bf16.mxu0 %v14861_v36 }
 0xfcd   :  { %11424 = vmatpush3.bf16.msra.mxu1 %v14862_v26  ;;  %11448 = vmatpush3.bf16.msra.mxu0 %v14863_v44 }
 0xfce   :  { %11426 = vmatprep.subr.bf16.mxu1 %v14864_v45  ;;  %11450 = vmatprep.subr.bf16.mxu0 %v14865_v63 }
 0xfd1   :  { %11428 = vmatpush3.bf16.msra.mxu1 %v14867_v25  ;;  %11452 = vmatpush3.bf16.msra.mxu0 %v14868_v22 }
 0xfd2   :  { %11430 = vmatprep.subr.bf16.mxu1 %v14869_v41  ;;  %11454 = vmatprep.subr.bf16.mxu0 %v14870_v28 }
 0xfd5   :  { %11432 = vmatpush3.bf16.msra.mxu1 %v14872_v47  ;;  %11456 = vmatpush3.bf16.msra.mxu0 %v14873_v48  ;;  %v7529_v48 = vld [vmem:[%s13998_s7 + $0x8] sm:$0xff] }
 0xfd6   :  { %11458 = vmatprep.subr.bf16.mxu0 %v14874_v53  ;;  %11466 = vmatprep.subr.bf16.mxu1 %v14875_v49  ;;  %v7530_v49 = vld [vmem:[%s13998_s7 + $0x10] sm:$0xff] }
 0xfd8   :  { %7291 = vmatmul.mubr.f32.vlgmr.msra.gmra.mrb[92].mxu1 %v7080_v39 }
 0xfd9   :  { %11460 = vmatpush3.bf16.msra.mxu0 %v14877_v31  ;;  %11468 = vmatpush3.bf16.msra.mxu1 %v14878_v30 }
 0xfda   :  { %11462 = vmatprep.subr.bf16.mxu0 %v14879_v8  ;;  %11470 = vmatprep.subr.bf16.mxu1 %v14880_v0 }
 0xfdb   :  { %7430 = vmatprep.mubr.f32.mxu1 %v7085_v27 }
 0xfdd   :  { %11464 = vmatpush3.bf16.msra.mxu0 %v14881_v16  ;;  %11472 = vmatpush3.bf16.msra.mxu1 %v14882_v14 }
 0xfde   :  { %11474 = vmatprep.subr.bf16.mxu1 %v14883_v52  ;;  %11497 = vmatprep.subr.bf16.mxu0 %v14884_v59 }
 0xfe0   :  { %7361 = vmatmul.mubr.f32.vlgmr.msra.gmra.mrb[98].mxu0 %v7082_v61  ;;  %v7756_v61 = vld [vmem:[%s13999_s8] ss:$0 sm:$0xff] }
 0xfe1   :  { %11476 = vmatpush3.bf16.msra.mxu1 %v14885_v57  ;;  %9587 = vmatprep.mubr.msk.f32.mxu0 %vm11547_vm1, %v14364_v58 }
 0xfe2   :  { %11478 = vmatprep.subr.bf16.mxu1 %v14886_v29  ;;  %11499 = vmatpush3.bf16.msra.mxu0 %v11498_v46 }
 0xfe3   :  { %11500 = vmatprep.subr.bf16.mxu0 %v14884_v59 }
 0xfe5   :  { %11480 = vmatpush3.bf16.msra.mxu1 %v14887_v12 }
 0xfe6   :  { %11482 = vmatprep.subr.bf16.mxu1 %v14888_v4  ;;  %11502 = vmatpush3.bf16.msra.mxu0 %v11501_v35 }
 0xfe7   :  { %11503 = vmatprep.subr.bf16.mxu0 %v14884_v59 }
 0xfe9   :  { %11484 = vmatpush3.bf16.msra.mxu1 %v14889_v3 }
 0xfea   :  { %11486 = vmatprep.subr.bf16.mxu1 %v14890_v50  ;;  %11505 = vmatpush3.bf16.msra.mxu0 %v11504_v18 }
 0xfeb   :  { %11506 = vmatprep.subr.bf16.mxu0 %v14884_v59 }
 0xfed   :  { %11488 = vmatpush3.bf16.msra.mxu1 %v14891_v42 }
 0xfee   :  { %11490 = vmatprep.subr.bf16.mxu1 %v14892_v5  ;;  %11508 = vmatpush3.bf16.msra.mxu0 %v11507_v10 }
 0xfef   :  { %11509 = vmatprep.subr.bf16.mxu0 %v14884_v59 }
 0xff1   :  { %11492 = vmatpush3.bf16.msra.mxu1 %v14893_v62 }
 0xff2   :  { %11494 = vmatprep.subr.bf16.mxu1 %v14895_v7 }
 0xff5   :  { %11496 = vmatpush3.bf16.msra.mxu1 %v14896_v37 }
 0xff8   :  { %7431 = vmatmul.mubr.f32.vlgmr.msra.gmra.mrb[94].mxu1 %v7084_v43 }
0x108b   :  { %v9262_v38 = vpop.f32.mrb[90].mxu1 }
0x108c   :  { %v9263_v24 = vpop.f32.mrb[91].mxu1 }
0x108d   :  { %v9264_v20 = vadd.f32 %v9263_v24, %v9262_v38 }
0x108f   :  { %v7153_v36 = vadd.f32 %v13659_v55, %v9264_v20  ;;  %v7528_v55 = vld [vmem:[%s13998_s7] sm:$0xff] }
0x1090   :  { %v11510_v53 = vpack.c.bf16 %v7529_v48, %v7528_v55 }
0x1093   :  { %v9297_v54 = vpop.f32.mrb[96].mxu0 }
0x1094   :  { %v9298_v40 = vpop.f32.mrb[97].mxu0 }
0x1095   :  { %v9299_v26 = vadd.f32 %v9298_v40, %v9297_v54 }
0x1097   :  { %v7223_v44 = vadd.f32 %v9299_v26, %v7153_v36 }
0x10ab   :  { %v9332_v45 = vpop.f32.mrb[92].mxu1 }
0x10ac   :  { %v9333_v63 = vpop.f32.mrb[93].mxu1 }
0x10ad   :  { %v9334_v56 = vadd.f32 %v9333_v63, %v9332_v45 }
0x10af   :  { %v7293_v19 = vadd.f32 %v9334_v56, %v7223_v44 }
0x10b3   :  { %v9367_v25 = vpop.f32.mrb[98].mxu0 }
0x10b4   :  { %v9368_v22 = vpop.f32.mrb[99].mxu0 }
0x10b5   :  { %v9369_v41 = vadd.f32 %v9368_v22, %v9367_v25 }
0x10b7   :  { %v7363_v28 = vadd.f32 %v9369_v41, %v7293_v19 }
0x10cb   :  { %v9402_v51 = vpop.f32.mrb[94].mxu1 }
0x10cc   :  { %v9403_v9 = vpop.f32.mrb[95].mxu1 }
0x10cd   :  { %v9404_v39 = vadd.f32 %v9403_v9, %v9402_v51 }
0x10cf   :  { %v7433_v47 = vadd.f32 %v9404_v39, %v7363_v28 }
0x10d1   :  { %9588 = vmatmul.mubr.msk.f32.vlgmr.msra.gmra.mrb[100].mxu0 %vm1751_vm2, %v7433_v47 }
0x10d2   :  { %9598 = vmatprep.mubr.msk.f32.mxu0 %vm11547_vm1, %v14364_v58  ;;  %11511 = vmatpush3.bf16.msra.mxu0 %v11510_v53  ;;  %v7531_v58 = vld [vmem:[%s13998_s7 + $0x18] sm:$0xff]  ;;  %s7620_s7 = sshll.u32 %s11548_s23, 4  ;;  %s7621_s7 = int_to_ptr.vmem [resolvable:$true] %s7620_s7 }
0x10d3   :  { %11512 = vmatprep.subr.bf16.mxu0 %v14884_v59  ;;  %v11513_v27 = vpack.c.bf16 %v7531_v58, %v7530_v49  ;;  %s11521_s6 = scalar_lea.vmem %s7621_s7, 32  ;;  %p11526_p1 = scmp.lt.s32.totalorder %s7621_s7, %s7621_s7 }
0x10d4   :  { %p11522_p0 = scmp.ne.s32.totalorder %s7621_s7, %s11521_s6  ;;  %p11527_p2 = scmp.lt.s32.totalorder %s11521_s6, %s11521_s6 }
0x10d6   :  { %11514 = vmatpush3.bf16.msra.mxu0 %v11513_v27  ;;  %p11528_p3 = por %p11527_p2, %p11526_p1 }
0x10d8   :  { %p11529_p4 = pnand %p11528_p3, %p11522_p0 }
0x11a4   :  { %v7514_v2 = vpop.f32.mrb[100].mxu0 }
0x11a5   :  { %v7518_v31 = vadd.f32 %v7514_v2, %v13864_v33  ;;  %v9589_v30 = vpop.f32.mrb[101].mxu0 }
0x11a7   :  { %v7526_v8 = vadd.f32 %v7755_v17, %v7518_v31 }
0x11a9   :  { %v7527_v0 = vmax.f32 %v7526_v8, 0.0 }
0x11ab   :  { %9599 = vmatmul.mubr.msk.f32.vlgmr.msra.gmra.mrb[102].mxu0 %vm289_vm0, %v7527_v0 }
0x127e   :  { %v7608_v16 = vpop.f32.mrb[102].mxu0 }
0x127f   :  { %v7609_v14 = vadd.f32 %v7756_v61, %v7608_v16  ;;  %v9600_v52 = vpop.f32.mrb[103].mxu0 }
0x1281   :  { %7613 = vst.msk [vmem:[#allocation2] sm:$0x3] %vm7612_vm3, %v7609_v14 }
0x1282   :  { %11532 = shalt.err (!%p11529_p4)
}
0x1283   :  { %s11533_s25 = scalar_lea.hbm %s14000_s9, 32 }
0x1284   :  { %p11534_p5 = scmp.ne.s32.totalorder %s14000_s9, %s11533_s25  ;;  %p11537_p6 = scmp.lt.u32.totalorder %s11533_s25, %s14000_s9 }
0x1286   :  { %p11539_p7 = pnand %p11537_p6, %p11534_p5 }
0x1288   :  { %11542 = shalt.err (!%p11539_p7)
}
0x1289   :  { %7623 = dma.vmem_to_hbm [thread:$0]  %s7621_s7, 32, %s14000_s9, [#allocation3]  }
0x128a   :  { %11543 = dma.done.wait [#allocation3], 32  }
0x128b   :  { %11544 = vsyncadd [#allocation3], 4294967264 }
0x128c   :  { %7627 = vsyncpa [#allocation3], 1 }

</bundles_post_ra>
